<compile_context>
chip_gen: v7x
topology: tpu7x:2x2x1
jax: 0.10.0
libtpu: 0.0.40
codegen_flags: <defaults>
</compile_context>

<pallas_src>
import functools
import math

import jax
import jax.numpy as jnp
from jax.experimental import pallas as pl
from jax.experimental.pallas import tpu as pltpu

# ----------------------------- config (small, deterministic) -----------------------------
VOCAB_SIZE = 64
NUM_STYLES = 2
NUM_LAYERS = 2
NUM_HEADS = 4
HIDDEN = 32
FFN_DIM = 4 * HIDDEN
MAX_SEQ_LEN = 16
PAD_IDX = 0
EOS_IDX = 1
TEMPERATURE = 1.0

# Order in which the stacked weight arrays are passed to the fused kernel.
WEIGHT_ORDER = (
    "e_ln1_g", "e_ln1_b", "e_ln2_g", "e_ln2_b",
    "e_qkv_w", "e_qkv_b", "e_o_w", "e_o_b",
    "e_f_w1", "e_f_b1", "e_f_w2", "e_f_b2",
    "e_out_g", "e_out_b",
    "d_ln1_g", "d_ln1_b", "d_ln2_g", "d_ln2_b", "d_ln3_g", "d_ln3_b",
    "d_sa_qkv_w", "d_sa_qkv_b", "d_sa_o_w", "d_sa_o_b",
    "d_xa_qkv_w", "d_xa_qkv_b", "d_xa_o_w", "d_xa_o_b",
    "d_f_w1", "d_f_b1", "d_f_w2", "d_f_b2",
    "d_out_g", "d_out_b",
    "gen_w", "gen_b",
)

# Weights that feed the MXU -> pre-cast to bf16 on the host side (f32 accumulation in-kernel).
MATMUL_WEIGHTS = frozenset({
    "e_qkv_w", "e_o_w", "e_f_w1", "e_f_w2",
    "d_sa_qkv_w", "d_sa_o_w", "d_xa_qkv_w", "d_xa_o_w",
    "d_f_w1", "d_f_w2", "gen_w",
})


# --------------------------- in-kernel building blocks (on values) ------------------------
def _ln(x, g, b, eps):
    mu = jnp.mean(x, axis=-1, keepdims=True)
    xc = x - mu
    var = jnp.mean(xc * xc, axis=-1, keepdims=True)
    return xc * jax.lax.rsqrt(var + eps) * g + b


def _dense(x, w, b=None):
    # bf16 operands, f32 accumulation on the MXU.
    out = jnp.dot(x.astype(jnp.bfloat16), w, preferred_element_type=jnp.float32)
    return out if b is None else out + b


def _masked_softmax(s, masked):
    # masked: bool, True = blocked.  No row is ever fully masked in this model (style token /
    # causal diagonal always visible), so the -1e30 fill is safe.
    s = jnp.where(masked, -1e30, s)
    s = s - jnp.max(s, axis=-1, keepdims=True)
    p = jnp.exp(s)
    return p * pl.reciprocal(jnp.sum(p, axis=-1, keepdims=True), approx=True)


def _mha(x_q, x_kv, masked, qkv_w, qkv_b, o_w, o_b, *, cross):
    """Multi-head attention on one batch element, all heads in one shot.

    x_q: (Sq, H) f32, x_kv: (Sk, H) f32, qkv_w: (H, 3H) bf16, qkv_b: (1, 3H) f32,
    o_w: (H, H) bf16, o_b: (1, H) f32, masked broadcastable to (Sq, Sk)."""
    H = o_w.shape[0]
    dh = H // NUM_HEADS
    scale = 1.0 / math.sqrt(dh)
    if cross:
        q = _dense(x_q, qkv_w[:, :H], qkv_b[:, :H])
        kv = _dense(x_kv, qkv_w[:, H:], qkv_b[:, H:])
        k, v = kv[:, :H], kv[:, H:]
    else:
        qkv = _dense(x_q, qkv_w, qkv_b)            # fused QKV projection
        q, k, v = qkv[:, :H], qkv[:, H:2 * H], qkv[:, 2 * H:]

    heads = []
    for h in range(NUM_HEADS):
        sl = slice(h * dh, (h + 1) * dh)
        # q_h @ k_h^T without an explicit transpose (contract dim 1 of both).
        s = jax.lax.dot_general(
            q[:, sl].astype(jnp.bfloat16), k[:, sl].astype(jnp.bfloat16),
            (((1,), (1,)), ((), ())), preferred_element_type=jnp.float32) * scale
        p = _masked_softmax(s, masked)
        heads.append(jnp.dot(p.astype(jnp.bfloat16), v[:, sl].astype(jnp.bfloat16),
                             preferred_element_type=jnp.float32))
    attn = jnp.concatenate(heads, axis=-1)          # (Sq, H)
    return _dense(attn, o_w, o_b)


def _ffn(x, w1, b1, w2, b2):
    h = jnp.maximum(_dense(x, w1, b1), 0.0)         # ReLU
    return _dense(h, w2, b2)


# ------------------------------------ fused forward kernel --------------------------------
def _fused_forward_kernel(lens_ref, enc_ref, dec_ref, *rest, inv_temp):
    out_ref = rest[-1]
    wr = dict(zip(WEIGHT_ORDER, rest[:-1]))         # name -> ref (all VMEM-resident)

    def big(name, l=None):                          # matmul weights: load only layer l
        return wr[name][l] if l is not None else wr[name][...]

    def small(name, l=None):                        # LN params / biases (tiny): load full
        v = wr[name][...]
        return v[l:l + 1] if l is not None else v

    b = pl.program_id(0)
    length = lens_ref[b]                            # int32 scalar from SMEM

    x = enc_ref[0]                                  # (S_enc_pad, H) f32
    y = dec_ref[0]                                  # (S_dec_pad, H) f32
    s_enc = x.shape[0]
    s_dec = y.shape[0]

    # Masks built in-kernel (True = masked). Key 0 is the style token (never masked);
    # j >= length+1 masks both the PAD tokens and the sublane-padding rows.
    key_pos = jax.lax.broadcasted_iota(jnp.int32, (1, s_enc), 1)
    src_masked = key_pos >= (length + 1)            # (1, S_enc_pad)
    q_pos = jax.lax.broadcasted_iota(jnp.int32, (s_dec, s_dec), 0)
    k_pos = jax.lax.broadcasted_iota(jnp.int32, (s_dec, s_dec), 1)
    tgt_masked = k_pos > q_pos                      # causal (S_dec_pad, S_dec_pad)

    # ------------------------------------ encoder ------------------------------------
    for l in range(NUM_LAYERS):
        h = _ln(x, small("e_ln1_g", l), small("e_ln1_b", l), 1e-5)
        x = x + _mha(h, h, src_masked,
                     big("e_qkv_w", l), small("e_qkv_b", l),
                     big("e_o_w", l), small("e_o_b", l), cross=False)
        h = _ln(x, small("e_ln2_g", l), small("e_ln2_b", l), 1e-5)
        x = x + _ffn(h, big("e_f_w1", l), small("e_f_b1", l),
                     big("e_f_w2", l), small("e_f_b2", l))
    memory = _ln(x, small("e_out_g"), small("e_out_b"), 1e-6)

    # ------------------------------------ decoder ------------------------------------
    for l in range(NUM_LAYERS):
        h = _ln(y, small("d_ln1_g", l), small("d_ln1_b", l), 1e-5)
        y = y + _mha(h, h, tgt_masked,
                     big("d_sa_qkv_w", l), small("d_sa_qkv_b", l),
                     big("d_sa_o_w", l), small("d_sa_o_b", l), cross=False)
        h = _ln(y, small("d_ln2_g", l), small("d_ln2_b", l), 1e-5)
        y = y + _mha(h, memory, src_masked,
                     big("d_xa_qkv_w", l), small("d_xa_qkv_b", l),
                     big("d_xa_o_w", l), small("d_xa_o_b", l), cross=True)
        h = _ln(y, small("d_ln3_g", l), small("d_ln3_b", l), 1e-5)
        y = y + _ffn(h, big("d_f_w1", l), small("d_f_b1", l),
                     big("d_f_w2", l), small("d_f_b2", l))
    y = _ln(y, small("d_out_g"), small("d_out_b"), 1e-6)

    # ----------------------------- generator: log_softmax -----------------------------
    logits = _dense(y, big("gen_w"), small("gen_b")) * inv_temp
    z = logits - jnp.max(logits, axis=-1, keepdims=True)
    out_ref[0] = z - jnp.log(jnp.sum(jnp.exp(z), axis=-1, keepdims=True))


# -------------------------------------- kernel wrapper ------------------------------------
def _const_index_map(ndim):
    return lambda b, lens: (0,) * ndim


def fused_forward(weights, inp_lengths, enc_input, dec_input, *, temperature):
    """Single pallas_call over the whole forward pass. grid=(batch,)."""
    B, s_enc, H = enc_input.shape
    s_dec = dec_input.shape[1]
    V = weights["gen_b"].shape[-1]

    weight_list = [
        weights[n].astype(jnp.bfloat16) if n in MATMUL_WEIGHTS else weights[n]
        for n in WEIGHT_ORDER
    ]

    in_specs = [
        pl.BlockSpec((1, s_enc, H), lambda b, lens: (b, 0, 0)),
        pl.BlockSpec((1, s_dec, H), lambda b, lens: (b, 0, 0)),
    ] + [pl.BlockSpec(a.shape, _const_index_map(a.ndim)) for a in weight_list]

    grid_spec = pltpu.PrefetchScalarGridSpec(
        num_scalar_prefetch=1,
        grid=(B,),
        in_specs=in_specs,
        out_specs=pl.BlockSpec((1, s_dec, V), lambda b, lens: (b, 0, 0)),
    )

    return pl.pallas_call(
        functools.partial(_fused_forward_kernel, inv_temp=1.0 / float(temperature)),
        grid_spec=grid_spec,
        out_shape=jax.ShapeDtypeStruct((B, s_dec, V), jnp.float32),
        compiler_params=pltpu.CompilerParams(dimension_semantics=("parallel",)),
    )(inp_lengths.astype(jnp.int32), enc_input, dec_input, *weight_list)


# --------------------------------------- model forward ------------------------------------
def _round_up(n, m):
    return ((n + m - 1) // m) * m


def style_transformer_forward(params, inp_tokens, gold_tokens, inp_lengths, style,
                              temperature=TEMPERATURE):
    """generate=False (teacher-forced) forward pass; returns log-probs [B, Ldec, V]."""
    B, max_enc_len = inp_tokens.shape
    max_dec_len = gold_tokens.shape[1]
    assert max_enc_len <= MAX_SEQ_LEN

    # embeddings (gathers are plain-JAX glue; dropout = eval-mode identity)
    style_emb = params["style_embed"][style][:, None, :]                          # [B,1,H]
    enc_tok = params["token_embed"][inp_tokens] + params["pos_embed"][:max_enc_len][None]
    enc_input = jnp.concatenate([style_emb, enc_tok], axis=1)                     # [B,Lenc+1,H]
    s_enc = max_enc_len + 1
    s_enc_pad = _round_up(s_enc, 8)
    if s_enc_pad != s_enc:   # padded rows are masked as keys inside the kernel
        enc_input = jnp.pad(enc_input, ((0, 0), (0, s_enc_pad - s_enc), (0, 0)))

    sos = jnp.broadcast_to(params["sos_token"][None, None, :], (B, 1, HIDDEN))
    dec_tok = (params["token_embed"][gold_tokens[:, :-1]]
               + params["pos_embed"][:max_dec_len - 1][None])
    dec_input = jnp.concatenate([sos, dec_tok], axis=1)                           # [B,Ldec,H]
    s_dec = max_dec_len
    s_dec_pad = _round_up(s_dec, 8)
    if s_dec_pad != s_dec:   # padded rows are causally masked as keys
        dec_input = jnp.pad(dec_input, ((0, 0), (0, s_dec_pad - s_dec), (0, 0)))

    log_probs = fused_forward(params["weights"], inp_lengths, enc_input, dec_input,
                              temperature=temperature)
    return log_probs[:, :s_dec]


# TODO(synk): generate=True incremental autoregressive decode (host-side loop with per-step
# KV state) is not implemented; only the teacher-forced path is kernelized.


# ------------------------------------ parameter init --------------------------------------
def init_params(key):
    keys = iter(jax.random.split(key, 64))

    def nrm(shape, scale=0.05):
        return (scale * jax.random.normal(next(keys), shape)).astype(jnp.float32)

    L, H, F, V = NUM_LAYERS, HIDDEN, FFN_DIM, VOCAB_SIZE

    def ln_g():
        return jnp.ones((L, H), jnp.float32)

    def ln_b():
        return jnp.zeros((L, H), jnp.float32)

    weights = {
        "e_ln1_g": ln_g(), "e_ln1_b": ln_b(),
        "e_ln2_g": ln_g(), "e_ln2_b": ln_b(),
        "e_qkv_w": nrm((L, H, 3 * H)), "e_qkv_b": jnp.zeros((L, 3 * H), jnp.float32),
        "e_o_w": nrm((L, H, H)), "e_o_b": jnp.zeros((L, H), jnp.float32),
        "e_f_w1": nrm((L, H, F)), "e_f_b1": jnp.zeros((L, F), jnp.float32),
        "e_f_w2": nrm((L, F, H)), "e_f_b2": jnp.zeros((L, H), jnp.float32),
        "e_out_g": jnp.ones((1, H), jnp.float32), "e_out_b": jnp.zeros((1, H), jnp.float32),
        "d_ln1_g": ln_g(), "d_ln1_b": ln_b(),
        "d_ln2_g": ln_g(), "d_ln2_b": ln_b(),
        "d_ln3_g": ln_g(), "d_ln3_b": ln_b(),
        "d_sa_qkv_w": nrm((L, H, 3 * H)), "d_sa_qkv_b": jnp.zeros((L, 3 * H), jnp.float32),
        "d_sa_o_w": nrm((L, H, H)), "d_sa_o_b": jnp.zeros((L, H), jnp.float32),
        "d_xa_qkv_w": nrm((L, H, 3 * H)), "d_xa_qkv_b": jnp.zeros((L, 3 * H), jnp.float32),
        "d_xa_o_w": nrm((L, H, H)), "d_xa_o_b": jnp.zeros((L, H), jnp.float32),
        "d_f_w1": nrm((L, H, F)), "d_f_b1": jnp.zeros((L, F), jnp.float32),
        "d_f_w2": nrm((L, F, H)), "d_f_b2": jnp.zeros((L, H), jnp.float32),
        "d_out_g": jnp.ones((1, H), jnp.float32), "d_out_b": jnp.zeros((1, H), jnp.float32),
        "gen_w": nrm((H, V)), "gen_b": jnp.zeros((1, V), jnp.float32),
    }

    tok = nrm((V, H)).at[PAD_IDX].set(0.0)   # padding_idx row zeroed

    return {
        "weights": weights,
        "style_embed": jnp.zeros((NUM_STYLES, H), jnp.float32),  # nn.init.constant_(0)
        "token_embed": tok,
        "pos_embed": nrm((MAX_SEQ_LEN, H)),
        "sos_token": nrm((H,)),
    }


# -------------------------------------------- main ----------------------------------------
if __name__ == "__main__":
    key = jax.random.PRNGKey(0)
    k_params, k_inp, k_gold = jax.random.split(key, 3)

    params = init_params(k_params)

    B = 2
    L_ENC = 8
    L_GOLD = 8
    inp_tokens = jax.random.randint(k_inp, (B, L_ENC), 2, VOCAB_SIZE, dtype=jnp.int32)
    gold_tokens = jax.random.randint(k_gold, (B, L_GOLD), 2, VOCAB_SIZE, dtype=jnp.int32)
    inp_lengths = jnp.array([8, 5], dtype=jnp.int32)
    style = jnp.array([0, 1], dtype=jnp.int32)

    fwd = jax.jit(style_transformer_forward)
    log_probs = jax.block_until_ready(fwd(params, inp_tokens, gold_tokens, inp_lengths, style))

    assert log_probs.shape == (B, L_GOLD, VOCAB_SIZE), log_probs.shape
    assert bool(jnp.all(jnp.isfinite(log_probs)))
    # rows of exp(log_probs) must sum to 1 (log_softmax output)
    assert bool(jnp.allclose(jnp.exp(log_probs).sum(-1), 1.0, atol=1e-3))
    print("KERNEL_OK")
</pallas_src>

<mosaic_0001>
module attributes {stable_mosaic.version = 11 : i64} {
  func.func @_fused_forward_kernel(%arg0: i32, %arg1: memref<2xi32, #tpu.memory_space<smem>>, %arg2: memref<1x16x32xf32, #tpu.memory_space<vmem>>, %arg3: memref<1x8x32xf32, #tpu.memory_space<vmem>>, %arg4: memref<2x32xf32, #tpu.memory_space<vmem>>, %arg5: memref<2x32xf32, #tpu.memory_space<vmem>>, %arg6: memref<2x32xf32, #tpu.memory_space<vmem>>, %arg7: memref<2x32xf32, #tpu.memory_space<vmem>>, %arg8: memref<2x32x96xbf16, #tpu.memory_space<vmem>>, %arg9: memref<2x96xf32, #tpu.memory_space<vmem>>, %arg10: memref<2x32x32xbf16, #tpu.memory_space<vmem>>, %arg11: memref<2x32xf32, #tpu.memory_space<vmem>>, %arg12: memref<2x32x128xbf16, #tpu.memory_space<vmem>>, %arg13: memref<2x128xf32, #tpu.memory_space<vmem>>, %arg14: memref<2x128x32xbf16, #tpu.memory_space<vmem>>, %arg15: memref<2x32xf32, #tpu.memory_space<vmem>>, %arg16: memref<1x32xf32, #tpu.memory_space<vmem>>, %arg17: memref<1x32xf32, #tpu.memory_space<vmem>>, %arg18: memref<2x32xf32, #tpu.memory_space<vmem>>, %arg19: memref<2x32xf32, #tpu.memory_space<vmem>>, %arg20: memref<2x32xf32, #tpu.memory_space<vmem>>, %arg21: memref<2x32xf32, #tpu.memory_space<vmem>>, %arg22: memref<2x32xf32, #tpu.memory_space<vmem>>, %arg23: memref<2x32xf32, #tpu.memory_space<vmem>>, %arg24: memref<2x32x96xbf16, #tpu.memory_space<vmem>>, %arg25: memref<2x96xf32, #tpu.memory_space<vmem>>, %arg26: memref<2x32x32xbf16, #tpu.memory_space<vmem>>, %arg27: memref<2x32xf32, #tpu.memory_space<vmem>>, %arg28: memref<2x32x96xbf16, #tpu.memory_space<vmem>>, %arg29: memref<2x96xf32, #tpu.memory_space<vmem>>, %arg30: memref<2x32x32xbf16, #tpu.memory_space<vmem>>, %arg31: memref<2x32xf32, #tpu.memory_space<vmem>>, %arg32: memref<2x32x128xbf16, #tpu.memory_space<vmem>>, %arg33: memref<2x128xf32, #tpu.memory_space<vmem>>, %arg34: memref<2x128x32xbf16, #tpu.memory_space<vmem>>, %arg35: memref<2x32xf32, #tpu.memory_space<vmem>>, %arg36: memref<1x32xf32, #tpu.memory_space<vmem>>, %arg37: memref<1x32xf32, #tpu.memory_space<vmem>>, %arg38: memref<32x64xbf16, #tpu.memory_space<vmem>>, %arg39: memref<1x64xf32, #tpu.memory_space<vmem>>, %arg40: memref<1x8x64xf32, #tpu.memory_space<vmem>>) attributes {dimension_semantics = [#tpu.dimension_semantics<parallel>], iteration_bounds = array<i64: 2>, scalar_prefetch = 1 : i64, scratch_operands = 0 : i64, tpu.core_type = #tpu.core_type<tc>, window_params = [{transform_indices = @transform_0, window_bounds = array<i64: 1, 16, 32>}, {transform_indices = @transform_1, window_bounds = array<i64: 1, 8, 32>}, {pipeline_mode = #tpu.pipeline_mode<synchronous>, transform_indices = @transform_2, window_bounds = array<i64: 2, 32>}, {pipeline_mode = #tpu.pipeline_mode<synchronous>, transform_indices = @transform_3, window_bounds = array<i64: 2, 32>}, {pipeline_mode = #tpu.pipeline_mode<synchronous>, transform_indices = @transform_4, window_bounds = array<i64: 2, 32>}, {pipeline_mode = #tpu.pipeline_mode<synchronous>, transform_indices = @transform_5, window_bounds = array<i64: 2, 32>}, {pipeline_mode = #tpu.pipeline_mode<synchronous>, transform_indices = @transform_6, window_bounds = array<i64: 2, 32, 96>}, {pipeline_mode = #tpu.pipeline_mode<synchronous>, transform_indices = @transform_7, window_bounds = array<i64: 2, 96>}, {pipeline_mode = #tpu.pipeline_mode<synchronous>, transform_indices = @transform_8, window_bounds = array<i64: 2, 32, 32>}, {pipeline_mode = #tpu.pipeline_mode<synchronous>, transform_indices = @transform_9, window_bounds = array<i64: 2, 32>}, {pipeline_mode = #tpu.pipeline_mode<synchronous>, transform_indices = @transform_10, window_bounds = array<i64: 2, 32, 128>}, {pipeline_mode = #tpu.pipeline_mode<synchronous>, transform_indices = @transform_11, window_bounds = array<i64: 2, 128>}, {pipeline_mode = #tpu.pipeline_mode<synchronous>, transform_indices = @transform_12, window_bounds = array<i64: 2, 128, 32>}, {pipeline_mode = #tpu.pipeline_mode<synchronous>, transform_indices = @transform_13, window_bounds = array<i64: 2, 32>}, {pipeline_mode = #tpu.pipeline_mode<synchronous>, transform_indices = @transform_14, window_bounds = array<i64: 1, 32>}, {pipeline_mode = #tpu.pipeline_mode<synchronous>, transform_indices = @transform_15, window_bounds = array<i64: 1, 32>}, {pipeline_mode = #tpu.pipeline_mode<synchronous>, transform_indices = @transform_16, window_bounds = array<i64: 2, 32>}, {pipeline_mode = #tpu.pipeline_mode<synchronous>, transform_indices = @transform_17, window_bounds = array<i64: 2, 32>}, {pipeline_mode = #tpu.pipeline_mode<synchronous>, transform_indices = @transform_18, window_bounds = array<i64: 2, 32>}, {pipeline_mode = #tpu.pipeline_mode<synchronous>, transform_indices = @transform_19, window_bounds = array<i64: 2, 32>}, {pipeline_mode = #tpu.pipeline_mode<synchronous>, transform_indices = @transform_20, window_bounds = array<i64: 2, 32>}, {pipeline_mode = #tpu.pipeline_mode<synchronous>, transform_indices = @transform_21, window_bounds = array<i64: 2, 32>}, {pipeline_mode = #tpu.pipeline_mode<synchronous>, transform_indices = @transform_22, window_bounds = array<i64: 2, 32, 96>}, {pipeline_mode = #tpu.pipeline_mode<synchronous>, transform_indices = @transform_23, window_bounds = array<i64: 2, 96>}, {pipeline_mode = #tpu.pipeline_mode<synchronous>, transform_indices = @transform_24, window_bounds = array<i64: 2, 32, 32>}, {pipeline_mode = #tpu.pipeline_mode<synchronous>, transform_indices = @transform_25, window_bounds = array<i64: 2, 32>}, {pipeline_mode = #tpu.pipeline_mode<synchronous>, transform_indices = @transform_26, window_bounds = array<i64: 2, 32, 96>}, {pipeline_mode = #tpu.pipeline_mode<synchronous>, transform_indices = @transform_27, window_bounds = array<i64: 2, 96>}, {pipeline_mode = #tpu.pipeline_mode<synchronous>, transform_indices = @transform_28, window_bounds = array<i64: 2, 32, 32>}, {pipeline_mode = #tpu.pipeline_mode<synchronous>, transform_indices = @transform_29, window_bounds = array<i64: 2, 32>}, {pipeline_mode = #tpu.pipeline_mode<synchronous>, transform_indices = @transform_30, window_bounds = array<i64: 2, 32, 128>}, {pipeline_mode = #tpu.pipeline_mode<synchronous>, transform_indices = @transform_31, window_bounds = array<i64: 2, 128>}, {pipeline_mode = #tpu.pipeline_mode<synchronous>, transform_indices = @transform_32, window_bounds = array<i64: 2, 128, 32>}, {pipeline_mode = #tpu.pipeline_mode<synchronous>, transform_indices = @transform_33, window_bounds = array<i64: 2, 32>}, {pipeline_mode = #tpu.pipeline_mode<synchronous>, transform_indices = @transform_34, window_bounds = array<i64: 1, 32>}, {pipeline_mode = #tpu.pipeline_mode<synchronous>, transform_indices = @transform_35, window_bounds = array<i64: 1, 32>}, {pipeline_mode = #tpu.pipeline_mode<synchronous>, transform_indices = @transform_36, window_bounds = array<i64: 32, 64>}, {pipeline_mode = #tpu.pipeline_mode<synchronous>, transform_indices = @transform_37, window_bounds = array<i64: 1, 64>}, {transform_indices = @transform_38, window_bounds = array<i64: 1, 8, 64>}]} {
    %0 = arith.index_cast %arg0 : i32 to index
    %1 = memref.load %arg1[%0] : memref<2xi32, #tpu.memory_space<smem>>
    %c0 = arith.constant 0 : index
    %c0_0 = arith.constant 0 : index
    %c0_1 = arith.constant 0 : index
    %2 = vector.load %arg2[%c0, %c0_0, %c0_1] : memref<1x16x32xf32, #tpu.memory_space<vmem>>, vector<1x16x32xf32>
    %3 = vector.shape_cast %2 : vector<1x16x32xf32> to vector<16x32xf32>
    %c0_2 = arith.constant 0 : index
    %c0_3 = arith.constant 0 : index
    %c0_4 = arith.constant 0 : index
    %4 = vector.load %arg3[%c0_2, %c0_3, %c0_4] : memref<1x8x32xf32, #tpu.memory_space<vmem>>, vector<1x8x32xf32>
    %5 = vector.shape_cast %4 : vector<1x8x32xf32> to vector<8x32xf32>
    %6 = tpu.iota {dimensions = array<i32: 1>} : vector<1x16xi32>
    %c1_i32 = arith.constant 1 : i32
    %7 = arith.addi %1, %c1_i32 : i32
    %8 = vector.broadcast %7 : i32 to vector<1x16xi32>
    %9 = arith.cmpi sge, %6, %8 : vector<1x16xi32>
    %10 = tpu.iota {dimensions = array<i32: 0>} : vector<8x8xi32>
    %11 = tpu.iota {dimensions = array<i32: 1>} : vector<8x8xi32>
    %12 = arith.cmpi sgt, %11, %10 : vector<8x8xi32>
    %c0_5 = arith.constant 0 : index
    %c0_6 = arith.constant 0 : index
    %13 = vector.load %arg4[%c0_5, %c0_6] : memref<2x32xf32, #tpu.memory_space<vmem>>, vector<2x32xf32>
    %14 = vector.extract_strided_slice %13 {offsets = [0, 0], sizes = [1, 32], strides = [1, 1]} : vector<2x32xf32> to vector<1x32xf32>
    %c0_7 = arith.constant 0 : index
    %c0_8 = arith.constant 0 : index
    %15 = vector.load %arg5[%c0_7, %c0_8] : memref<2x32xf32, #tpu.memory_space<vmem>>, vector<2x32xf32>
    %16 = vector.extract_strided_slice %15 {offsets = [0, 0], sizes = [1, 32], strides = [1, 1]} : vector<2x32xf32> to vector<1x32xf32>
    %cst = arith.constant dense<0.000000e+00> : vector<16xf32>
    %17 = vector.multi_reduction <add>, %3, %cst [1] : vector<16x32xf32> to vector<16xf32>
    %18 = vector.shape_cast %17 : vector<16xf32> to vector<16x1xf32>
    %cst_9 = arith.constant 3.200000e+01 : f32
    %19 = vector.broadcast %cst_9 : f32 to vector<16x1xf32>
    %20 = arith.divf %18, %19 : vector<16x1xf32>
    %21 = vector.broadcast %20 : vector<16x1xf32> to vector<16x32xf32>
    %22 = arith.subf %3, %21 : vector<16x32xf32>
    %23 = arith.mulf %22, %22 : vector<16x32xf32>
    %cst_10 = arith.constant dense<0.000000e+00> : vector<16xf32>
    %24 = vector.multi_reduction <add>, %23, %cst_10 [1] : vector<16x32xf32> to vector<16xf32>
    %25 = vector.shape_cast %24 : vector<16xf32> to vector<16x1xf32>
    %cst_11 = arith.constant 3.200000e+01 : f32
    %26 = vector.broadcast %cst_11 : f32 to vector<16x1xf32>
    %27 = arith.divf %25, %26 : vector<16x1xf32>
    %cst_12 = arith.constant 9.99999974E-6 : f32
    %28 = vector.broadcast %cst_12 : f32 to vector<16x1xf32>
    %29 = arith.addf %27, %28 : vector<16x1xf32>
    %30 = math.rsqrt %29 : vector<16x1xf32>
    %31 = vector.broadcast %30 : vector<16x1xf32> to vector<16x32xf32>
    %32 = arith.mulf %22, %31 : vector<16x32xf32>
    %33 = vector.broadcast %14 : vector<1x32xf32> to vector<16x32xf32>
    %34 = arith.mulf %32, %33 : vector<16x32xf32>
    %35 = vector.broadcast %16 : vector<1x32xf32> to vector<16x32xf32>
    %36 = arith.addf %34, %35 : vector<16x32xf32>
    %c0_13 = arith.constant 0 : index
    %c0_14 = arith.constant 0 : index
    %c0_15 = arith.constant 0 : index
    %37 = vector.load %arg8[%c0_13, %c0_14, %c0_15] : memref<2x32x96xbf16, #tpu.memory_space<vmem>>, vector<1x32x96xbf16>
    %38 = vector.shape_cast %37 : vector<1x32x96xbf16> to vector<32x96xbf16>
    %c0_16 = arith.constant 0 : index
    %c0_17 = arith.constant 0 : index
    %39 = vector.load %arg9[%c0_16, %c0_17] : memref<2x96xf32, #tpu.memory_space<vmem>>, vector<2x96xf32>
    %40 = vector.extract_strided_slice %39 {offsets = [0, 0], sizes = [1, 96], strides = [1, 1]} : vector<2x96xf32> to vector<1x96xf32>
    %c0_18 = arith.constant 0 : index
    %c0_19 = arith.constant 0 : index
    %c0_20 = arith.constant 0 : index
    %41 = vector.load %arg10[%c0_18, %c0_19, %c0_20] : memref<2x32x32xbf16, #tpu.memory_space<vmem>>, vector<1x32x32xbf16>
    %42 = vector.shape_cast %41 : vector<1x32x32xbf16> to vector<32x32xbf16>
    %c0_21 = arith.constant 0 : index
    %c0_22 = arith.constant 0 : index
    %43 = vector.load %arg11[%c0_21, %c0_22] : memref<2x32xf32, #tpu.memory_space<vmem>>, vector<2x32xf32>
    %44 = vector.extract_strided_slice %43 {offsets = [0, 0], sizes = [1, 32], strides = [1, 1]} : vector<2x32xf32> to vector<1x32xf32>
    %45 = arith.truncf %36 : vector<16x32xf32> to vector<16x32xbf16>
    %cst_23 = arith.constant dense<0.000000e+00> : vector<16x96xf32>
    %46 = tpu.matmul %45, %38, %cst_23 {dimension_numbers = #tpu.dot_dimension_numbers<[1], [0], [0], [1], [0, 0, 1, 1], [], []>} : vector<16x32xbf16>, vector<32x96xbf16>, vector<16x96xf32> -> vector<16x96xf32>
    %47 = vector.broadcast %40 : vector<1x96xf32> to vector<16x96xf32>
    %48 = arith.addf %46, %47 : vector<16x96xf32>
    %49 = vector.extract_strided_slice %48 {offsets = [0, 0], sizes = [16, 32], strides = [1, 1]} : vector<16x96xf32> to vector<16x32xf32>
    %50 = vector.extract_strided_slice %48 {offsets = [0, 32], sizes = [16, 32], strides = [1, 1]} : vector<16x96xf32> to vector<16x32xf32>
    %51 = vector.extract_strided_slice %48 {offsets = [0, 64], sizes = [16, 32], strides = [1, 1]} : vector<16x96xf32> to vector<16x32xf32>
    %52 = vector.extract_strided_slice %49 {offsets = [0, 0], sizes = [16, 8], strides = [1, 1]} : vector<16x32xf32> to vector<16x8xf32>
    %53 = arith.truncf %52 : vector<16x8xf32> to vector<16x8xbf16>
    %54 = vector.extract_strided_slice %50 {offsets = [0, 0], sizes = [16, 8], strides = [1, 1]} : vector<16x32xf32> to vector<16x8xf32>
    %55 = arith.truncf %54 : vector<16x8xf32> to vector<16x8xbf16>
    %cst_24 = arith.constant dense<0.000000e+00> : vector<16x16xf32>
    %56 = tpu.matmul %53, %55, %cst_24 {dimension_numbers = #tpu.dot_dimension_numbers<[1], [1], [0], [0], [0, 0, 1, 0], [], []>} : vector<16x8xbf16>, vector<16x8xbf16>, vector<16x16xf32> -> vector<16x16xf32>
    %cst_25 = arith.constant 0.353553385 : f32
    %57 = vector.broadcast %cst_25 : f32 to vector<16x16xf32>
    %58 = arith.mulf %56, %57 : vector<16x16xf32>
    %cst_26 = arith.constant -1.000000e+30 : f32
    %59 = vector.shape_cast %9 : vector<1x16xi1> to vector<1x16xi1>
    %60 = vector.broadcast %59 : vector<1x16xi1> to vector<16x16xi1>
    %61 = vector.broadcast %cst_26 : f32 to vector<16x16xf32>
    %62 = arith.select %60, %61, %58 : vector<16x16xi1>, vector<16x16xf32>
    %cst_27 = arith.constant dense<0xFF800000> : vector<16xf32>
    %63 = vector.multi_reduction <maximumf>, %62, %cst_27 [1] : vector<16x16xf32> to vector<16xf32>
    %64 = vector.shape_cast %63 : vector<16xf32> to vector<16x1xf32>
    %65 = vector.broadcast %64 : vector<16x1xf32> to vector<16x16xf32>
    %66 = arith.subf %62, %65 : vector<16x16xf32>
    %67 = math.exp %66 : vector<16x16xf32>
    %cst_28 = arith.constant dense<0.000000e+00> : vector<16xf32>
    %68 = vector.multi_reduction <add>, %67, %cst_28 [1] : vector<16x16xf32> to vector<16xf32>
    %69 = vector.shape_cast %68 : vector<16xf32> to vector<16x1xf32>
    %70 = tpu.reciprocal %69 {approx = true} : vector<16x1xf32> -> vector<16x1xf32>
    %71 = vector.broadcast %70 : vector<16x1xf32> to vector<16x16xf32>
    %72 = arith.mulf %67, %71 : vector<16x16xf32>
    %73 = arith.truncf %72 : vector<16x16xf32> to vector<16x16xbf16>
    %74 = vector.extract_strided_slice %51 {offsets = [0, 0], sizes = [16, 8], strides = [1, 1]} : vector<16x32xf32> to vector<16x8xf32>
    %75 = arith.truncf %74 : vector<16x8xf32> to vector<16x8xbf16>
    %cst_29 = arith.constant dense<0.000000e+00> : vector<16x8xf32>
    %76 = tpu.matmul %73, %75, %cst_29 {dimension_numbers = #tpu.dot_dimension_numbers<[1], [0], [0], [1], [0, 0, 1, 1], [], []>} : vector<16x16xbf16>, vector<16x8xbf16>, vector<16x8xf32> -> vector<16x8xf32>
    %77 = vector.extract_strided_slice %49 {offsets = [0, 8], sizes = [16, 8], strides = [1, 1]} : vector<16x32xf32> to vector<16x8xf32>
    %78 = arith.truncf %77 : vector<16x8xf32> to vector<16x8xbf16>
    %79 = vector.extract_strided_slice %50 {offsets = [0, 8], sizes = [16, 8], strides = [1, 1]} : vector<16x32xf32> to vector<16x8xf32>
    %80 = arith.truncf %79 : vector<16x8xf32> to vector<16x8xbf16>
    %cst_30 = arith.constant dense<0.000000e+00> : vector<16x16xf32>
    %81 = tpu.matmul %78, %80, %cst_30 {dimension_numbers = #tpu.dot_dimension_numbers<[1], [1], [0], [0], [0, 0, 1, 0], [], []>} : vector<16x8xbf16>, vector<16x8xbf16>, vector<16x16xf32> -> vector<16x16xf32>
    %cst_31 = arith.constant 0.353553385 : f32
    %82 = vector.broadcast %cst_31 : f32 to vector<16x16xf32>
    %83 = arith.mulf %81, %82 : vector<16x16xf32>
    %cst_32 = arith.constant -1.000000e+30 : f32
    %84 = vector.shape_cast %9 : vector<1x16xi1> to vector<1x16xi1>
    %85 = vector.broadcast %84 : vector<1x16xi1> to vector<16x16xi1>
    %86 = vector.broadcast %cst_32 : f32 to vector<16x16xf32>
    %87 = arith.select %85, %86, %83 : vector<16x16xi1>, vector<16x16xf32>
    %cst_33 = arith.constant dense<0xFF800000> : vector<16xf32>
    %88 = vector.multi_reduction <maximumf>, %87, %cst_33 [1] : vector<16x16xf32> to vector<16xf32>
    %89 = vector.shape_cast %88 : vector<16xf32> to vector<16x1xf32>
    %90 = vector.broadcast %89 : vector<16x1xf32> to vector<16x16xf32>
    %91 = arith.subf %87, %90 : vector<16x16xf32>
    %92 = math.exp %91 : vector<16x16xf32>
    %cst_34 = arith.constant dense<0.000000e+00> : vector<16xf32>
    %93 = vector.multi_reduction <add>, %92, %cst_34 [1] : vector<16x16xf32> to vector<16xf32>
    %94 = vector.shape_cast %93 : vector<16xf32> to vector<16x1xf32>
    %95 = tpu.reciprocal %94 {approx = true} : vector<16x1xf32> -> vector<16x1xf32>
    %96 = vector.broadcast %95 : vector<16x1xf32> to vector<16x16xf32>
    %97 = arith.mulf %92, %96 : vector<16x16xf32>
    %98 = arith.truncf %97 : vector<16x16xf32> to vector<16x16xbf16>
    %99 = vector.extract_strided_slice %51 {offsets = [0, 8], sizes = [16, 8], strides = [1, 1]} : vector<16x32xf32> to vector<16x8xf32>
    %100 = arith.truncf %99 : vector<16x8xf32> to vector<16x8xbf16>
    %cst_35 = arith.constant dense<0.000000e+00> : vector<16x8xf32>
    %101 = tpu.matmul %98, %100, %cst_35 {dimension_numbers = #tpu.dot_dimension_numbers<[1], [0], [0], [1], [0, 0, 1, 1], [], []>} : vector<16x16xbf16>, vector<16x8xbf16>, vector<16x8xf32> -> vector<16x8xf32>
    %102 = vector.extract_strided_slice %49 {offsets = [0, 16], sizes = [16, 8], strides = [1, 1]} : vector<16x32xf32> to vector<16x8xf32>
    %103 = arith.truncf %102 : vector<16x8xf32> to vector<16x8xbf16>
    %104 = vector.extract_strided_slice %50 {offsets = [0, 16], sizes = [16, 8], strides = [1, 1]} : vector<16x32xf32> to vector<16x8xf32>
    %105 = arith.truncf %104 : vector<16x8xf32> to vector<16x8xbf16>
    %cst_36 = arith.constant dense<0.000000e+00> : vector<16x16xf32>
    %106 = tpu.matmul %103, %105, %cst_36 {dimension_numbers = #tpu.dot_dimension_numbers<[1], [1], [0], [0], [0, 0, 1, 0], [], []>} : vector<16x8xbf16>, vector<16x8xbf16>, vector<16x16xf32> -> vector<16x16xf32>
    %cst_37 = arith.constant 0.353553385 : f32
    %107 = vector.broadcast %cst_37 : f32 to vector<16x16xf32>
    %108 = arith.mulf %106, %107 : vector<16x16xf32>
    %cst_38 = arith.constant -1.000000e+30 : f32
    %109 = vector.shape_cast %9 : vector<1x16xi1> to vector<1x16xi1>
    %110 = vector.broadcast %109 : vector<1x16xi1> to vector<16x16xi1>
    %111 = vector.broadcast %cst_38 : f32 to vector<16x16xf32>
    %112 = arith.select %110, %111, %108 : vector<16x16xi1>, vector<16x16xf32>
    %cst_39 = arith.constant dense<0xFF800000> : vector<16xf32>
    %113 = vector.multi_reduction <maximumf>, %112, %cst_39 [1] : vector<16x16xf32> to vector<16xf32>
    %114 = vector.shape_cast %113 : vector<16xf32> to vector<16x1xf32>
    %115 = vector.broadcast %114 : vector<16x1xf32> to vector<16x16xf32>
    %116 = arith.subf %112, %115 : vector<16x16xf32>
    %117 = math.exp %116 : vector<16x16xf32>
    %cst_40 = arith.constant dense<0.000000e+00> : vector<16xf32>
    %118 = vector.multi_reduction <add>, %117, %cst_40 [1] : vector<16x16xf32> to vector<16xf32>
    %119 = vector.shape_cast %118 : vector<16xf32> to vector<16x1xf32>
    %120 = tpu.reciprocal %119 {approx = true} : vector<16x1xf32> -> vector<16x1xf32>
    %121 = vector.broadcast %120 : vector<16x1xf32> to vector<16x16xf32>
    %122 = arith.mulf %117, %121 : vector<16x16xf32>
    %123 = arith.truncf %122 : vector<16x16xf32> to vector<16x16xbf16>
    %124 = vector.extract_strided_slice %51 {offsets = [0, 16], sizes = [16, 8], strides = [1, 1]} : vector<16x32xf32> to vector<16x8xf32>
    %125 = arith.truncf %124 : vector<16x8xf32> to vector<16x8xbf16>
    %cst_41 = arith.constant dense<0.000000e+00> : vector<16x8xf32>
    %126 = tpu.matmul %123, %125, %cst_41 {dimension_numbers = #tpu.dot_dimension_numbers<[1], [0], [0], [1], [0, 0, 1, 1], [], []>} : vector<16x16xbf16>, vector<16x8xbf16>, vector<16x8xf32> -> vector<16x8xf32>
    %127 = vector.extract_strided_slice %49 {offsets = [0, 24], sizes = [16, 8], strides = [1, 1]} : vector<16x32xf32> to vector<16x8xf32>
    %128 = arith.truncf %127 : vector<16x8xf32> to vector<16x8xbf16>
    %129 = vector.extract_strided_slice %50 {offsets = [0, 24], sizes = [16, 8], strides = [1, 1]} : vector<16x32xf32> to vector<16x8xf32>
    %130 = arith.truncf %129 : vector<16x8xf32> to vector<16x8xbf16>
    %cst_42 = arith.constant dense<0.000000e+00> : vector<16x16xf32>
    %131 = tpu.matmul %128, %130, %cst_42 {dimension_numbers = #tpu.dot_dimension_numbers<[1], [1], [0], [0], [0, 0, 1, 0], [], []>} : vector<16x8xbf16>, vector<16x8xbf16>, vector<16x16xf32> -> vector<16x16xf32>
    %cst_43 = arith.constant 0.353553385 : f32
    %132 = vector.broadcast %cst_43 : f32 to vector<16x16xf32>
    %133 = arith.mulf %131, %132 : vector<16x16xf32>
    %cst_44 = arith.constant -1.000000e+30 : f32
    %134 = vector.shape_cast %9 : vector<1x16xi1> to vector<1x16xi1>
    %135 = vector.broadcast %134 : vector<1x16xi1> to vector<16x16xi1>
    %136 = vector.broadcast %cst_44 : f32 to vector<16x16xf32>
    %137 = arith.select %135, %136, %133 : vector<16x16xi1>, vector<16x16xf32>
    %cst_45 = arith.constant dense<0xFF800000> : vector<16xf32>
    %138 = vector.multi_reduction <maximumf>, %137, %cst_45 [1] : vector<16x16xf32> to vector<16xf32>
    %139 = vector.shape_cast %138 : vector<16xf32> to vector<16x1xf32>
    %140 = vector.broadcast %139 : vector<16x1xf32> to vector<16x16xf32>
    %141 = arith.subf %137, %140 : vector<16x16xf32>
    %142 = math.exp %141 : vector<16x16xf32>
    %cst_46 = arith.constant dense<0.000000e+00> : vector<16xf32>
    %143 = vector.multi_reduction <add>, %142, %cst_46 [1] : vector<16x16xf32> to vector<16xf32>
    %144 = vector.shape_cast %143 : vector<16xf32> to vector<16x1xf32>
    %145 = tpu.reciprocal %144 {approx = true} : vector<16x1xf32> -> vector<16x1xf32>
    %146 = vector.broadcast %145 : vector<16x1xf32> to vector<16x16xf32>
    %147 = arith.mulf %142, %146 : vector<16x16xf32>
    %148 = arith.truncf %147 : vector<16x16xf32> to vector<16x16xbf16>
    %149 = vector.extract_strided_slice %51 {offsets = [0, 24], sizes = [16, 8], strides = [1, 1]} : vector<16x32xf32> to vector<16x8xf32>
    %150 = arith.truncf %149 : vector<16x8xf32> to vector<16x8xbf16>
    %cst_47 = arith.constant dense<0.000000e+00> : vector<16x8xf32>
    %151 = tpu.matmul %148, %150, %cst_47 {dimension_numbers = #tpu.dot_dimension_numbers<[1], [0], [0], [1], [0, 0, 1, 1], [], []>} : vector<16x16xbf16>, vector<16x8xbf16>, vector<16x8xf32> -> vector<16x8xf32>
    %152 = tpu.concatenate %76, %101, %126, %151 in 1 : vector<16x8xf32>, vector<16x8xf32>, vector<16x8xf32>, vector<16x8xf32> -> vector<16x32xf32>
    %153 = arith.truncf %152 : vector<16x32xf32> to vector<16x32xbf16>
    %cst_48 = arith.constant dense<0.000000e+00> : vector<16x32xf32>
    %154 = tpu.matmul %153, %42, %cst_48 {dimension_numbers = #tpu.dot_dimension_numbers<[1], [0], [0], [1], [0, 0, 1, 1], [], []>} : vector<16x32xbf16>, vector<32x32xbf16>, vector<16x32xf32> -> vector<16x32xf32>
    %155 = vector.broadcast %44 : vector<1x32xf32> to vector<16x32xf32>
    %156 = arith.addf %154, %155 : vector<16x32xf32>
    %157 = arith.addf %3, %156 : vector<16x32xf32>
    %c0_49 = arith.constant 0 : index
    %c0_50 = arith.constant 0 : index
    %158 = vector.load %arg6[%c0_49, %c0_50] : memref<2x32xf32, #tpu.memory_space<vmem>>, vector<2x32xf32>
    %159 = vector.extract_strided_slice %158 {offsets = [0, 0], sizes = [1, 32], strides = [1, 1]} : vector<2x32xf32> to vector<1x32xf32>
    %c0_51 = arith.constant 0 : index
    %c0_52 = arith.constant 0 : index
    %160 = vector.load %arg7[%c0_51, %c0_52] : memref<2x32xf32, #tpu.memory_space<vmem>>, vector<2x32xf32>
    %161 = vector.extract_strided_slice %160 {offsets = [0, 0], sizes = [1, 32], strides = [1, 1]} : vector<2x32xf32> to vector<1x32xf32>
    %cst_53 = arith.constant dense<0.000000e+00> : vector<16xf32>
    %162 = vector.multi_reduction <add>, %157, %cst_53 [1] : vector<16x32xf32> to vector<16xf32>
    %163 = vector.shape_cast %162 : vector<16xf32> to vector<16x1xf32>
    %cst_54 = arith.constant 3.200000e+01 : f32
    %164 = vector.broadcast %cst_54 : f32 to vector<16x1xf32>
    %165 = arith.divf %163, %164 : vector<16x1xf32>
    %166 = vector.broadcast %165 : vector<16x1xf32> to vector<16x32xf32>
    %167 = arith.subf %157, %166 : vector<16x32xf32>
    %168 = arith.mulf %167, %167 : vector<16x32xf32>
    %cst_55 = arith.constant dense<0.000000e+00> : vector<16xf32>
    %169 = vector.multi_reduction <add>, %168, %cst_55 [1] : vector<16x32xf32> to vector<16xf32>
    %170 = vector.shape_cast %169 : vector<16xf32> to vector<16x1xf32>
    %cst_56 = arith.constant 3.200000e+01 : f32
    %171 = vector.broadcast %cst_56 : f32 to vector<16x1xf32>
    %172 = arith.divf %170, %171 : vector<16x1xf32>
    %cst_57 = arith.constant 9.99999974E-6 : f32
    %173 = vector.broadcast %cst_57 : f32 to vector<16x1xf32>
    %174 = arith.addf %172, %173 : vector<16x1xf32>
    %175 = math.rsqrt %174 : vector<16x1xf32>
    %176 = vector.broadcast %175 : vector<16x1xf32> to vector<16x32xf32>
    %177 = arith.mulf %167, %176 : vector<16x32xf32>
    %178 = vector.broadcast %159 : vector<1x32xf32> to vector<16x32xf32>
    %179 = arith.mulf %177, %178 : vector<16x32xf32>
    %180 = vector.broadcast %161 : vector<1x32xf32> to vector<16x32xf32>
    %181 = arith.addf %179, %180 : vector<16x32xf32>
    %c0_58 = arith.constant 0 : index
    %c0_59 = arith.constant 0 : index
    %c0_60 = arith.constant 0 : index
    %182 = vector.load %arg12[%c0_58, %c0_59, %c0_60] : memref<2x32x128xbf16, #tpu.memory_space<vmem>>, vector<1x32x128xbf16>
    %183 = vector.shape_cast %182 : vector<1x32x128xbf16> to vector<32x128xbf16>
    %c0_61 = arith.constant 0 : index
    %c0_62 = arith.constant 0 : index
    %184 = vector.load %arg13[%c0_61, %c0_62] : memref<2x128xf32, #tpu.memory_space<vmem>>, vector<2x128xf32>
    %185 = vector.extract_strided_slice %184 {offsets = [0, 0], sizes = [1, 128], strides = [1, 1]} : vector<2x128xf32> to vector<1x128xf32>
    %c0_63 = arith.constant 0 : index
    %c0_64 = arith.constant 0 : index
    %c0_65 = arith.constant 0 : index
    %186 = vector.load %arg14[%c0_63, %c0_64, %c0_65] : memref<2x128x32xbf16, #tpu.memory_space<vmem>>, vector<1x128x32xbf16>
    %187 = vector.shape_cast %186 : vector<1x128x32xbf16> to vector<128x32xbf16>
    %c0_66 = arith.constant 0 : index
    %c0_67 = arith.constant 0 : index
    %188 = vector.load %arg15[%c0_66, %c0_67] : memref<2x32xf32, #tpu.memory_space<vmem>>, vector<2x32xf32>
    %189 = vector.extract_strided_slice %188 {offsets = [0, 0], sizes = [1, 32], strides = [1, 1]} : vector<2x32xf32> to vector<1x32xf32>
    %190 = arith.truncf %181 : vector<16x32xf32> to vector<16x32xbf16>
    %cst_68 = arith.constant dense<0.000000e+00> : vector<16x128xf32>
    %191 = tpu.matmul %190, %183, %cst_68 {dimension_numbers = #tpu.dot_dimension_numbers<[1], [0], [0], [1], [0, 0, 1, 1], [], []>} : vector<16x32xbf16>, vector<32x128xbf16>, vector<16x128xf32> -> vector<16x128xf32>
    %192 = vector.broadcast %185 : vector<1x128xf32> to vector<16x128xf32>
    %193 = arith.addf %191, %192 : vector<16x128xf32>
    %cst_69 = arith.constant 0.000000e+00 : f32
    %194 = vector.broadcast %cst_69 : f32 to vector<16x128xf32>
    %195 = arith.maximumf %193, %194 : vector<16x128xf32>
    %196 = arith.truncf %195 : vector<16x128xf32> to vector<16x128xbf16>
    %cst_70 = arith.constant dense<0.000000e+00> : vector<16x32xf32>
    %197 = tpu.matmul %196, %187, %cst_70 {dimension_numbers = #tpu.dot_dimension_numbers<[1], [0], [0], [1], [0, 0, 1, 1], [], []>} : vector<16x128xbf16>, vector<128x32xbf16>, vector<16x32xf32> -> vector<16x32xf32>
    %198 = vector.broadcast %189 : vector<1x32xf32> to vector<16x32xf32>
    %199 = arith.addf %197, %198 : vector<16x32xf32>
    %200 = arith.addf %157, %199 : vector<16x32xf32>
    %c0_71 = arith.constant 0 : index
    %c0_72 = arith.constant 0 : index
    %201 = vector.load %arg4[%c0_71, %c0_72] : memref<2x32xf32, #tpu.memory_space<vmem>>, vector<2x32xf32>
    %202 = vector.extract_strided_slice %201 {offsets = [1, 0], sizes = [1, 32], strides = [1, 1]} : vector<2x32xf32> to vector<1x32xf32>
    %c0_73 = arith.constant 0 : index
    %c0_74 = arith.constant 0 : index
    %203 = vector.load %arg5[%c0_73, %c0_74] : memref<2x32xf32, #tpu.memory_space<vmem>>, vector<2x32xf32>
    %204 = vector.extract_strided_slice %203 {offsets = [1, 0], sizes = [1, 32], strides = [1, 1]} : vector<2x32xf32> to vector<1x32xf32>
    %cst_75 = arith.constant dense<0.000000e+00> : vector<16xf32>
    %205 = vector.multi_reduction <add>, %200, %cst_75 [1] : vector<16x32xf32> to vector<16xf32>
    %206 = vector.shape_cast %205 : vector<16xf32> to vector<16x1xf32>
    %cst_76 = arith.constant 3.200000e+01 : f32
    %207 = vector.broadcast %cst_76 : f32 to vector<16x1xf32>
    %208 = arith.divf %206, %207 : vector<16x1xf32>
    %209 = vector.broadcast %208 : vector<16x1xf32> to vector<16x32xf32>
    %210 = arith.subf %200, %209 : vector<16x32xf32>
    %211 = arith.mulf %210, %210 : vector<16x32xf32>
    %cst_77 = arith.constant dense<0.000000e+00> : vector<16xf32>
    %212 = vector.multi_reduction <add>, %211, %cst_77 [1] : vector<16x32xf32> to vector<16xf32>
    %213 = vector.shape_cast %212 : vector<16xf32> to vector<16x1xf32>
    %cst_78 = arith.constant 3.200000e+01 : f32
    %214 = vector.broadcast %cst_78 : f32 to vector<16x1xf32>
    %215 = arith.divf %213, %214 : vector<16x1xf32>
    %cst_79 = arith.constant 9.99999974E-6 : f32
    %216 = vector.broadcast %cst_79 : f32 to vector<16x1xf32>
    %217 = arith.addf %215, %216 : vector<16x1xf32>
    %218 = math.rsqrt %217 : vector<16x1xf32>
    %219 = vector.broadcast %218 : vector<16x1xf32> to vector<16x32xf32>
    %220 = arith.mulf %210, %219 : vector<16x32xf32>
    %221 = vector.broadcast %202 : vector<1x32xf32> to vector<16x32xf32>
    %222 = arith.mulf %220, %221 : vector<16x32xf32>
    %223 = vector.broadcast %204 : vector<1x32xf32> to vector<16x32xf32>
    %224 = arith.addf %222, %223 : vector<16x32xf32>
    %c1 = arith.constant 1 : index
    %c0_80 = arith.constant 0 : index
    %c0_81 = arith.constant 0 : index
    %225 = vector.load %arg8[%c1, %c0_80, %c0_81] : memref<2x32x96xbf16, #tpu.memory_space<vmem>>, vector<1x32x96xbf16>
    %226 = vector.shape_cast %225 : vector<1x32x96xbf16> to vector<32x96xbf16>
    %c0_82 = arith.constant 0 : index
    %c0_83 = arith.constant 0 : index
    %227 = vector.load %arg9[%c0_82, %c0_83] : memref<2x96xf32, #tpu.memory_space<vmem>>, vector<2x96xf32>
    %228 = vector.extract_strided_slice %227 {offsets = [1, 0], sizes = [1, 96], strides = [1, 1]} : vector<2x96xf32> to vector<1x96xf32>
    %c1_84 = arith.constant 1 : index
    %c0_85 = arith.constant 0 : index
    %c0_86 = arith.constant 0 : index
    %229 = vector.load %arg10[%c1_84, %c0_85, %c0_86] : memref<2x32x32xbf16, #tpu.memory_space<vmem>>, vector<1x32x32xbf16>
    %230 = vector.shape_cast %229 : vector<1x32x32xbf16> to vector<32x32xbf16>
    %c0_87 = arith.constant 0 : index
    %c0_88 = arith.constant 0 : index
    %231 = vector.load %arg11[%c0_87, %c0_88] : memref<2x32xf32, #tpu.memory_space<vmem>>, vector<2x32xf32>
    %232 = vector.extract_strided_slice %231 {offsets = [1, 0], sizes = [1, 32], strides = [1, 1]} : vector<2x32xf32> to vector<1x32xf32>
    %233 = arith.truncf %224 : vector<16x32xf32> to vector<16x32xbf16>
    %cst_89 = arith.constant dense<0.000000e+00> : vector<16x96xf32>
    %234 = tpu.matmul %233, %226, %cst_89 {dimension_numbers = #tpu.dot_dimension_numbers<[1], [0], [0], [1], [0, 0, 1, 1], [], []>} : vector<16x32xbf16>, vector<32x96xbf16>, vector<16x96xf32> -> vector<16x96xf32>
    %235 = vector.broadcast %228 : vector<1x96xf32> to vector<16x96xf32>
    %236 = arith.addf %234, %235 : vector<16x96xf32>
    %237 = vector.extract_strided_slice %236 {offsets = [0, 0], sizes = [16, 32], strides = [1, 1]} : vector<16x96xf32> to vector<16x32xf32>
    %238 = vector.extract_strided_slice %236 {offsets = [0, 32], sizes = [16, 32], strides = [1, 1]} : vector<16x96xf32> to vector<16x32xf32>
    %239 = vector.extract_strided_slice %236 {offsets = [0, 64], sizes = [16, 32], strides = [1, 1]} : vector<16x96xf32> to vector<16x32xf32>
    %240 = vector.extract_strided_slice %237 {offsets = [0, 0], sizes = [16, 8], strides = [1, 1]} : vector<16x32xf32> to vector<16x8xf32>
    %241 = arith.truncf %240 : vector<16x8xf32> to vector<16x8xbf16>
    %242 = vector.extract_strided_slice %238 {offsets = [0, 0], sizes = [16, 8], strides = [1, 1]} : vector<16x32xf32> to vector<16x8xf32>
    %243 = arith.truncf %242 : vector<16x8xf32> to vector<16x8xbf16>
    %cst_90 = arith.constant dense<0.000000e+00> : vector<16x16xf32>
    %244 = tpu.matmul %241, %243, %cst_90 {dimension_numbers = #tpu.dot_dimension_numbers<[1], [1], [0], [0], [0, 0, 1, 0], [], []>} : vector<16x8xbf16>, vector<16x8xbf16>, vector<16x16xf32> -> vector<16x16xf32>
    %cst_91 = arith.constant 0.353553385 : f32
    %245 = vector.broadcast %cst_91 : f32 to vector<16x16xf32>
    %246 = arith.mulf %244, %245 : vector<16x16xf32>
    %cst_92 = arith.constant -1.000000e+30 : f32
    %247 = vector.shape_cast %9 : vector<1x16xi1> to vector<1x16xi1>
    %248 = vector.broadcast %247 : vector<1x16xi1> to vector<16x16xi1>
    %249 = vector.broadcast %cst_92 : f32 to vector<16x16xf32>
    %250 = arith.select %248, %249, %246 : vector<16x16xi1>, vector<16x16xf32>
    %cst_93 = arith.constant dense<0xFF800000> : vector<16xf32>
    %251 = vector.multi_reduction <maximumf>, %250, %cst_93 [1] : vector<16x16xf32> to vector<16xf32>
    %252 = vector.shape_cast %251 : vector<16xf32> to vector<16x1xf32>
    %253 = vector.broadcast %252 : vector<16x1xf32> to vector<16x16xf32>
    %254 = arith.subf %250, %253 : vector<16x16xf32>
    %255 = math.exp %254 : vector<16x16xf32>
    %cst_94 = arith.constant dense<0.000000e+00> : vector<16xf32>
    %256 = vector.multi_reduction <add>, %255, %cst_94 [1] : vector<16x16xf32> to vector<16xf32>
    %257 = vector.shape_cast %256 : vector<16xf32> to vector<16x1xf32>
    %258 = tpu.reciprocal %257 {approx = true} : vector<16x1xf32> -> vector<16x1xf32>
    %259 = vector.broadcast %258 : vector<16x1xf32> to vector<16x16xf32>
    %260 = arith.mulf %255, %259 : vector<16x16xf32>
    %261 = arith.truncf %260 : vector<16x16xf32> to vector<16x16xbf16>
    %262 = vector.extract_strided_slice %239 {offsets = [0, 0], sizes = [16, 8], strides = [1, 1]} : vector<16x32xf32> to vector<16x8xf32>
    %263 = arith.truncf %262 : vector<16x8xf32> to vector<16x8xbf16>
    %cst_95 = arith.constant dense<0.000000e+00> : vector<16x8xf32>
    %264 = tpu.matmul %261, %263, %cst_95 {dimension_numbers = #tpu.dot_dimension_numbers<[1], [0], [0], [1], [0, 0, 1, 1], [], []>} : vector<16x16xbf16>, vector<16x8xbf16>, vector<16x8xf32> -> vector<16x8xf32>
    %265 = vector.extract_strided_slice %237 {offsets = [0, 8], sizes = [16, 8], strides = [1, 1]} : vector<16x32xf32> to vector<16x8xf32>
    %266 = arith.truncf %265 : vector<16x8xf32> to vector<16x8xbf16>
    %267 = vector.extract_strided_slice %238 {offsets = [0, 8], sizes = [16, 8], strides = [1, 1]} : vector<16x32xf32> to vector<16x8xf32>
    %268 = arith.truncf %267 : vector<16x8xf32> to vector<16x8xbf16>
    %cst_96 = arith.constant dense<0.000000e+00> : vector<16x16xf32>
    %269 = tpu.matmul %266, %268, %cst_96 {dimension_numbers = #tpu.dot_dimension_numbers<[1], [1], [0], [0], [0, 0, 1, 0], [], []>} : vector<16x8xbf16>, vector<16x8xbf16>, vector<16x16xf32> -> vector<16x16xf32>
    %cst_97 = arith.constant 0.353553385 : f32
    %270 = vector.broadcast %cst_97 : f32 to vector<16x16xf32>
    %271 = arith.mulf %269, %270 : vector<16x16xf32>
    %cst_98 = arith.constant -1.000000e+30 : f32
    %272 = vector.shape_cast %9 : vector<1x16xi1> to vector<1x16xi1>
    %273 = vector.broadcast %272 : vector<1x16xi1> to vector<16x16xi1>
    %274 = vector.broadcast %cst_98 : f32 to vector<16x16xf32>
    %275 = arith.select %273, %274, %271 : vector<16x16xi1>, vector<16x16xf32>
    %cst_99 = arith.constant dense<0xFF800000> : vector<16xf32>
    %276 = vector.multi_reduction <maximumf>, %275, %cst_99 [1] : vector<16x16xf32> to vector<16xf32>
    %277 = vector.shape_cast %276 : vector<16xf32> to vector<16x1xf32>
    %278 = vector.broadcast %277 : vector<16x1xf32> to vector<16x16xf32>
    %279 = arith.subf %275, %278 : vector<16x16xf32>
    %280 = math.exp %279 : vector<16x16xf32>
    %cst_100 = arith.constant dense<0.000000e+00> : vector<16xf32>
    %281 = vector.multi_reduction <add>, %280, %cst_100 [1] : vector<16x16xf32> to vector<16xf32>
    %282 = vector.shape_cast %281 : vector<16xf32> to vector<16x1xf32>
    %283 = tpu.reciprocal %282 {approx = true} : vector<16x1xf32> -> vector<16x1xf32>
    %284 = vector.broadcast %283 : vector<16x1xf32> to vector<16x16xf32>
    %285 = arith.mulf %280, %284 : vector<16x16xf32>
    %286 = arith.truncf %285 : vector<16x16xf32> to vector<16x16xbf16>
    %287 = vector.extract_strided_slice %239 {offsets = [0, 8], sizes = [16, 8], strides = [1, 1]} : vector<16x32xf32> to vector<16x8xf32>
    %288 = arith.truncf %287 : vector<16x8xf32> to vector<16x8xbf16>
    %cst_101 = arith.constant dense<0.000000e+00> : vector<16x8xf32>
    %289 = tpu.matmul %286, %288, %cst_101 {dimension_numbers = #tpu.dot_dimension_numbers<[1], [0], [0], [1], [0, 0, 1, 1], [], []>} : vector<16x16xbf16>, vector<16x8xbf16>, vector<16x8xf32> -> vector<16x8xf32>
    %290 = vector.extract_strided_slice %237 {offsets = [0, 16], sizes = [16, 8], strides = [1, 1]} : vector<16x32xf32> to vector<16x8xf32>
    %291 = arith.truncf %290 : vector<16x8xf32> to vector<16x8xbf16>
    %292 = vector.extract_strided_slice %238 {offsets = [0, 16], sizes = [16, 8], strides = [1, 1]} : vector<16x32xf32> to vector<16x8xf32>
    %293 = arith.truncf %292 : vector<16x8xf32> to vector<16x8xbf16>
    %cst_102 = arith.constant dense<0.000000e+00> : vector<16x16xf32>
    %294 = tpu.matmul %291, %293, %cst_102 {dimension_numbers = #tpu.dot_dimension_numbers<[1], [1], [0], [0], [0, 0, 1, 0], [], []>} : vector<16x8xbf16>, vector<16x8xbf16>, vector<16x16xf32> -> vector<16x16xf32>
    %cst_103 = arith.constant 0.353553385 : f32
    %295 = vector.broadcast %cst_103 : f32 to vector<16x16xf32>
    %296 = arith.mulf %294, %295 : vector<16x16xf32>
    %cst_104 = arith.constant -1.000000e+30 : f32
    %297 = vector.shape_cast %9 : vector<1x16xi1> to vector<1x16xi1>
    %298 = vector.broadcast %297 : vector<1x16xi1> to vector<16x16xi1>
    %299 = vector.broadcast %cst_104 : f32 to vector<16x16xf32>
    %300 = arith.select %298, %299, %296 : vector<16x16xi1>, vector<16x16xf32>
    %cst_105 = arith.constant dense<0xFF800000> : vector<16xf32>
    %301 = vector.multi_reduction <maximumf>, %300, %cst_105 [1] : vector<16x16xf32> to vector<16xf32>
    %302 = vector.shape_cast %301 : vector<16xf32> to vector<16x1xf32>
    %303 = vector.broadcast %302 : vector<16x1xf32> to vector<16x16xf32>
    %304 = arith.subf %300, %303 : vector<16x16xf32>
    %305 = math.exp %304 : vector<16x16xf32>
    %cst_106 = arith.constant dense<0.000000e+00> : vector<16xf32>
    %306 = vector.multi_reduction <add>, %305, %cst_106 [1] : vector<16x16xf32> to vector<16xf32>
    %307 = vector.shape_cast %306 : vector<16xf32> to vector<16x1xf32>
    %308 = tpu.reciprocal %307 {approx = true} : vector<16x1xf32> -> vector<16x1xf32>
    %309 = vector.broadcast %308 : vector<16x1xf32> to vector<16x16xf32>
    %310 = arith.mulf %305, %309 : vector<16x16xf32>
    %311 = arith.truncf %310 : vector<16x16xf32> to vector<16x16xbf16>
    %312 = vector.extract_strided_slice %239 {offsets = [0, 16], sizes = [16, 8], strides = [1, 1]} : vector<16x32xf32> to vector<16x8xf32>
    %313 = arith.truncf %312 : vector<16x8xf32> to vector<16x8xbf16>
    %cst_107 = arith.constant dense<0.000000e+00> : vector<16x8xf32>
    %314 = tpu.matmul %311, %313, %cst_107 {dimension_numbers = #tpu.dot_dimension_numbers<[1], [0], [0], [1], [0, 0, 1, 1], [], []>} : vector<16x16xbf16>, vector<16x8xbf16>, vector<16x8xf32> -> vector<16x8xf32>
    %315 = vector.extract_strided_slice %237 {offsets = [0, 24], sizes = [16, 8], strides = [1, 1]} : vector<16x32xf32> to vector<16x8xf32>
    %316 = arith.truncf %315 : vector<16x8xf32> to vector<16x8xbf16>
    %317 = vector.extract_strided_slice %238 {offsets = [0, 24], sizes = [16, 8], strides = [1, 1]} : vector<16x32xf32> to vector<16x8xf32>
    %318 = arith.truncf %317 : vector<16x8xf32> to vector<16x8xbf16>
    %cst_108 = arith.constant dense<0.000000e+00> : vector<16x16xf32>
    %319 = tpu.matmul %316, %318, %cst_108 {dimension_numbers = #tpu.dot_dimension_numbers<[1], [1], [0], [0], [0, 0, 1, 0], [], []>} : vector<16x8xbf16>, vector<16x8xbf16>, vector<16x16xf32> -> vector<16x16xf32>
    %cst_109 = arith.constant 0.353553385 : f32
    %320 = vector.broadcast %cst_109 : f32 to vector<16x16xf32>
    %321 = arith.mulf %319, %320 : vector<16x16xf32>
    %cst_110 = arith.constant -1.000000e+30 : f32
    %322 = vector.shape_cast %9 : vector<1x16xi1> to vector<1x16xi1>
    %323 = vector.broadcast %322 : vector<1x16xi1> to vector<16x16xi1>
    %324 = vector.broadcast %cst_110 : f32 to vector<16x16xf32>
    %325 = arith.select %323, %324, %321 : vector<16x16xi1>, vector<16x16xf32>
    %cst_111 = arith.constant dense<0xFF800000> : vector<16xf32>
    %326 = vector.multi_reduction <maximumf>, %325, %cst_111 [1] : vector<16x16xf32> to vector<16xf32>
    %327 = vector.shape_cast %326 : vector<16xf32> to vector<16x1xf32>
    %328 = vector.broadcast %327 : vector<16x1xf32> to vector<16x16xf32>
    %329 = arith.subf %325, %328 : vector<16x16xf32>
    %330 = math.exp %329 : vector<16x16xf32>
    %cst_112 = arith.constant dense<0.000000e+00> : vector<16xf32>
    %331 = vector.multi_reduction <add>, %330, %cst_112 [1] : vector<16x16xf32> to vector<16xf32>
    %332 = vector.shape_cast %331 : vector<16xf32> to vector<16x1xf32>
    %333 = tpu.reciprocal %332 {approx = true} : vector<16x1xf32> -> vector<16x1xf32>
    %334 = vector.broadcast %333 : vector<16x1xf32> to vector<16x16xf32>
    %335 = arith.mulf %330, %334 : vector<16x16xf32>
    %336 = arith.truncf %335 : vector<16x16xf32> to vector<16x16xbf16>
    %337 = vector.extract_strided_slice %239 {offsets = [0, 24], sizes = [16, 8], strides = [1, 1]} : vector<16x32xf32> to vector<16x8xf32>
    %338 = arith.truncf %337 : vector<16x8xf32> to vector<16x8xbf16>
    %cst_113 = arith.constant dense<0.000000e+00> : vector<16x8xf32>
    %339 = tpu.matmul %336, %338, %cst_113 {dimension_numbers = #tpu.dot_dimension_numbers<[1], [0], [0], [1], [0, 0, 1, 1], [], []>} : vector<16x16xbf16>, vector<16x8xbf16>, vector<16x8xf32> -> vector<16x8xf32>
    %340 = tpu.concatenate %264, %289, %314, %339 in 1 : vector<16x8xf32>, vector<16x8xf32>, vector<16x8xf32>, vector<16x8xf32> -> vector<16x32xf32>
    %341 = arith.truncf %340 : vector<16x32xf32> to vector<16x32xbf16>
    %cst_114 = arith.constant dense<0.000000e+00> : vector<16x32xf32>
    %342 = tpu.matmul %341, %230, %cst_114 {dimension_numbers = #tpu.dot_dimension_numbers<[1], [0], [0], [1], [0, 0, 1, 1], [], []>} : vector<16x32xbf16>, vector<32x32xbf16>, vector<16x32xf32> -> vector<16x32xf32>
    %343 = vector.broadcast %232 : vector<1x32xf32> to vector<16x32xf32>
    %344 = arith.addf %342, %343 : vector<16x32xf32>
    %345 = arith.addf %200, %344 : vector<16x32xf32>
    %c0_115 = arith.constant 0 : index
    %c0_116 = arith.constant 0 : index
    %346 = vector.load %arg6[%c0_115, %c0_116] : memref<2x32xf32, #tpu.memory_space<vmem>>, vector<2x32xf32>
    %347 = vector.extract_strided_slice %346 {offsets = [1, 0], sizes = [1, 32], strides = [1, 1]} : vector<2x32xf32> to vector<1x32xf32>
    %c0_117 = arith.constant 0 : index
    %c0_118 = arith.constant 0 : index
    %348 = vector.load %arg7[%c0_117, %c0_118] : memref<2x32xf32, #tpu.memory_space<vmem>>, vector<2x32xf32>
    %349 = vector.extract_strided_slice %348 {offsets = [1, 0], sizes = [1, 32], strides = [1, 1]} : vector<2x32xf32> to vector<1x32xf32>
    %cst_119 = arith.constant dense<0.000000e+00> : vector<16xf32>
    %350 = vector.multi_reduction <add>, %345, %cst_119 [1] : vector<16x32xf32> to vector<16xf32>
    %351 = vector.shape_cast %350 : vector<16xf32> to vector<16x1xf32>
    %cst_120 = arith.constant 3.200000e+01 : f32
    %352 = vector.broadcast %cst_120 : f32 to vector<16x1xf32>
    %353 = arith.divf %351, %352 : vector<16x1xf32>
    %354 = vector.broadcast %353 : vector<16x1xf32> to vector<16x32xf32>
    %355 = arith.subf %345, %354 : vector<16x32xf32>
    %356 = arith.mulf %355, %355 : vector<16x32xf32>
    %cst_121 = arith.constant dense<0.000000e+00> : vector<16xf32>
    %357 = vector.multi_reduction <add>, %356, %cst_121 [1] : vector<16x32xf32> to vector<16xf32>
    %358 = vector.shape_cast %357 : vector<16xf32> to vector<16x1xf32>
    %cst_122 = arith.constant 3.200000e+01 : f32
    %359 = vector.broadcast %cst_122 : f32 to vector<16x1xf32>
    %360 = arith.divf %358, %359 : vector<16x1xf32>
    %cst_123 = arith.constant 9.99999974E-6 : f32
    %361 = vector.broadcast %cst_123 : f32 to vector<16x1xf32>
    %362 = arith.addf %360, %361 : vector<16x1xf32>
    %363 = math.rsqrt %362 : vector<16x1xf32>
    %364 = vector.broadcast %363 : vector<16x1xf32> to vector<16x32xf32>
    %365 = arith.mulf %355, %364 : vector<16x32xf32>
    %366 = vector.broadcast %347 : vector<1x32xf32> to vector<16x32xf32>
    %367 = arith.mulf %365, %366 : vector<16x32xf32>
    %368 = vector.broadcast %349 : vector<1x32xf32> to vector<16x32xf32>
    %369 = arith.addf %367, %368 : vector<16x32xf32>
    %c1_124 = arith.constant 1 : index
    %c0_125 = arith.constant 0 : index
    %c0_126 = arith.constant 0 : index
    %370 = vector.load %arg12[%c1_124, %c0_125, %c0_126] : memref<2x32x128xbf16, #tpu.memory_space<vmem>>, vector<1x32x128xbf16>
    %371 = vector.shape_cast %370 : vector<1x32x128xbf16> to vector<32x128xbf16>
    %c0_127 = arith.constant 0 : index
    %c0_128 = arith.constant 0 : index
    %372 = vector.load %arg13[%c0_127, %c0_128] : memref<2x128xf32, #tpu.memory_space<vmem>>, vector<2x128xf32>
    %373 = vector.extract_strided_slice %372 {offsets = [1, 0], sizes = [1, 128], strides = [1, 1]} : vector<2x128xf32> to vector<1x128xf32>
    %c1_129 = arith.constant 1 : index
    %c0_130 = arith.constant 0 : index
    %c0_131 = arith.constant 0 : index
    %374 = vector.load %arg14[%c1_129, %c0_130, %c0_131] : memref<2x128x32xbf16, #tpu.memory_space<vmem>>, vector<1x128x32xbf16>
    %375 = vector.shape_cast %374 : vector<1x128x32xbf16> to vector<128x32xbf16>
    %c0_132 = arith.constant 0 : index
    %c0_133 = arith.constant 0 : index
    %376 = vector.load %arg15[%c0_132, %c0_133] : memref<2x32xf32, #tpu.memory_space<vmem>>, vector<2x32xf32>
    %377 = vector.extract_strided_slice %376 {offsets = [1, 0], sizes = [1, 32], strides = [1, 1]} : vector<2x32xf32> to vector<1x32xf32>
    %378 = arith.truncf %369 : vector<16x32xf32> to vector<16x32xbf16>
    %cst_134 = arith.constant dense<0.000000e+00> : vector<16x128xf32>
    %379 = tpu.matmul %378, %371, %cst_134 {dimension_numbers = #tpu.dot_dimension_numbers<[1], [0], [0], [1], [0, 0, 1, 1], [], []>} : vector<16x32xbf16>, vector<32x128xbf16>, vector<16x128xf32> -> vector<16x128xf32>
    %380 = vector.broadcast %373 : vector<1x128xf32> to vector<16x128xf32>
    %381 = arith.addf %379, %380 : vector<16x128xf32>
    %cst_135 = arith.constant 0.000000e+00 : f32
    %382 = vector.broadcast %cst_135 : f32 to vector<16x128xf32>
    %383 = arith.maximumf %381, %382 : vector<16x128xf32>
    %384 = arith.truncf %383 : vector<16x128xf32> to vector<16x128xbf16>
    %cst_136 = arith.constant dense<0.000000e+00> : vector<16x32xf32>
    %385 = tpu.matmul %384, %375, %cst_136 {dimension_numbers = #tpu.dot_dimension_numbers<[1], [0], [0], [1], [0, 0, 1, 1], [], []>} : vector<16x128xbf16>, vector<128x32xbf16>, vector<16x32xf32> -> vector<16x32xf32>
    %386 = vector.broadcast %377 : vector<1x32xf32> to vector<16x32xf32>
    %387 = arith.addf %385, %386 : vector<16x32xf32>
    %388 = arith.addf %345, %387 : vector<16x32xf32>
    %c0_137 = arith.constant 0 : index
    %c0_138 = arith.constant 0 : index
    %389 = vector.load %arg16[%c0_137, %c0_138] : memref<1x32xf32, #tpu.memory_space<vmem>>, vector<1x32xf32>
    %c0_139 = arith.constant 0 : index
    %c0_140 = arith.constant 0 : index
    %390 = vector.load %arg17[%c0_139, %c0_140] : memref<1x32xf32, #tpu.memory_space<vmem>>, vector<1x32xf32>
    %cst_141 = arith.constant dense<0.000000e+00> : vector<16xf32>
    %391 = vector.multi_reduction <add>, %388, %cst_141 [1] : vector<16x32xf32> to vector<16xf32>
    %392 = vector.shape_cast %391 : vector<16xf32> to vector<16x1xf32>
    %cst_142 = arith.constant 3.200000e+01 : f32
    %393 = vector.broadcast %cst_142 : f32 to vector<16x1xf32>
    %394 = arith.divf %392, %393 : vector<16x1xf32>
    %395 = vector.broadcast %394 : vector<16x1xf32> to vector<16x32xf32>
    %396 = arith.subf %388, %395 : vector<16x32xf32>
    %397 = arith.mulf %396, %396 : vector<16x32xf32>
    %cst_143 = arith.constant dense<0.000000e+00> : vector<16xf32>
    %398 = vector.multi_reduction <add>, %397, %cst_143 [1] : vector<16x32xf32> to vector<16xf32>
    %399 = vector.shape_cast %398 : vector<16xf32> to vector<16x1xf32>
    %cst_144 = arith.constant 3.200000e+01 : f32
    %400 = vector.broadcast %cst_144 : f32 to vector<16x1xf32>
    %401 = arith.divf %399, %400 : vector<16x1xf32>
    %cst_145 = arith.constant 9.99999997E-7 : f32
    %402 = vector.broadcast %cst_145 : f32 to vector<16x1xf32>
    %403 = arith.addf %401, %402 : vector<16x1xf32>
    %404 = math.rsqrt %403 : vector<16x1xf32>
    %405 = vector.broadcast %404 : vector<16x1xf32> to vector<16x32xf32>
    %406 = arith.mulf %396, %405 : vector<16x32xf32>
    %407 = vector.broadcast %389 : vector<1x32xf32> to vector<16x32xf32>
    %408 = arith.mulf %406, %407 : vector<16x32xf32>
    %409 = vector.broadcast %390 : vector<1x32xf32> to vector<16x32xf32>
    %410 = arith.addf %408, %409 : vector<16x32xf32>
    %c0_146 = arith.constant 0 : index
    %c0_147 = arith.constant 0 : index
    %411 = vector.load %arg18[%c0_146, %c0_147] : memref<2x32xf32, #tpu.memory_space<vmem>>, vector<2x32xf32>
    %412 = vector.extract_strided_slice %411 {offsets = [0, 0], sizes = [1, 32], strides = [1, 1]} : vector<2x32xf32> to vector<1x32xf32>
    %c0_148 = arith.constant 0 : index
    %c0_149 = arith.constant 0 : index
    %413 = vector.load %arg19[%c0_148, %c0_149] : memref<2x32xf32, #tpu.memory_space<vmem>>, vector<2x32xf32>
    %414 = vector.extract_strided_slice %413 {offsets = [0, 0], sizes = [1, 32], strides = [1, 1]} : vector<2x32xf32> to vector<1x32xf32>
    %cst_150 = arith.constant dense<0.000000e+00> : vector<8xf32>
    %415 = vector.multi_reduction <add>, %5, %cst_150 [1] : vector<8x32xf32> to vector<8xf32>
    %416 = vector.shape_cast %415 : vector<8xf32> to vector<8x1xf32>
    %cst_151 = arith.constant 3.200000e+01 : f32
    %417 = vector.broadcast %cst_151 : f32 to vector<8x1xf32>
    %418 = arith.divf %416, %417 : vector<8x1xf32>
    %419 = vector.broadcast %418 : vector<8x1xf32> to vector<8x32xf32>
    %420 = arith.subf %5, %419 : vector<8x32xf32>
    %421 = arith.mulf %420, %420 : vector<8x32xf32>
    %cst_152 = arith.constant dense<0.000000e+00> : vector<8xf32>
    %422 = vector.multi_reduction <add>, %421, %cst_152 [1] : vector<8x32xf32> to vector<8xf32>
    %423 = vector.shape_cast %422 : vector<8xf32> to vector<8x1xf32>
    %cst_153 = arith.constant 3.200000e+01 : f32
    %424 = vector.broadcast %cst_153 : f32 to vector<8x1xf32>
    %425 = arith.divf %423, %424 : vector<8x1xf32>
    %cst_154 = arith.constant 9.99999974E-6 : f32
    %426 = vector.broadcast %cst_154 : f32 to vector<8x1xf32>
    %427 = arith.addf %425, %426 : vector<8x1xf32>
    %428 = math.rsqrt %427 : vector<8x1xf32>
    %429 = vector.broadcast %428 : vector<8x1xf32> to vector<8x32xf32>
    %430 = arith.mulf %420, %429 : vector<8x32xf32>
    %431 = vector.broadcast %412 : vector<1x32xf32> to vector<8x32xf32>
    %432 = arith.mulf %430, %431 : vector<8x32xf32>
    %433 = vector.broadcast %414 : vector<1x32xf32> to vector<8x32xf32>
    %434 = arith.addf %432, %433 : vector<8x32xf32>
    %c0_155 = arith.constant 0 : index
    %c0_156 = arith.constant 0 : index
    %c0_157 = arith.constant 0 : index
    %435 = vector.load %arg24[%c0_155, %c0_156, %c0_157] : memref<2x32x96xbf16, #tpu.memory_space<vmem>>, vector<1x32x96xbf16>
    %436 = vector.shape_cast %435 : vector<1x32x96xbf16> to vector<32x96xbf16>
    %c0_158 = arith.constant 0 : index
    %c0_159 = arith.constant 0 : index
    %437 = vector.load %arg25[%c0_158, %c0_159] : memref<2x96xf32, #tpu.memory_space<vmem>>, vector<2x96xf32>
    %438 = vector.extract_strided_slice %437 {offsets = [0, 0], sizes = [1, 96], strides = [1, 1]} : vector<2x96xf32> to vector<1x96xf32>
    %c0_160 = arith.constant 0 : index
    %c0_161 = arith.constant 0 : index
    %c0_162 = arith.constant 0 : index
    %439 = vector.load %arg26[%c0_160, %c0_161, %c0_162] : memref<2x32x32xbf16, #tpu.memory_space<vmem>>, vector<1x32x32xbf16>
    %440 = vector.shape_cast %439 : vector<1x32x32xbf16> to vector<32x32xbf16>
    %c0_163 = arith.constant 0 : index
    %c0_164 = arith.constant 0 : index
    %441 = vector.load %arg27[%c0_163, %c0_164] : memref<2x32xf32, #tpu.memory_space<vmem>>, vector<2x32xf32>
    %442 = vector.extract_strided_slice %441 {offsets = [0, 0], sizes = [1, 32], strides = [1, 1]} : vector<2x32xf32> to vector<1x32xf32>
    %443 = arith.truncf %434 : vector<8x32xf32> to vector<8x32xbf16>
    %cst_165 = arith.constant dense<0.000000e+00> : vector<8x96xf32>
    %444 = tpu.matmul %443, %436, %cst_165 {dimension_numbers = #tpu.dot_dimension_numbers<[1], [0], [0], [1], [0, 0, 1, 1], [], []>} : vector<8x32xbf16>, vector<32x96xbf16>, vector<8x96xf32> -> vector<8x96xf32>
    %445 = vector.broadcast %438 : vector<1x96xf32> to vector<8x96xf32>
    %446 = arith.addf %444, %445 : vector<8x96xf32>
    %447 = vector.extract_strided_slice %446 {offsets = [0, 0], sizes = [8, 32], strides = [1, 1]} : vector<8x96xf32> to vector<8x32xf32>
    %448 = vector.extract_strided_slice %446 {offsets = [0, 32], sizes = [8, 32], strides = [1, 1]} : vector<8x96xf32> to vector<8x32xf32>
    %449 = vector.extract_strided_slice %446 {offsets = [0, 64], sizes = [8, 32], strides = [1, 1]} : vector<8x96xf32> to vector<8x32xf32>
    %450 = vector.extract_strided_slice %447 {offsets = [0, 0], sizes = [8, 8], strides = [1, 1]} : vector<8x32xf32> to vector<8x8xf32>
    %451 = arith.truncf %450 : vector<8x8xf32> to vector<8x8xbf16>
    %452 = vector.extract_strided_slice %448 {offsets = [0, 0], sizes = [8, 8], strides = [1, 1]} : vector<8x32xf32> to vector<8x8xf32>
    %453 = arith.truncf %452 : vector<8x8xf32> to vector<8x8xbf16>
    %cst_166 = arith.constant dense<0.000000e+00> : vector<8x8xf32>
    %454 = tpu.matmul %451, %453, %cst_166 {dimension_numbers = #tpu.dot_dimension_numbers<[1], [1], [0], [0], [0, 0, 1, 0], [], []>} : vector<8x8xbf16>, vector<8x8xbf16>, vector<8x8xf32> -> vector<8x8xf32>
    %cst_167 = arith.constant 0.353553385 : f32
    %455 = vector.broadcast %cst_167 : f32 to vector<8x8xf32>
    %456 = arith.mulf %454, %455 : vector<8x8xf32>
    %cst_168 = arith.constant -1.000000e+30 : f32
    %457 = vector.broadcast %cst_168 : f32 to vector<8x8xf32>
    %458 = arith.select %12, %457, %456 : vector<8x8xi1>, vector<8x8xf32>
    %cst_169 = arith.constant dense<0xFF800000> : vector<8xf32>
    %459 = vector.multi_reduction <maximumf>, %458, %cst_169 [1] : vector<8x8xf32> to vector<8xf32>
    %460 = vector.shape_cast %459 : vector<8xf32> to vector<8x1xf32>
    %461 = vector.broadcast %460 : vector<8x1xf32> to vector<8x8xf32>
    %462 = arith.subf %458, %461 : vector<8x8xf32>
    %463 = math.exp %462 : vector<8x8xf32>
    %cst_170 = arith.constant dense<0.000000e+00> : vector<8xf32>
    %464 = vector.multi_reduction <add>, %463, %cst_170 [1] : vector<8x8xf32> to vector<8xf32>
    %465 = vector.shape_cast %464 : vector<8xf32> to vector<8x1xf32>
    %466 = tpu.reciprocal %465 {approx = true} : vector<8x1xf32> -> vector<8x1xf32>
    %467 = vector.broadcast %466 : vector<8x1xf32> to vector<8x8xf32>
    %468 = arith.mulf %463, %467 : vector<8x8xf32>
    %469 = arith.truncf %468 : vector<8x8xf32> to vector<8x8xbf16>
    %470 = vector.extract_strided_slice %449 {offsets = [0, 0], sizes = [8, 8], strides = [1, 1]} : vector<8x32xf32> to vector<8x8xf32>
    %471 = arith.truncf %470 : vector<8x8xf32> to vector<8x8xbf16>
    %cst_171 = arith.constant dense<0.000000e+00> : vector<8x8xf32>
    %472 = tpu.matmul %469, %471, %cst_171 {dimension_numbers = #tpu.dot_dimension_numbers<[1], [0], [0], [1], [0, 0, 1, 1], [], []>} : vector<8x8xbf16>, vector<8x8xbf16>, vector<8x8xf32> -> vector<8x8xf32>
    %473 = vector.extract_strided_slice %447 {offsets = [0, 8], sizes = [8, 8], strides = [1, 1]} : vector<8x32xf32> to vector<8x8xf32>
    %474 = arith.truncf %473 : vector<8x8xf32> to vector<8x8xbf16>
    %475 = vector.extract_strided_slice %448 {offsets = [0, 8], sizes = [8, 8], strides = [1, 1]} : vector<8x32xf32> to vector<8x8xf32>
    %476 = arith.truncf %475 : vector<8x8xf32> to vector<8x8xbf16>
    %cst_172 = arith.constant dense<0.000000e+00> : vector<8x8xf32>
    %477 = tpu.matmul %474, %476, %cst_172 {dimension_numbers = #tpu.dot_dimension_numbers<[1], [1], [0], [0], [0, 0, 1, 0], [], []>} : vector<8x8xbf16>, vector<8x8xbf16>, vector<8x8xf32> -> vector<8x8xf32>
    %cst_173 = arith.constant 0.353553385 : f32
    %478 = vector.broadcast %cst_173 : f32 to vector<8x8xf32>
    %479 = arith.mulf %477, %478 : vector<8x8xf32>
    %cst_174 = arith.constant -1.000000e+30 : f32
    %480 = vector.broadcast %cst_174 : f32 to vector<8x8xf32>
    %481 = arith.select %12, %480, %479 : vector<8x8xi1>, vector<8x8xf32>
    %cst_175 = arith.constant dense<0xFF800000> : vector<8xf32>
    %482 = vector.multi_reduction <maximumf>, %481, %cst_175 [1] : vector<8x8xf32> to vector<8xf32>
    %483 = vector.shape_cast %482 : vector<8xf32> to vector<8x1xf32>
    %484 = vector.broadcast %483 : vector<8x1xf32> to vector<8x8xf32>
    %485 = arith.subf %481, %484 : vector<8x8xf32>
    %486 = math.exp %485 : vector<8x8xf32>
    %cst_176 = arith.constant dense<0.000000e+00> : vector<8xf32>
    %487 = vector.multi_reduction <add>, %486, %cst_176 [1] : vector<8x8xf32> to vector<8xf32>
    %488 = vector.shape_cast %487 : vector<8xf32> to vector<8x1xf32>
    %489 = tpu.reciprocal %488 {approx = true} : vector<8x1xf32> -> vector<8x1xf32>
    %490 = vector.broadcast %489 : vector<8x1xf32> to vector<8x8xf32>
    %491 = arith.mulf %486, %490 : vector<8x8xf32>
    %492 = arith.truncf %491 : vector<8x8xf32> to vector<8x8xbf16>
    %493 = vector.extract_strided_slice %449 {offsets = [0, 8], sizes = [8, 8], strides = [1, 1]} : vector<8x32xf32> to vector<8x8xf32>
    %494 = arith.truncf %493 : vector<8x8xf32> to vector<8x8xbf16>
    %cst_177 = arith.constant dense<0.000000e+00> : vector<8x8xf32>
    %495 = tpu.matmul %492, %494, %cst_177 {dimension_numbers = #tpu.dot_dimension_numbers<[1], [0], [0], [1], [0, 0, 1, 1], [], []>} : vector<8x8xbf16>, vector<8x8xbf16>, vector<8x8xf32> -> vector<8x8xf32>
    %496 = vector.extract_strided_slice %447 {offsets = [0, 16], sizes = [8, 8], strides = [1, 1]} : vector<8x32xf32> to vector<8x8xf32>
    %497 = arith.truncf %496 : vector<8x8xf32> to vector<8x8xbf16>
    %498 = vector.extract_strided_slice %448 {offsets = [0, 16], sizes = [8, 8], strides = [1, 1]} : vector<8x32xf32> to vector<8x8xf32>
    %499 = arith.truncf %498 : vector<8x8xf32> to vector<8x8xbf16>
    %cst_178 = arith.constant dense<0.000000e+00> : vector<8x8xf32>
    %500 = tpu.matmul %497, %499, %cst_178 {dimension_numbers = #tpu.dot_dimension_numbers<[1], [1], [0], [0], [0, 0, 1, 0], [], []>} : vector<8x8xbf16>, vector<8x8xbf16>, vector<8x8xf32> -> vector<8x8xf32>
    %cst_179 = arith.constant 0.353553385 : f32
    %501 = vector.broadcast %cst_179 : f32 to vector<8x8xf32>
    %502 = arith.mulf %500, %501 : vector<8x8xf32>
    %cst_180 = arith.constant -1.000000e+30 : f32
    %503 = vector.broadcast %cst_180 : f32 to vector<8x8xf32>
    %504 = arith.select %12, %503, %502 : vector<8x8xi1>, vector<8x8xf32>
    %cst_181 = arith.constant dense<0xFF800000> : vector<8xf32>
    %505 = vector.multi_reduction <maximumf>, %504, %cst_181 [1] : vector<8x8xf32> to vector<8xf32>
    %506 = vector.shape_cast %505 : vector<8xf32> to vector<8x1xf32>
    %507 = vector.broadcast %506 : vector<8x1xf32> to vector<8x8xf32>
    %508 = arith.subf %504, %507 : vector<8x8xf32>
    %509 = math.exp %508 : vector<8x8xf32>
    %cst_182 = arith.constant dense<0.000000e+00> : vector<8xf32>
    %510 = vector.multi_reduction <add>, %509, %cst_182 [1] : vector<8x8xf32> to vector<8xf32>
    %511 = vector.shape_cast %510 : vector<8xf32> to vector<8x1xf32>
    %512 = tpu.reciprocal %511 {approx = true} : vector<8x1xf32> -> vector<8x1xf32>
    %513 = vector.broadcast %512 : vector<8x1xf32> to vector<8x8xf32>
    %514 = arith.mulf %509, %513 : vector<8x8xf32>
    %515 = arith.truncf %514 : vector<8x8xf32> to vector<8x8xbf16>
    %516 = vector.extract_strided_slice %449 {offsets = [0, 16], sizes = [8, 8], strides = [1, 1]} : vector<8x32xf32> to vector<8x8xf32>
    %517 = arith.truncf %516 : vector<8x8xf32> to vector<8x8xbf16>
    %cst_183 = arith.constant dense<0.000000e+00> : vector<8x8xf32>
    %518 = tpu.matmul %515, %517, %cst_183 {dimension_numbers = #tpu.dot_dimension_numbers<[1], [0], [0], [1], [0, 0, 1, 1], [], []>} : vector<8x8xbf16>, vector<8x8xbf16>, vector<8x8xf32> -> vector<8x8xf32>
    %519 = vector.extract_strided_slice %447 {offsets = [0, 24], sizes = [8, 8], strides = [1, 1]} : vector<8x32xf32> to vector<8x8xf32>
    %520 = arith.truncf %519 : vector<8x8xf32> to vector<8x8xbf16>
    %521 = vector.extract_strided_slice %448 {offsets = [0, 24], sizes = [8, 8], strides = [1, 1]} : vector<8x32xf32> to vector<8x8xf32>
    %522 = arith.truncf %521 : vector<8x8xf32> to vector<8x8xbf16>
    %cst_184 = arith.constant dense<0.000000e+00> : vector<8x8xf32>
    %523 = tpu.matmul %520, %522, %cst_184 {dimension_numbers = #tpu.dot_dimension_numbers<[1], [1], [0], [0], [0, 0, 1, 0], [], []>} : vector<8x8xbf16>, vector<8x8xbf16>, vector<8x8xf32> -> vector<8x8xf32>
    %cst_185 = arith.constant 0.353553385 : f32
    %524 = vector.broadcast %cst_185 : f32 to vector<8x8xf32>
    %525 = arith.mulf %523, %524 : vector<8x8xf32>
    %cst_186 = arith.constant -1.000000e+30 : f32
    %526 = vector.broadcast %cst_186 : f32 to vector<8x8xf32>
    %527 = arith.select %12, %526, %525 : vector<8x8xi1>, vector<8x8xf32>
    %cst_187 = arith.constant dense<0xFF800000> : vector<8xf32>
    %528 = vector.multi_reduction <maximumf>, %527, %cst_187 [1] : vector<8x8xf32> to vector<8xf32>
    %529 = vector.shape_cast %528 : vector<8xf32> to vector<8x1xf32>
    %530 = vector.broadcast %529 : vector<8x1xf32> to vector<8x8xf32>
    %531 = arith.subf %527, %530 : vector<8x8xf32>
    %532 = math.exp %531 : vector<8x8xf32>
    %cst_188 = arith.constant dense<0.000000e+00> : vector<8xf32>
    %533 = vector.multi_reduction <add>, %532, %cst_188 [1] : vector<8x8xf32> to vector<8xf32>
    %534 = vector.shape_cast %533 : vector<8xf32> to vector<8x1xf32>
    %535 = tpu.reciprocal %534 {approx = true} : vector<8x1xf32> -> vector<8x1xf32>
    %536 = vector.broadcast %535 : vector<8x1xf32> to vector<8x8xf32>
    %537 = arith.mulf %532, %536 : vector<8x8xf32>
    %538 = arith.truncf %537 : vector<8x8xf32> to vector<8x8xbf16>
    %539 = vector.extract_strided_slice %449 {offsets = [0, 24], sizes = [8, 8], strides = [1, 1]} : vector<8x32xf32> to vector<8x8xf32>
    %540 = arith.truncf %539 : vector<8x8xf32> to vector<8x8xbf16>
    %cst_189 = arith.constant dense<0.000000e+00> : vector<8x8xf32>
    %541 = tpu.matmul %538, %540, %cst_189 {dimension_numbers = #tpu.dot_dimension_numbers<[1], [0], [0], [1], [0, 0, 1, 1], [], []>} : vector<8x8xbf16>, vector<8x8xbf16>, vector<8x8xf32> -> vector<8x8xf32>
    %542 = tpu.concatenate %472, %495, %518, %541 in 1 : vector<8x8xf32>, vector<8x8xf32>, vector<8x8xf32>, vector<8x8xf32> -> vector<8x32xf32>
    %543 = arith.truncf %542 : vector<8x32xf32> to vector<8x32xbf16>
    %cst_190 = arith.constant dense<0.000000e+00> : vector<8x32xf32>
    %544 = tpu.matmul %543, %440, %cst_190 {dimension_numbers = #tpu.dot_dimension_numbers<[1], [0], [0], [1], [0, 0, 1, 1], [], []>} : vector<8x32xbf16>, vector<32x32xbf16>, vector<8x32xf32> -> vector<8x32xf32>
    %545 = vector.broadcast %442 : vector<1x32xf32> to vector<8x32xf32>
    %546 = arith.addf %544, %545 : vector<8x32xf32>
    %547 = arith.addf %5, %546 : vector<8x32xf32>
    %c0_191 = arith.constant 0 : index
    %c0_192 = arith.constant 0 : index
    %548 = vector.load %arg20[%c0_191, %c0_192] : memref<2x32xf32, #tpu.memory_space<vmem>>, vector<2x32xf32>
    %549 = vector.extract_strided_slice %548 {offsets = [0, 0], sizes = [1, 32], strides = [1, 1]} : vector<2x32xf32> to vector<1x32xf32>
    %c0_193 = arith.constant 0 : index
    %c0_194 = arith.constant 0 : index
    %550 = vector.load %arg21[%c0_193, %c0_194] : memref<2x32xf32, #tpu.memory_space<vmem>>, vector<2x32xf32>
    %551 = vector.extract_strided_slice %550 {offsets = [0, 0], sizes = [1, 32], strides = [1, 1]} : vector<2x32xf32> to vector<1x32xf32>
    %cst_195 = arith.constant dense<0.000000e+00> : vector<8xf32>
    %552 = vector.multi_reduction <add>, %547, %cst_195 [1] : vector<8x32xf32> to vector<8xf32>
    %553 = vector.shape_cast %552 : vector<8xf32> to vector<8x1xf32>
    %cst_196 = arith.constant 3.200000e+01 : f32
    %554 = vector.broadcast %cst_196 : f32 to vector<8x1xf32>
    %555 = arith.divf %553, %554 : vector<8x1xf32>
    %556 = vector.broadcast %555 : vector<8x1xf32> to vector<8x32xf32>
    %557 = arith.subf %547, %556 : vector<8x32xf32>
    %558 = arith.mulf %557, %557 : vector<8x32xf32>
    %cst_197 = arith.constant dense<0.000000e+00> : vector<8xf32>
    %559 = vector.multi_reduction <add>, %558, %cst_197 [1] : vector<8x32xf32> to vector<8xf32>
    %560 = vector.shape_cast %559 : vector<8xf32> to vector<8x1xf32>
    %cst_198 = arith.constant 3.200000e+01 : f32
    %561 = vector.broadcast %cst_198 : f32 to vector<8x1xf32>
    %562 = arith.divf %560, %561 : vector<8x1xf32>
    %cst_199 = arith.constant 9.99999974E-6 : f32
    %563 = vector.broadcast %cst_199 : f32 to vector<8x1xf32>
    %564 = arith.addf %562, %563 : vector<8x1xf32>
    %565 = math.rsqrt %564 : vector<8x1xf32>
    %566 = vector.broadcast %565 : vector<8x1xf32> to vector<8x32xf32>
    %567 = arith.mulf %557, %566 : vector<8x32xf32>
    %568 = vector.broadcast %549 : vector<1x32xf32> to vector<8x32xf32>
    %569 = arith.mulf %567, %568 : vector<8x32xf32>
    %570 = vector.broadcast %551 : vector<1x32xf32> to vector<8x32xf32>
    %571 = arith.addf %569, %570 : vector<8x32xf32>
    %c0_200 = arith.constant 0 : index
    %c0_201 = arith.constant 0 : index
    %c0_202 = arith.constant 0 : index
    %572 = vector.load %arg28[%c0_200, %c0_201, %c0_202] : memref<2x32x96xbf16, #tpu.memory_space<vmem>>, vector<1x32x96xbf16>
    %573 = vector.shape_cast %572 : vector<1x32x96xbf16> to vector<32x96xbf16>
    %c0_203 = arith.constant 0 : index
    %c0_204 = arith.constant 0 : index
    %574 = vector.load %arg29[%c0_203, %c0_204] : memref<2x96xf32, #tpu.memory_space<vmem>>, vector<2x96xf32>
    %575 = vector.extract_strided_slice %574 {offsets = [0, 0], sizes = [1, 96], strides = [1, 1]} : vector<2x96xf32> to vector<1x96xf32>
    %c0_205 = arith.constant 0 : index
    %c0_206 = arith.constant 0 : index
    %c0_207 = arith.constant 0 : index
    %576 = vector.load %arg30[%c0_205, %c0_206, %c0_207] : memref<2x32x32xbf16, #tpu.memory_space<vmem>>, vector<1x32x32xbf16>
    %577 = vector.shape_cast %576 : vector<1x32x32xbf16> to vector<32x32xbf16>
    %c0_208 = arith.constant 0 : index
    %c0_209 = arith.constant 0 : index
    %578 = vector.load %arg31[%c0_208, %c0_209] : memref<2x32xf32, #tpu.memory_space<vmem>>, vector<2x32xf32>
    %579 = vector.extract_strided_slice %578 {offsets = [0, 0], sizes = [1, 32], strides = [1, 1]} : vector<2x32xf32> to vector<1x32xf32>
    %580 = vector.extract_strided_slice %573 {offsets = [0, 0], sizes = [32, 32], strides = [1, 1]} : vector<32x96xbf16> to vector<32x32xbf16>
    %581 = vector.extract_strided_slice %575 {offsets = [0, 0], sizes = [1, 32], strides = [1, 1]} : vector<1x96xf32> to vector<1x32xf32>
    %582 = arith.truncf %571 : vector<8x32xf32> to vector<8x32xbf16>
    %cst_210 = arith.constant dense<0.000000e+00> : vector<8x32xf32>
    %583 = tpu.matmul %582, %580, %cst_210 {dimension_numbers = #tpu.dot_dimension_numbers<[1], [0], [0], [1], [0, 0, 1, 1], [], []>} : vector<8x32xbf16>, vector<32x32xbf16>, vector<8x32xf32> -> vector<8x32xf32>
    %584 = vector.broadcast %581 : vector<1x32xf32> to vector<8x32xf32>
    %585 = arith.addf %583, %584 : vector<8x32xf32>
    %586 = vector.extract_strided_slice %573 {offsets = [0, 32], sizes = [32, 64], strides = [1, 1]} : vector<32x96xbf16> to vector<32x64xbf16>
    %587 = vector.extract_strided_slice %575 {offsets = [0, 32], sizes = [1, 64], strides = [1, 1]} : vector<1x96xf32> to vector<1x64xf32>
    %588 = arith.truncf %410 : vector<16x32xf32> to vector<16x32xbf16>
    %cst_211 = arith.constant dense<0.000000e+00> : vector<16x64xf32>
    %589 = tpu.matmul %588, %586, %cst_211 {dimension_numbers = #tpu.dot_dimension_numbers<[1], [0], [0], [1], [0, 0, 1, 1], [], []>} : vector<16x32xbf16>, vector<32x64xbf16>, vector<16x64xf32> -> vector<16x64xf32>
    %590 = vector.broadcast %587 : vector<1x64xf32> to vector<16x64xf32>
    %591 = arith.addf %589, %590 : vector<16x64xf32>
    %592 = vector.extract_strided_slice %591 {offsets = [0, 0], sizes = [16, 32], strides = [1, 1]} : vector<16x64xf32> to vector<16x32xf32>
    %593 = vector.extract_strided_slice %591 {offsets = [0, 32], sizes = [16, 32], strides = [1, 1]} : vector<16x64xf32> to vector<16x32xf32>
    %594 = vector.extract_strided_slice %585 {offsets = [0, 0], sizes = [8, 8], strides = [1, 1]} : vector<8x32xf32> to vector<8x8xf32>
    %595 = arith.truncf %594 : vector<8x8xf32> to vector<8x8xbf16>
    %596 = vector.extract_strided_slice %592 {offsets = [0, 0], sizes = [16, 8], strides = [1, 1]} : vector<16x32xf32> to vector<16x8xf32>
    %597 = arith.truncf %596 : vector<16x8xf32> to vector<16x8xbf16>
    %cst_212 = arith.constant dense<0.000000e+00> : vector<8x16xf32>
    %598 = tpu.matmul %595, %597, %cst_212 {dimension_numbers = #tpu.dot_dimension_numbers<[1], [1], [0], [0], [0, 0, 1, 0], [], []>} : vector<8x8xbf16>, vector<16x8xbf16>, vector<8x16xf32> -> vector<8x16xf32>
    %cst_213 = arith.constant 0.353553385 : f32
    %599 = vector.broadcast %cst_213 : f32 to vector<8x16xf32>
    %600 = arith.mulf %598, %599 : vector<8x16xf32>
    %cst_214 = arith.constant -1.000000e+30 : f32
    %601 = vector.shape_cast %9 : vector<1x16xi1> to vector<1x16xi1>
    %602 = vector.broadcast %601 : vector<1x16xi1> to vector<8x16xi1>
    %603 = vector.broadcast %cst_214 : f32 to vector<8x16xf32>
    %604 = arith.select %602, %603, %600 : vector<8x16xi1>, vector<8x16xf32>
    %cst_215 = arith.constant dense<0xFF800000> : vector<8xf32>
    %605 = vector.multi_reduction <maximumf>, %604, %cst_215 [1] : vector<8x16xf32> to vector<8xf32>
    %606 = vector.shape_cast %605 : vector<8xf32> to vector<8x1xf32>
    %607 = vector.broadcast %606 : vector<8x1xf32> to vector<8x16xf32>
    %608 = arith.subf %604, %607 : vector<8x16xf32>
    %609 = math.exp %608 : vector<8x16xf32>
    %cst_216 = arith.constant dense<0.000000e+00> : vector<8xf32>
    %610 = vector.multi_reduction <add>, %609, %cst_216 [1] : vector<8x16xf32> to vector<8xf32>
    %611 = vector.shape_cast %610 : vector<8xf32> to vector<8x1xf32>
    %612 = tpu.reciprocal %611 {approx = true} : vector<8x1xf32> -> vector<8x1xf32>
    %613 = vector.broadcast %612 : vector<8x1xf32> to vector<8x16xf32>
    %614 = arith.mulf %609, %613 : vector<8x16xf32>
    %615 = arith.truncf %614 : vector<8x16xf32> to vector<8x16xbf16>
    %616 = vector.extract_strided_slice %593 {offsets = [0, 0], sizes = [16, 8], strides = [1, 1]} : vector<16x32xf32> to vector<16x8xf32>
    %617 = arith.truncf %616 : vector<16x8xf32> to vector<16x8xbf16>
    %cst_217 = arith.constant dense<0.000000e+00> : vector<8x8xf32>
    %618 = tpu.matmul %615, %617, %cst_217 {dimension_numbers = #tpu.dot_dimension_numbers<[1], [0], [0], [1], [0, 0, 1, 1], [], []>} : vector<8x16xbf16>, vector<16x8xbf16>, vector<8x8xf32> -> vector<8x8xf32>
    %619 = vector.extract_strided_slice %585 {offsets = [0, 8], sizes = [8, 8], strides = [1, 1]} : vector<8x32xf32> to vector<8x8xf32>
    %620 = arith.truncf %619 : vector<8x8xf32> to vector<8x8xbf16>
    %621 = vector.extract_strided_slice %592 {offsets = [0, 8], sizes = [16, 8], strides = [1, 1]} : vector<16x32xf32> to vector<16x8xf32>
    %622 = arith.truncf %621 : vector<16x8xf32> to vector<16x8xbf16>
    %cst_218 = arith.constant dense<0.000000e+00> : vector<8x16xf32>
    %623 = tpu.matmul %620, %622, %cst_218 {dimension_numbers = #tpu.dot_dimension_numbers<[1], [1], [0], [0], [0, 0, 1, 0], [], []>} : vector<8x8xbf16>, vector<16x8xbf16>, vector<8x16xf32> -> vector<8x16xf32>
    %cst_219 = arith.constant 0.353553385 : f32
    %624 = vector.broadcast %cst_219 : f32 to vector<8x16xf32>
    %625 = arith.mulf %623, %624 : vector<8x16xf32>
    %cst_220 = arith.constant -1.000000e+30 : f32
    %626 = vector.shape_cast %9 : vector<1x16xi1> to vector<1x16xi1>
    %627 = vector.broadcast %626 : vector<1x16xi1> to vector<8x16xi1>
    %628 = vector.broadcast %cst_220 : f32 to vector<8x16xf32>
    %629 = arith.select %627, %628, %625 : vector<8x16xi1>, vector<8x16xf32>
    %cst_221 = arith.constant dense<0xFF800000> : vector<8xf32>
    %630 = vector.multi_reduction <maximumf>, %629, %cst_221 [1] : vector<8x16xf32> to vector<8xf32>
    %631 = vector.shape_cast %630 : vector<8xf32> to vector<8x1xf32>
    %632 = vector.broadcast %631 : vector<8x1xf32> to vector<8x16xf32>
    %633 = arith.subf %629, %632 : vector<8x16xf32>
    %634 = math.exp %633 : vector<8x16xf32>
    %cst_222 = arith.constant dense<0.000000e+00> : vector<8xf32>
    %635 = vector.multi_reduction <add>, %634, %cst_222 [1] : vector<8x16xf32> to vector<8xf32>
    %636 = vector.shape_cast %635 : vector<8xf32> to vector<8x1xf32>
    %637 = tpu.reciprocal %636 {approx = true} : vector<8x1xf32> -> vector<8x1xf32>
    %638 = vector.broadcast %637 : vector<8x1xf32> to vector<8x16xf32>
    %639 = arith.mulf %634, %638 : vector<8x16xf32>
    %640 = arith.truncf %639 : vector<8x16xf32> to vector<8x16xbf16>
    %641 = vector.extract_strided_slice %593 {offsets = [0, 8], sizes = [16, 8], strides = [1, 1]} : vector<16x32xf32> to vector<16x8xf32>
    %642 = arith.truncf %641 : vector<16x8xf32> to vector<16x8xbf16>
    %cst_223 = arith.constant dense<0.000000e+00> : vector<8x8xf32>
    %643 = tpu.matmul %640, %642, %cst_223 {dimension_numbers = #tpu.dot_dimension_numbers<[1], [0], [0], [1], [0, 0, 1, 1], [], []>} : vector<8x16xbf16>, vector<16x8xbf16>, vector<8x8xf32> -> vector<8x8xf32>
    %644 = vector.extract_strided_slice %585 {offsets = [0, 16], sizes = [8, 8], strides = [1, 1]} : vector<8x32xf32> to vector<8x8xf32>
    %645 = arith.truncf %644 : vector<8x8xf32> to vector<8x8xbf16>
    %646 = vector.extract_strided_slice %592 {offsets = [0, 16], sizes = [16, 8], strides = [1, 1]} : vector<16x32xf32> to vector<16x8xf32>
    %647 = arith.truncf %646 : vector<16x8xf32> to vector<16x8xbf16>
    %cst_224 = arith.constant dense<0.000000e+00> : vector<8x16xf32>
    %648 = tpu.matmul %645, %647, %cst_224 {dimension_numbers = #tpu.dot_dimension_numbers<[1], [1], [0], [0], [0, 0, 1, 0], [], []>} : vector<8x8xbf16>, vector<16x8xbf16>, vector<8x16xf32> -> vector<8x16xf32>
    %cst_225 = arith.constant 0.353553385 : f32
    %649 = vector.broadcast %cst_225 : f32 to vector<8x16xf32>
    %650 = arith.mulf %648, %649 : vector<8x16xf32>
    %cst_226 = arith.constant -1.000000e+30 : f32
    %651 = vector.shape_cast %9 : vector<1x16xi1> to vector<1x16xi1>
    %652 = vector.broadcast %651 : vector<1x16xi1> to vector<8x16xi1>
    %653 = vector.broadcast %cst_226 : f32 to vector<8x16xf32>
    %654 = arith.select %652, %653, %650 : vector<8x16xi1>, vector<8x16xf32>
    %cst_227 = arith.constant dense<0xFF800000> : vector<8xf32>
    %655 = vector.multi_reduction <maximumf>, %654, %cst_227 [1] : vector<8x16xf32> to vector<8xf32>
    %656 = vector.shape_cast %655 : vector<8xf32> to vector<8x1xf32>
    %657 = vector.broadcast %656 : vector<8x1xf32> to vector<8x16xf32>
    %658 = arith.subf %654, %657 : vector<8x16xf32>
    %659 = math.exp %658 : vector<8x16xf32>
    %cst_228 = arith.constant dense<0.000000e+00> : vector<8xf32>
    %660 = vector.multi_reduction <add>, %659, %cst_228 [1] : vector<8x16xf32> to vector<8xf32>
    %661 = vector.shape_cast %660 : vector<8xf32> to vector<8x1xf32>
    %662 = tpu.reciprocal %661 {approx = true} : vector<8x1xf32> -> vector<8x1xf32>
    %663 = vector.broadcast %662 : vector<8x1xf32> to vector<8x16xf32>
    %664 = arith.mulf %659, %663 : vector<8x16xf32>
    %665 = arith.truncf %664 : vector<8x16xf32> to vector<8x16xbf16>
    %666 = vector.extract_strided_slice %593 {offsets = [0, 16], sizes = [16, 8], strides = [1, 1]} : vector<16x32xf32> to vector<16x8xf32>
    %667 = arith.truncf %666 : vector<16x8xf32> to vector<16x8xbf16>
    %cst_229 = arith.constant dense<0.000000e+00> : vector<8x8xf32>
    %668 = tpu.matmul %665, %667, %cst_229 {dimension_numbers = #tpu.dot_dimension_numbers<[1], [0], [0], [1], [0, 0, 1, 1], [], []>} : vector<8x16xbf16>, vector<16x8xbf16>, vector<8x8xf32> -> vector<8x8xf32>
    %669 = vector.extract_strided_slice %585 {offsets = [0, 24], sizes = [8, 8], strides = [1, 1]} : vector<8x32xf32> to vector<8x8xf32>
    %670 = arith.truncf %669 : vector<8x8xf32> to vector<8x8xbf16>
    %671 = vector.extract_strided_slice %592 {offsets = [0, 24], sizes = [16, 8], strides = [1, 1]} : vector<16x32xf32> to vector<16x8xf32>
    %672 = arith.truncf %671 : vector<16x8xf32> to vector<16x8xbf16>
    %cst_230 = arith.constant dense<0.000000e+00> : vector<8x16xf32>
    %673 = tpu.matmul %670, %672, %cst_230 {dimension_numbers = #tpu.dot_dimension_numbers<[1], [1], [0], [0], [0, 0, 1, 0], [], []>} : vector<8x8xbf16>, vector<16x8xbf16>, vector<8x16xf32> -> vector<8x16xf32>
    %cst_231 = arith.constant 0.353553385 : f32
    %674 = vector.broadcast %cst_231 : f32 to vector<8x16xf32>
    %675 = arith.mulf %673, %674 : vector<8x16xf32>
    %cst_232 = arith.constant -1.000000e+30 : f32
    %676 = vector.shape_cast %9 : vector<1x16xi1> to vector<1x16xi1>
    %677 = vector.broadcast %676 : vector<1x16xi1> to vector<8x16xi1>
    %678 = vector.broadcast %cst_232 : f32 to vector<8x16xf32>
    %679 = arith.select %677, %678, %675 : vector<8x16xi1>, vector<8x16xf32>
    %cst_233 = arith.constant dense<0xFF800000> : vector<8xf32>
    %680 = vector.multi_reduction <maximumf>, %679, %cst_233 [1] : vector<8x16xf32> to vector<8xf32>
    %681 = vector.shape_cast %680 : vector<8xf32> to vector<8x1xf32>
    %682 = vector.broadcast %681 : vector<8x1xf32> to vector<8x16xf32>
    %683 = arith.subf %679, %682 : vector<8x16xf32>
    %684 = math.exp %683 : vector<8x16xf32>
    %cst_234 = arith.constant dense<0.000000e+00> : vector<8xf32>
    %685 = vector.multi_reduction <add>, %684, %cst_234 [1] : vector<8x16xf32> to vector<8xf32>
    %686 = vector.shape_cast %685 : vector<8xf32> to vector<8x1xf32>
    %687 = tpu.reciprocal %686 {approx = true} : vector<8x1xf32> -> vector<8x1xf32>
    %688 = vector.broadcast %687 : vector<8x1xf32> to vector<8x16xf32>
    %689 = arith.mulf %684, %688 : vector<8x16xf32>
    %690 = arith.truncf %689 : vector<8x16xf32> to vector<8x16xbf16>
    %691 = vector.extract_strided_slice %593 {offsets = [0, 24], sizes = [16, 8], strides = [1, 1]} : vector<16x32xf32> to vector<16x8xf32>
    %692 = arith.truncf %691 : vector<16x8xf32> to vector<16x8xbf16>
    %cst_235 = arith.constant dense<0.000000e+00> : vector<8x8xf32>
    %693 = tpu.matmul %690, %692, %cst_235 {dimension_numbers = #tpu.dot_dimension_numbers<[1], [0], [0], [1], [0, 0, 1, 1], [], []>} : vector<8x16xbf16>, vector<16x8xbf16>, vector<8x8xf32> -> vector<8x8xf32>
    %694 = tpu.concatenate %618, %643, %668, %693 in 1 : vector<8x8xf32>, vector<8x8xf32>, vector<8x8xf32>, vector<8x8xf32> -> vector<8x32xf32>
    %695 = arith.truncf %694 : vector<8x32xf32> to vector<8x32xbf16>
    %cst_236 = arith.constant dense<0.000000e+00> : vector<8x32xf32>
    %696 = tpu.matmul %695, %577, %cst_236 {dimension_numbers = #tpu.dot_dimension_numbers<[1], [0], [0], [1], [0, 0, 1, 1], [], []>} : vector<8x32xbf16>, vector<32x32xbf16>, vector<8x32xf32> -> vector<8x32xf32>
    %697 = vector.broadcast %579 : vector<1x32xf32> to vector<8x32xf32>
    %698 = arith.addf %696, %697 : vector<8x32xf32>
    %699 = arith.addf %547, %698 : vector<8x32xf32>
    %c0_237 = arith.constant 0 : index
    %c0_238 = arith.constant 0 : index
    %700 = vector.load %arg22[%c0_237, %c0_238] : memref<2x32xf32, #tpu.memory_space<vmem>>, vector<2x32xf32>
    %701 = vector.extract_strided_slice %700 {offsets = [0, 0], sizes = [1, 32], strides = [1, 1]} : vector<2x32xf32> to vector<1x32xf32>
    %c0_239 = arith.constant 0 : index
    %c0_240 = arith.constant 0 : index
    %702 = vector.load %arg23[%c0_239, %c0_240] : memref<2x32xf32, #tpu.memory_space<vmem>>, vector<2x32xf32>
    %703 = vector.extract_strided_slice %702 {offsets = [0, 0], sizes = [1, 32], strides = [1, 1]} : vector<2x32xf32> to vector<1x32xf32>
    %cst_241 = arith.constant dense<0.000000e+00> : vector<8xf32>
    %704 = vector.multi_reduction <add>, %699, %cst_241 [1] : vector<8x32xf32> to vector<8xf32>
    %705 = vector.shape_cast %704 : vector<8xf32> to vector<8x1xf32>
    %cst_242 = arith.constant 3.200000e+01 : f32
    %706 = vector.broadcast %cst_242 : f32 to vector<8x1xf32>
    %707 = arith.divf %705, %706 : vector<8x1xf32>
    %708 = vector.broadcast %707 : vector<8x1xf32> to vector<8x32xf32>
    %709 = arith.subf %699, %708 : vector<8x32xf32>
    %710 = arith.mulf %709, %709 : vector<8x32xf32>
    %cst_243 = arith.constant dense<0.000000e+00> : vector<8xf32>
    %711 = vector.multi_reduction <add>, %710, %cst_243 [1] : vector<8x32xf32> to vector<8xf32>
    %712 = vector.shape_cast %711 : vector<8xf32> to vector<8x1xf32>
    %cst_244 = arith.constant 3.200000e+01 : f32
    %713 = vector.broadcast %cst_244 : f32 to vector<8x1xf32>
    %714 = arith.divf %712, %713 : vector<8x1xf32>
    %cst_245 = arith.constant 9.99999974E-6 : f32
    %715 = vector.broadcast %cst_245 : f32 to vector<8x1xf32>
    %716 = arith.addf %714, %715 : vector<8x1xf32>
    %717 = math.rsqrt %716 : vector<8x1xf32>
    %718 = vector.broadcast %717 : vector<8x1xf32> to vector<8x32xf32>
    %719 = arith.mulf %709, %718 : vector<8x32xf32>
    %720 = vector.broadcast %701 : vector<1x32xf32> to vector<8x32xf32>
    %721 = arith.mulf %719, %720 : vector<8x32xf32>
    %722 = vector.broadcast %703 : vector<1x32xf32> to vector<8x32xf32>
    %723 = arith.addf %721, %722 : vector<8x32xf32>
    %c0_246 = arith.constant 0 : index
    %c0_247 = arith.constant 0 : index
    %c0_248 = arith.constant 0 : index
    %724 = vector.load %arg32[%c0_246, %c0_247, %c0_248] : memref<2x32x128xbf16, #tpu.memory_space<vmem>>, vector<1x32x128xbf16>
    %725 = vector.shape_cast %724 : vector<1x32x128xbf16> to vector<32x128xbf16>
    %c0_249 = arith.constant 0 : index
    %c0_250 = arith.constant 0 : index
    %726 = vector.load %arg33[%c0_249, %c0_250] : memref<2x128xf32, #tpu.memory_space<vmem>>, vector<2x128xf32>
    %727 = vector.extract_strided_slice %726 {offsets = [0, 0], sizes = [1, 128], strides = [1, 1]} : vector<2x128xf32> to vector<1x128xf32>
    %c0_251 = arith.constant 0 : index
    %c0_252 = arith.constant 0 : index
    %c0_253 = arith.constant 0 : index
    %728 = vector.load %arg34[%c0_251, %c0_252, %c0_253] : memref<2x128x32xbf16, #tpu.memory_space<vmem>>, vector<1x128x32xbf16>
    %729 = vector.shape_cast %728 : vector<1x128x32xbf16> to vector<128x32xbf16>
    %c0_254 = arith.constant 0 : index
    %c0_255 = arith.constant 0 : index
    %730 = vector.load %arg35[%c0_254, %c0_255] : memref<2x32xf32, #tpu.memory_space<vmem>>, vector<2x32xf32>
    %731 = vector.extract_strided_slice %730 {offsets = [0, 0], sizes = [1, 32], strides = [1, 1]} : vector<2x32xf32> to vector<1x32xf32>
    %732 = arith.truncf %723 : vector<8x32xf32> to vector<8x32xbf16>
    %cst_256 = arith.constant dense<0.000000e+00> : vector<8x128xf32>
    %733 = tpu.matmul %732, %725, %cst_256 {dimension_numbers = #tpu.dot_dimension_numbers<[1], [0], [0], [1], [0, 0, 1, 1], [], []>} : vector<8x32xbf16>, vector<32x128xbf16>, vector<8x128xf32> -> vector<8x128xf32>
    %734 = vector.broadcast %727 : vector<1x128xf32> to vector<8x128xf32>
    %735 = arith.addf %733, %734 : vector<8x128xf32>
    %cst_257 = arith.constant 0.000000e+00 : f32
    %736 = vector.broadcast %cst_257 : f32 to vector<8x128xf32>
    %737 = arith.maximumf %735, %736 : vector<8x128xf32>
    %738 = arith.truncf %737 : vector<8x128xf32> to vector<8x128xbf16>
    %cst_258 = arith.constant dense<0.000000e+00> : vector<8x32xf32>
    %739 = tpu.matmul %738, %729, %cst_258 {dimension_numbers = #tpu.dot_dimension_numbers<[1], [0], [0], [1], [0, 0, 1, 1], [], []>} : vector<8x128xbf16>, vector<128x32xbf16>, vector<8x32xf32> -> vector<8x32xf32>
    %740 = vector.broadcast %731 : vector<1x32xf32> to vector<8x32xf32>
    %741 = arith.addf %739, %740 : vector<8x32xf32>
    %742 = arith.addf %699, %741 : vector<8x32xf32>
    %c0_259 = arith.constant 0 : index
    %c0_260 = arith.constant 0 : index
    %743 = vector.load %arg18[%c0_259, %c0_260] : memref<2x32xf32, #tpu.memory_space<vmem>>, vector<2x32xf32>
    %744 = vector.extract_strided_slice %743 {offsets = [1, 0], sizes = [1, 32], strides = [1, 1]} : vector<2x32xf32> to vector<1x32xf32>
    %c0_261 = arith.constant 0 : index
    %c0_262 = arith.constant 0 : index
    %745 = vector.load %arg19[%c0_261, %c0_262] : memref<2x32xf32, #tpu.memory_space<vmem>>, vector<2x32xf32>
    %746 = vector.extract_strided_slice %745 {offsets = [1, 0], sizes = [1, 32], strides = [1, 1]} : vector<2x32xf32> to vector<1x32xf32>
    %cst_263 = arith.constant dense<0.000000e+00> : vector<8xf32>
    %747 = vector.multi_reduction <add>, %742, %cst_263 [1] : vector<8x32xf32> to vector<8xf32>
    %748 = vector.shape_cast %747 : vector<8xf32> to vector<8x1xf32>
    %cst_264 = arith.constant 3.200000e+01 : f32
    %749 = vector.broadcast %cst_264 : f32 to vector<8x1xf32>
    %750 = arith.divf %748, %749 : vector<8x1xf32>
    %751 = vector.broadcast %750 : vector<8x1xf32> to vector<8x32xf32>
    %752 = arith.subf %742, %751 : vector<8x32xf32>
    %753 = arith.mulf %752, %752 : vector<8x32xf32>
    %cst_265 = arith.constant dense<0.000000e+00> : vector<8xf32>
    %754 = vector.multi_reduction <add>, %753, %cst_265 [1] : vector<8x32xf32> to vector<8xf32>
    %755 = vector.shape_cast %754 : vector<8xf32> to vector<8x1xf32>
    %cst_266 = arith.constant 3.200000e+01 : f32
    %756 = vector.broadcast %cst_266 : f32 to vector<8x1xf32>
    %757 = arith.divf %755, %756 : vector<8x1xf32>
    %cst_267 = arith.constant 9.99999974E-6 : f32
    %758 = vector.broadcast %cst_267 : f32 to vector<8x1xf32>
    %759 = arith.addf %757, %758 : vector<8x1xf32>
    %760 = math.rsqrt %759 : vector<8x1xf32>
    %761 = vector.broadcast %760 : vector<8x1xf32> to vector<8x32xf32>
    %762 = arith.mulf %752, %761 : vector<8x32xf32>
    %763 = vector.broadcast %744 : vector<1x32xf32> to vector<8x32xf32>
    %764 = arith.mulf %762, %763 : vector<8x32xf32>
    %765 = vector.broadcast %746 : vector<1x32xf32> to vector<8x32xf32>
    %766 = arith.addf %764, %765 : vector<8x32xf32>
    %c1_268 = arith.constant 1 : index
    %c0_269 = arith.constant 0 : index
    %c0_270 = arith.constant 0 : index
    %767 = vector.load %arg24[%c1_268, %c0_269, %c0_270] : memref<2x32x96xbf16, #tpu.memory_space<vmem>>, vector<1x32x96xbf16>
    %768 = vector.shape_cast %767 : vector<1x32x96xbf16> to vector<32x96xbf16>
    %c0_271 = arith.constant 0 : index
    %c0_272 = arith.constant 0 : index
    %769 = vector.load %arg25[%c0_271, %c0_272] : memref<2x96xf32, #tpu.memory_space<vmem>>, vector<2x96xf32>
    %770 = vector.extract_strided_slice %769 {offsets = [1, 0], sizes = [1, 96], strides = [1, 1]} : vector<2x96xf32> to vector<1x96xf32>
    %c1_273 = arith.constant 1 : index
    %c0_274 = arith.constant 0 : index
    %c0_275 = arith.constant 0 : index
    %771 = vector.load %arg26[%c1_273, %c0_274, %c0_275] : memref<2x32x32xbf16, #tpu.memory_space<vmem>>, vector<1x32x32xbf16>
    %772 = vector.shape_cast %771 : vector<1x32x32xbf16> to vector<32x32xbf16>
    %c0_276 = arith.constant 0 : index
    %c0_277 = arith.constant 0 : index
    %773 = vector.load %arg27[%c0_276, %c0_277] : memref<2x32xf32, #tpu.memory_space<vmem>>, vector<2x32xf32>
    %774 = vector.extract_strided_slice %773 {offsets = [1, 0], sizes = [1, 32], strides = [1, 1]} : vector<2x32xf32> to vector<1x32xf32>
    %775 = arith.truncf %766 : vector<8x32xf32> to vector<8x32xbf16>
    %cst_278 = arith.constant dense<0.000000e+00> : vector<8x96xf32>
    %776 = tpu.matmul %775, %768, %cst_278 {dimension_numbers = #tpu.dot_dimension_numbers<[1], [0], [0], [1], [0, 0, 1, 1], [], []>} : vector<8x32xbf16>, vector<32x96xbf16>, vector<8x96xf32> -> vector<8x96xf32>
    %777 = vector.broadcast %770 : vector<1x96xf32> to vector<8x96xf32>
    %778 = arith.addf %776, %777 : vector<8x96xf32>
    %779 = vector.extract_strided_slice %778 {offsets = [0, 0], sizes = [8, 32], strides = [1, 1]} : vector<8x96xf32> to vector<8x32xf32>
    %780 = vector.extract_strided_slice %778 {offsets = [0, 32], sizes = [8, 32], strides = [1, 1]} : vector<8x96xf32> to vector<8x32xf32>
    %781 = vector.extract_strided_slice %778 {offsets = [0, 64], sizes = [8, 32], strides = [1, 1]} : vector<8x96xf32> to vector<8x32xf32>
    %782 = vector.extract_strided_slice %779 {offsets = [0, 0], sizes = [8, 8], strides = [1, 1]} : vector<8x32xf32> to vector<8x8xf32>
    %783 = arith.truncf %782 : vector<8x8xf32> to vector<8x8xbf16>
    %784 = vector.extract_strided_slice %780 {offsets = [0, 0], sizes = [8, 8], strides = [1, 1]} : vector<8x32xf32> to vector<8x8xf32>
    %785 = arith.truncf %784 : vector<8x8xf32> to vector<8x8xbf16>
    %cst_279 = arith.constant dense<0.000000e+00> : vector<8x8xf32>
    %786 = tpu.matmul %783, %785, %cst_279 {dimension_numbers = #tpu.dot_dimension_numbers<[1], [1], [0], [0], [0, 0, 1, 0], [], []>} : vector<8x8xbf16>, vector<8x8xbf16>, vector<8x8xf32> -> vector<8x8xf32>
    %cst_280 = arith.constant 0.353553385 : f32
    %787 = vector.broadcast %cst_280 : f32 to vector<8x8xf32>
    %788 = arith.mulf %786, %787 : vector<8x8xf32>
    %cst_281 = arith.constant -1.000000e+30 : f32
    %789 = vector.broadcast %cst_281 : f32 to vector<8x8xf32>
    %790 = arith.select %12, %789, %788 : vector<8x8xi1>, vector<8x8xf32>
    %cst_282 = arith.constant dense<0xFF800000> : vector<8xf32>
    %791 = vector.multi_reduction <maximumf>, %790, %cst_282 [1] : vector<8x8xf32> to vector<8xf32>
    %792 = vector.shape_cast %791 : vector<8xf32> to vector<8x1xf32>
    %793 = vector.broadcast %792 : vector<8x1xf32> to vector<8x8xf32>
    %794 = arith.subf %790, %793 : vector<8x8xf32>
    %795 = math.exp %794 : vector<8x8xf32>
    %cst_283 = arith.constant dense<0.000000e+00> : vector<8xf32>
    %796 = vector.multi_reduction <add>, %795, %cst_283 [1] : vector<8x8xf32> to vector<8xf32>
    %797 = vector.shape_cast %796 : vector<8xf32> to vector<8x1xf32>
    %798 = tpu.reciprocal %797 {approx = true} : vector<8x1xf32> -> vector<8x1xf32>
    %799 = vector.broadcast %798 : vector<8x1xf32> to vector<8x8xf32>
    %800 = arith.mulf %795, %799 : vector<8x8xf32>
    %801 = arith.truncf %800 : vector<8x8xf32> to vector<8x8xbf16>
    %802 = vector.extract_strided_slice %781 {offsets = [0, 0], sizes = [8, 8], strides = [1, 1]} : vector<8x32xf32> to vector<8x8xf32>
    %803 = arith.truncf %802 : vector<8x8xf32> to vector<8x8xbf16>
    %cst_284 = arith.constant dense<0.000000e+00> : vector<8x8xf32>
    %804 = tpu.matmul %801, %803, %cst_284 {dimension_numbers = #tpu.dot_dimension_numbers<[1], [0], [0], [1], [0, 0, 1, 1], [], []>} : vector<8x8xbf16>, vector<8x8xbf16>, vector<8x8xf32> -> vector<8x8xf32>
    %805 = vector.extract_strided_slice %779 {offsets = [0, 8], sizes = [8, 8], strides = [1, 1]} : vector<8x32xf32> to vector<8x8xf32>
    %806 = arith.truncf %805 : vector<8x8xf32> to vector<8x8xbf16>
    %807 = vector.extract_strided_slice %780 {offsets = [0, 8], sizes = [8, 8], strides = [1, 1]} : vector<8x32xf32> to vector<8x8xf32>
    %808 = arith.truncf %807 : vector<8x8xf32> to vector<8x8xbf16>
    %cst_285 = arith.constant dense<0.000000e+00> : vector<8x8xf32>
    %809 = tpu.matmul %806, %808, %cst_285 {dimension_numbers = #tpu.dot_dimension_numbers<[1], [1], [0], [0], [0, 0, 1, 0], [], []>} : vector<8x8xbf16>, vector<8x8xbf16>, vector<8x8xf32> -> vector<8x8xf32>
    %cst_286 = arith.constant 0.353553385 : f32
    %810 = vector.broadcast %cst_286 : f32 to vector<8x8xf32>
    %811 = arith.mulf %809, %810 : vector<8x8xf32>
    %cst_287 = arith.constant -1.000000e+30 : f32
    %812 = vector.broadcast %cst_287 : f32 to vector<8x8xf32>
    %813 = arith.select %12, %812, %811 : vector<8x8xi1>, vector<8x8xf32>
    %cst_288 = arith.constant dense<0xFF800000> : vector<8xf32>
    %814 = vector.multi_reduction <maximumf>, %813, %cst_288 [1] : vector<8x8xf32> to vector<8xf32>
    %815 = vector.shape_cast %814 : vector<8xf32> to vector<8x1xf32>
    %816 = vector.broadcast %815 : vector<8x1xf32> to vector<8x8xf32>
    %817 = arith.subf %813, %816 : vector<8x8xf32>
    %818 = math.exp %817 : vector<8x8xf32>
    %cst_289 = arith.constant dense<0.000000e+00> : vector<8xf32>
    %819 = vector.multi_reduction <add>, %818, %cst_289 [1] : vector<8x8xf32> to vector<8xf32>
    %820 = vector.shape_cast %819 : vector<8xf32> to vector<8x1xf32>
    %821 = tpu.reciprocal %820 {approx = true} : vector<8x1xf32> -> vector<8x1xf32>
    %822 = vector.broadcast %821 : vector<8x1xf32> to vector<8x8xf32>
    %823 = arith.mulf %818, %822 : vector<8x8xf32>
    %824 = arith.truncf %823 : vector<8x8xf32> to vector<8x8xbf16>
    %825 = vector.extract_strided_slice %781 {offsets = [0, 8], sizes = [8, 8], strides = [1, 1]} : vector<8x32xf32> to vector<8x8xf32>
    %826 = arith.truncf %825 : vector<8x8xf32> to vector<8x8xbf16>
    %cst_290 = arith.constant dense<0.000000e+00> : vector<8x8xf32>
    %827 = tpu.matmul %824, %826, %cst_290 {dimension_numbers = #tpu.dot_dimension_numbers<[1], [0], [0], [1], [0, 0, 1, 1], [], []>} : vector<8x8xbf16>, vector<8x8xbf16>, vector<8x8xf32> -> vector<8x8xf32>
    %828 = vector.extract_strided_slice %779 {offsets = [0, 16], sizes = [8, 8], strides = [1, 1]} : vector<8x32xf32> to vector<8x8xf32>
    %829 = arith.truncf %828 : vector<8x8xf32> to vector<8x8xbf16>
    %830 = vector.extract_strided_slice %780 {offsets = [0, 16], sizes = [8, 8], strides = [1, 1]} : vector<8x32xf32> to vector<8x8xf32>
    %831 = arith.truncf %830 : vector<8x8xf32> to vector<8x8xbf16>
    %cst_291 = arith.constant dense<0.000000e+00> : vector<8x8xf32>
    %832 = tpu.matmul %829, %831, %cst_291 {dimension_numbers = #tpu.dot_dimension_numbers<[1], [1], [0], [0], [0, 0, 1, 0], [], []>} : vector<8x8xbf16>, vector<8x8xbf16>, vector<8x8xf32> -> vector<8x8xf32>
    %cst_292 = arith.constant 0.353553385 : f32
    %833 = vector.broadcast %cst_292 : f32 to vector<8x8xf32>
    %834 = arith.mulf %832, %833 : vector<8x8xf32>
    %cst_293 = arith.constant -1.000000e+30 : f32
    %835 = vector.broadcast %cst_293 : f32 to vector<8x8xf32>
    %836 = arith.select %12, %835, %834 : vector<8x8xi1>, vector<8x8xf32>
    %cst_294 = arith.constant dense<0xFF800000> : vector<8xf32>
    %837 = vector.multi_reduction <maximumf>, %836, %cst_294 [1] : vector<8x8xf32> to vector<8xf32>
    %838 = vector.shape_cast %837 : vector<8xf32> to vector<8x1xf32>
    %839 = vector.broadcast %838 : vector<8x1xf32> to vector<8x8xf32>
    %840 = arith.subf %836, %839 : vector<8x8xf32>
    %841 = math.exp %840 : vector<8x8xf32>
    %cst_295 = arith.constant dense<0.000000e+00> : vector<8xf32>
    %842 = vector.multi_reduction <add>, %841, %cst_295 [1] : vector<8x8xf32> to vector<8xf32>
    %843 = vector.shape_cast %842 : vector<8xf32> to vector<8x1xf32>
    %844 = tpu.reciprocal %843 {approx = true} : vector<8x1xf32> -> vector<8x1xf32>
    %845 = vector.broadcast %844 : vector<8x1xf32> to vector<8x8xf32>
    %846 = arith.mulf %841, %845 : vector<8x8xf32>
    %847 = arith.truncf %846 : vector<8x8xf32> to vector<8x8xbf16>
    %848 = vector.extract_strided_slice %781 {offsets = [0, 16], sizes = [8, 8], strides = [1, 1]} : vector<8x32xf32> to vector<8x8xf32>
    %849 = arith.truncf %848 : vector<8x8xf32> to vector<8x8xbf16>
    %cst_296 = arith.constant dense<0.000000e+00> : vector<8x8xf32>
    %850 = tpu.matmul %847, %849, %cst_296 {dimension_numbers = #tpu.dot_dimension_numbers<[1], [0], [0], [1], [0, 0, 1, 1], [], []>} : vector<8x8xbf16>, vector<8x8xbf16>, vector<8x8xf32> -> vector<8x8xf32>
    %851 = vector.extract_strided_slice %779 {offsets = [0, 24], sizes = [8, 8], strides = [1, 1]} : vector<8x32xf32> to vector<8x8xf32>
    %852 = arith.truncf %851 : vector<8x8xf32> to vector<8x8xbf16>
    %853 = vector.extract_strided_slice %780 {offsets = [0, 24], sizes = [8, 8], strides = [1, 1]} : vector<8x32xf32> to vector<8x8xf32>
    %854 = arith.truncf %853 : vector<8x8xf32> to vector<8x8xbf16>
    %cst_297 = arith.constant dense<0.000000e+00> : vector<8x8xf32>
    %855 = tpu.matmul %852, %854, %cst_297 {dimension_numbers = #tpu.dot_dimension_numbers<[1], [1], [0], [0], [0, 0, 1, 0], [], []>} : vector<8x8xbf16>, vector<8x8xbf16>, vector<8x8xf32> -> vector<8x8xf32>
    %cst_298 = arith.constant 0.353553385 : f32
    %856 = vector.broadcast %cst_298 : f32 to vector<8x8xf32>
    %857 = arith.mulf %855, %856 : vector<8x8xf32>
    %cst_299 = arith.constant -1.000000e+30 : f32
    %858 = vector.broadcast %cst_299 : f32 to vector<8x8xf32>
    %859 = arith.select %12, %858, %857 : vector<8x8xi1>, vector<8x8xf32>
    %cst_300 = arith.constant dense<0xFF800000> : vector<8xf32>
    %860 = vector.multi_reduction <maximumf>, %859, %cst_300 [1] : vector<8x8xf32> to vector<8xf32>
    %861 = vector.shape_cast %860 : vector<8xf32> to vector<8x1xf32>
    %862 = vector.broadcast %861 : vector<8x1xf32> to vector<8x8xf32>
    %863 = arith.subf %859, %862 : vector<8x8xf32>
    %864 = math.exp %863 : vector<8x8xf32>
    %cst_301 = arith.constant dense<0.000000e+00> : vector<8xf32>
    %865 = vector.multi_reduction <add>, %864, %cst_301 [1] : vector<8x8xf32> to vector<8xf32>
    %866 = vector.shape_cast %865 : vector<8xf32> to vector<8x1xf32>
    %867 = tpu.reciprocal %866 {approx = true} : vector<8x1xf32> -> vector<8x1xf32>
    %868 = vector.broadcast %867 : vector<8x1xf32> to vector<8x8xf32>
    %869 = arith.mulf %864, %868 : vector<8x8xf32>
    %870 = arith.truncf %869 : vector<8x8xf32> to vector<8x8xbf16>
    %871 = vector.extract_strided_slice %781 {offsets = [0, 24], sizes = [8, 8], strides = [1, 1]} : vector<8x32xf32> to vector<8x8xf32>
    %872 = arith.truncf %871 : vector<8x8xf32> to vector<8x8xbf16>
    %cst_302 = arith.constant dense<0.000000e+00> : vector<8x8xf32>
    %873 = tpu.matmul %870, %872, %cst_302 {dimension_numbers = #tpu.dot_dimension_numbers<[1], [0], [0], [1], [0, 0, 1, 1], [], []>} : vector<8x8xbf16>, vector<8x8xbf16>, vector<8x8xf32> -> vector<8x8xf32>
    %874 = tpu.concatenate %804, %827, %850, %873 in 1 : vector<8x8xf32>, vector<8x8xf32>, vector<8x8xf32>, vector<8x8xf32> -> vector<8x32xf32>
    %875 = arith.truncf %874 : vector<8x32xf32> to vector<8x32xbf16>
    %cst_303 = arith.constant dense<0.000000e+00> : vector<8x32xf32>
    %876 = tpu.matmul %875, %772, %cst_303 {dimension_numbers = #tpu.dot_dimension_numbers<[1], [0], [0], [1], [0, 0, 1, 1], [], []>} : vector<8x32xbf16>, vector<32x32xbf16>, vector<8x32xf32> -> vector<8x32xf32>
    %877 = vector.broadcast %774 : vector<1x32xf32> to vector<8x32xf32>
    %878 = arith.addf %876, %877 : vector<8x32xf32>
    %879 = arith.addf %742, %878 : vector<8x32xf32>
    %c0_304 = arith.constant 0 : index
    %c0_305 = arith.constant 0 : index
    %880 = vector.load %arg20[%c0_304, %c0_305] : memref<2x32xf32, #tpu.memory_space<vmem>>, vector<2x32xf32>
    %881 = vector.extract_strided_slice %880 {offsets = [1, 0], sizes = [1, 32], strides = [1, 1]} : vector<2x32xf32> to vector<1x32xf32>
    %c0_306 = arith.constant 0 : index
    %c0_307 = arith.constant 0 : index
    %882 = vector.load %arg21[%c0_306, %c0_307] : memref<2x32xf32, #tpu.memory_space<vmem>>, vector<2x32xf32>
    %883 = vector.extract_strided_slice %882 {offsets = [1, 0], sizes = [1, 32], strides = [1, 1]} : vector<2x32xf32> to vector<1x32xf32>
    %cst_308 = arith.constant dense<0.000000e+00> : vector<8xf32>
    %884 = vector.multi_reduction <add>, %879, %cst_308 [1] : vector<8x32xf32> to vector<8xf32>
    %885 = vector.shape_cast %884 : vector<8xf32> to vector<8x1xf32>
    %cst_309 = arith.constant 3.200000e+01 : f32
    %886 = vector.broadcast %cst_309 : f32 to vector<8x1xf32>
    %887 = arith.divf %885, %886 : vector<8x1xf32>
    %888 = vector.broadcast %887 : vector<8x1xf32> to vector<8x32xf32>
    %889 = arith.subf %879, %888 : vector<8x32xf32>
    %890 = arith.mulf %889, %889 : vector<8x32xf32>
    %cst_310 = arith.constant dense<0.000000e+00> : vector<8xf32>
    %891 = vector.multi_reduction <add>, %890, %cst_310 [1] : vector<8x32xf32> to vector<8xf32>
    %892 = vector.shape_cast %891 : vector<8xf32> to vector<8x1xf32>
    %cst_311 = arith.constant 3.200000e+01 : f32
    %893 = vector.broadcast %cst_311 : f32 to vector<8x1xf32>
    %894 = arith.divf %892, %893 : vector<8x1xf32>
    %cst_312 = arith.constant 9.99999974E-6 : f32
    %895 = vector.broadcast %cst_312 : f32 to vector<8x1xf32>
    %896 = arith.addf %894, %895 : vector<8x1xf32>
    %897 = math.rsqrt %896 : vector<8x1xf32>
    %898 = vector.broadcast %897 : vector<8x1xf32> to vector<8x32xf32>
    %899 = arith.mulf %889, %898 : vector<8x32xf32>
    %900 = vector.broadcast %881 : vector<1x32xf32> to vector<8x32xf32>
    %901 = arith.mulf %899, %900 : vector<8x32xf32>
    %902 = vector.broadcast %883 : vector<1x32xf32> to vector<8x32xf32>
    %903 = arith.addf %901, %902 : vector<8x32xf32>
    %c1_313 = arith.constant 1 : index
    %c0_314 = arith.constant 0 : index
    %c0_315 = arith.constant 0 : index
    %904 = vector.load %arg28[%c1_313, %c0_314, %c0_315] : memref<2x32x96xbf16, #tpu.memory_space<vmem>>, vector<1x32x96xbf16>
    %905 = vector.shape_cast %904 : vector<1x32x96xbf16> to vector<32x96xbf16>
    %c0_316 = arith.constant 0 : index
    %c0_317 = arith.constant 0 : index
    %906 = vector.load %arg29[%c0_316, %c0_317] : memref<2x96xf32, #tpu.memory_space<vmem>>, vector<2x96xf32>
    %907 = vector.extract_strided_slice %906 {offsets = [1, 0], sizes = [1, 96], strides = [1, 1]} : vector<2x96xf32> to vector<1x96xf32>
    %c1_318 = arith.constant 1 : index
    %c0_319 = arith.constant 0 : index
    %c0_320 = arith.constant 0 : index
    %908 = vector.load %arg30[%c1_318, %c0_319, %c0_320] : memref<2x32x32xbf16, #tpu.memory_space<vmem>>, vector<1x32x32xbf16>
    %909 = vector.shape_cast %908 : vector<1x32x32xbf16> to vector<32x32xbf16>
    %c0_321 = arith.constant 0 : index
    %c0_322 = arith.constant 0 : index
    %910 = vector.load %arg31[%c0_321, %c0_322] : memref<2x32xf32, #tpu.memory_space<vmem>>, vector<2x32xf32>
    %911 = vector.extract_strided_slice %910 {offsets = [1, 0], sizes = [1, 32], strides = [1, 1]} : vector<2x32xf32> to vector<1x32xf32>
    %912 = vector.extract_strided_slice %905 {offsets = [0, 0], sizes = [32, 32], strides = [1, 1]} : vector<32x96xbf16> to vector<32x32xbf16>
    %913 = vector.extract_strided_slice %907 {offsets = [0, 0], sizes = [1, 32], strides = [1, 1]} : vector<1x96xf32> to vector<1x32xf32>
    %914 = arith.truncf %903 : vector<8x32xf32> to vector<8x32xbf16>
    %cst_323 = arith.constant dense<0.000000e+00> : vector<8x32xf32>
    %915 = tpu.matmul %914, %912, %cst_323 {dimension_numbers = #tpu.dot_dimension_numbers<[1], [0], [0], [1], [0, 0, 1, 1], [], []>} : vector<8x32xbf16>, vector<32x32xbf16>, vector<8x32xf32> -> vector<8x32xf32>
    %916 = vector.broadcast %913 : vector<1x32xf32> to vector<8x32xf32>
    %917 = arith.addf %915, %916 : vector<8x32xf32>
    %918 = vector.extract_strided_slice %905 {offsets = [0, 32], sizes = [32, 64], strides = [1, 1]} : vector<32x96xbf16> to vector<32x64xbf16>
    %919 = vector.extract_strided_slice %907 {offsets = [0, 32], sizes = [1, 64], strides = [1, 1]} : vector<1x96xf32> to vector<1x64xf32>
    %920 = arith.truncf %410 : vector<16x32xf32> to vector<16x32xbf16>
    %cst_324 = arith.constant dense<0.000000e+00> : vector<16x64xf32>
    %921 = tpu.matmul %920, %918, %cst_324 {dimension_numbers = #tpu.dot_dimension_numbers<[1], [0], [0], [1], [0, 0, 1, 1], [], []>} : vector<16x32xbf16>, vector<32x64xbf16>, vector<16x64xf32> -> vector<16x64xf32>
    %922 = vector.broadcast %919 : vector<1x64xf32> to vector<16x64xf32>
    %923 = arith.addf %921, %922 : vector<16x64xf32>
    %924 = vector.extract_strided_slice %923 {offsets = [0, 0], sizes = [16, 32], strides = [1, 1]} : vector<16x64xf32> to vector<16x32xf32>
    %925 = vector.extract_strided_slice %923 {offsets = [0, 32], sizes = [16, 32], strides = [1, 1]} : vector<16x64xf32> to vector<16x32xf32>
    %926 = vector.extract_strided_slice %917 {offsets = [0, 0], sizes = [8, 8], strides = [1, 1]} : vector<8x32xf32> to vector<8x8xf32>
    %927 = arith.truncf %926 : vector<8x8xf32> to vector<8x8xbf16>
    %928 = vector.extract_strided_slice %924 {offsets = [0, 0], sizes = [16, 8], strides = [1, 1]} : vector<16x32xf32> to vector<16x8xf32>
    %929 = arith.truncf %928 : vector<16x8xf32> to vector<16x8xbf16>
    %cst_325 = arith.constant dense<0.000000e+00> : vector<8x16xf32>
    %930 = tpu.matmul %927, %929, %cst_325 {dimension_numbers = #tpu.dot_dimension_numbers<[1], [1], [0], [0], [0, 0, 1, 0], [], []>} : vector<8x8xbf16>, vector<16x8xbf16>, vector<8x16xf32> -> vector<8x16xf32>
    %cst_326 = arith.constant 0.353553385 : f32
    %931 = vector.broadcast %cst_326 : f32 to vector<8x16xf32>
    %932 = arith.mulf %930, %931 : vector<8x16xf32>
    %cst_327 = arith.constant -1.000000e+30 : f32
    %933 = vector.shape_cast %9 : vector<1x16xi1> to vector<1x16xi1>
    %934 = vector.broadcast %933 : vector<1x16xi1> to vector<8x16xi1>
    %935 = vector.broadcast %cst_327 : f32 to vector<8x16xf32>
    %936 = arith.select %934, %935, %932 : vector<8x16xi1>, vector<8x16xf32>
    %cst_328 = arith.constant dense<0xFF800000> : vector<8xf32>
    %937 = vector.multi_reduction <maximumf>, %936, %cst_328 [1] : vector<8x16xf32> to vector<8xf32>
    %938 = vector.shape_cast %937 : vector<8xf32> to vector<8x1xf32>
    %939 = vector.broadcast %938 : vector<8x1xf32> to vector<8x16xf32>
    %940 = arith.subf %936, %939 : vector<8x16xf32>
    %941 = math.exp %940 : vector<8x16xf32>
    %cst_329 = arith.constant dense<0.000000e+00> : vector<8xf32>
    %942 = vector.multi_reduction <add>, %941, %cst_329 [1] : vector<8x16xf32> to vector<8xf32>
    %943 = vector.shape_cast %942 : vector<8xf32> to vector<8x1xf32>
    %944 = tpu.reciprocal %943 {approx = true} : vector<8x1xf32> -> vector<8x1xf32>
    %945 = vector.broadcast %944 : vector<8x1xf32> to vector<8x16xf32>
    %946 = arith.mulf %941, %945 : vector<8x16xf32>
    %947 = arith.truncf %946 : vector<8x16xf32> to vector<8x16xbf16>
    %948 = vector.extract_strided_slice %925 {offsets = [0, 0], sizes = [16, 8], strides = [1, 1]} : vector<16x32xf32> to vector<16x8xf32>
    %949 = arith.truncf %948 : vector<16x8xf32> to vector<16x8xbf16>
    %cst_330 = arith.constant dense<0.000000e+00> : vector<8x8xf32>
    %950 = tpu.matmul %947, %949, %cst_330 {dimension_numbers = #tpu.dot_dimension_numbers<[1], [0], [0], [1], [0, 0, 1, 1], [], []>} : vector<8x16xbf16>, vector<16x8xbf16>, vector<8x8xf32> -> vector<8x8xf32>
    %951 = vector.extract_strided_slice %917 {offsets = [0, 8], sizes = [8, 8], strides = [1, 1]} : vector<8x32xf32> to vector<8x8xf32>
    %952 = arith.truncf %951 : vector<8x8xf32> to vector<8x8xbf16>
    %953 = vector.extract_strided_slice %924 {offsets = [0, 8], sizes = [16, 8], strides = [1, 1]} : vector<16x32xf32> to vector<16x8xf32>
    %954 = arith.truncf %953 : vector<16x8xf32> to vector<16x8xbf16>
    %cst_331 = arith.constant dense<0.000000e+00> : vector<8x16xf32>
    %955 = tpu.matmul %952, %954, %cst_331 {dimension_numbers = #tpu.dot_dimension_numbers<[1], [1], [0], [0], [0, 0, 1, 0], [], []>} : vector<8x8xbf16>, vector<16x8xbf16>, vector<8x16xf32> -> vector<8x16xf32>
    %cst_332 = arith.constant 0.353553385 : f32
    %956 = vector.broadcast %cst_332 : f32 to vector<8x16xf32>
    %957 = arith.mulf %955, %956 : vector<8x16xf32>
    %cst_333 = arith.constant -1.000000e+30 : f32
    %958 = vector.shape_cast %9 : vector<1x16xi1> to vector<1x16xi1>
    %959 = vector.broadcast %958 : vector<1x16xi1> to vector<8x16xi1>
    %960 = vector.broadcast %cst_333 : f32 to vector<8x16xf32>
    %961 = arith.select %959, %960, %957 : vector<8x16xi1>, vector<8x16xf32>
    %cst_334 = arith.constant dense<0xFF800000> : vector<8xf32>
    %962 = vector.multi_reduction <maximumf>, %961, %cst_334 [1] : vector<8x16xf32> to vector<8xf32>
    %963 = vector.shape_cast %962 : vector<8xf32> to vector<8x1xf32>
    %964 = vector.broadcast %963 : vector<8x1xf32> to vector<8x16xf32>
    %965 = arith.subf %961, %964 : vector<8x16xf32>
    %966 = math.exp %965 : vector<8x16xf32>
    %cst_335 = arith.constant dense<0.000000e+00> : vector<8xf32>
    %967 = vector.multi_reduction <add>, %966, %cst_335 [1] : vector<8x16xf32> to vector<8xf32>
    %968 = vector.shape_cast %967 : vector<8xf32> to vector<8x1xf32>
    %969 = tpu.reciprocal %968 {approx = true} : vector<8x1xf32> -> vector<8x1xf32>
    %970 = vector.broadcast %969 : vector<8x1xf32> to vector<8x16xf32>
    %971 = arith.mulf %966, %970 : vector<8x16xf32>
    %972 = arith.truncf %971 : vector<8x16xf32> to vector<8x16xbf16>
    %973 = vector.extract_strided_slice %925 {offsets = [0, 8], sizes = [16, 8], strides = [1, 1]} : vector<16x32xf32> to vector<16x8xf32>
    %974 = arith.truncf %973 : vector<16x8xf32> to vector<16x8xbf16>
    %cst_336 = arith.constant dense<0.000000e+00> : vector<8x8xf32>
    %975 = tpu.matmul %972, %974, %cst_336 {dimension_numbers = #tpu.dot_dimension_numbers<[1], [0], [0], [1], [0, 0, 1, 1], [], []>} : vector<8x16xbf16>, vector<16x8xbf16>, vector<8x8xf32> -> vector<8x8xf32>
    %976 = vector.extract_strided_slice %917 {offsets = [0, 16], sizes = [8, 8], strides = [1, 1]} : vector<8x32xf32> to vector<8x8xf32>
    %977 = arith.truncf %976 : vector<8x8xf32> to vector<8x8xbf16>
    %978 = vector.extract_strided_slice %924 {offsets = [0, 16], sizes = [16, 8], strides = [1, 1]} : vector<16x32xf32> to vector<16x8xf32>
    %979 = arith.truncf %978 : vector<16x8xf32> to vector<16x8xbf16>
    %cst_337 = arith.constant dense<0.000000e+00> : vector<8x16xf32>
    %980 = tpu.matmul %977, %979, %cst_337 {dimension_numbers = #tpu.dot_dimension_numbers<[1], [1], [0], [0], [0, 0, 1, 0], [], []>} : vector<8x8xbf16>, vector<16x8xbf16>, vector<8x16xf32> -> vector<8x16xf32>
    %cst_338 = arith.constant 0.353553385 : f32
    %981 = vector.broadcast %cst_338 : f32 to vector<8x16xf32>
    %982 = arith.mulf %980, %981 : vector<8x16xf32>
    %cst_339 = arith.constant -1.000000e+30 : f32
    %983 = vector.shape_cast %9 : vector<1x16xi1> to vector<1x16xi1>
    %984 = vector.broadcast %983 : vector<1x16xi1> to vector<8x16xi1>
    %985 = vector.broadcast %cst_339 : f32 to vector<8x16xf32>
    %986 = arith.select %984, %985, %982 : vector<8x16xi1>, vector<8x16xf32>
    %cst_340 = arith.constant dense<0xFF800000> : vector<8xf32>
    %987 = vector.multi_reduction <maximumf>, %986, %cst_340 [1] : vector<8x16xf32> to vector<8xf32>
    %988 = vector.shape_cast %987 : vector<8xf32> to vector<8x1xf32>
    %989 = vector.broadcast %988 : vector<8x1xf32> to vector<8x16xf32>
    %990 = arith.subf %986, %989 : vector<8x16xf32>
    %991 = math.exp %990 : vector<8x16xf32>
    %cst_341 = arith.constant dense<0.000000e+00> : vector<8xf32>
    %992 = vector.multi_reduction <add>, %991, %cst_341 [1] : vector<8x16xf32> to vector<8xf32>
    %993 = vector.shape_cast %992 : vector<8xf32> to vector<8x1xf32>
    %994 = tpu.reciprocal %993 {approx = true} : vector<8x1xf32> -> vector<8x1xf32>
    %995 = vector.broadcast %994 : vector<8x1xf32> to vector<8x16xf32>
    %996 = arith.mulf %991, %995 : vector<8x16xf32>
    %997 = arith.truncf %996 : vector<8x16xf32> to vector<8x16xbf16>
    %998 = vector.extract_strided_slice %925 {offsets = [0, 16], sizes = [16, 8], strides = [1, 1]} : vector<16x32xf32> to vector<16x8xf32>
    %999 = arith.truncf %998 : vector<16x8xf32> to vector<16x8xbf16>
    %cst_342 = arith.constant dense<0.000000e+00> : vector<8x8xf32>
    %1000 = tpu.matmul %997, %999, %cst_342 {dimension_numbers = #tpu.dot_dimension_numbers<[1], [0], [0], [1], [0, 0, 1, 1], [], []>} : vector<8x16xbf16>, vector<16x8xbf16>, vector<8x8xf32> -> vector<8x8xf32>
    %1001 = vector.extract_strided_slice %917 {offsets = [0, 24], sizes = [8, 8], strides = [1, 1]} : vector<8x32xf32> to vector<8x8xf32>
    %1002 = arith.truncf %1001 : vector<8x8xf32> to vector<8x8xbf16>
    %1003 = vector.extract_strided_slice %924 {offsets = [0, 24], sizes = [16, 8], strides = [1, 1]} : vector<16x32xf32> to vector<16x8xf32>
    %1004 = arith.truncf %1003 : vector<16x8xf32> to vector<16x8xbf16>
    %cst_343 = arith.constant dense<0.000000e+00> : vector<8x16xf32>
    %1005 = tpu.matmul %1002, %1004, %cst_343 {dimension_numbers = #tpu.dot_dimension_numbers<[1], [1], [0], [0], [0, 0, 1, 0], [], []>} : vector<8x8xbf16>, vector<16x8xbf16>, vector<8x16xf32> -> vector<8x16xf32>
    %cst_344 = arith.constant 0.353553385 : f32
    %1006 = vector.broadcast %cst_344 : f32 to vector<8x16xf32>
    %1007 = arith.mulf %1005, %1006 : vector<8x16xf32>
    %cst_345 = arith.constant -1.000000e+30 : f32
    %1008 = vector.shape_cast %9 : vector<1x16xi1> to vector<1x16xi1>
    %1009 = vector.broadcast %1008 : vector<1x16xi1> to vector<8x16xi1>
    %1010 = vector.broadcast %cst_345 : f32 to vector<8x16xf32>
    %1011 = arith.select %1009, %1010, %1007 : vector<8x16xi1>, vector<8x16xf32>
    %cst_346 = arith.constant dense<0xFF800000> : vector<8xf32>
    %1012 = vector.multi_reduction <maximumf>, %1011, %cst_346 [1] : vector<8x16xf32> to vector<8xf32>
    %1013 = vector.shape_cast %1012 : vector<8xf32> to vector<8x1xf32>
    %1014 = vector.broadcast %1013 : vector<8x1xf32> to vector<8x16xf32>
    %1015 = arith.subf %1011, %1014 : vector<8x16xf32>
    %1016 = math.exp %1015 : vector<8x16xf32>
    %cst_347 = arith.constant dense<0.000000e+00> : vector<8xf32>
    %1017 = vector.multi_reduction <add>, %1016, %cst_347 [1] : vector<8x16xf32> to vector<8xf32>
    %1018 = vector.shape_cast %1017 : vector<8xf32> to vector<8x1xf32>
    %1019 = tpu.reciprocal %1018 {approx = true} : vector<8x1xf32> -> vector<8x1xf32>
    %1020 = vector.broadcast %1019 : vector<8x1xf32> to vector<8x16xf32>
    %1021 = arith.mulf %1016, %1020 : vector<8x16xf32>
    %1022 = arith.truncf %1021 : vector<8x16xf32> to vector<8x16xbf16>
    %1023 = vector.extract_strided_slice %925 {offsets = [0, 24], sizes = [16, 8], strides = [1, 1]} : vector<16x32xf32> to vector<16x8xf32>
    %1024 = arith.truncf %1023 : vector<16x8xf32> to vector<16x8xbf16>
    %cst_348 = arith.constant dense<0.000000e+00> : vector<8x8xf32>
    %1025 = tpu.matmul %1022, %1024, %cst_348 {dimension_numbers = #tpu.dot_dimension_numbers<[1], [0], [0], [1], [0, 0, 1, 1], [], []>} : vector<8x16xbf16>, vector<16x8xbf16>, vector<8x8xf32> -> vector<8x8xf32>
    %1026 = tpu.concatenate %950, %975, %1000, %1025 in 1 : vector<8x8xf32>, vector<8x8xf32>, vector<8x8xf32>, vector<8x8xf32> -> vector<8x32xf32>
    %1027 = arith.truncf %1026 : vector<8x32xf32> to vector<8x32xbf16>
    %cst_349 = arith.constant dense<0.000000e+00> : vector<8x32xf32>
    %1028 = tpu.matmul %1027, %909, %cst_349 {dimension_numbers = #tpu.dot_dimension_numbers<[1], [0], [0], [1], [0, 0, 1, 1], [], []>} : vector<8x32xbf16>, vector<32x32xbf16>, vector<8x32xf32> -> vector<8x32xf32>
    %1029 = vector.broadcast %911 : vector<1x32xf32> to vector<8x32xf32>
    %1030 = arith.addf %1028, %1029 : vector<8x32xf32>
    %1031 = arith.addf %879, %1030 : vector<8x32xf32>
    %c0_350 = arith.constant 0 : index
    %c0_351 = arith.constant 0 : index
    %1032 = vector.load %arg22[%c0_350, %c0_351] : memref<2x32xf32, #tpu.memory_space<vmem>>, vector<2x32xf32>
    %1033 = vector.extract_strided_slice %1032 {offsets = [1, 0], sizes = [1, 32], strides = [1, 1]} : vector<2x32xf32> to vector<1x32xf32>
    %c0_352 = arith.constant 0 : index
    %c0_353 = arith.constant 0 : index
    %1034 = vector.load %arg23[%c0_352, %c0_353] : memref<2x32xf32, #tpu.memory_space<vmem>>, vector<2x32xf32>
    %1035 = vector.extract_strided_slice %1034 {offsets = [1, 0], sizes = [1, 32], strides = [1, 1]} : vector<2x32xf32> to vector<1x32xf32>
    %cst_354 = arith.constant dense<0.000000e+00> : vector<8xf32>
    %1036 = vector.multi_reduction <add>, %1031, %cst_354 [1] : vector<8x32xf32> to vector<8xf32>
    %1037 = vector.shape_cast %1036 : vector<8xf32> to vector<8x1xf32>
    %cst_355 = arith.constant 3.200000e+01 : f32
    %1038 = vector.broadcast %cst_355 : f32 to vector<8x1xf32>
    %1039 = arith.divf %1037, %1038 : vector<8x1xf32>
    %1040 = vector.broadcast %1039 : vector<8x1xf32> to vector<8x32xf32>
    %1041 = arith.subf %1031, %1040 : vector<8x32xf32>
    %1042 = arith.mulf %1041, %1041 : vector<8x32xf32>
    %cst_356 = arith.constant dense<0.000000e+00> : vector<8xf32>
    %1043 = vector.multi_reduction <add>, %1042, %cst_356 [1] : vector<8x32xf32> to vector<8xf32>
    %1044 = vector.shape_cast %1043 : vector<8xf32> to vector<8x1xf32>
    %cst_357 = arith.constant 3.200000e+01 : f32
    %1045 = vector.broadcast %cst_357 : f32 to vector<8x1xf32>
    %1046 = arith.divf %1044, %1045 : vector<8x1xf32>
    %cst_358 = arith.constant 9.99999974E-6 : f32
    %1047 = vector.broadcast %cst_358 : f32 to vector<8x1xf32>
    %1048 = arith.addf %1046, %1047 : vector<8x1xf32>
    %1049 = math.rsqrt %1048 : vector<8x1xf32>
    %1050 = vector.broadcast %1049 : vector<8x1xf32> to vector<8x32xf32>
    %1051 = arith.mulf %1041, %1050 : vector<8x32xf32>
    %1052 = vector.broadcast %1033 : vector<1x32xf32> to vector<8x32xf32>
    %1053 = arith.mulf %1051, %1052 : vector<8x32xf32>
    %1054 = vector.broadcast %1035 : vector<1x32xf32> to vector<8x32xf32>
    %1055 = arith.addf %1053, %1054 : vector<8x32xf32>
    %c1_359 = arith.constant 1 : index
    %c0_360 = arith.constant 0 : index
    %c0_361 = arith.constant 0 : index
    %1056 = vector.load %arg32[%c1_359, %c0_360, %c0_361] : memref<2x32x128xbf16, #tpu.memory_space<vmem>>, vector<1x32x128xbf16>
    %1057 = vector.shape_cast %1056 : vector<1x32x128xbf16> to vector<32x128xbf16>
    %c0_362 = arith.constant 0 : index
    %c0_363 = arith.constant 0 : index
    %1058 = vector.load %arg33[%c0_362, %c0_363] : memref<2x128xf32, #tpu.memory_space<vmem>>, vector<2x128xf32>
    %1059 = vector.extract_strided_slice %1058 {offsets = [1, 0], sizes = [1, 128], strides = [1, 1]} : vector<2x128xf32> to vector<1x128xf32>
    %c1_364 = arith.constant 1 : index
    %c0_365 = arith.constant 0 : index
    %c0_366 = arith.constant 0 : index
    %1060 = vector.load %arg34[%c1_364, %c0_365, %c0_366] : memref<2x128x32xbf16, #tpu.memory_space<vmem>>, vector<1x128x32xbf16>
    %1061 = vector.shape_cast %1060 : vector<1x128x32xbf16> to vector<128x32xbf16>
    %c0_367 = arith.constant 0 : index
    %c0_368 = arith.constant 0 : index
    %1062 = vector.load %arg35[%c0_367, %c0_368] : memref<2x32xf32, #tpu.memory_space<vmem>>, vector<2x32xf32>
    %1063 = vector.extract_strided_slice %1062 {offsets = [1, 0], sizes = [1, 32], strides = [1, 1]} : vector<2x32xf32> to vector<1x32xf32>
    %1064 = arith.truncf %1055 : vector<8x32xf32> to vector<8x32xbf16>
    %cst_369 = arith.constant dense<0.000000e+00> : vector<8x128xf32>
    %1065 = tpu.matmul %1064, %1057, %cst_369 {dimension_numbers = #tpu.dot_dimension_numbers<[1], [0], [0], [1], [0, 0, 1, 1], [], []>} : vector<8x32xbf16>, vector<32x128xbf16>, vector<8x128xf32> -> vector<8x128xf32>
    %1066 = vector.broadcast %1059 : vector<1x128xf32> to vector<8x128xf32>
    %1067 = arith.addf %1065, %1066 : vector<8x128xf32>
    %cst_370 = arith.constant 0.000000e+00 : f32
    %1068 = vector.broadcast %cst_370 : f32 to vector<8x128xf32>
    %1069 = arith.maximumf %1067, %1068 : vector<8x128xf32>
    %1070 = arith.truncf %1069 : vector<8x128xf32> to vector<8x128xbf16>
    %cst_371 = arith.constant dense<0.000000e+00> : vector<8x32xf32>
    %1071 = tpu.matmul %1070, %1061, %cst_371 {dimension_numbers = #tpu.dot_dimension_numbers<[1], [0], [0], [1], [0, 0, 1, 1], [], []>} : vector<8x128xbf16>, vector<128x32xbf16>, vector<8x32xf32> -> vector<8x32xf32>
    %1072 = vector.broadcast %1063 : vector<1x32xf32> to vector<8x32xf32>
    %1073 = arith.addf %1071, %1072 : vector<8x32xf32>
    %1074 = arith.addf %1031, %1073 : vector<8x32xf32>
    %c0_372 = arith.constant 0 : index
    %c0_373 = arith.constant 0 : index
    %1075 = vector.load %arg36[%c0_372, %c0_373] : memref<1x32xf32, #tpu.memory_space<vmem>>, vector<1x32xf32>
    %c0_374 = arith.constant 0 : index
    %c0_375 = arith.constant 0 : index
    %1076 = vector.load %arg37[%c0_374, %c0_375] : memref<1x32xf32, #tpu.memory_space<vmem>>, vector<1x32xf32>
    %cst_376 = arith.constant dense<0.000000e+00> : vector<8xf32>
    %1077 = vector.multi_reduction <add>, %1074, %cst_376 [1] : vector<8x32xf32> to vector<8xf32>
    %1078 = vector.shape_cast %1077 : vector<8xf32> to vector<8x1xf32>
    %cst_377 = arith.constant 3.200000e+01 : f32
    %1079 = vector.broadcast %cst_377 : f32 to vector<8x1xf32>
    %1080 = arith.divf %1078, %1079 : vector<8x1xf32>
    %1081 = vector.broadcast %1080 : vector<8x1xf32> to vector<8x32xf32>
    %1082 = arith.subf %1074, %1081 : vector<8x32xf32>
    %1083 = arith.mulf %1082, %1082 : vector<8x32xf32>
    %cst_378 = arith.constant dense<0.000000e+00> : vector<8xf32>
    %1084 = vector.multi_reduction <add>, %1083, %cst_378 [1] : vector<8x32xf32> to vector<8xf32>
    %1085 = vector.shape_cast %1084 : vector<8xf32> to vector<8x1xf32>
    %cst_379 = arith.constant 3.200000e+01 : f32
    %1086 = vector.broadcast %cst_379 : f32 to vector<8x1xf32>
    %1087 = arith.divf %1085, %1086 : vector<8x1xf32>
    %cst_380 = arith.constant 9.99999997E-7 : f32
    %1088 = vector.broadcast %cst_380 : f32 to vector<8x1xf32>
    %1089 = arith.addf %1087, %1088 : vector<8x1xf32>
    %1090 = math.rsqrt %1089 : vector<8x1xf32>
    %1091 = vector.broadcast %1090 : vector<8x1xf32> to vector<8x32xf32>
    %1092 = arith.mulf %1082, %1091 : vector<8x32xf32>
    %1093 = vector.broadcast %1075 : vector<1x32xf32> to vector<8x32xf32>
    %1094 = arith.mulf %1092, %1093 : vector<8x32xf32>
    %1095 = vector.broadcast %1076 : vector<1x32xf32> to vector<8x32xf32>
    %1096 = arith.addf %1094, %1095 : vector<8x32xf32>
    %c0_381 = arith.constant 0 : index
    %c0_382 = arith.constant 0 : index
    %1097 = vector.load %arg38[%c0_381, %c0_382] : memref<32x64xbf16, #tpu.memory_space<vmem>>, vector<32x64xbf16>
    %c0_383 = arith.constant 0 : index
    %c0_384 = arith.constant 0 : index
    %1098 = vector.load %arg39[%c0_383, %c0_384] : memref<1x64xf32, #tpu.memory_space<vmem>>, vector<1x64xf32>
    %1099 = arith.truncf %1096 : vector<8x32xf32> to vector<8x32xbf16>
    %cst_385 = arith.constant dense<0.000000e+00> : vector<8x64xf32>
    %1100 = tpu.matmul %1099, %1097, %cst_385 {dimension_numbers = #tpu.dot_dimension_numbers<[1], [0], [0], [1], [0, 0, 1, 1], [], []>} : vector<8x32xbf16>, vector<32x64xbf16>, vector<8x64xf32> -> vector<8x64xf32>
    %1101 = vector.broadcast %1098 : vector<1x64xf32> to vector<8x64xf32>
    %1102 = arith.addf %1100, %1101 : vector<8x64xf32>
    %cst_386 = arith.constant 1.000000e+00 : f32
    %1103 = vector.broadcast %cst_386 : f32 to vector<8x64xf32>
    %1104 = arith.mulf %1102, %1103 : vector<8x64xf32>
    %cst_387 = arith.constant dense<0xFF800000> : vector<8xf32>
    %1105 = vector.multi_reduction <maximumf>, %1104, %cst_387 [1] : vector<8x64xf32> to vector<8xf32>
    %1106 = vector.shape_cast %1105 : vector<8xf32> to vector<8x1xf32>
    %1107 = vector.broadcast %1106 : vector<8x1xf32> to vector<8x64xf32>
    %1108 = arith.subf %1104, %1107 : vector<8x64xf32>
    %1109 = math.exp %1108 : vector<8x64xf32>
    %cst_388 = arith.constant dense<0.000000e+00> : vector<8xf32>
    %1110 = vector.multi_reduction <add>, %1109, %cst_388 [1] : vector<8x64xf32> to vector<8xf32>
    %1111 = vector.shape_cast %1110 : vector<8xf32> to vector<8x1xf32>
    %1112 = math.log %1111 : vector<8x1xf32>
    %1113 = vector.broadcast %1112 : vector<8x1xf32> to vector<8x64xf32>
    %1114 = arith.subf %1108, %1113 : vector<8x64xf32>
    %c0_389 = arith.constant 0 : index
    %c0_390 = arith.constant 0 : index
    %c0_391 = arith.constant 0 : index
    %1115 = vector.load %arg40[%c0_389, %c0_390, %c0_391] : memref<1x8x64xf32, #tpu.memory_space<vmem>>, vector<1x8x64xf32>
    %1116 = vector.shape_cast %1115 : vector<1x8x64xf32> to vector<8x64xf32>
    %1117 = vector.shape_cast %1114 : vector<8x64xf32> to vector<1x8x64xf32>
    tpu.vector_store %arg40[%c0_389, %c0_390, %c0_391], %1117 {strides = array<i32>} : memref<1x8x64xf32, #tpu.memory_space<vmem>>, vector<1x8x64xf32>,
    return
  }
  func.func @transform_0(%arg0: i32, %arg1: memref<2xi32, #tpu.memory_space<smem>>) -> (i32, i32, i32) {
    %c0_i32 = arith.constant 0 : i32
    %c0_i32_0 = arith.constant 0 : i32
    %c0_i32_1 = arith.constant 0 : i32
    return %arg0, %c0_i32, %c0_i32_0 : i32, i32, i32
  }
  func.func @transform_1(%arg0: i32, %arg1: memref<2xi32, #tpu.memory_space<smem>>) -> (i32, i32, i32) {
    %c0_i32 = arith.constant 0 : i32
    %c0_i32_0 = arith.constant 0 : i32
    %c0_i32_1 = arith.constant 0 : i32
    return %arg0, %c0_i32, %c0_i32_0 : i32, i32, i32
  }
  func.func @transform_2(%arg0: i32, %arg1: memref<2xi32, #tpu.memory_space<smem>>) -> (i32, i32) {
    %c0_i32 = arith.constant 0 : i32
    %c0_i32_0 = arith.constant 0 : i32
    %c0_i32_1 = arith.constant 0 : i32
    return %c0_i32, %c0_i32_0 : i32, i32
  }
  func.func @transform_3(%arg0: i32, %arg1: memref<2xi32, #tpu.memory_space<smem>>) -> (i32, i32) {
    %c0_i32 = arith.constant 0 : i32
    %c0_i32_0 = arith.constant 0 : i32
    %c0_i32_1 = arith.constant 0 : i32
    return %c0_i32, %c0_i32_0 : i32, i32
  }
  func.func @transform_4(%arg0: i32, %arg1: memref<2xi32, #tpu.memory_space<smem>>) -> (i32, i32) {
    %c0_i32 = arith.constant 0 : i32
    %c0_i32_0 = arith.constant 0 : i32
    %c0_i32_1 = arith.constant 0 : i32
    return %c0_i32, %c0_i32_0 : i32, i32
  }
  func.func @transform_5(%arg0: i32, %arg1: memref<2xi32, #tpu.memory_space<smem>>) -> (i32, i32) {
    %c0_i32 = arith.constant 0 : i32
    %c0_i32_0 = arith.constant 0 : i32
    %c0_i32_1 = arith.constant 0 : i32
    return %c0_i32, %c0_i32_0 : i32, i32
  }
  func.func @transform_6(%arg0: i32, %arg1: memref<2xi32, #tpu.memory_space<smem>>) -> (i32, i32, i32) {
    %c0_i32 = arith.constant 0 : i32
    %c0_i32_0 = arith.constant 0 : i32
    %c0_i32_1 = arith.constant 0 : i32
    %c0_i32_2 = arith.constant 0 : i32
    return %c0_i32, %c0_i32_0, %c0_i32_1 : i32, i32, i32
  }
  func.func @transform_7(%arg0: i32, %arg1: memref<2xi32, #tpu.memory_space<smem>>) -> (i32, i32) {
    %c0_i32 = arith.constant 0 : i32
    %c0_i32_0 = arith.constant 0 : i32
    %c0_i32_1 = arith.constant 0 : i32
    return %c0_i32, %c0_i32_0 : i32, i32
  }
  func.func @transform_8(%arg0: i32, %arg1: memref<2xi32, #tpu.memory_space<smem>>) -> (i32, i32, i32) {
    %c0_i32 = arith.constant 0 : i32
    %c0_i32_0 = arith.constant 0 : i32
    %c0_i32_1 = arith.constant 0 : i32
    %c0_i32_2 = arith.constant 0 : i32
    return %c0_i32, %c0_i32_0, %c0_i32_1 : i32, i32, i32
  }
  func.func @transform_9(%arg0: i32, %arg1: memref<2xi32, #tpu.memory_space<smem>>) -> (i32, i32) {
    %c0_i32 = arith.constant 0 : i32
    %c0_i32_0 = arith.constant 0 : i32
    %c0_i32_1 = arith.constant 0 : i32
    return %c0_i32, %c0_i32_0 : i32, i32
  }
  func.func @transform_10(%arg0: i32, %arg1: memref<2xi32, #tpu.memory_space<smem>>) -> (i32, i32, i32) {
    %c0_i32 = arith.constant 0 : i32
    %c0_i32_0 = arith.constant 0 : i32
    %c0_i32_1 = arith.constant 0 : i32
    %c0_i32_2 = arith.constant 0 : i32
    return %c0_i32, %c0_i32_0, %c0_i32_1 : i32, i32, i32
  }
  func.func @transform_11(%arg0: i32, %arg1: memref<2xi32, #tpu.memory_space<smem>>) -> (i32, i32) {
    %c0_i32 = arith.constant 0 : i32
    %c0_i32_0 = arith.constant 0 : i32
    %c0_i32_1 = arith.constant 0 : i32
    return %c0_i32, %c0_i32_0 : i32, i32
  }
  func.func @transform_12(%arg0: i32, %arg1: memref<2xi32, #tpu.memory_space<smem>>) -> (i32, i32, i32) {
    %c0_i32 = arith.constant 0 : i32
    %c0_i32_0 = arith.constant 0 : i32
    %c0_i32_1 = arith.constant 0 : i32
    %c0_i32_2 = arith.constant 0 : i32
    return %c0_i32, %c0_i32_0, %c0_i32_1 : i32, i32, i32
  }
  func.func @transform_13(%arg0: i32, %arg1: memref<2xi32, #tpu.memory_space<smem>>) -> (i32, i32) {
    %c0_i32 = arith.constant 0 : i32
    %c0_i32_0 = arith.constant 0 : i32
    %c0_i32_1 = arith.constant 0 : i32
    return %c0_i32, %c0_i32_0 : i32, i32
  }
  func.func @transform_14(%arg0: i32, %arg1: memref<2xi32, #tpu.memory_space<smem>>) -> (i32, i32) {
    %c0_i32 = arith.constant 0 : i32
    %c0_i32_0 = arith.constant 0 : i32
    %c0_i32_1 = arith.constant 0 : i32
    return %c0_i32, %c0_i32_0 : i32, i32
  }
  func.func @transform_15(%arg0: i32, %arg1: memref<2xi32, #tpu.memory_space<smem>>) -> (i32, i32) {
    %c0_i32 = arith.constant 0 : i32
    %c0_i32_0 = arith.constant 0 : i32
    %c0_i32_1 = arith.constant 0 : i32
    return %c0_i32, %c0_i32_0 : i32, i32
  }
  func.func @transform_16(%arg0: i32, %arg1: memref<2xi32, #tpu.memory_space<smem>>) -> (i32, i32) {
    %c0_i32 = arith.constant 0 : i32
    %c0_i32_0 = arith.constant 0 : i32
    %c0_i32_1 = arith.constant 0 : i32
    return %c0_i32, %c0_i32_0 : i32, i32
  }
  func.func @transform_17(%arg0: i32, %arg1: memref<2xi32, #tpu.memory_space<smem>>) -> (i32, i32) {
    %c0_i32 = arith.constant 0 : i32
    %c0_i32_0 = arith.constant 0 : i32
    %c0_i32_1 = arith.constant 0 : i32
    return %c0_i32, %c0_i32_0 : i32, i32
  }
  func.func @transform_18(%arg0: i32, %arg1: memref<2xi32, #tpu.memory_space<smem>>) -> (i32, i32) {
    %c0_i32 = arith.constant 0 : i32
    %c0_i32_0 = arith.constant 0 : i32
    %c0_i32_1 = arith.constant 0 : i32
    return %c0_i32, %c0_i32_0 : i32, i32
  }
  func.func @transform_19(%arg0: i32, %arg1: memref<2xi32, #tpu.memory_space<smem>>) -> (i32, i32) {
    %c0_i32 = arith.constant 0 : i32
    %c0_i32_0 = arith.constant 0 : i32
    %c0_i32_1 = arith.constant 0 : i32
    return %c0_i32, %c0_i32_0 : i32, i32
  }
  func.func @transform_20(%arg0: i32, %arg1: memref<2xi32, #tpu.memory_space<smem>>) -> (i32, i32) {
    %c0_i32 = arith.constant 0 : i32
    %c0_i32_0 = arith.constant 0 : i32
    %c0_i32_1 = arith.constant 0 : i32
    return %c0_i32, %c0_i32_0 : i32, i32
  }
  func.func @transform_21(%arg0: i32, %arg1: memref<2xi32, #tpu.memory_space<smem>>) -> (i32, i32) {
    %c0_i32 = arith.constant 0 : i32
    %c0_i32_0 = arith.constant 0 : i32
    %c0_i32_1 = arith.constant 0 : i32
    return %c0_i32, %c0_i32_0 : i32, i32
  }
  func.func @transform_22(%arg0: i32, %arg1: memref<2xi32, #tpu.memory_space<smem>>) -> (i32, i32, i32) {
    %c0_i32 = arith.constant 0 : i32
    %c0_i32_0 = arith.constant 0 : i32
    %c0_i32_1 = arith.constant 0 : i32
    %c0_i32_2 = arith.constant 0 : i32
    return %c0_i32, %c0_i32_0, %c0_i32_1 : i32, i32, i32
  }
  func.func @transform_23(%arg0: i32, %arg1: memref<2xi32, #tpu.memory_space<smem>>) -> (i32, i32) {
    %c0_i32 = arith.constant 0 : i32
    %c0_i32_0 = arith.constant 0 : i32
    %c0_i32_1 = arith.constant 0 : i32
    return %c0_i32, %c0_i32_0 : i32, i32
  }
  func.func @transform_24(%arg0: i32, %arg1: memref<2xi32, #tpu.memory_space<smem>>) -> (i32, i32, i32) {
    %c0_i32 = arith.constant 0 : i32
    %c0_i32_0 = arith.constant 0 : i32
    %c0_i32_1 = arith.constant 0 : i32
    %c0_i32_2 = arith.constant 0 : i32
    return %c0_i32, %c0_i32_0, %c0_i32_1 : i32, i32, i32
  }
  func.func @transform_25(%arg0: i32, %arg1: memref<2xi32, #tpu.memory_space<smem>>) -> (i32, i32) {
    %c0_i32 = arith.constant 0 : i32
    %c0_i32_0 = arith.constant 0 : i32
    %c0_i32_1 = arith.constant 0 : i32
    return %c0_i32, %c0_i32_0 : i32, i32
  }
  func.func @transform_26(%arg0: i32, %arg1: memref<2xi32, #tpu.memory_space<smem>>) -> (i32, i32, i32) {
    %c0_i32 = arith.constant 0 : i32
    %c0_i32_0 = arith.constant 0 : i32
    %c0_i32_1 = arith.constant 0 : i32
    %c0_i32_2 = arith.constant 0 : i32
    return %c0_i32, %c0_i32_0, %c0_i32_1 : i32, i32, i32
  }
  func.func @transform_27(%arg0: i32, %arg1: memref<2xi32, #tpu.memory_space<smem>>) -> (i32, i32) {
    %c0_i32 = arith.constant 0 : i32
    %c0_i32_0 = arith.constant 0 : i32
    %c0_i32_1 = arith.constant 0 : i32
    return %c0_i32, %c0_i32_0 : i32, i32
  }
  func.func @transform_28(%arg0: i32, %arg1: memref<2xi32, #tpu.memory_space<smem>>) -> (i32, i32, i32) {
    %c0_i32 = arith.constant 0 : i32
    %c0_i32_0 = arith.constant 0 : i32
    %c0_i32_1 = arith.constant 0 : i32
    %c0_i32_2 = arith.constant 0 : i32
    return %c0_i32, %c0_i32_0, %c0_i32_1 : i32, i32, i32
  }
  func.func @transform_29(%arg0: i32, %arg1: memref<2xi32, #tpu.memory_space<smem>>) -> (i32, i32) {
    %c0_i32 = arith.constant 0 : i32
    %c0_i32_0 = arith.constant 0 : i32
    %c0_i32_1 = arith.constant 0 : i32
    return %c0_i32, %c0_i32_0 : i32, i32
  }
  func.func @transform_30(%arg0: i32, %arg1: memref<2xi32, #tpu.memory_space<smem>>) -> (i32, i32, i32) {
    %c0_i32 = arith.constant 0 : i32
    %c0_i32_0 = arith.constant 0 : i32
    %c0_i32_1 = arith.constant 0 : i32
    %c0_i32_2 = arith.constant 0 : i32
    return %c0_i32, %c0_i32_0, %c0_i32_1 : i32, i32, i32
  }
  func.func @transform_31(%arg0: i32, %arg1: memref<2xi32, #tpu.memory_space<smem>>) -> (i32, i32) {
    %c0_i32 = arith.constant 0 : i32
    %c0_i32_0 = arith.constant 0 : i32
    %c0_i32_1 = arith.constant 0 : i32
    return %c0_i32, %c0_i32_0 : i32, i32
  }
  func.func @transform_32(%arg0: i32, %arg1: memref<2xi32, #tpu.memory_space<smem>>) -> (i32, i32, i32) {
    %c0_i32 = arith.constant 0 : i32
    %c0_i32_0 = arith.constant 0 : i32
    %c0_i32_1 = arith.constant 0 : i32
    %c0_i32_2 = arith.constant 0 : i32
    return %c0_i32, %c0_i32_0, %c0_i32_1 : i32, i32, i32
  }
  func.func @transform_33(%arg0: i32, %arg1: memref<2xi32, #tpu.memory_space<smem>>) -> (i32, i32) {
    %c0_i32 = arith.constant 0 : i32
    %c0_i32_0 = arith.constant 0 : i32
    %c0_i32_1 = arith.constant 0 : i32
    return %c0_i32, %c0_i32_0 : i32, i32
  }
  func.func @transform_34(%arg0: i32, %arg1: memref<2xi32, #tpu.memory_space<smem>>) -> (i32, i32) {
    %c0_i32 = arith.constant 0 : i32
    %c0_i32_0 = arith.constant 0 : i32
    %c0_i32_1 = arith.constant 0 : i32
    return %c0_i32, %c0_i32_0 : i32, i32
  }
  func.func @transform_35(%arg0: i32, %arg1: memref<2xi32, #tpu.memory_space<smem>>) -> (i32, i32) {
    %c0_i32 = arith.constant 0 : i32
    %c0_i32_0 = arith.constant 0 : i32
    %c0_i32_1 = arith.constant 0 : i32
    return %c0_i32, %c0_i32_0 : i32, i32
  }
  func.func @transform_36(%arg0: i32, %arg1: memref<2xi32, #tpu.memory_space<smem>>) -> (i32, i32) {
    %c0_i32 = arith.constant 0 : i32
    %c0_i32_0 = arith.constant 0 : i32
    %c0_i32_1 = arith.constant 0 : i32
    return %c0_i32, %c0_i32_0 : i32, i32
  }
  func.func @transform_37(%arg0: i32, %arg1: memref<2xi32, #tpu.memory_space<smem>>) -> (i32, i32) {
    %c0_i32 = arith.constant 0 : i32
    %c0_i32_0 = arith.constant 0 : i32
    %c0_i32_1 = arith.constant 0 : i32
    return %c0_i32, %c0_i32_0 : i32, i32
  }
  func.func @transform_38(%arg0: i32, %arg1: memref<2xi32, #tpu.memory_space<smem>>) -> (i32, i32, i32) {
    %c0_i32 = arith.constant 0 : i32
    %c0_i32_0 = arith.constant 0 : i32
    %c0_i32_1 = arith.constant 0 : i32
    return %arg0, %c0_i32, %c0_i32_0 : i32, i32, i32
  }
}

</mosaic_0001>

<bundles_post_ra>
// kernel: style_transformer_forward.1
= control target key start
LH: loop header
LB: loop body
LE: loop exit
PB: predicated region body
PF: predicated region fallthrough
CT: control target
= control target key end

     0   :  { %s7659_s6 = smov 1   ;;  %s7660_s10 = smov 2   ;;  %s9019_s0 = inlined_call_operand.smem [shape: u32[40], index: -1, kind: input, shape index: {}] }
   0x1   :  { %s7724_s5 = sld [smem:[%s9019_s0]]   ;;  %s7661_s14 = smov 3  }
   0x2   :  { %s7729_s9 = sld [smem:[%s9019_s0 + %s7659_s6]]   ;;  %s7662_s18 = smov 4  }
   0x3   :  { %s7734_s13 = sld [smem:[%s9019_s0 + %s7660_s10]]   ;;  %s7663_s22 = smov 5  }
   0x4   :  { %s7739_s17 = sld [smem:[%s9019_s0 + %s7661_s14]]   ;;  %s7664_s26 = smov 6  }
   0x5   :  { %s7744_s21 = sld [smem:[%s9019_s0 + %s7662_s18]]   ;;  %s7665_s30 = smov 7  }
   0x6   :  { %s7749_s25 = sld [smem:[%s9019_s0 + %s7663_s22]]   ;;  %s7666_s4 = smov 8  }
   0x7   :  { %s7754_s29 = sld [smem:[%s9019_s0 + %s7664_s26]]   ;;  %s7667_s10 = smov 9  }
   0x8   :  { %9083 = sst [smem:[#allocation8_spill]] %s7729_s9  ;;  %s7668_s15 = smov 10  }
   0x9   :  { %9084 = sst [smem:[#allocation9_spill]] %s7734_s13  ;;  %s7669_s20 = smov 11  }
   0xa   :  { %9085 = sst [smem:[#allocation10_spill]] %s7739_s17  ;;  %s7670_s26 = smov 12  }
   0xb   :  { %9086 = sst [smem:[#allocation11_spill]] %s7744_s21  ;;  %s7671_s1 = smov 13  }
   0xc   :  { %9087 = sst [smem:[#allocation12_spill]] %s7749_s25  ;;  %s7672_s7 = smov 14  }
   0xd   :  { %9088 = sst [smem:[#allocation13_spill]] %s7754_s29  ;;  %s7674_s22 = smov 16  }
   0xe   :  { %s7759_s3 = sld [smem:[%s9019_s0 + %s7665_s30]]   ;;  %s7675_s28 = smov 17  }
   0xf   :  { %s7764_s8 = sld [smem:[%s9019_s0 + %s7666_s4]]  }
  0x10   :  { %s7769_s14 = sld [smem:[%s9019_s0 + %s7667_s10]]  }
  0x11   :  { %s7774_s19 = sld [smem:[%s9019_s0 + %s7668_s15]]   ;;  %s7673_s15 = smov 15  }
  0x12   :  { %s7779_s24 = sld [smem:[%s9019_s0 + %s7669_s20]]  }
  0x13   :  { %s7784_s30 = sld [smem:[%s9019_s0 + %s7670_s26]]  }
  0x14   :  { %9089 = sst [smem:[#allocation14_spill]] %s7759_s3 }
  0x15   :  { %9090 = sst [smem:[#allocation15_spill]] %s7764_s8 }
  0x16   :  { %9091 = sst [smem:[#allocation16_spill]] %s7769_s14 }
  0x17   :  { %9092 = sst [smem:[#allocation17_spill]] %s7774_s19 }
  0x18   :  { %9093 = sst [smem:[#allocation18_spill]] %s7779_s24 }
  0x19   :  { %9094 = sst [smem:[#allocation19_spill]] %s7784_s30 }
  0x1a   :  { %s7789_s6 = sld [smem:[%s9019_s0 + %s7671_s1]]  }
  0x1b   :  { %s7794_s12 = sld [smem:[%s9019_s0 + %s7672_s7]]   ;;  %s7676_s7 = smov 18  }
  0x1c   :  { %s7799_s20 = sld [smem:[%s9019_s0 + %s7673_s15]]   ;;  %s7677_s15 = smov 19  }
  0x1d   :  { %s7804_s27 = sld [smem:[%s9019_s0 + %s7674_s22]]   ;;  %s7678_s22 = smov 20  }
  0x1e   :  { %s7809_s4 = sld [smem:[%s9019_s0 + %s7675_s28]]   ;;  %s7679_s28 = smov 21  }
  0x1f   :  { %s7814_s13 = sld [smem:[%s9019_s0 + %s7676_s7]]   ;;  %s7680_s7 = smov 22  }
  0x20   :  { %9095 = sst [smem:[#allocation20_spill]] %s7789_s6 }
  0x21   :  { %9096 = sst [smem:[#allocation21_spill]] %s7794_s12 }
  0x22   :  { %9097 = sst [smem:[#allocation22_spill]] %s7799_s20 }
  0x23   :  { %9098 = sst [smem:[#allocation23_spill]] %s7804_s27 }
  0x24   :  { %9099 = sst [smem:[#allocation24_spill]] %s7809_s4 }
  0x25   :  { %9100 = sst [smem:[#allocation25_spill]] %s7814_s13 }
  0x26   :  { %s7819_s20 = sld [smem:[%s9019_s0 + %s7677_s15]]   ;;  %s7681_s15 = smov 23  }
  0x27   :  { %s7824_s27 = sld [smem:[%s9019_s0 + %s7678_s22]]   ;;  %s7682_s22 = smov 24  }
  0x28   :  { %s7829_s4 = sld [smem:[%s9019_s0 + %s7679_s28]]   ;;  %s7683_s28 = smov 25  }
  0x29   :  { %s7834_s13 = sld [smem:[%s9019_s0 + %s7680_s7]]   ;;  %s7684_s7 = smov 26  }
  0x2c   :  { %9101 = sst [smem:[#allocation26_spill]] %s7819_s20 }
  0x2d   :  { %9102 = sst [smem:[#allocation27_spill]] %s7824_s27 }
  0x2e   :  { %9103 = sst [smem:[#allocation28_spill]] %s7829_s4 }
  0x2f   :  { %9104 = sst [smem:[#allocation29_spill]] %s7834_s13 }
  0x30   :  { %s7839_s20 = sld [smem:[%s9019_s0 + %s7681_s15]]   ;;  %s7685_s15 = smov 27  }
  0x31   :  { %s7844_s27 = sld [smem:[%s9019_s0 + %s7682_s22]]   ;;  %s7686_s22 = smov 28  }
  0x32   :  { %s7849_s4 = sld [smem:[%s9019_s0 + %s7683_s28]]   ;;  %s7687_s28 = smov 29  }
  0x33   :  { %s7854_s13 = sld [smem:[%s9019_s0 + %s7684_s7]]   ;;  %s7688_s7 = smov 30  }
  0x36   :  { %9105 = sst [smem:[#allocation30_spill]] %s7839_s20 }
  0x37   :  { %9106 = sst [smem:[#allocation31_spill]] %s7844_s27 }
  0x38   :  { %9107 = sst [smem:[#allocation32_spill]] %s7849_s4 }
  0x39   :  { %9108 = sst [smem:[#allocation33_spill]] %s7854_s13 }
  0x3a   :  { %s7859_s20 = sld [smem:[%s9019_s0 + %s7685_s15]]   ;;  %s7689_s15 = smov 31  }
  0x3b   :  { %s7864_s27 = sld [smem:[%s9019_s0 + %s7686_s22]]   ;;  %s7690_s22 = smov 32  }
  0x3c   :  { %s7869_s4 = sld [smem:[%s9019_s0 + %s7687_s28]]   ;;  %s7691_s28 = smov 33  }
  0x3d   :  { %s7874_s13 = sld [smem:[%s9019_s0 + %s7688_s7]]   ;;  %s7692_s7 = smov 34  }
  0x3e   :  { %s7884_s1 = sld [smem:[%s9019_s0 + %s7690_s22]]   ;;  %s7694_s22 = smov 36  }
  0x3f   :  { %s7889_s10 = sld [smem:[%s9019_s0 + %s7691_s28]]  }
  0x40   :  { %9109 = sst [smem:[#allocation34_spill]] %s7859_s20 }
  0x41   :  { %9110 = sst [smem:[#allocation35_spill]] %s7864_s27 }
  0x42   :  { %9111 = sst [smem:[#allocation36_spill]] %s7869_s4  ;;  %s7695_s4 = smov 37  }
  0x43   :  { %9112 = sst [smem:[#allocation37_spill]] %s7874_s13  ;;  %s7696_s13 = smov 38  }
  0x44   :  { %s7879_s20 = sld [smem:[%s9019_s0 + %s7689_s15]]   ;;  %s7693_s15 = smov 35  }
  0x45   :  { %9114 = sst [smem:[#allocation39_spill]] %s7884_s1  ;;  %s84_s1 = sshll.u32 %s7724_s5, 4  ;;  %s85_s1 = int_to_ptr.vmem [resolvable:$true] %s84_s1 }
  0x46   :  { %9115 = sst [smem:[#allocation40_spill]] %s7889_s10  ;;  %p7586_p1 = scmp.lt.s32.totalorder %s85_s1, %s85_s1 }
  0x47   :  { %s7894_s16 = sld [smem:[%s9019_s0 + %s7692_s7]]  }
  0x48   :  { %s7899_s23 = sld [smem:[%s9019_s0 + %s7693_s15]]  }
  0x49   :  { %s7904_s27 = sld [smem:[%s9019_s0 + %s7694_s22]]   ;;  %s7581_s22 = scalar_lea.vmem %s85_s1, 16 }
  0x4a   :  { %9113 = sst [smem:[#allocation38_spill]] %s7879_s20  ;;  %s7697_s20 = smov 39  }
  0x4b   :  { %s7909_s10 = sld [smem:[%s9019_s0 + %s7695_s4]]   ;;  %p7582_p0 = scmp.ne.s32.totalorder %s85_s1, %s7581_s22 }
  0x4c   :  { %p7587_p2 = scmp.lt.s32.totalorder %s7581_s22, %s7581_s22 }
  0x4d   :  { %9116 = sst [smem:[#allocation41_spill]] %s7894_s16 }
  0x4e   :  { %9117 = sst [smem:[#allocation42_spill]] %s7899_s23  ;;  %p7588_p3 = por %p7587_p2, %p7586_p1 }
  0x4f   :  { %9118 = sst [smem:[#allocation43_spill]] %s7904_s27 }
  0x50   :  { %s7914_s16 = sld [smem:[%s9019_s0 + %s7696_s13]]   ;;  %p7589_p4 = pnand %p7588_p3, %p7582_p0 }
  0x51   :  { %9119 = sst [smem:[#allocation44_spill]] %s7909_s10 }
  0x52   :  { %s7919_s23 = sld [smem:[%s9019_s0 + %s7697_s20]]  }
  0x56   :  { %9120 = sst [smem:[#allocation45_spill]] %s7914_s16 }
  0x58   :  { %9121 = sst [smem:[#allocation46_spill]] %s7919_s23 }
  0x59   :  { %7592 = shalt.err (!%p7589_p4)  }
  0x5a   :  { %s7698_s26 = smov [#allocation3]  }
  0x5b   :  { %87 = dma.vmem_to_smem %s85_s1, 16, %s7698_s26, [#allocation2] }
  0x5c   :  { %7637 = dma.done.wait [#allocation2], 16 }
  0x5d   :  { %7638 = vsyncadd [#allocation2], 4294967280 }
  0x5e   :  { %89 = sfence }
  0x5f   :  { %90 = vsyncpa [#allocation5], 0 }
  0x60   :  { %92 = vsyncpa [#allocation5 + $0x1], 0  ;;  %s7922_s4 = smov 0   ;;  %s7924_s0 = smov 0  }
  0x61   :  { %s7926_s5 = smov 0   ;;  %s7928_s28 = smov 0  }
  0x62 LB: > { %s9122_s12 = sld [smem:[#allocation21_spill]]  ;;  %s9123_s24 = sld [smem:[#allocation18_spill]]  ;;  %s7645_s4 = sphi %s7922_s4, %s9210_s4   ;;  %s7657_s28 = sphi %s7928_s28, %s9207_s28   ;;  %s7653_s5 = sphi %s7926_s5, %s9209_s5   ;;  %s7649_s0 = sphi %s7924_s0, %s9211_s0  }
  0x63   : > { %s9124_s6 = sld [smem:[#allocation20_spill]]  ;;  %s9125_s14 = sld [smem:[#allocation16_spill]] }
  0x64   : > { %s9126_s3 = sld [smem:[#allocation14_spill]]  ;;  %9127 = sst [smem:[#allocation47_spill]] %s7645_s4 }
  0x65   : > { %9128 = sst [smem:[#allocation48_spill]] %s7653_s5  ;;  %s7943_s2 = sadd.s32 4294967295, %s7657_s28  }
  0x66   : > { %9129 = sst [smem:[#allocation49_spill]] %s7657_s28  ;;  %s6287_s13 = sadd.s32 4294967294, %s7657_s28  }
  0x67   : > { %9130 = sst [smem:[#allocation50_spill]] %s7943_s2  ;;  %s7947_s7 = sadd.s32 1, %s7657_s28  }
  0x68   : > { %9131 = sst [smem:[#allocation51_spill]] %s7947_s7  ;;  %s913_s11 = sadd.s32 1, %s7653_s5 }
  0x69   : > { %s910_s20 = ssub.s32 %s7657_s28, %s7947_s7  ;;  %p923_p5 = scmp.ne.s32.totalorder %s7653_s5, %s7649_s0 }
  0x6a   : > { %p911_p6 = scmp.eq.s32.totalorder %s910_s20, 0  ;;  %p924_p7 = scmp.eq.s32.totalorder %s7943_s2, 1 }
  0x6b   : > { %p929_p8 = scmp.ne.s32.totalorder %s7649_s0, %s7645_s4  ;;  %p930_p9 = scmp.eq.s32.totalorder %s6287_s13, 1 }
  0x6c   : > { %s7958_s15 = scalar_select %p911_p6, %s7653_s5, %s913_s11  }
  0x6d   : > { %p7960_p10 = por %p924_p7, %p923_p5  ;;  %p7964_p11 = por %p930_p9, %p929_p8 }
  0x6e   : > { %9132 = sst [smem:[#allocation52_spill]] %s7958_s15  ;;  %p6290_p12 = scmp.ge.s32.totalorder %s7657_s28, 1 }
  0x6f   : > { %s9133_s18 = scalar_select %p7960_p10, 1, 0 }
  0x70   : > { %s9135_s1 = scalar_select %p7964_p11, 1, 0 }
  0x71   : > { %9134 = sst [smem:[#allocation53_spill]] %s9133_s18  ;;  %p1071_p13 = scmp.lt.s32.totalorder %s7657_s28, 3 }
  0x72   : > { %9136 = sst [smem:[#allocation54_spill]] %s9135_s1 }
  0x73   : > { %p1072_p0 = pnand %p6290_p12, %p1071_p13 }
  0x74   : > { %s9137_s9 = sld [smem:[#allocation8_spill]] (!%p1072_p0)  ;;  %p1169_p1 = scmp.lt.s32.totalorder (!%p1072_p0), %s7943_s2, 1  ;;  %vm1193_vm0 = vcmask (!%p1072_p0), 261120   ;;  %v7336_v14 = vld [vmem:[%s9126_s3] sm:$0xff] (!%p1072_p0)   ;;  %v7699_v15 = vmov (!%p1072_p0), 0.0   ;;  %vm7700_vm1 = vmmov (!%p1072_p0), 0   ;;  %v1183_v21 = vlaneseq (!%p1072_p0) }
  0x75   : > { %1075 = sbr.rel (%p1072_p0) target bundleno = 15447 (0x3c57), region = 172  ;;  %6691 = vmatprep.subr.bf16.mxu1 (!%p1072_p0), %v7699_v15  ;;  %6695 = vmatprep.mubr.msk.bf16.mxu1 (!%p1072_p0), %vm7700_vm1, %v7699_v15  ;;  %v7337_v16 = vld [vmem:[%s9126_s3 + $0x8] sm:$0xff] (!%p1072_p0)   ;;  %s9138_s17 = sld [smem:[#allocation10_spill]] (!%p1072_p0)  ;;  %vm1308_vm2 = vcmask (!%p1072_p0), 64512   ;;  %vm1362_vm4 = vcmask (!%p1072_p0), 130048   ;;  %vm1836_vm5 = vcmask (!%p1072_p0), 195584  }
  0x76   : > { %6692 = vmatpush3.bf16.msra.mxu1 (!%p1072_p0), %v7336_v14  ;;  %6705 = vmatprep.subr.bf16.mxu0 (!%p1072_p0), %v7699_v15  ;;  %s9139_s21 = sld [smem:[#allocation11_spill]] (!%p1072_p0)  ;;  %v7999_v24 = vshrl.u32 (!%p1072_p0), %v1183_v21, 7  ;;  %s9140_s8 = sld [smem:[#allocation15_spill]] (!%p1072_p0)  ;;  %v8061_v59 = vand.u32 (!%p1072_p0), 127, %v1183_v21  ;;  %vm3252_vm7 = vcmask (!%p1072_p0), 1043456   ;;  %vm6149_vm8 = vcmask (!%p1072_p0), 523264  }
  0x77   : > { %6693 = vmatprep.subr.bf16.mxu1 (!%p1072_p0), %v7699_v15  ;;  %6707 = vmatprep.mubr.msk.bf16.mxu0 (!%p1072_p0), %vm7700_vm1, %v7699_v15  ;;  %s9038_s11 = smov (!%p1072_p0), 88   ;;  %s9062_s20 = smov (!%p1072_p0), 96  }
  0x78   : > { %v8002_v25 = vsub.s32 (!%p1072_p0), 0, %v7999_v24  ;;  %s9143_s19 = sld [smem:[#allocation17_spill]] (!%p1072_p0)  ;;  %s9144_s25 = sld [smem:[#allocation12_spill]] (!%p1072_p0)  ;;  %vm8436_vm6 = vcmp.gt.s32.totalorder (!%p1072_p0), %v8061_v59, %v7999_v24 }
  0x79   : > { %s9145_s29 = sld [smem:[#allocation13_spill]] (!%p1072_p0)  ;;  %s9146_s30 = sld [smem:[#allocation19_spill]] (!%p1072_p0) }
  0x7a   : > { %6694 = vmatpush3.bf16.msra.mxu1 (!%p1072_p0), %v7337_v16  ;;  %s9167_s15 = smov (!%p1072_p0), 48   ;;  %s9168_s5 = sld [smem:[#allocation32_spill]] (!%p1072_p0) }
  0x7b   : > { %6699 = vmatprep.subr.bf16.mxu1 (!%p1072_p0), %v7699_v15  ;;  %v8005_v26 = vld [vmem:[%s9138_s17] sm:$0x3] (!%p1072_p0)  ;;  %s9153_s17 = smov (!%p1072_p0), 40   ;;  %s9174_s4 = sld [smem:[#allocation23_spill]] (!%p1072_p0) }
  0x7c   : > { %s7972_s22 = scalar_select %p1169_p1, %s7943_s2, 1  ;;  %v1224_v29 = vrot.slane %v8005_v26, %v8002_v25  ;;  %v8010_v30 = vld [vmem:[%s9139_s21] sm:$0x3] }
  0x7d   : > { %v1230_v34 = vrot.slane %v8010_v30, %v8002_v25  ;;  %v8018_v39 = vld [vmem:[%s9140_s8] sm:$0x3]  ;;  %s9060_s8 = smov 80   ;;  %s9156_s21 = smov 24  }
  0x7e   : > { %s6501_s26 = sshll.u32 %s7972_s22, 4  ;;  %v1247_v40 = vrot.slane %v8018_v39, %v8002_v25  ;;  %s9175_s28 = sld [smem:[#allocation35_spill]] }
  0x7f   : > { %s1173_s13 = scalar_lea.vmem %s9137_s9, %s6501_s26  ;;  %s9058_s26 = smov 120  }
  0x80   : > { %v7976_v0 = vld [vmem:[%s1173_s13] sm:$0xff]  ;;  %v7978_v1 = vld [vmem:[%s1173_s13 + $0x8] sm:$0xff]  ;;  %s9042_s13 = smov 112   ;;  %s9040_s9 = smov 104  }
  0x81   : > { %v1194_v2 = vsel %vm1193_vm0, %v7976_v0, 0.0  ;;  %v1197_v3 = vsel %vm1193_vm0, %v7978_v1, 0.0  ;;  %s9169_s7 = smov %s9168_s5  ;;  %s9177_s23 = sld [smem:[#allocation26_spill]] }
  0x82   : > { %1195 = vadd.xlane.f32.xlu0 %v1194_v2 }
  0x84   : > { %s9176_s18 = smov %s9175_s28 }
  0x86   : > { %1198 = vadd.xlane.f32.xlu0 %v1197_v3 }
 0x10f   : > { %v1196_v4 = vpop.xlane.xlu0 %1195 }
 0x110   : > { %v1201_v5 = vmul.f32 0.03125, %v1196_v4 }
 0x112   : > { %v1203_v6 = vsub.f32 %v7976_v0, %v1201_v5 }
 0x113   : > { %v1199_v7 = vpop.xlane.xlu0 %1198 }
 0x114   : > { %v1202_v8 = vmul.f32 0.03125, %v1199_v7  ;;  %v1205_v9 = vmul.f32 %v1203_v6, %v1203_v6 }
 0x116   : > { %v1204_v10 = vsub.f32 %v7978_v1, %v1202_v8  ;;  %v1207_v11 = vsel %vm1193_vm0, %v1205_v9, 0.0 }
 0x117   : > { %1208 = vadd.xlane.f32.xlu1 %v1207_v11 }
 0x118   : > { %v1206_v12 = vmul.f32 %v1204_v10, %v1204_v10 }
 0x11a   : > { %v1210_v13 = vsel %vm1193_vm0, %v1206_v12, 0.0 }
 0x11b   : > { %1211 = vadd.xlane.f32.xlu1 %v1210_v13 }
 0x1a4   : > { %v1209_v17 = vpop.xlane.xlu1 %1208 }
 0x1a5   : > { %v1213_v18 = vmul.f32 0.03125, %v1209_v17 }
 0x1a7   : > { %v1215_v19 = vadd.f32 1e-05, %v1213_v18 }
 0x1a8   : > { %v1212_v20 = vpop.xlane.xlu1 %1211 }
 0x1a9   : > { %7402 = vrsqrt.f32 %v1215_v19  ;;  %v1214_v22 = vmul.f32 0.03125, %v1212_v20 }
 0x1ab   : > { %v1216_v23 = vadd.f32 1e-05, %v1214_v22 }
 0x1ad   : > { %7404 = vrsqrt.f32 %v1216_v23 }
 0x1b3   : > { %v7403_v27 = vpop.eup %7402 }
 0x1b4   : > { %v1219_v28 = vmul.f32 %v7403_v27, %v1203_v6 }
 0x1b6   : > { %v1225_v33 = vmul.f32 %v1224_v29, %v1219_v28 }
 0x1b7   : > { %v7405_v31 = vpop.eup %7404 }
 0x1b8   : > { %v1220_v32 = vmul.f32 %v7405_v31, %v1204_v10  ;;  %v1231_v36 = vadd.f32 %v1230_v34, %v1225_v33 }
 0x1ba   : > { %v1226_v35 = vmul.f32 %v1224_v29, %v1220_v32 }
 0x1bc   : > { %v1232_v37 = vadd.f32 %v1230_v34, %v1226_v35 }
 0x1be   : > { %v1243_v38 = vpack.c.bf16 %v1232_v37, %v1231_v36 }
 0x1c0   : > { %6696 = vmatmul.mubr.msk.bf16.vlgmr.msra.gmra.mrb[0].mxu1 %vm1193_vm0, %v1243_v38 }
 0x1c1   : > { %6701 = vmatprep.mubr.msk.bf16.mxu1 %vm7700_vm1, %v7699_v15 }
 0x293   : > { %v1297_v41 = vpop.f32.mrb[0].mxu1 }
 0x294   : > { %v6697_v42 = vpop.f32.mrb[1].mxu1  ;;  %v1298_v44 = vadd.f32 %v1297_v41, %v1247_v40 }
 0x295   : > { %v1300_v43 = vpop.f32.mrb[2].mxu1 }
 0x296   : > { %v1301_v45 = vadd.f32 %v1300_v43, %v1247_v40  ;;  %v6698_v46 = vpop.f32.mrb[3].mxu1 }
 0x298   : > { %v8022_v47 = vpack.c.bf16 %v1301_v45, %v1298_v44 }
 0x29a   : > { %1435 = vrot.lane.b32.xlu1 %v8022_v47, %s9038_s11  ;;  %1306 = vrot.lane.b32.xlu0 %v8022_v47, %s9062_s20  ;;  %s9046_s11 = smov 72  }
 0x29e   : > { %1433 = vrot.lane.b32.xlu1 %v8022_v47, %s9058_s26  ;;  %1558 = vrot.lane.b32.xlu0 %v8022_v47, %s9042_s13 }
 0x2a2   : > { %1560 = vrot.lane.b32.xlu1 %v8022_v47, %s9060_s8  ;;  %1683 = vrot.lane.b32.xlu0 %v8022_v47, %s9040_s9  ;;  %s1179_s9 = sld [smem:[#allocation3 + %s7943_s2]] }
 0x2a3   : > { %s9178_s2 = sld [smem:[#allocation27_spill]] }
 0x2a6   : > { %1685 = vrot.lane.b32.xlu1 %v8022_v47, %s9046_s11  ;;  %s9050_s11 = smov 56  }
 0x2a8   : > { %s1185_s13 = sadd.s32 1, %s1179_s9  ;;  %s9044_s9 = smov 64  }
 0x2a9   : > { %v1186_v60 = vstv %s1185_s13  ;;  %s9065_s13 = smov 48  }
 0x2aa   : > { %vm8064_vm3 = vcmp.ge.s32.totalorder %v8061_v59, %v1186_v60 }
 0x30c   : > { %v1307_v48 = vpop.permute.xlu0 %1306  ;;  %v1436_v50 = vpop.permute.xlu1 %1435 }
 0x30d   : > { %v1313_v49 = vsel %vm1308_vm2, %v1307_v48, 0  ;;  %v1441_v52 = vsel %vm1308_vm2, %v1436_v50, 0 }
 0x30e   : > { %6700 = vmatpush3.bf16.xpose.msra.mxu1 %v1313_v49 }
 0x30f   : > { %6711 = vmatprep.subr.bf16.mxu1 %v7699_v15 }
 0x310   : > { %v1434_v51 = vpop.permute.xlu1 %1433  ;;  %v1559_v56 = vpop.permute.xlu0 %1558 }
 0x314   : > { %v1561_v53 = vpop.permute.xlu1 %1560  ;;  %v1684_v58 = vpop.permute.xlu0 %1683 }
 0x315   : > { %6702 = vmatmul.mubr.msk.bf16.vlgmr.msra.gmra.mrb[4].mxu1 %vm1308_vm2, %v8022_v47  ;;  %v1566_v54 = vsel %vm1308_vm2, %v1561_v53, 0 }
 0x316   : > { %6712 = vmatpush3.bf16.xpose.msra.mxu1 %v1441_v52  ;;  %6713 = vmatprep.mubr.msk.bf16.mxu1 %vm7700_vm1, %v7699_v15 }
 0x317   : > { %6723 = vmatprep.subr.bf16.mxu1 %v7699_v15 }
 0x318   : > { %v1686_v55 = vpop.permute.xlu1 %1685 }
 0x319   : > { %v1691_v57 = vsel %vm1308_vm2, %v1686_v55, 0 }
 0x31d   : > { %6714 = vmatmul.mubr.msk.bf16.vlgmr.msra.gmra.mrb[8].mxu1 %vm1308_vm2, %v1434_v51 }
 0x31e   : > { %6724 = vmatpush3.bf16.xpose.msra.mxu1 %v1566_v54  ;;  %6725 = vmatprep.mubr.msk.bf16.mxu1 %vm7700_vm1, %v7699_v15 }
 0x31f   : > { %6735 = vmatprep.subr.bf16.mxu1 %v7699_v15 }
 0x325   : > { %6726 = vmatmul.mubr.msk.bf16.vlgmr.msra.gmra.mrb[12].mxu1 %vm1308_vm2, %v1559_v56 }
 0x326   : > { %6736 = vmatpush3.bf16.xpose.msra.mxu1 %v1691_v57  ;;  %6737 = vmatprep.mubr.msk.bf16.mxu1 %vm7700_vm1, %v7699_v15 }
 0x327   : > { %6747 = vmatprep.subr.bf16.mxu1 %v7699_v15 }
 0x32d   : > { %6738 = vmatmul.mubr.msk.bf16.vlgmr.msra.gmra.mrb[16].mxu1 %vm1308_vm2, %v1684_v58 }
 0x32e   : > { %6751 = vmatprep.mubr.msk.bf16.mxu1 %vm7700_vm1, %v7699_v15 }
 0x3e8   : > { %v1349_v61 = vpop.f32.mrb[4].mxu1 }
 0x3e9   : > { %v1356_v63 = vmul.f32 0.35355338, %v1349_v61  ;;  %v6703_v2 = vpop.f32.mrb[5].mxu1 }
 0x3ea   : > { %v1352_v3 = vpop.f32.mrb[6].mxu1 }
 0x3eb   : > { %v1357_v4 = vmul.f32 0.35355338, %v1352_v3  ;;  %v6704_v5 = vpop.f32.mrb[7].mxu1  ;;  %v1360_v6 = vsel %vm8064_vm3, -1e+30, %v1356_v63 }
 0x3ec   : > { %v1363_v7 = vsel %vm1362_vm4, %v1360_v6, -inf }
 0x3ed   : > { %1364 = vmax.xlane.f32.xlu1 %v1363_v7  ;;  %v1361_v8 = vsel %vm8064_vm3, -1e+30, %v1357_v4 }
 0x3ee   : > { %v1366_v9 = vsel %vm1362_vm4, %v1361_v8, -inf }
 0x3ef   : > { %1367 = vmax.xlane.f32.xlu0 %v1366_v9 }
 0x3f0   : > { %v1477_v10 = vpop.f32.mrb[8].mxu1 }
 0x3f1   : > { %v1484_v11 = vmul.f32 0.35355338, %v1477_v10  ;;  %v6715_v12 = vpop.f32.mrb[9].mxu1 }
 0x3f2   : > { %v1480_v13 = vpop.f32.mrb[10].mxu1 }
 0x3f3   : > { %v1485_v14 = vmul.f32 0.35355338, %v1480_v13  ;;  %v6716_v16 = vpop.f32.mrb[11].mxu1  ;;  %v1486_v17 = vsel %vm8064_vm3, -1e+30, %v1484_v11 }
 0x3f4   : > { %v1488_v18 = vsel %vm1362_vm4, %v1486_v17, -inf }
 0x3f5   : > { %1489 = vmax.xlane.f32.xlu0 %v1488_v18  ;;  %v1487_v19 = vsel %vm8064_vm3, -1e+30, %v1485_v14 }
 0x3f6   : > { %v1491_v21 = vsel %vm1362_vm4, %v1487_v19, -inf }
 0x3f8   : > { %v1602_v20 = vpop.f32.mrb[12].mxu1 }
 0x3f9   : > { %v1609_v22 = vmul.f32 0.35355338, %v1602_v20  ;;  %1492 = vmax.xlane.f32.xlu0 %v1491_v21  ;;  %v6727_v23 = vpop.f32.mrb[13].mxu1 }
 0x3fa   : > { %v1605_v27 = vpop.f32.mrb[14].mxu1 }
 0x3fb   : > { %v1610_v28 = vmul.f32 0.35355338, %v1605_v27  ;;  %v6728_v29 = vpop.f32.mrb[15].mxu1  ;;  %v1611_v31 = vsel %vm8064_vm3, -1e+30, %v1609_v22 }
 0x3fc   : > { %v1613_v32 = vsel %vm1362_vm4, %v1611_v31, -inf }
 0x3fd   : > { %1614 = vmax.xlane.f32.xlu1 %v1613_v32  ;;  %v1612_v33 = vsel %vm8064_vm3, -1e+30, %v1610_v28 }
 0x3fe   : > { %v1616_v34 = vsel %vm1362_vm4, %v1612_v33, -inf }
 0x3ff   : > { %1617 = vmax.xlane.f32.xlu0 %v1616_v34 }
 0x400   : > { %v1727_v35 = vpop.f32.mrb[16].mxu1 }
 0x401   : > { %v1734_v36 = vmul.f32 0.35355338, %v1727_v35  ;;  %v6739_v37 = vpop.f32.mrb[17].mxu1 }
 0x402   : > { %v1730_v38 = vpop.f32.mrb[18].mxu1 }
 0x403   : > { %v1735_v40 = vmul.f32 0.35355338, %v1730_v38  ;;  %v6740_v41 = vpop.f32.mrb[19].mxu1  ;;  %v1736_v42 = vsel %vm8064_vm3, -1e+30, %v1734_v36 }
 0x404   : > { %v1738_v43 = vsel %vm1362_vm4, %v1736_v42, -inf }
 0x405   : > { %1739 = vmax.xlane.f32.xlu1 %v1738_v43  ;;  %v1737_v44 = vsel %vm8064_vm3, -1e+30, %v1735_v40 }
 0x406   : > { %v1741_v45 = vsel %vm1362_vm4, %v1737_v44, -inf }
 0x407   : > { %1742 = vmax.xlane.f32.xlu0 %v1741_v45 }
 0x416   : > { %1386 = vrot.lane.b32.xlu1 %v8022_v47, %s9044_s9  ;;  %s9048_s9 = smov 40  }
 0x47a   : > { %v1365_v46 = vpop.xlane.xlu1 %1364 }
 0x47b   : > { %v1369_v48 = vsub.f32 %v1360_v6, %v1365_v46 }
 0x47c   : > { %v1368_v49 = vpop.xlane.xlu0 %1367 }
 0x47d   : > { %v1371_v50 = vmul.f32 1.442695, %v1369_v48  ;;  %v1370_v51 = vsub.f32 %v1361_v8, %v1368_v49 }
 0x47f   : > { %7406 = vpow2.f32 %v1371_v50  ;;  %v1373_v52 = vmul.f32 1.442695, %v1370_v51 }
 0x481   : > { %7408 = vpow2.f32 %v1373_v52 }
 0x482   : > { %v1490_v53 = vpop.xlane.xlu0 %1489 }
 0x483   : > { %v1494_v54 = vsub.f32 %v1486_v17, %v1490_v53 }
 0x485   : > { %v1496_v55 = vmul.f32 1.442695, %v1494_v54 }
 0x486   : > { %v1493_v56 = vpop.xlane.xlu0 %1492 }
 0x487   : > { %7410 = vpow2.f32 %v1496_v55  ;;  %v1495_v57 = vsub.f32 %v1487_v19, %v1493_v56 }
 0x489   : > { %v7407_v58 = vpop.eup %7406  ;;  %v1498_v60 = vmul.f32 1.442695, %v1495_v57 }
 0x48a   : > { %v1615_v61 = vpop.xlane.xlu1 %1614  ;;  %v1375_v63 = vsel %vm1362_vm4, %v7407_v58, 0.0 }
 0x48b   : > { %v7409_v2 = vpop.eup %7408  ;;  %7412 = vpow2.f32 %v1498_v60  ;;  %v1619_v3 = vsub.f32 %v1611_v31, %v1615_v61  ;;  %1376 = vadd.xlane.f32.xlu1 %v1375_v63 }
 0x48c   : > { %v1618_v4 = vpop.xlane.xlu0 %1617  ;;  %v1378_v5 = vsel %vm1362_vm4, %v7409_v2, 0.0 }
 0x48d   : > { %v1621_v6 = vmul.f32 1.442695, %v1619_v3  ;;  %v1620_v7 = vsub.f32 %v1612_v33, %v1618_v4  ;;  %1379 = vadd.xlane.f32.xlu0 %v1378_v5 }
 0x48f   : > { %7414 = vpow2.f32 %v1621_v6  ;;  %v1623_v8 = vmul.f32 1.442695, %v1620_v7 }
 0x491   : > { %v7411_v9 = vpop.eup %7410  ;;  %7416 = vpow2.f32 %v1623_v8 }
 0x492   : > { %v1740_v10 = vpop.xlane.xlu1 %1739  ;;  %v1500_v11 = vsel %vm1362_vm4, %v7411_v9, 0.0 }
 0x493   : > { %v1744_v12 = vsub.f32 %v1736_v42, %v1740_v10  ;;  %1501 = vadd.xlane.f32.xlu1 %v1500_v11 }
 0x494   : > { %v1743_v13 = vpop.xlane.xlu0 %1742 }
 0x495   : > { %v7413_v14 = vpop.eup %7412  ;;  %v1746_v16 = vmul.f32 1.442695, %v1744_v12  ;;  %v1745_v17 = vsub.f32 %v1737_v44, %v1743_v13  ;;  %v7338_v12 = vld [vmem:[%s9125_s14] sm:$0xff]  }
 0x496   : > { %v1387_v18 = vpop.permute.xlu1 %1386  ;;  %v1503_v19 = vsel %vm1362_vm4, %v7413_v14, 0.0  ;;  %6748 = vmatpush3.bf16.msra.mxu1 %v7338_v12  ;;  %v7344_v12 = vld [vmem:[%s9124_s6 + $0x10] sm:$0xff]  }
 0x497   : > { %7418 = vpow2.f32 %v1746_v16  ;;  %v1748_v20 = vmul.f32 1.442695, %v1745_v17  ;;  %6706 = vmatpush3.bf16.msra.mxu0 %v1387_v18  ;;  %1504 = vadd.xlane.f32.xlu0 %v1503_v19  ;;  %v7339_v18 = vld [vmem:[%s9125_s14 + $0x8] sm:$0xff]  }
 0x498   : > { %6717 = vmatprep.subr.bf16.mxu0 %v7699_v15  ;;  %6749 = vmatprep.subr.bf16.mxu1 %v7699_v15 }
 0x499   : > { %v7415_v21 = vpop.eup %7414  ;;  %7420 = vpow2.f32 %v1748_v20 }
 0x49a   : > { %v1625_v22 = vsel %vm1362_vm4, %v7415_v21, 0.0  ;;  %6750 = vmatpush3.bf16.msra.mxu1 %v7339_v18 }
 0x49b   : > { %v7417_v23 = vpop.eup %7416  ;;  %1626 = vadd.xlane.f32.xlu1 %v1625_v22  ;;  %6763 = vmatprep.subr.bf16.mxu1 %v7699_v15 }
 0x49c   : > { %v1628_v27 = vsel %vm1362_vm4, %v7417_v23, 0.0 }
 0x49d   : > { %1629 = vadd.xlane.f32.xlu0 %v1628_v27 }
 0x4a1   : > { %v7419_v28 = vpop.eup %7418 }
 0x4a2   : > { %v1750_v29 = vsel %vm1362_vm4, %v7419_v28, 0.0 }
 0x4a3   : > { %v7421_v31 = vpop.eup %7420  ;;  %1751 = vadd.xlane.f32.xlu1 %v1750_v29 }
 0x4a4   : > { %v1753_v32 = vsel %vm1362_vm4, %v7421_v31, 0.0 }
 0x4a5   : > { %1754 = vadd.xlane.f32.xlu0 %v1753_v32 }
 0x4b4   : > { %1636 = vrot.lane.b32.xlu1 %v8022_v47, %s9065_s13 }
 0x4b8   : > { %1761 = vrot.lane.b32.xlu1 %v8022_v47, %s9048_s9  ;;  %s9052_s9 = smov 8  }
 0x4bb   : > { %1511 = vrot.lane.b32.xlu0 %v8022_v47, %s9050_s11  ;;  %s9056_s11 = smov 16  }
 0x518   : > { %v1377_v33 = vpop.xlane.xlu1 %1376 }
 0x519   : > { %7422 = vrcp.f32 %v1377_v33 }
 0x51a   : > { %v1380_v34 = vpop.xlane.xlu0 %1379 }
 0x51b   : > { %7424 = vrcp.f32 %v1380_v34 }
 0x520   : > { %v1502_v38 = vpop.xlane.xlu1 %1501 }
 0x523   : > { %v7423_v35 = vpop.eup %7422 }
 0x524   : > { %v1505_v36 = vpop.xlane.xlu0 %1504  ;;  %v1383_v40 = vmul.f32 %v7423_v35, %v7407_v58 }
 0x525   : > { %v7425_v37 = vpop.eup %7424  ;;  %7426 = vrcp.f32 %v1505_v36 }
 0x526   : > { %v1384_v41 = vmul.f32 %v7425_v37, %v7409_v2  ;;  %7428 = vrcp.f32 %v1502_v38 }
 0x528   : > { %v1385_v42 = vpack.c.bf16 %v1384_v41, %v1383_v40  ;;  %v1627_v47 = vpop.xlane.xlu1 %1626 }
 0x52a   : > { %6708 = vmatmul.mubr.msk.bf16.vlgmr.msra.gmra.mrb[0].mxu0 %vm1362_vm4, %v1385_v42  ;;  %v1630_v43 = vpop.xlane.xlu0 %1629 }
 0x52b   : > { %6719 = vmatprep.mubr.msk.bf16.mxu0 %vm7700_vm1, %v7699_v15  ;;  %7430 = vrcp.f32 %v1630_v43 }
 0x52c   : > { %7432 = vrcp.f32 %v1627_v47 }
 0x52f   : > { %v7427_v44 = vpop.eup %7426 }
 0x530   : > { %v7429_v46 = vpop.eup %7428  ;;  %v1509_v48 = vmul.f32 %v7427_v44, %v7413_v14  ;;  %v1752_v49 = vpop.xlane.xlu1 %1751 }
 0x531   : > { %v1508_v50 = vmul.f32 %v7429_v46, %v7411_v9 }
 0x532   : > { %v1755_v45 = vpop.xlane.xlu0 %1754 }
 0x533   : > { %7434 = vrcp.f32 %v1755_v45  ;;  %v1510_v52 = vpack.c.bf16 %v1509_v48, %v1508_v50  ;;  %v8141_v48 = vld [vmem:[%s9143_s19] sm:$0x3]  ;;  %s9155_s19 = smov 16  }
 0x534   : > { %7436 = vrcp.f32 %v1752_v49  ;;  %v1637_v54 = vpop.permute.xlu1 %1636  ;;  %v1843_v49 = vrot.slane %v8141_v48, %v8002_v25 }
 0x535   : > { %v7431_v53 = vpop.eup %7430 }
 0x536   : > { %v1512_v51 = vpop.permute.xlu0 %1511  ;;  %v7433_v55 = vpop.eup %7432  ;;  %v1634_v56 = vmul.f32 %v7431_v53, %v7417_v23 }
 0x537   : > { %6718 = vmatpush3.bf16.msra.mxu0 %v1512_v51  ;;  %v1633_v57 = vmul.f32 %v7433_v55, %v7415_v21 }
 0x538   : > { %6729 = vmatprep.subr.bf16.mxu0 %v7699_v15  ;;  %v1762_v61 = vpop.permute.xlu1 %1761 }
 0x539   : > { %v1635_v58 = vpack.c.bf16 %v1634_v56, %v1633_v57 }
 0x53a   : > { %6720 = vmatmul.mubr.msk.bf16.vlgmr.msra.gmra.mrb[4].mxu0 %vm1362_vm4, %v1510_v52 }
 0x53b   : > { %6730 = vmatpush3.bf16.msra.mxu0 %v1637_v54  ;;  %6731 = vmatprep.mubr.msk.bf16.mxu0 %vm7700_vm1, %v7699_v15 }
 0x53c   : > { %6741 = vmatprep.subr.bf16.mxu0 %v7699_v15 }
 0x53d   : > { %v7435_v60 = vpop.eup %7434 }
 0x53e   : > { %v7437_v63 = vpop.eup %7436  ;;  %v1759_v2 = vmul.f32 %v7435_v60, %v7421_v31 }
 0x53f   : > { %v1758_v3 = vmul.f32 %v7437_v63, %v7419_v28 }
 0x541   : > { %v1760_v4 = vpack.c.bf16 %v1759_v2, %v1758_v3 }
 0x542   : > { %6732 = vmatmul.mubr.msk.bf16.vlgmr.msra.gmra.mrb[8].mxu0 %vm1362_vm4, %v1635_v58 }
 0x543   : > { %6742 = vmatpush3.bf16.msra.mxu0 %v1762_v61  ;;  %6743 = vmatprep.mubr.msk.bf16.mxu0 %vm7700_vm1, %v7699_v15 }
 0x544   : > { %6755 = vmatprep.subr.bf16.mxu0 %v7699_v15 }
 0x54a   : > { %6744 = vmatmul.mubr.msk.bf16.vlgmr.msra.gmra.mrb[12].mxu0 %vm1362_vm4, %v1760_v4 }
 0x54b   : > { %6759 = vmatprep.mubr.msk.bf16.mxu0 %vm7700_vm1, %v7699_v15 }
 0x5fd   : > { %v1426_v5 = vpop.f32.mrb[0].mxu0 }
 0x5fe   : > { %v6709_v6 = vpop.f32.mrb[1].mxu0 }
 0x5ff   : > { %v1429_v7 = vpop.f32.mrb[2].mxu0 }
 0x600   : > { %v6710_v8 = vpop.f32.mrb[3].mxu0 }
 0x601   : > { %v7340_v8 = vld [vmem:[%s9123_s24] sm:$0xff]  }
 0x602   : > { %6756 = vmatpush3.bf16.msra.mxu0 %v7340_v8 }
 0x603   : > { %6757 = vmatprep.subr.bf16.mxu0 %v7699_v15 }
 0x60d   : > { %v1551_v9 = vpop.f32.mrb[4].mxu0 }
 0x60e   : > { %v6721_v10 = vpop.f32.mrb[5].mxu0 }
 0x60f   : > { %v1554_v11 = vpop.f32.mrb[6].mxu0  ;;  %v7342_v10 = vld [vmem:[%s9124_s6] sm:$0xff]  }
 0x610   : > { %v7306_v13 = vpack.i.bf16 %v1554_v11, %v1551_v9  ;;  %v6722_v14 = vpop.f32.mrb[7].mxu0  ;;  %v7341_v9 = vld [vmem:[%s9123_s24 + $0x8] sm:$0xff]  }
 0x611   : > { %6758 = vmatpush3.bf16.msra.mxu0 %v7341_v9  ;;  %v7343_v11 = vld [vmem:[%s9124_s6 + $0x8] sm:$0xff]   ;;  %v7346_v14 = vld [vmem:[%s9124_s6 + $0x20] sm:$0xff]  }
 0x612   : > { %7307 = vrot.lane.b32.xlu1 %v7306_v13, %s9052_s9  ;;  %s9054_s9 = smov 24   ;;  %6783 = vmatprep.subr.bf16.mxu0 %v7699_v15  ;;  %v7345_v13 = vld [vmem:[%s9124_s6 + $0x18] sm:$0xff]  }
 0x615   : > { %v1676_v16 = vpop.f32.mrb[8].mxu0 }
 0x616   : > { %v6733_v17 = vpop.f32.mrb[9].mxu0 }
 0x617   : > { %v1679_v19 = vpop.f32.mrb[10].mxu0 }
 0x618   : > { %v7311_v20 = vpack.i.bf16 %v1679_v19, %v1676_v16  ;;  %v6734_v21 = vpop.f32.mrb[11].mxu0  ;;  %v7347_v16 = vld [vmem:[%s9124_s6 + $0x28] sm:$0xff]  }
 0x61a   : > { %7312 = vrot.lane.b32.xlu0 %v7311_v20, %s9056_s11  ;;  %s9148_s11 = smov 72  }
 0x61d   : > { %v1801_v22 = vpop.f32.mrb[12].mxu0 }
 0x61e   : > { %v6745_v23 = vpop.f32.mrb[13].mxu0 }
 0x61f   : > { %v1804_v27 = vpop.f32.mrb[14].mxu0  ;;  %v8176_v23 = vld [vmem:[%s9144_s25] sm:$0x3]  ;;  %s6294_s25 = sshll.u32 %s7972_s22, 3  ;;  %s9161_s22 = sld [smem:[#allocation31_spill]] }
 0x620   : > { %v7316_v28 = vpack.i.bf16 %v1804_v27, %v1801_v22  ;;  %v6746_v29 = vpop.f32.mrb[15].mxu0 }
 0x622   : > { %7317 = vrot.lane.b32.xlu1 %v7316_v28, %s9054_s9  ;;  %v1933_v28 = vrot.slane %v8176_v23, %v8002_v25  ;;  %s9147_s9 = smov 88  }
 0x684   : > { %v7308_v31 = vpop.permute.xlu1 %7307 }
 0x685   : > { %v7310_v33 = vunpack.i.h.bf16 %v7308_v31  ;;  %v7309_v34 = vunpack.i.l.bf16 %v7308_v31  ;;  %v8181_v31 = vld [vmem:[%s9145_s29] sm:$0x3] }
 0x687   : > { %v1833_v38 = vsel %vm1308_vm2, %v1429_v7, %v7310_v33  ;;  %v1832_v40 = vsel %vm1308_vm2, %v1426_v5, %v7309_v34 }
 0x68c   : > { %v7313_v32 = vpop.permute.xlu0 %7312 }
 0x68d   : > { %v7315_v35 = vunpack.i.h.bf16 %v7313_v32  ;;  %v7314_v36 = vunpack.i.l.bf16 %v7313_v32 }
 0x68f   : > { %v1835_v43 = vsel %vm1362_vm4, %v1833_v38, %v7315_v35  ;;  %v1834_v47 = vsel %vm1362_vm4, %v1832_v40, %v7314_v36  ;;  %v1939_v35 = vrot.slane %v8181_v31, %v8002_v25 }
 0x694   : > { %v7318_v37 = vpop.permute.xlu1 %7317 }
 0x695   : > { %v7320_v41 = vunpack.i.h.bf16 %v7318_v37  ;;  %v7319_v42 = vunpack.i.l.bf16 %v7318_v37 }
 0x697   : > { %v1838_v44 = vsel %vm1836_vm5, %v1835_v43, %v7320_v41  ;;  %v1837_v45 = vsel %vm1836_vm5, %v1834_v47, %v7319_v42  ;;  %v7348_v41 = vld [vmem:[%s9124_s6 + $0x30] sm:$0xff]   ;;  %v7349_v42 = vld [vmem:[%s9124_s6 + $0x38] sm:$0xff]   ;;  %v8193_v43 = vld [vmem:[%s9146_s30] sm:$0x3]  ;;  %s9166_s30 = smov 120  }
 0x698   : > { %v1839_v46 = vpack.c.bf16 %v1838_v44, %v1837_v45  ;;  %v1968_v47 = vrot.slane %v8193_v43, %v8002_v25 }
 0x69a   : > { %6752 = vmatmul.mubr.msk.bf16.vlgmr.msra.gmra.mrb[20].mxu1 %vm1193_vm0, %v1839_v46 }
 0x69b   : > { %6779 = vmatprep.mubr.msk.bf16.mxu1 %vm7700_vm1, %v7699_v15  ;;  %6764 = vmatpush3.bf16.msra.mxu1 %v7342_v10 }
 0x69c   : > { %6765 = vmatprep.subr.bf16.mxu1 %v7699_v15 }
 0x69f   : > { %6766 = vmatpush3.bf16.msra.mxu1 %v7343_v11 }
 0x6a0   : > { %6767 = vmatprep.subr.bf16.mxu1 %v7699_v15 }
 0x6a3   : > { %6768 = vmatpush3.bf16.msra.mxu1 %v7344_v12 }
 0x6a4   : > { %6769 = vmatprep.subr.bf16.mxu1 %v7699_v15 }
 0x6a7   : > { %6770 = vmatpush3.bf16.msra.mxu1 %v7345_v13 }
 0x6a8   : > { %6771 = vmatprep.subr.bf16.mxu1 %v7699_v15 }
 0x6ab   : > { %6772 = vmatpush3.bf16.msra.mxu1 %v7346_v14 }
 0x6ac   : > { %6773 = vmatprep.subr.bf16.mxu1 %v7699_v15 }
 0x6af   : > { %6774 = vmatpush3.bf16.msra.mxu1 %v7347_v16  ;;  %v7350_v16 = vld [vmem:[%s9126_s3 + $0x10] sm:$0xff]  }
 0x6b0   : > { %6775 = vmatprep.subr.bf16.mxu1 %v7699_v15 }
 0x6b3   : > { %6776 = vmatpush3.bf16.msra.mxu1 %v7348_v41 }
 0x6b4   : > { %6777 = vmatprep.subr.bf16.mxu1 %v7699_v15 }
 0x6b7   : > { %6778 = vmatpush3.bf16.msra.mxu1 %v7349_v42 }
 0x6b8   : > { %6809 = vmatprep.subr.bf16.mxu1 %v7699_v15 }
 0x76d   : > { %v1893_v50 = vpop.f32.mrb[20].mxu1 }
 0x76e   : > { %v1894_v51 = vadd.f32 %v1893_v50, %v1843_v49  ;;  %v6753_v52 = vpop.f32.mrb[21].mxu1 }
 0x76f   : > { %v1896_v53 = vpop.f32.mrb[22].mxu1 }
 0x770   : > { %v8146_v54 = vadd.f32 %v1894_v51, %v7976_v0  ;;  %v1897_v55 = vadd.f32 %v1896_v53, %v1843_v49  ;;  %v6754_v56 = vpop.f32.mrb[23].mxu1 }
 0x771   : > { %v1963_v56 = vld [vmem:[%s9122_s12] sm:$0x3] }
 0x772   : > { %v8149_v57 = vadd.f32 %v1897_v55, %v7978_v1  ;;  %v1904_v58 = vsel %vm1193_vm0, %v8146_v54, 0.0 }
 0x773   : > { %1905 = vadd.xlane.f32.xlu0 %v1904_v58  ;;  %v2031_v58 = vrot.slane %v1963_v56, %v8002_v25 }
 0x774   : > { %v1907_v60 = vsel %vm1193_vm0, %v8149_v57, 0.0 }
 0x775   : > { %1908 = vadd.xlane.f32.xlu1 %v1907_v60 }
 0x800   : > { %v1906_v61 = vpop.xlane.xlu0 %1905 }
 0x801   : > { %v1910_v63 = vmul.f32 0.03125, %v1906_v61 }
 0x802   : > { %v1909_v2 = vpop.xlane.xlu1 %1908 }
 0x803   : > { %v1912_v0 = vsub.f32 %v8146_v54, %v1910_v63  ;;  %v1911_v3 = vmul.f32 0.03125, %v1909_v2 }
 0x805   : > { %v1913_v1 = vsub.f32 %v8149_v57, %v1911_v3  ;;  %v1914_v4 = vmul.f32 %v1912_v0, %v1912_v0 }
 0x807   : > { %v1916_v5 = vsel %vm1193_vm0, %v1914_v4, 0.0  ;;  %v1915_v6 = vmul.f32 %v1913_v1, %v1913_v1 }
 0x808   : > { %1917 = vadd.xlane.f32.xlu0 %v1916_v5 }
 0x809   : > { %v1919_v7 = vsel %vm1193_vm0, %v1915_v6, 0.0 }
 0x80c   : > { %1920 = vadd.xlane.f32.xlu0 %v1919_v7 }
 0x895   : > { %v1918_v17 = vpop.xlane.xlu0 %1917 }
 0x896   : > { %v1922_v18 = vmul.f32 0.03125, %v1918_v17  ;;  %v7351_v17 = vld [vmem:[%s9126_s3 + $0x18] sm:$0xff]   ;;  %s9152_s3 = smov 56  }
 0x898   : > { %v1924_v19 = vadd.f32 1e-05, %v1922_v18 }
 0x899   : > { %v1921_v20 = vpop.xlane.xlu0 %1920 }
 0x89a   : > { %7438 = vrsqrt.f32 %v1924_v19  ;;  %v1923_v21 = vmul.f32 0.03125, %v1921_v20 }
 0x89c   : > { %v1925_v22 = vadd.f32 1e-05, %v1923_v21 }
 0x89e   : > { %7440 = vrsqrt.f32 %v1925_v22 }
 0x8a4   : > { %v7439_v27 = vpop.eup %7438 }
 0x8a5   : > { %v1928_v29 = vmul.f32 %v7439_v27, %v1912_v0 }
 0x8a7   : > { %v1934_v33 = vmul.f32 %v1933_v28, %v1928_v29 }
 0x8a8   : > { %v7441_v32 = vpop.eup %7440 }
 0x8a9   : > { %v1929_v34 = vmul.f32 %v7441_v32, %v1913_v1  ;;  %v1940_v37 = vadd.f32 %v1939_v35, %v1934_v33 }
 0x8ab   : > { %v1935_v36 = vmul.f32 %v1933_v28, %v1929_v34  ;;  %v8220_v28 = vsub.s32 1, %v7999_v24 }
 0x8ad   : > { %v1941_v38 = vadd.f32 %v1939_v35, %v1935_v36  ;;  %v2152_v29 = vrot.slane %v8005_v26, %v8220_v28  ;;  %v2158_v33 = vrot.slane %v8010_v30, %v8220_v28  ;;  %v2175_v26 = vrot.slane %v8018_v39, %v8220_v28 }
 0x8af   : > { %v1964_v40 = vpack.c.bf16 %v1941_v38, %v1940_v37 }
 0x8b1   : > { %6760 = vmatmul.mubr.msk.bf16.vlgmr.msra.gmra.mrb[16].mxu0 %vm1193_vm0, %v1964_v40 }
 0x8b2   : > { %6787 = vmatprep.mubr.msk.bf16.mxu0 %vm7700_vm1, %v7699_v15  ;;  %6784 = vmatpush3.bf16.msra.mxu0 %v7350_v16 }
 0x8b3   : > { %6785 = vmatprep.subr.bf16.mxu0 %v7699_v15 }
 0x8b6   : > { %6786 = vmatpush3.bf16.msra.mxu0 %v7351_v17 }
 0x8b7   : > { %6791 = vmatprep.subr.bf16.mxu0 %v7699_v15 }
 0x984   : > { %v2018_v44 = vpop.f32.mrb[16].mxu0 }
 0x985   : > { %v2019_v45 = vadd.f32 %v2018_v44, %v1968_v47  ;;  %v6761_v46 = vpop.f32.mrb[17].mxu0 }
 0x986   : > { %v2021_v49 = vpop.f32.mrb[18].mxu0 }
 0x987   : > { %v2022_v50 = vadd.f32 %v2021_v49, %v1968_v47  ;;  %v6762_v51 = vpop.f32.mrb[19].mxu0  ;;  %v2025_v52 = vmax.f32 %v2019_v45, 0.0 }
 0x989   : > { %v2026_v53 = vmax.f32 %v2022_v50, 0.0 }
 0x98b   : > { %v2027_v55 = vpack.c.bf16 %v2026_v53, %v2025_v52 }
 0x98d   : > { %6780 = vmatmul.mubr.bf16.vlgmr.msra.gmra.mrb[24].mxu1 %v2027_v55 }
 0x98e   : > { %6811 = vmatprep.mubr.msk.bf16.mxu1 %vm7700_vm1, %v7699_v15 }
 0xa60   : > { %v2114_v60 = vpop.f32.mrb[24].mxu1 }
 0xa61   : > { %v2115_v61 = vadd.f32 %v2114_v60, %v2031_v58  ;;  %v6781_v63 = vpop.f32.mrb[25].mxu1 }
 0xa62   : > { %v2117_v2 = vpop.f32.mrb[26].mxu1 }
 0xa63   : > { %v8202_v0 = vadd.f32 %v2115_v61, %v8146_v54  ;;  %v2118_v3 = vadd.f32 %v2117_v2, %v2031_v58  ;;  %v6782_v1 = vpop.f32.mrb[27].mxu1 }
 0xa65   : > { %v8205_v4 = vadd.f32 %v2118_v3, %v8149_v57  ;;  %v2123_v5 = vsel %vm1193_vm0, %v8202_v0, 0.0 }
 0xa66   : > { %2124 = vadd.xlane.f32.xlu0 %v2123_v5 }
 0xa67   : > { %v2126_v6 = vsel %vm1193_vm0, %v8205_v4, 0.0 }
 0xa68   : > { %2127 = vadd.xlane.f32.xlu1 %v2126_v6 }
 0xaf3   : > { %v2125_v7 = vpop.xlane.xlu0 %2124 }
 0xaf4   : > { %v2129_v8 = vmul.f32 0.03125, %v2125_v7 }
 0xaf5   : > { %v2128_v9 = vpop.xlane.xlu1 %2127 }
 0xaf6   : > { %v2131_v54 = vsub.f32 %v8202_v0, %v2129_v8  ;;  %v2130_v10 = vmul.f32 0.03125, %v2128_v9 }
 0xaf8   : > { %v2132_v11 = vsub.f32 %v8205_v4, %v2130_v10  ;;  %v2133_v57 = vmul.f32 %v2131_v54, %v2131_v54 }
 0xafa   : > { %v2135_v12 = vsel %vm1193_vm0, %v2133_v57, 0.0  ;;  %v2134_v13 = vmul.f32 %v2132_v11, %v2132_v11 }
 0xafb   : > { %2136 = vadd.xlane.f32.xlu0 %v2135_v12 }
 0xafc   : > { %v2138_v14 = vsel %vm1193_vm0, %v2134_v13, 0.0 }
 0xafd   : > { %2139 = vadd.xlane.f32.xlu1 %v2138_v14 }
 0xb88   : > { %v2137_v18 = vpop.xlane.xlu0 %2136 }
 0xb89   : > { %v2141_v19 = vmul.f32 0.03125, %v2137_v18 }
 0xb8a   : > { %v2140_v20 = vpop.xlane.xlu1 %2139 }
 0xb8b   : > { %v2143_v21 = vadd.f32 1e-05, %v2141_v19  ;;  %v2142_v22 = vmul.f32 0.03125, %v2140_v20 }
 0xb8d   : > { %7442 = vrsqrt.f32 %v2143_v21  ;;  %v2144_v27 = vadd.f32 1e-05, %v2142_v22 }
 0xb8f   : > { %7444 = vrsqrt.f32 %v2144_v27 }
 0xb97   : > { %v7443_v32 = vpop.eup %7442 }
 0xb98   : > { %v2147_v34 = vmul.f32 %v7443_v32, %v2131_v54 }
 0xb99   : > { %v7445_v35 = vpop.eup %7444 }
 0xb9a   : > { %v2153_v36 = vmul.f32 %v2152_v29, %v2147_v34  ;;  %v2148_v37 = vmul.f32 %v7445_v35, %v2132_v11 }
 0xb9c   : > { %v2154_v38 = vmul.f32 %v2152_v29, %v2148_v37  ;;  %v2159_v40 = vadd.f32 %v2158_v33, %v2153_v36 }
 0xb9e   : > { %v2160_v41 = vadd.f32 %v2158_v33, %v2154_v38 }
 0xba0   : > { %v2171_v42 = vpack.c.bf16 %v2160_v41, %v2159_v40 }
 0xba2   : > { %6788 = vmatmul.mubr.msk.bf16.vlgmr.msra.gmra.mrb[20].mxu0 %vm1193_vm0, %v2171_v42 }
 0xba3   : > { %6793 = vmatprep.mubr.msk.bf16.mxu0 %vm7700_vm1, %v7699_v15 }
 0xc75   : > { %v2225_v47 = vpop.f32.mrb[20].mxu0 }
 0xc76   : > { %v6789_v44 = vpop.f32.mrb[21].mxu0  ;;  %v2226_v30 = vadd.f32 %v2225_v47, %v2175_v26 }
 0xc77   : > { %v2228_v45 = vpop.f32.mrb[22].mxu0 }
 0xc78   : > { %v2229_v46 = vadd.f32 %v2228_v45, %v2175_v26  ;;  %v6790_v49 = vpop.f32.mrb[23].mxu0 }
 0xc7a   : > { %v8231_v50 = vpack.c.bf16 %v2229_v46, %v2226_v30 }
 0xc7c   : > { %2234 = vrot.lane.b32.xlu0 %v8231_v50, %s9062_s20  ;;  %s9151_s20 = smov 104  }
 0xc80   : > { %2359 = vrot.lane.b32.xlu0 %v8231_v50, %s9147_s9 }
 0xc84   : > { %2357 = vrot.lane.b32.xlu0 %v8231_v50, %s9058_s26  ;;  %s9149_s26 = smov 64  }
 0xc88   : > { %2484 = vrot.lane.b32.xlu0 %v8231_v50, %s9060_s8  ;;  %s9150_s8 = smov 112  }
 0xc8c   : > { %2609 = vrot.lane.b32.xlu0 %v8231_v50, %s9148_s11 }
 0xcee   : > { %v2235_v39 = vpop.permute.xlu0 %2234 }
 0xcef   : > { %v2240_v51 = vsel %vm1308_vm2, %v2235_v39, 0 }
 0xcf0   : > { %6792 = vmatpush3.bf16.xpose.msra.mxu0 %v2240_v51 }
 0xcf1   : > { %6797 = vmatprep.subr.bf16.mxu0 %v7699_v15 }
 0xcf2   : > { %v2360_v17 = vpop.permute.xlu0 %2359 }
 0xcf3   : > { %v2365_v27 = vsel %vm1308_vm2, %v2360_v17, 0 }
 0xcf6   : > { %v2358_v22 = vpop.permute.xlu0 %2357 }
 0xcf7   : > { %6794 = vmatmul.mubr.msk.bf16.vlgmr.msra.gmra.mrb[24].mxu0 %vm1308_vm2, %v8231_v50 }
 0xcf8   : > { %6799 = vmatprep.mubr.msk.bf16.mxu0 %vm7700_vm1, %v7699_v15 }
 0xcfa   : > { %v2485_v29 = vpop.permute.xlu0 %2484 }
 0xcfb   : > { %v2490_v32 = vsel %vm1308_vm2, %v2485_v29, 0 }
 0xcfe   : > { %v2610_v33 = vpop.permute.xlu0 %2609 }
 0xcff   : > { %v2615_v35 = vsel %vm1308_vm2, %v2610_v33, 0 }
 0xdca   : > { %v2276_v52 = vpop.f32.mrb[24].mxu0 }
 0xdcb   : > { %v2283_v53 = vmul.f32 0.35355338, %v2276_v52  ;;  %v6795_v55 = vpop.f32.mrb[25].mxu0 }
 0xdcc   : > { %v2279_v56 = vpop.f32.mrb[26].mxu0 }
 0xdcd   : > { %v2284_v58 = vmul.f32 0.35355338, %v2279_v56  ;;  %v6796_v60 = vpop.f32.mrb[27].mxu0  ;;  %v2285_v61 = vsel %vm8064_vm3, -1e+30, %v2283_v53 }
 0xdce   : > { %v2287_v63 = vsel %vm1362_vm4, %v2285_v61, -inf }
 0xdcf   : > { %2288 = vmax.xlane.f32.xlu1 %v2287_v63  ;;  %v2286_v2 = vsel %vm8064_vm3, -1e+30, %v2284_v58 }
 0xdd0   : > { %v2290_v3 = vsel %vm1362_vm4, %v2286_v2, -inf }
 0xdd3   : > { %2291 = vmax.xlane.f32.xlu1 %v2290_v3 }
 0xe5c   : > { %v2289_v1 = vpop.xlane.xlu1 %2288 }
 0xe5d   : > { %v2293_v5 = vsub.f32 %v2285_v61, %v2289_v1 }
 0xe5f   : > { %v2295_v6 = vmul.f32 1.442695, %v2293_v5 }
 0xe60   : > { %v2292_v7 = vpop.xlane.xlu1 %2291 }
 0xe61   : > { %7446 = vpow2.f32 %v2295_v6  ;;  %v2294_v8 = vsub.f32 %v2286_v2, %v2292_v7 }
 0xe63   : > { %v2297_v9 = vmul.f32 1.442695, %v2294_v8 }
 0xe65   : > { %7448 = vpow2.f32 %v2297_v9 }
 0xe6b   : > { %v7447_v54 = vpop.eup %7446 }
 0xe6c   : > { %v2299_v10 = vsel %vm1362_vm4, %v7447_v54, 0.0 }
 0xe6d   : > { %2300 = vadd.xlane.f32.xlu1 %v2299_v10 }
 0xe6f   : > { %v7449_v11 = vpop.eup %7448 }
 0xe70   : > { %v2302_v57 = vsel %vm1362_vm4, %v7449_v11, 0.0 }
 0xe71   : > { %2303 = vadd.xlane.f32.xlu1 %v2302_v57 }
 0xe82   : > { %2310 = vrot.lane.b32.xlu1 %v8231_v50, %s9149_s26 }
 0xe86   : > { %2482 = vrot.lane.b32.xlu1 %v8231_v50, %s9150_s8 }
 0xe8a   : > { %2607 = vrot.lane.b32.xlu1 %v8231_v50, %s9151_s20 }
 0xefa   : > { %v2301_v12 = vpop.xlane.xlu1 %2300 }
 0xefb   : > { %7450 = vrcp.f32 %v2301_v12 }
 0xefe   : > { %v2304_v13 = vpop.xlane.xlu1 %2303 }
 0xeff   : > { %7452 = vrcp.f32 %v2304_v13 }
 0xf02   : > { %v2311_v14 = vpop.permute.xlu1 %2310 }
 0xf03   : > { %6798 = vmatpush3.bf16.msra.mxu0 %v2311_v14 }
 0xf04   : > { %6803 = vmatprep.subr.bf16.mxu0 %v7699_v15 }
 0xf05   : > { %v7451_v16 = vpop.eup %7450 }
 0xf06   : > { %v2307_v19 = vmul.f32 %v7451_v16, %v7447_v54  ;;  %v2483_v34 = vpop.permute.xlu1 %2482 }
 0xf09   : > { %v7453_v18 = vpop.eup %7452 }
 0xf0a   : > { %v2308_v20 = vmul.f32 %v7453_v18, %v7449_v11  ;;  %v2608_v36 = vpop.permute.xlu1 %2607 }
 0xf0c   : > { %v2309_v21 = vpack.c.bf16 %v2308_v20, %v2307_v19 }
 0xf0e   : > { %6800 = vmatmul.mubr.msk.bf16.vlgmr.msra.gmra.mrb[28].mxu0 %vm1362_vm4, %v2309_v21 }
 0xf0f   : > { %6804 = vmatpush3.bf16.xpose.msra.mxu0 %v2365_v27  ;;  %6805 = vmatprep.mubr.msk.bf16.mxu0 %vm7700_vm1, %v7699_v15 }
 0xf10   : > { %6815 = vmatprep.subr.bf16.mxu0 %v7699_v15 }
 0xf16   : > { %6806 = vmatmul.mubr.msk.bf16.vlgmr.msra.gmra.mrb[32].mxu0 %vm1308_vm2, %v2358_v22 }
 0xf17   : > { %6816 = vmatpush3.bf16.xpose.msra.mxu0 %v2490_v32  ;;  %6817 = vmatprep.mubr.msk.bf16.mxu0 %vm7700_vm1, %v7699_v15 }
 0xf18   : > { %6827 = vmatprep.subr.bf16.mxu0 %v7699_v15 }
 0xf1e   : > { %6818 = vmatmul.mubr.msk.bf16.vlgmr.msra.gmra.mrb[36].mxu0 %vm1308_vm2, %v2483_v34 }
 0xf1f   : > { %6828 = vmatpush3.bf16.xpose.msra.mxu0 %v2615_v35  ;;  %6829 = vmatprep.mubr.msk.bf16.mxu0 %vm7700_vm1, %v7699_v15 }
 0xf20   : > { %6839 = vmatprep.subr.bf16.mxu0 %v7699_v15 }
 0xf26   : > { %6830 = vmatmul.mubr.msk.bf16.vlgmr.msra.gmra.mrb[40].mxu0 %vm1308_vm2, %v2608_v36 }
 0xf27   : > { %6843 = vmatprep.mubr.msk.bf16.mxu0 %vm7700_vm1, %v7699_v15 }
 0xfe1   : > { %v8282_v37 = vpop.f32.mrb[28].mxu0 }
 0xfe2   : > { %v6801_v38 = vpop.f32.mrb[29].mxu0 }
 0xfe3   : > { %v8284_v40 = vpop.f32.mrb[30].mxu0 }
 0xfe4   : > { %v6802_v41 = vpop.f32.mrb[31].mxu0 }
 0xfe9   : > { %v2401_v42 = vpop.f32.mrb[32].mxu0 }
 0xfea   : > { %v2408_v26 = vmul.f32 0.35355338, %v2401_v42  ;;  %v6807_v47 = vpop.f32.mrb[33].mxu0 }
 0xfeb   : > { %v2404_v44 = vpop.f32.mrb[34].mxu0 }
 0xfec   : > { %v2409_v45 = vmul.f32 0.35355338, %v2404_v44  ;;  %v6808_v30 = vpop.f32.mrb[35].mxu0  ;;  %v2410_v46 = vsel %vm8064_vm3, -1e+30, %v2408_v26 }
 0xfed   : > { %v2412_v49 = vsel %vm1362_vm4, %v2410_v46, -inf }
 0xfee   : > { %2413 = vmax.xlane.f32.xlu0 %v2412_v49  ;;  %v2411_v39 = vsel %vm8064_vm3, -1e+30, %v2409_v45 }
 0xfef   : > { %v2415_v51 = vsel %vm1362_vm4, %v2411_v39, -inf }
 0xff0   : > { %2416 = vmax.xlane.f32.xlu1 %v2415_v51 }
 0xff1   : > { %v2526_v52 = vpop.f32.mrb[36].mxu0 }
 0xff2   : > { %v2533_v53 = vmul.f32 0.35355338, %v2526_v52  ;;  %v6819_v55 = vpop.f32.mrb[37].mxu0 }
 0xff3   : > { %v2529_v56 = vpop.f32.mrb[38].mxu0 }
 0xff4   : > { %v2534_v58 = vmul.f32 0.35355338, %v2529_v56  ;;  %v6820_v60 = vpop.f32.mrb[39].mxu0  ;;  %v2535_v61 = vsel %vm8064_vm3, -1e+30, %v2533_v53 }
 0xff5   : > { %v2537_v63 = vsel %vm1362_vm4, %v2535_v61, -inf }
 0xff6   : > { %2538 = vmax.xlane.f32.xlu0 %v2537_v63  ;;  %v2536_v2 = vsel %vm8064_vm3, -1e+30, %v2534_v58 }
 0xff7   : > { %v2540_v1 = vsel %vm1362_vm4, %v2536_v2, -inf }
 0xff9   : > { %v2651_v3 = vpop.f32.mrb[40].mxu0 }
 0xffa   : > { %v2658_v5 = vmul.f32 0.35355338, %v2651_v3  ;;  %2541 = vmax.xlane.f32.xlu0 %v2540_v1  ;;  %v6831_v6 = vpop.f32.mrb[41].mxu0 }
 0xffb   : > { %v2654_v7 = vpop.f32.mrb[42].mxu0 }
 0xffc   : > { %v2659_v8 = vmul.f32 0.35355338, %v2654_v7  ;;  %v6832_v9 = vpop.f32.mrb[43].mxu0  ;;  %v2660_v54 = vsel %vm8064_vm3, -1e+30, %v2658_v5 }
 0xffd   : > { %v2662_v10 = vsel %vm1362_vm4, %v2660_v54, -inf }
 0xffe   : > { %2663 = vmax.xlane.f32.xlu0 %v2662_v10  ;;  %v2661_v11 = vsel %vm8064_vm3, -1e+30, %v2659_v8 }
 0xfff   : > { %v2665_v57 = vsel %vm1362_vm4, %v2661_v11, -inf }
0x1000   : > { %2666 = vmax.xlane.f32.xlu1 %v2665_v57 }
0x107b   : > { %v2414_v12 = vpop.xlane.xlu0 %2413 }
0x107c   : > { %v2418_v13 = vsub.f32 %v2410_v46, %v2414_v12 }
0x107d   : > { %v2417_v14 = vpop.xlane.xlu1 %2416 }
0x107e   : > { %v2420_v16 = vmul.f32 1.442695, %v2418_v13  ;;  %v2419_v17 = vsub.f32 %v2411_v39, %v2417_v14 }
0x1080   : > { %7454 = vpow2.f32 %v2420_v16  ;;  %v2422_v18 = vmul.f32 1.442695, %v2419_v17 }
0x1082   : > { %7456 = vpow2.f32 %v2422_v18 }
0x1083   : > { %v2539_v19 = vpop.xlane.xlu0 %2538 }
0x1084   : > { %v2543_v20 = vsub.f32 %v2535_v61, %v2539_v19 }
0x1086   : > { %v2545_v21 = vmul.f32 1.442695, %v2543_v20  ;;  %v7352_v20 = vld [vmem:[%s9125_s14 + $0x10] sm:$0xff]  }
0x1087   : > { %v2542_v22 = vpop.xlane.xlu0 %2541  ;;  %6840 = vmatpush3.bf16.msra.mxu0 %v7352_v20 }
0x1088   : > { %7458 = vpow2.f32 %v2545_v21  ;;  %v2544_v27 = vsub.f32 %v2536_v2, %v2542_v22  ;;  %6841 = vmatprep.subr.bf16.mxu0 %v7699_v15 }
0x108a   : > { %v7455_v29 = vpop.eup %7454  ;;  %v2547_v32 = vmul.f32 1.442695, %v2544_v27 }
0x108b   : > { %v2664_v33 = vpop.xlane.xlu0 %2663  ;;  %v2424_v34 = vsel %vm1362_vm4, %v7455_v29, 0.0 }
0x108c   : > { %v7457_v35 = vpop.eup %7456  ;;  %7460 = vpow2.f32 %v2547_v32  ;;  %v2668_v36 = vsub.f32 %v2660_v54, %v2664_v33  ;;  %2425 = vadd.xlane.f32.xlu0 %v2424_v34 }
0x108d   : > { %v2427_v38 = vsel %vm1362_vm4, %v7457_v35, 0.0  ;;  %v2667_v46 = vpop.xlane.xlu1 %2666 }
0x108e   : > { %v2670_v41 = vmul.f32 1.442695, %v2668_v36  ;;  %2428 = vadd.xlane.f32.xlu1 %v2427_v38  ;;  %v2669_v49 = vsub.f32 %v2661_v11, %v2667_v46 }
0x1090   : > { %7462 = vpow2.f32 %v2670_v41  ;;  %v2672_v39 = vmul.f32 1.442695, %v2669_v49 }
0x1092   : > { %v7459_v42 = vpop.eup %7458  ;;  %7464 = vpow2.f32 %v2672_v39 }
0x1093   : > { %v2549_v26 = vsel %vm1362_vm4, %v7459_v42, 0.0 }
0x1094   : > { %2550 = vadd.xlane.f32.xlu0 %v2549_v26 }
0x1096   : > { %v7461_v47 = vpop.eup %7460 }
0x1097   : > { %v2552_v44 = vsel %vm1362_vm4, %v7461_v47, 0.0 }
0x1098   : > { %2553 = vadd.xlane.f32.xlu1 %v2552_v44 }
0x109a   : > { %v7463_v45 = vpop.eup %7462 }
0x109b   : > { %v2674_v30 = vsel %vm1362_vm4, %v7463_v45, 0.0 }
0x109c   : > { %2675 = vadd.xlane.f32.xlu0 %v2674_v30  ;;  %v7465_v51 = vpop.eup %7464 }
0x109d   : > { %v2677_v52 = vsel %vm1362_vm4, %v7465_v51, 0.0 }
0x10a9   : > { %2560 = vrot.lane.b32.xlu1 %v8231_v50, %s9065_s13  ;;  %s9154_s13 = smov 8  }
0x10b2   : > { %2435 = vrot.lane.b32.xlu0 %v8231_v50, %s9152_s3 }
0x10cd   : > { %2678 = vadd.xlane.f32.xlu1 %v2677_v52 }
0x10de   : > { %2685 = vrot.lane.b32.xlu1 %v8231_v50, %s9153_s17 }
0x1119   : > { %v2426_v55 = vpop.xlane.xlu0 %2425 }
0x111b   : > { %v2429_v53 = vpop.xlane.xlu1 %2428 }
0x111c   : > { %7466 = vrcp.f32 %v2429_v53 }
0x111d   : > { %7468 = vrcp.f32 %v2426_v55 }
0x1121   : > { %v2551_v56 = vpop.xlane.xlu0 %2550 }
0x1125   : > { %v2554_v58 = vpop.xlane.xlu1 %2553 }
0x1126   : > { %7470 = vrcp.f32 %v2554_v58  ;;  %v7467_v60 = vpop.eup %7466 }
0x1127   : > { %7472 = vrcp.f32 %v2551_v56  ;;  %v7469_v63 = vpop.eup %7468  ;;  %v2433_v2 = vmul.f32 %v7467_v60, %v7457_v35  ;;  %v7353_v35 = vld [vmem:[%s9125_s14 + $0x18] sm:$0xff]   ;;  %s9157_s14 = sld [smem:[#allocation9_spill]] }
0x1128   : > { %v2432_v3 = vmul.f32 %v7469_v63, %v7455_v29  ;;  %6842 = vmatpush3.bf16.msra.mxu0 %v7353_v35  ;;  %v7361_v35 = vld [vmem:[%s9124_s6 + $0x58] sm:$0xff]  }
0x1129   : > { %v2676_v61 = vpop.xlane.xlu0 %2675  ;;  %v2561_v50 = vpop.permute.xlu1 %2560  ;;  %6855 = vmatprep.subr.bf16.mxu0 %v7699_v15 }
0x112a   : > { %v2434_v5 = vpack.c.bf16 %v2433_v2, %v2432_v3  ;;  %7474 = vrcp.f32 %v2676_v61 }
0x112d   : > { %v2436_v1 = vpop.permute.xlu0 %2435  ;;  %s1177_s29 = scalar_lea.vmem %s9157_s14, %s6294_s25  ;;  %s9158_s25 = sld [smem:[#allocation24_spill]] }
0x112e   : > { %6810 = vmatpush3.bf16.msra.mxu1 %v2436_v1  ;;  %s9160_s14 = sld [smem:[#allocation30_spill]] }
0x112f   : > { %6821 = vmatprep.subr.bf16.mxu1 %v7699_v15 }
0x1130   : > { %v7471_v6 = vpop.eup %7470 }
0x1131   : > { %6812 = vmatmul.mubr.msk.bf16.vlgmr.msra.gmra.mrb[28].mxu1 %vm1362_vm4, %v2434_v5  ;;  %v7473_v7 = vpop.eup %7472  ;;  %v2558_v8 = vmul.f32 %v7471_v6, %v7461_v47 }
0x1132   : > { %6822 = vmatpush3.bf16.msra.mxu1 %v2561_v50  ;;  %6823 = vmatprep.mubr.msk.bf16.mxu1 %vm7700_vm1, %v7699_v15  ;;  %v2557_v9 = vmul.f32 %v7473_v7, %v7459_v42  ;;  %v8353_v7 = vld [vmem:[%s1177_s29] sm:$0xff]  ;;  %s9159_s29 = sld [smem:[#allocation25_spill]] }
0x1133   : > { %6833 = vmatprep.subr.bf16.mxu1 %v7699_v15 }
0x1134   : > { %v2559_v54 = vpack.c.bf16 %v2558_v8, %v2557_v9  ;;  %v7475_v57 = vpop.eup %7474 }
0x1135   : > { %v2682_v13 = vmul.f32 %v7475_v57, %v7463_v45 }
0x1139   : > { %6824 = vmatmul.mubr.msk.bf16.vlgmr.msra.gmra.mrb[32].mxu1 %vm1362_vm4, %v2559_v54  ;;  %v3090_v54 = vsel %vm1193_vm0, %v8353_v7, 0.0 }
0x113a   : > { %6835 = vmatprep.mubr.msk.bf16.mxu1 %vm7700_vm1, %v7699_v15 }
0x115a   : > { %v2679_v10 = vpop.xlane.xlu1 %2678 }
0x115b   : > { %7476 = vrcp.f32 %v2679_v10 }
0x115e   : > { %v2686_v11 = vpop.permute.xlu1 %2685 }
0x115f   : > { %6834 = vmatpush3.bf16.msra.mxu1 %v2686_v11 }
0x1160   : > { %6847 = vmatprep.subr.bf16.mxu1 %v7699_v15 }
0x1165   : > { %v7477_v12 = vpop.eup %7476 }
0x1166   : > { %v2683_v14 = vmul.f32 %v7477_v12, %v7465_v51 }
0x1168   : > { %v2684_v16 = vpack.c.bf16 %v2683_v14, %v2682_v13 }
0x116a   : > { %6836 = vmatmul.mubr.msk.bf16.vlgmr.msra.gmra.mrb[36].mxu1 %vm1362_vm4, %v2684_v16 }
0x116b   : > { %6851 = vmatprep.mubr.msk.bf16.mxu1 %vm7700_vm1, %v7699_v15 }
0x1204   : > { %v2475_v17 = vpop.f32.mrb[28].mxu1 }
0x1205   : > { %v6813_v18 = vpop.f32.mrb[29].mxu1 }
0x1206   : > { %v2478_v19 = vpop.f32.mrb[30].mxu1 }
0x1207   : > { %v7321_v21 = vpack.i.bf16 %v2478_v19, %v2475_v17  ;;  %v6814_v22 = vpop.f32.mrb[31].mxu1 }
0x1209   : > { %7322 = vrot.lane.b32.xlu1 %v7321_v21, %s9154_s13 }
0x120c   : > { %v2600_v27 = vpop.f32.mrb[32].mxu1 }
0x120d   : > { %v6825_v29 = vpop.f32.mrb[33].mxu1 }
0x120e   : > { %v2603_v32 = vpop.f32.mrb[34].mxu1  ;;  %v7355_v29 = vld [vmem:[%s9123_s24 + $0x18] sm:$0xff]  }
0x120f   : > { %v7326_v33 = vpack.i.bf16 %v2603_v32, %v2600_v27  ;;  %v6826_v34 = vpop.f32.mrb[35].mxu1  ;;  %v7354_v27 = vld [vmem:[%s9123_s24 + $0x10] sm:$0xff]   ;;  %v7358_v32 = vld [vmem:[%s9124_s6 + $0x40] sm:$0xff]   ;;  %s9163_s24 = smov 80  }
0x1210   : > { %6848 = vmatpush3.bf16.msra.mxu1 %v7354_v27  ;;  %v7360_v34 = vld [vmem:[%s9124_s6 + $0x50] sm:$0xff]  }
0x1211   : > { %7327 = vrot.lane.b32.xlu0 %v7326_v33, %s9155_s19  ;;  %6849 = vmatprep.subr.bf16.mxu1 %v7699_v15  ;;  %v7359_v33 = vld [vmem:[%s9124_s6 + $0x48] sm:$0xff]  }
0x1214   : > { %6850 = vmatpush3.bf16.msra.mxu1 %v7355_v29 }
0x1215   : > { %6875 = vmatprep.subr.bf16.mxu1 %v7699_v15 }
0x123d   : > { %v2725_v36 = vpop.f32.mrb[36].mxu1 }
0x123e   : > { %v6837_v38 = vpop.f32.mrb[37].mxu1 }
0x123f   : > { %v2728_v41 = vpop.f32.mrb[38].mxu1  ;;  %v7363_v38 = vld [vmem:[%s9124_s6 + $0x68] sm:$0xff]  }
0x1240   : > { %v7331_v42 = vpack.i.bf16 %v2728_v41, %v2725_v36  ;;  %v6838_v26 = vpop.f32.mrb[39].mxu1  ;;  %v7362_v36 = vld [vmem:[%s9124_s6 + $0x60] sm:$0xff]  }
0x1242   : > { %7332 = vrot.lane.b32.xlu1 %v7331_v42, %s9156_s21 }
0x127b   : > { %v7323_v47 = vpop.permute.xlu1 %7322 }
0x127c   : > { %v7325_v45 = vunpack.i.h.bf16 %v7323_v47  ;;  %v7324_v30 = vunpack.i.l.bf16 %v7323_v47 }
0x127e   : > { %v2757_v51 = vsel %vm1308_vm2, %v8284_v40, %v7325_v45  ;;  %v2756_v52 = vsel %vm1308_vm2, %v8282_v37, %v7324_v30  ;;  %v2766_v40 = vrot.slane %v8141_v48, %v8220_v28 }
0x1283   : > { %v7328_v44 = vpop.permute.xlu0 %7327 }
0x1284   : > { %v7330_v46 = vunpack.i.h.bf16 %v7328_v44  ;;  %v7329_v49 = vunpack.i.l.bf16 %v7328_v44 }
0x1286   : > { %v2759_v56 = vsel %vm1362_vm4, %v2757_v51, %v7330_v46  ;;  %v2758_v58 = vsel %vm1362_vm4, %v2756_v52, %v7329_v49  ;;  %v2854_v51 = vrot.slane %v8176_v23, %v8220_v28 }
0x12b4   : > { %v7333_v39 = vpop.permute.xlu1 %7332 }
0x12b5   : > { %v7335_v53 = vunpack.i.h.bf16 %v7333_v39  ;;  %v7334_v55 = vunpack.i.l.bf16 %v7333_v39 }
0x12b7   : > { %v2761_v60 = vsel %vm1836_vm5, %v2759_v56, %v7335_v53  ;;  %v2760_v61 = vsel %vm1836_vm5, %v2758_v58, %v7334_v55  ;;  %v3088_v55 = vld [vmem:[%s9158_s25] sm:$0x3] }
0x12b8   : > { %v2762_v63 = vpack.c.bf16 %v2761_v60, %v2760_v61  ;;  %v2860_v61 = vrot.slane %v8181_v31, %v8220_v28 }
0x12ba   : > { %6844 = vmatmul.mubr.msk.bf16.vlgmr.msra.gmra.mrb[44].mxu0 %vm1193_vm0, %v2762_v63 }
0x12bb   : > { %6871 = vmatprep.mubr.msk.bf16.mxu0 %vm7700_vm1, %v7699_v15  ;;  %6856 = vmatpush3.bf16.msra.mxu0 %v7358_v32 }
0x12bc   : > { %6857 = vmatprep.subr.bf16.mxu0 %v7699_v15 }
0x12bf   : > { %6858 = vmatpush3.bf16.msra.mxu0 %v7359_v33 }
0x12c0   : > { %6859 = vmatprep.subr.bf16.mxu0 %v7699_v15 }
0x12c3   : > { %6860 = vmatpush3.bf16.msra.mxu0 %v7360_v34 }
0x12c4   : > { %6861 = vmatprep.subr.bf16.mxu0 %v7699_v15 }
0x12c7   : > { %6862 = vmatpush3.bf16.msra.mxu0 %v7361_v35 }
0x12c8   : > { %6863 = vmatprep.subr.bf16.mxu0 %v7699_v15 }
0x12cb   : > { %6864 = vmatpush3.bf16.msra.mxu0 %v7362_v36 }
0x12cc   : > { %6865 = vmatprep.subr.bf16.mxu0 %v7699_v15 }
0x12cf   : > { %6866 = vmatpush3.bf16.msra.mxu0 %v7363_v38 }
0x12d0   : > { %6867 = vmatprep.subr.bf16.mxu0 %v7699_v15 }
0x138d   : > { %v2816_v37 = vpop.f32.mrb[44].mxu0 }
0x138e   : > { %v2817_v2 = vadd.f32 %v2816_v37, %v2766_v40  ;;  %v6845_v3 = vpop.f32.mrb[45].mxu0  ;;  %v3106_v37 = vrot.slane %v3088_v55, %v8002_v25 }
0x138f   : > { %v2819_v1 = vpop.f32.mrb[46].mxu0 }
0x1390   : > { %v8351_v5 = vadd.f32 %v2817_v2, %v8202_v0  ;;  %v2820_v6 = vadd.f32 %v2819_v1, %v2766_v40  ;;  %v6846_v50 = vpop.f32.mrb[47].mxu0  ;;  %v3089_v2 = vld [vmem:[%s9159_s29] sm:$0x3] }
0x1392   : > { %v8356_v8 = vadd.f32 %v2820_v6, %v8205_v4  ;;  %v2825_v9 = vsel %vm1193_vm0, %v8351_v5, 0.0  ;;  %v7356_v6 = vld [vmem:[%s9160_s14] sm:$0xff]  }
0x1393   : > { %2826 = vadd.xlane.f32.xlu0 %v2825_v9  ;;  %v3111_v9 = vrot.slane %v3089_v2, %v8002_v25 }
0x1394   : > { %v2828_v48 = vsel %vm1193_vm0, %v8356_v8, 0.0 }
0x1395   : > { %2829 = vadd.xlane.f32.xlu1 %v2828_v48  ;;  %v7357_v48 = vld [vmem:[%s9160_s14 + $0x8] sm:$0xff]  }
0x1397   : > { %3091 = vadd.xlane.f32.xlu0 %v3090_v54 }
0x1420   : > { %v2827_v0 = vpop.xlane.xlu0 %2826 }
0x1421   : > { %v2831_v10 = vmul.f32 0.03125, %v2827_v0  ;;  %v7364_v0 = vld [vmem:[%s9124_s6 + $0x70] sm:$0xff]  }
0x1422   : > { %v2830_v11 = vpop.xlane.xlu1 %2829  ;;  %6868 = vmatpush3.bf16.msra.mxu0 %v7364_v0 }
0x1423   : > { %v2833_v57 = vsub.f32 %v8351_v5, %v2831_v10  ;;  %v2832_v4 = vmul.f32 0.03125, %v2830_v11  ;;  %6869 = vmatprep.subr.bf16.mxu0 %v7699_v15  ;;  %v7365_v10 = vld [vmem:[%s9124_s6 + $0x78] sm:$0xff]   ;;  %v2889_v11 = vrot.slane %v8193_v43, %v8220_v28  ;;  %s9162_s6 = smov 96  }
0x1424   : > { %v3092_v12 = vpop.xlane.xlu0 %3091 }
0x1425   : > { %v2834_v13 = vsub.f32 %v8356_v8, %v2832_v4  ;;  %v3093_v14 = vmul.f32 0.03125, %v3092_v12  ;;  %v2835_v16 = vmul.f32 %v2833_v57, %v2833_v57 }
0x1426   : > { %6870 = vmatpush3.bf16.msra.mxu0 %v7365_v10 }
0x1427   : > { %v3094_v17 = vsub.f32 %v8353_v7, %v3093_v14  ;;  %v2837_v18 = vsel %vm1193_vm0, %v2835_v16, 0.0  ;;  %v2836_v19 = vmul.f32 %v2834_v13, %v2834_v13  ;;  %6901 = vmatprep.subr.bf16.mxu0 %v7699_v15  ;;  %v3117_v14 = vld [vmem:[%s9161_s22] sm:$0x3] }
0x1428   : > { %2838 = vadd.xlane.f32.xlu0 %v2837_v18 }
0x1429   : > { %v3095_v20 = vmul.f32 %v3094_v17, %v3094_v17  ;;  %v2840_v22 = vsel %vm1193_vm0, %v2836_v19, 0.0 }
0x142b   : > { %v3096_v21 = vsel %vm1193_vm0, %v3095_v20, 0.0  ;;  %v3127_v20 = vrot.slane %v3117_v14, %v8002_v25 }
0x142c   : > { %3097 = vadd.xlane.f32.xlu1 %v3096_v21  ;;  %2841 = vadd.xlane.f32.xlu0 %v2840_v22 }
0x14b5   : > { %v2839_v41 = vpop.xlane.xlu0 %2838 }
0x14b6   : > { %v2843_v42 = vmul.f32 0.03125, %v2839_v41 }
0x14b8   : > { %v2845_v26 = vadd.f32 1e-05, %v2843_v42 }
0x14b9   : > { %v2842_v47 = vpop.xlane.xlu0 %2841  ;;  %v3098_v44 = vpop.xlane.xlu1 %3097 }
0x14ba   : > { %7478 = vrsqrt.f32 %v2845_v26  ;;  %v2844_v45 = vmul.f32 0.03125, %v2842_v47  ;;  %v3099_v30 = vmul.f32 0.03125, %v3098_v44 }
0x14bc   : > { %v2846_v46 = vadd.f32 1e-05, %v2844_v45  ;;  %v3100_v49 = vadd.f32 1e-05, %v3099_v30 }
0x14be   : > { %7480 = vrsqrt.f32 %v2846_v46 }
0x14bf   : > { %7482 = vrsqrt.f32 %v3100_v49 }
0x14c4   : > { %v7479_v39 = vpop.eup %7478 }
0x14c5   : > { %v2849_v52 = vmul.f32 %v7479_v39, %v2833_v57 }
0x14c7   : > { %v2855_v58 = vmul.f32 %v2854_v51, %v2849_v52 }
0x14c8   : > { %v7481_v53 = vpop.eup %7480 }
0x14c9   : > { %v7483_v56 = vpop.eup %7482  ;;  %v2850_v60 = vmul.f32 %v7481_v53, %v2834_v13  ;;  %v2861_v3 = vadd.f32 %v2860_v61, %v2855_v58 }
0x14ca   : > { %v3102_v40 = vmul.f32 %v7483_v56, %v3094_v17 }
0x14cb   : > { %v2856_v63 = vmul.f32 %v2854_v51, %v2850_v60 }
0x14cc   : > { %v3107_v50 = vmul.f32 %v3106_v37, %v3102_v40 }
0x14cd   : > { %v2862_v1 = vadd.f32 %v2860_v61, %v2856_v63 }
0x14ce   : > { %v3112_v31 = vadd.f32 %v3111_v9, %v3107_v50 }
0x14cf   : > { %v2885_v23 = vpack.c.bf16 %v2862_v1, %v2861_v3 }
0x14d0   : > { %v3123_v54 = vpack.c.bf16 %v3112_v31, %v3112_v31 }
0x14d1   : > { %6852 = vmatmul.mubr.msk.bf16.vlgmr.msra.gmra.mrb[40].mxu1 %vm1193_vm0, %v2885_v23 }
0x14d2   : > { %6876 = vmatpush3.bf16.msra.mxu1 %v7356_v6  ;;  %6879 = vmatprep.mubr.msk.bf16.mxu1 %vm7700_vm1, %v7699_v15 }
0x14d3   : > { %6877 = vmatprep.subr.bf16.mxu1 %v7699_v15 }
0x14d6   : > { %6878 = vmatpush3.bf16.msra.mxu1 %v7357_v48 }
0x14d7   : > { %6883 = vmatprep.subr.bf16.mxu1 %v7699_v15 }
0x14d9   : > { %6880 = vmatmul.mubr.msk.bf16.vlgmr.msra.gmra.mrb[44].mxu1 %vm1193_vm0, %v3123_v54 }
0x14da   : > { %6885 = vmatprep.mubr.msk.bf16.mxu1 %vm7700_vm1, %v7699_v15 }
0x15a4   : > { %v2939_v57 = vpop.f32.mrb[40].mxu1 }
0x15a5   : > { %v2940_v4 = vadd.f32 %v2939_v57, %v2889_v11  ;;  %v6853_v12 = vpop.f32.mrb[41].mxu1 }
0x15a6   : > { %v2942_v13 = vpop.f32.mrb[42].mxu1 }
0x15a7   : > { %v2943_v16 = vadd.f32 %v2942_v13, %v2889_v11  ;;  %v6854_v17 = vpop.f32.mrb[43].mxu1  ;;  %v2946_v18 = vmax.f32 %v2940_v4, 0.0 }
0x15a9   : > { %v2947_v19 = vmax.f32 %v2943_v16, 0.0 }
0x15ab   : > { %v2948_v21 = vpack.c.bf16 %v2947_v19, %v2946_v18 }
0x15ac   : > { %v3177_v22 = vpop.f32.mrb[44].mxu1 }
0x15ad   : > { %v3178_v27 = vadd.f32 %v3177_v22, %v3127_v20  ;;  %6872 = vmatmul.mubr.bf16.vlgmr.msra.gmra.mrb[48].mxu0 %v2948_v21  ;;  %v6881_v29 = vpop.f32.mrb[45].mxu1 }
0x15ae   : > { %v3180_v32 = vpop.f32.mrb[46].mxu1  ;;  %6903 = vmatprep.mubr.msk.bf16.mxu0 %vm7700_vm1, %v7699_v15 }
0x15af   : > { %v8414_v43 = vpack.c.bf16 %v3178_v27, %v3178_v27  ;;  %v6882_v33 = vpop.f32.mrb[47].mxu1 }
0x15b1   : > { %3185 = vrot.lane.b32.xlu0 %v8414_v43, %s9162_s6 }
0x15b5   : > { %3298 = vrot.lane.b32.xlu0 %v8414_v43, %s9147_s9 }
0x15b9   : > { %3410 = vrot.lane.b32.xlu0 %v8414_v43, %s9163_s24 }
0x15bd   : > { %3522 = vrot.lane.b32.xlu0 %v8414_v43, %s9148_s11 }
0x1623   : > { %v3186_v34 = vpop.permute.xlu0 %3185 }
0x1624   : > { %v3191_v35 = vsel %vm1308_vm2, %v3186_v34, 0 }
0x1625   : > { %6884 = vmatpush3.bf16.xpose.msra.mxu1 %v3191_v35 }
0x1626   : > { %6889 = vmatprep.subr.bf16.mxu1 %v7699_v15 }
0x1627   : > { %v3299_v63 = vpop.permute.xlu0 %3298 }
0x1628   : > { %v3304_v37 = vsel %vm1308_vm2, %v3299_v63, 0 }
0x162b   : > { %v3411_v2 = vpop.permute.xlu0 %3410 }
0x162c   : > { %6886 = vmatmul.mubr.msk.bf16.vlgmr.msra.gmra.mrb[48].mxu1 %vm1308_vm2, %v8414_v43  ;;  %v3416_v1 = vsel %vm1308_vm2, %v3411_v2, 0 }
0x162d   : > { %6891 = vmatprep.mubr.msk.bf16.mxu1 %vm7700_vm1, %v7699_v15 }
0x162f   : > { %v3523_v6 = vpop.permute.xlu0 %3522 }
0x1630   : > { %v3528_v50 = vsel %vm1308_vm2, %v3523_v6, 0 }
0x1680   : > { %v8430_v36 = vpop.f32.mrb[48].mxu0 }
0x1681   : > { %v6873_v38 = vpop.f32.mrb[49].mxu0 }
0x1682   : > { %v8432_v41 = vpop.f32.mrb[50].mxu0 }
0x1683   : > { %v6874_v42 = vpop.f32.mrb[51].mxu0 }
0x16ff   : > { %v3227_v26 = vpop.f32.mrb[48].mxu1 }
0x1700   : > { %v3233_v44 = vmul.f32 0.35355338, %v3227_v26  ;;  %v6887_v45 = vpop.f32.mrb[49].mxu1 }
0x1701   : > { %v3230_v30 = vpop.f32.mrb[50].mxu1 }
0x1702   : > { %v6888_v46 = vpop.f32.mrb[51].mxu1  ;;  %v3234_v49 = vsel %vm8436_vm6, -1e+30, %v3233_v44 }
0x1703   : > { %v3235_v39 = vsel %vm1308_vm2, %v3234_v49, -inf }
0x1704   : > { %3236 = vmax.xlane.f32.xlu1 %v3235_v39 }
0x1791   : > { %v3237_v51 = vpop.xlane.xlu1 %3236 }
0x1792   : > { %v3238_v52 = vsub.f32 %v3234_v49, %v3237_v51 }
0x1794   : > { %v3239_v53 = vmul.f32 1.442695, %v3238_v52 }
0x1796   : > { %7484 = vpow2.f32 %v3239_v53 }
0x17a0   : > { %v7485_v55 = vpop.eup %7484 }
0x17a1   : > { %v3241_v24 = vsel %vm1308_vm2, %v7485_v55, 0.0 }
0x17a2   : > { %3242 = vadd.xlane.f32.xlu1 %v3241_v24 }
0x17b3   : > { %3247 = vrot.lane.b32.xlu1 %v8414_v43, %s9149_s26 }
0x17b7   : > { %3296 = vrot.lane.b32.xlu1 %v8414_v43, %s9166_s30 }
0x17bb   : > { %3408 = vrot.lane.b32.xlu1 %v8414_v43, %s9150_s8 }
0x17bf   : > { %3520 = vrot.lane.b32.xlu1 %v8414_v43, %s9151_s20 }
0x182f   : > { %v3243_v59 = vpop.xlane.xlu1 %3242 }
0x1830   : > { %7486 = vrcp.f32 %v3243_v59 }
0x1833   : > { %v3248_v56 = vpop.permute.xlu1 %3247 }
0x1834   : > { %v3254_v58 = vsel %vm3252_vm7, %v3248_v56, 0 }
0x1835   : > { %6890 = vmatpush3.bf16.msra.mxu1 %v3254_v58 }
0x1836   : > { %6895 = vmatprep.subr.bf16.mxu1 %v7699_v15 }
0x1837   : > { %v3297_v3 = vpop.permute.xlu1 %3296 }
0x183a   : > { %v7487_v60 = vpop.eup %7486 }
0x183b   : > { %v3245_v61 = vmul.f32 %v7487_v60, %v7485_v55  ;;  %v3409_v23 = vpop.permute.xlu1 %3408 }
0x183d   : > { %v3246_v40 = vpack.c.bf16 %v3245_v61, %v3245_v61 }
0x183f   : > { %6892 = vmatmul.mubr.msk.bf16.vlgmr.msra.gmra.mrb[52].mxu1 %vm1308_vm2, %v3246_v40  ;;  %v3521_v9 = vpop.permute.xlu1 %3520 }
0x1840   : > { %6896 = vmatpush3.bf16.xpose.msra.mxu1 %v3304_v37  ;;  %6897 = vmatprep.mubr.msk.bf16.mxu1 %vm7700_vm1, %v7699_v15 }
0x1841   : > { %6907 = vmatprep.subr.bf16.mxu1 %v7699_v15 }
0x1847   : > { %6898 = vmatmul.mubr.msk.bf16.vlgmr.msra.gmra.mrb[56].mxu1 %vm1308_vm2, %v3297_v3 }
0x1848   : > { %6908 = vmatpush3.bf16.xpose.msra.mxu1 %v3416_v1  ;;  %6909 = vmatprep.mubr.msk.bf16.mxu1 %vm7700_vm1, %v7699_v15 }
0x1849   : > { %6919 = vmatprep.subr.bf16.mxu1 %v7699_v15 }
0x184f   : > { %6910 = vmatmul.mubr.msk.bf16.vlgmr.msra.gmra.mrb[60].mxu1 %vm1308_vm2, %v3409_v23 }
0x1850   : > { %6920 = vmatpush3.bf16.xpose.msra.mxu1 %v3528_v50  ;;  %6921 = vmatprep.mubr.msk.bf16.mxu1 %vm7700_vm1, %v7699_v15 }
0x1851   : > { %6931 = vmatprep.subr.bf16.mxu1 %v7699_v15 }
0x1857   : > { %6922 = vmatmul.mubr.msk.bf16.vlgmr.msra.gmra.mrb[64].mxu1 %vm1308_vm2, %v3521_v9 }
0x1858   : > { %6935 = vmatprep.mubr.msk.bf16.mxu1 %vm7700_vm1, %v7699_v15 }
0x1912   : > { %v8472_v48 = vpop.f32.mrb[52].mxu1 }
0x1913   : > { %v6893_v31 = vpop.f32.mrb[53].mxu1 }
0x1914   : > { %v3293_v54 = vpop.f32.mrb[54].mxu1 }
0x1915   : > { %v6894_v0 = vpop.f32.mrb[55].mxu1 }
0x191a   : > { %v3340_v10 = vpop.f32.mrb[56].mxu1 }
0x191b   : > { %v3346_v11 = vmul.f32 0.35355338, %v3340_v10  ;;  %v6899_v57 = vpop.f32.mrb[57].mxu1 }
0x191c   : > { %v3343_v4 = vpop.f32.mrb[58].mxu1 }
0x191d   : > { %v6900_v12 = vpop.f32.mrb[59].mxu1  ;;  %v3347_v13 = vsel %vm8436_vm6, -1e+30, %v3346_v11  ;;  %v7366_v11 = vld [vmem:[%s9168_s5] sm:$0xff]   ;;  %s9170_s5 = sld [smem:[#allocation33_spill]] }
0x191e   : > { %v3348_v14 = vsel %vm1308_vm2, %v3347_v13, -inf  ;;  %6932 = vmatpush3.bf16.msra.mxu1 %v7366_v11 }
0x191f   : > { %3349 = vmax.xlane.f32.xlu0 %v3348_v14  ;;  %6933 = vmatprep.subr.bf16.mxu1 %v7699_v15  ;;  %v7367_v14 = vld [vmem:[%s9169_s7 + $0x8] sm:$0xff]  }
0x1922   : > { %v3452_v16 = vpop.f32.mrb[60].mxu1  ;;  %6934 = vmatpush3.bf16.msra.mxu1 %v7367_v14 }
0x1923   : > { %v3458_v17 = vmul.f32 0.35355338, %v3452_v16  ;;  %v6911_v18 = vpop.f32.mrb[61].mxu1  ;;  %6947 = vmatprep.subr.bf16.mxu1 %v7699_v15  ;;  %s9171_s1 = smov %s9170_s5 }
0x1924   : > { %v3455_v19 = vpop.f32.mrb[62].mxu1 }
0x1925   : > { %v6912_v20 = vpop.f32.mrb[63].mxu1  ;;  %v3459_v21 = vsel %vm8436_vm6, -1e+30, %v3458_v17 }
0x1926   : > { %v3460_v22 = vsel %vm1308_vm2, %v3459_v21, -inf }
0x1927   : > { %3461 = vmax.xlane.f32.xlu1 %v3460_v22 }
0x192a   : > { %v3564_v27 = vpop.f32.mrb[64].mxu1 }
0x192b   : > { %v3570_v29 = vmul.f32 0.35355338, %v3564_v27  ;;  %v6923_v32 = vpop.f32.mrb[65].mxu1 }
0x192c   : > { %v3567_v33 = vpop.f32.mrb[66].mxu1 }
0x192d   : > { %v6924_v34 = vpop.f32.mrb[67].mxu1  ;;  %v3571_v35 = vsel %vm8436_vm6, -1e+30, %v3570_v29  ;;  %v7568_v29 = vld [vmem:[%s9122_s12] sm:$0x3]  ;;  %s9172_s12 = sld [smem:[#allocation34_spill]] }
0x192e   : > { %v3572_v38 = vsel %vm1308_vm2, %v3571_v35, -inf  ;;  %v2952_v32 = vrot.slane %v7568_v29, %v8220_v28  ;;  %v3737_v29 = vld [vmem:[%s9175_s28] sm:$0x3]  ;;  %s9181_s28 = sld [smem:[#allocation37_spill]] }
0x192f   : > { %3573 = vmax.xlane.f32.xlu0 %v3572_v38 }
0x1930   : > { %v3036_v33 = vadd.f32 %v8430_v36, %v2952_v32  ;;  %v3039_v38 = vadd.f32 %v8432_v41, %v2952_v32  ;;  %v3122_v41 = vld [vmem:[%s9170_s5] sm:$0x3]  ;;  %s9173_s5 = sld [smem:[#allocation22_spill]]  ;;  %v3747_v32 = vrot.slane %v3737_v29, %v8002_v25 }
0x1932   : > { %v3042_v34 = vadd.f32 %v3036_v33, %v8351_v5 }
0x1938   : > { %3472 = vrot.lane.b32.xlu1 %v8414_v43, %s9167_s15 }
0x19ac   : > { %v3350_v42 = vpop.xlane.xlu0 %3349 }
0x19ad   : > { %v3351_v26 = vsub.f32 %v3347_v13, %v3350_v42  ;;  %v3043_v42 = vadd.f32 %v3039_v38, %v8356_v8 }
0x19af   : > { %v3352_v44 = vmul.f32 1.442695, %v3351_v26  ;;  %v3049_v26 = vsel %vm1193_vm0, %v3043_v42, 0.0 }
0x19b1   : > { %7488 = vpow2.f32 %v3352_v44 }
0x19b4   : > { %v3462_v45 = vpop.xlane.xlu1 %3461 }
0x19b5   : > { %v3463_v30 = vsub.f32 %v3459_v21, %v3462_v45 }
0x19b7   : > { %v3464_v46 = vmul.f32 1.442695, %v3463_v30 }
0x19b8   : > { %v3473_v63 = vpop.permute.xlu1 %3472 }
0x19b9   : > { %7490 = vpow2.f32 %v3464_v46  ;;  %v3478_v6 = vsel %vm3252_vm7, %v3473_v63, 0 }
0x19bb   : > { %v7489_v49 = vpop.eup %7488 }
0x19bc   : > { %v3574_v39 = vpop.xlane.xlu0 %3573  ;;  %v3354_v51 = vsel %vm1308_vm2, %v7489_v49, 0.0 }
0x19bd   : > { %v3575_v52 = vsub.f32 %v3571_v35, %v3574_v39  ;;  %3355 = vadd.xlane.f32.xlu0 %v3354_v51  ;;  %v3046_v35 = vsel %vm1193_vm0, %v3042_v34, 0.0  ;;  %v3651_v51 = vrot.slane %v3122_v41, %v8002_v25 }
0x19bf   : > { %v3576_v53 = vmul.f32 1.442695, %v3575_v52 }
0x19c1   : > { %7492 = vpow2.f32 %v3576_v53 }
0x19c3   : > { %v7491_v55 = vpop.eup %7490 }
0x19c4   : > { %v3466_v24 = vsel %vm1308_vm2, %v7491_v55, 0.0 }
0x19c5   : > { %3467 = vadd.xlane.f32.xlu0 %v3466_v24 }
0x19cb   : > { %v7493_v59 = vpop.eup %7492 }
0x19cc   : > { %v3578_v56 = vsel %vm1308_vm2, %v7493_v59, 0.0 }
0x19cd   : > { %3579 = vadd.xlane.f32.xlu1 %v3578_v56 }
0x19db   : > { %3360 = vrot.lane.b32.xlu0 %v8414_v43, %s9152_s3 }
0x19de   : > { %3584 = vrot.lane.b32.xlu1 %v8414_v43, %s9153_s17 }
0x1a4a   : > { %v3356_v58 = vpop.xlane.xlu0 %3355 }
0x1a4b   : > { %7494 = vrcp.f32 %v3356_v58 }
0x1a52   : > { %v3468_v60 = vpop.xlane.xlu0 %3467 }
0x1a53   : > { %7496 = vrcp.f32 %v3468_v60 }
0x1a55   : > { %v7495_v61 = vpop.eup %7494 }
0x1a56   : > { %v3358_v40 = vmul.f32 %v7495_v61, %v7489_v49  ;;  %v3361_v37 = vpop.permute.xlu0 %3360 }
0x1a57   : > { %v3366_v2 = vsel %vm3252_vm7, %v3361_v37, 0 }
0x1a58   : > { %6902 = vmatpush3.bf16.msra.mxu0 %v3366_v2  ;;  %v3359_v3 = vpack.c.bf16 %v3358_v40, %v3358_v40 }
0x1a59   : > { %6913 = vmatprep.subr.bf16.mxu0 %v7699_v15 }
0x1a5a   : > { %v3580_v1 = vpop.xlane.xlu1 %3579 }
0x1a5b   : > { %7498 = vrcp.f32 %v3580_v1  ;;  %6904 = vmatmul.mubr.msk.bf16.vlgmr.msra.gmra.mrb[52].mxu0 %vm1308_vm2, %v3359_v3  ;;  %v7368_v1 = vld [vmem:[%s9172_s12] sm:$0xff]  }
0x1a5c   : > { %6914 = vmatpush3.bf16.msra.mxu0 %v3478_v6  ;;  %6915 = vmatprep.mubr.msk.bf16.mxu0 %vm7700_vm1, %v7699_v15 }
0x1a5d   : > { %v7497_v43 = vpop.eup %7496  ;;  %6925 = vmatprep.subr.bf16.mxu0 %v7699_v15 }
0x1a5e   : > { %v3470_v23 = vmul.f32 %v7497_v43, %v7491_v55  ;;  %v3585_v50 = vpop.permute.xlu1 %3584 }
0x1a5f   : > { %v3590_v31 = vsel %vm3252_vm7, %v3585_v50, 0 }
0x1a60   : > { %v3471_v9 = vpack.c.bf16 %v3470_v23, %v3470_v23 }
0x1a63   : > { %6916 = vmatmul.mubr.msk.bf16.vlgmr.msra.gmra.mrb[56].mxu0 %vm1308_vm2, %v3471_v9 }
0x1a64   : > { %6926 = vmatpush3.bf16.msra.mxu0 %v3590_v31  ;;  %6927 = vmatprep.mubr.msk.bf16.mxu0 %vm7700_vm1, %v7699_v15 }
0x1a65   : > { %v7499_v54 = vpop.eup %7498  ;;  %6939 = vmatprep.subr.bf16.mxu0 %v7699_v15 }
0x1a66   : > { %v3582_v0 = vmul.f32 %v7499_v54, %v7493_v59 }
0x1a68   : > { %v3583_v10 = vpack.c.bf16 %v3582_v0, %v3582_v0 }
0x1a6b   : > { %6928 = vmatmul.mubr.msk.bf16.vlgmr.msra.gmra.mrb[60].mxu0 %vm1308_vm2, %v3583_v10 }
0x1a6c   : > { %6943 = vmatprep.mubr.msk.bf16.mxu0 %vm7700_vm1, %v7699_v15  ;;  %6940 = vmatpush3.bf16.msra.mxu0 %v7368_v1 }
0x1a6d   : > { %6941 = vmatprep.subr.bf16.mxu0 %v7699_v15 }
0x1b2e   : > { %v3402_v57 = vpop.f32.mrb[52].mxu0 }
0x1b2f   : > { %3633 = vrot.lane.b32.xlu1 %v3402_v57, %s9154_s13  ;;  %v6905_v4 = vpop.f32.mrb[53].mxu0 }
0x1b30   : > { %v3405_v12 = vpop.f32.mrb[54].mxu0 }
0x1b31   : > { %v6906_v13 = vpop.f32.mrb[55].mxu0 }
0x1b32   : > { %v6373_v13 = vld [vmem:[%s9173_s5] ss:$0 sm:$0xff]  ;;  %s9182_s5 = sld [smem:[#allocation38_spill]] }
0x1b36   : > { %v3514_v16 = vpop.f32.mrb[56].mxu0 }
0x1b37   : > { %3637 = vrot.lane.b32.xlu0 %v3514_v16, %s9155_s19  ;;  %v6917_v17 = vpop.f32.mrb[57].mxu0 }
0x1b38   : > { %v3517_v18 = vpop.f32.mrb[58].mxu0  ;;  %s9183_s10 = smov %s9182_s5 }
0x1b39   : > { %v6918_v19 = vpop.f32.mrb[59].mxu0 }
0x1b3a   : > { %v6374_v19 = vld [vmem:[%s9174_s4] ss:$0 sm:$0xff]  ;;  %s9179_s4 = sld [smem:[#allocation36_spill]] }
0x1b3e   : > { %v3626_v20 = vpop.f32.mrb[60].mxu0 }
0x1b3f   : > { %3641 = vrot.lane.b32.xlu1 %v3626_v20, %s9156_s21  ;;  %v6929_v21 = vpop.f32.mrb[61].mxu0 }
0x1b40   : > { %v3629_v22 = vpop.f32.mrb[62].mxu0  ;;  %s9180_s16 = smov %s9179_s4 }
0x1b41   : > { %v6930_v27 = vpop.f32.mrb[63].mxu0 }
0x1b56   : > { %3047 = vadd.xlane.f32.xlu0 %v3046_v35 }
0x1b63   : > { %3050 = vadd.xlane.f32.xlu1 %v3049_v26  ;;  %v3709_v26 = vld [vmem:[%s9178_s2] sm:$0x3] }
0x1ba1   : > { %v3634_v44 = vpop.permute.xlu1 %3633 }
0x1ba2   : > { %v3644_v30 = vsel %vm1308_vm2, %v8472_v48, %v3634_v44 }
0x1ba9   : > { %v3638_v45 = vpop.permute.xlu0 %3637 }
0x1baa   : > { %v3645_v36 = vsel %vm1362_vm4, %v3644_v30, %v3638_v45 }
0x1bb1   : > { %v3642_v46 = vpop.permute.xlu1 %3641 }
0x1bb2   : > { %v3646_v5 = vsel %vm1836_vm5, %v3645_v36, %v3642_v46  ;;  %v3731_v36 = vrot.slane %v3709_v26, %v8002_v25 }
0x1bb3   : > { %v3647_v49 = vpack.c.bf16 %v3646_v5, %v3646_v5 }
0x1bb5   : > { %6936 = vmatmul.mubr.msk.bf16.vlgmr.msra.gmra.mrb[68].mxu1 %vm1193_vm0, %v3647_v49 }
0x1bb6   : > { %6951 = vmatprep.mubr.msk.bf16.mxu1 %vm7700_vm1, %v7699_v15 }
0x1be3   : > { %v3048_v8 = vpop.xlane.xlu0 %3047 }
0x1be4   : > { %v3052_v39 = vmul.f32 0.03125, %v3048_v8 }
0x1be6   : > { %v3054_v55 = vsub.f32 %v3042_v34, %v3052_v39 }
0x1be8   : > { %v3056_v40 = vmul.f32 %v3054_v55, %v3054_v55 }
0x1bea   : > { %v3058_v37 = vsel %vm1193_vm0, %v3056_v40, 0.0 }
0x1bf0   : > { %v3051_v52 = vpop.xlane.xlu1 %3050 }
0x1bf1   : > { %v3053_v48 = vmul.f32 0.03125, %v3051_v52 }
0x1bf3   : > { %v3055_v61 = vsub.f32 %v3043_v42, %v3053_v48  ;;  %v3708_v42 = vld [vmem:[%s9177_s23] sm:$0x3] }
0x1bf4   : > { %v3726_v44 = vrot.slane %v3708_v42, %v8002_v25 }
0x1bf5   : > { %v3057_v2 = vmul.f32 %v3055_v61, %v3055_v61 }
0x1bf7   : > { %v3061_v3 = vsel %vm1193_vm0, %v3057_v2, 0.0 }
0x1c88   : > { %v3701_v53 = vpop.f32.mrb[68].mxu1 }
0x1c89   : > { %v3702_v24 = vadd.f32 %v3701_v53, %v3651_v51  ;;  %v6937_v59 = vpop.f32.mrb[69].mxu1 }
0x1c8a   : > { %v3704_v56 = vpop.f32.mrb[70].mxu1 }
0x1c8b   : > { %v8532_v58 = vadd.f32 %v3702_v24, %v8353_v7  ;;  %v6938_v60 = vpop.f32.mrb[71].mxu1  ;;  %v7369_v7 = vld [vmem:[%s9172_s12 + $0x8] sm:$0xff]  }
0x1c8c   : > { %6942 = vmatpush3.bf16.msra.mxu0 %v7369_v7 }
0x1c8d   : > { %v3710_v63 = vsel %vm1193_vm0, %v8532_v58, 0.0  ;;  %6955 = vmatprep.subr.bf16.mxu0 %v7699_v15 }
0x1c8e   : > { %3711 = vadd.xlane.f32.xlu0 %v3710_v63 }
0x1c92   : > { %3059 = vadd.xlane.f32.xlu0 %v3058_v37 }
0x1c96   : > { %3062 = vadd.xlane.f32.xlu0 %v3061_v3 }
0x1cac   : > { %3804 = vrot.lane.b32.xlu0 %v7368_v1, %s9162_s6 }
0x1d1b   : > { %v3712_v6 = vpop.xlane.xlu0 %3711 }
0x1d1c   : > { %v3713_v43 = vmul.f32 0.03125, %v3712_v6 }
0x1d1e   : > { %v3714_v23 = vsub.f32 %v8532_v58, %v3713_v43 }
0x1d1f   : > { %v3060_v50 = vpop.xlane.xlu0 %3059 }
0x1d20   : > { %v3064_v9 = vmul.f32 0.03125, %v3060_v50  ;;  %v3715_v31 = vmul.f32 %v3714_v23, %v3714_v23 }
0x1d22   : > { %v3066_v54 = vadd.f32 1e-06, %v3064_v9  ;;  %v3716_v0 = vsel %vm1193_vm0, %v3715_v31, 0.0 }
0x1d23   : > { %3717 = vadd.xlane.f32.xlu1 %v3716_v0  ;;  %v3063_v10 = vpop.xlane.xlu0 %3062 }
0x1d24   : > { %7500 = vrsqrt.f32 %v3066_v54  ;;  %v3065_v11 = vmul.f32 0.03125, %v3063_v10 }
0x1d26   : > { %v3067_v57 = vadd.f32 1e-06, %v3065_v11 }
0x1d27   : > { %v3805_v14 = vpop.permute.xlu0 %3804 }
0x1d28   : > { %7502 = vrsqrt.f32 %v3067_v57  ;;  %6948 = vmatpush3.bf16.msra.mxu1 %v3805_v14 }
0x1d29   : > { %6949 = vmatprep.subr.bf16.mxu1 %v7699_v15 }
0x1d2e   : > { %v7501_v4 = vpop.eup %7500 }
0x1d2f   : > { %v3070_v12 = vmul.f32 %v7501_v4, %v3054_v55 }
0x1d31   : > { %v3078_v17 = vmul.f32 %v6373_v13, %v3070_v12 }
0x1d32   : > { %v7503_v16 = vpop.eup %7502 }
0x1d33   : > { %v3071_v18 = vmul.f32 %v7503_v16, %v3055_v61  ;;  %v3086_v21 = vadd.f32 %v6374_v19, %v3078_v17 }
0x1d34   : > { %3806 = vrot.lane.b32.xlu1 %v7369_v7, %s9162_s6 }
0x1d35   : > { %v3079_v20 = vmul.f32 %v6373_v13, %v3071_v18 }
0x1d37   : > { %v3087_v22 = vadd.f32 %v6374_v19, %v3079_v20 }
0x1d38   : > { %3811 = vrot.lane.b32.xlu1 %v3747_v32, %s9162_s6 }
0x1d39   : > { %v8549_v27 = vpack.c.bf16 %v3087_v22, %v3086_v21 }
0x1db0   : > { %v3718_v33 = vpop.xlane.xlu1 %3717 }
0x1db1   : > { %v3719_v34 = vmul.f32 0.03125, %v3718_v33 }
0x1db3   : > { %v3720_v35 = vadd.f32 1e-05, %v3719_v34 }
0x1db4   : > { %v3807_v38 = vpop.permute.xlu1 %3806 }
0x1db5   : > { %7504 = vrsqrt.f32 %v3720_v35  ;;  %6950 = vmatpush3.bf16.msra.mxu1 %v3807_v38 }
0x1db6   : > { %6961 = vmatprep.subr.bf16.mxu1 %v7699_v15 }
0x1db8   : > { %6952 = vmatmul.mubr.msk.bf16.vlgmr.msra.gmra.mrb[72].mxu1 %vm1193_vm0, %v8549_v27  ;;  %v3812_v8 = vpop.permute.xlu1 %3811 }
0x1db9   : > { %6963 = vmatprep.mubr.msk.bf16.mxu1 %vm7700_vm1, %v7699_v15 }
0x1dbf   : > { %v7505_v45 = vpop.eup %7504 }
0x1dc0   : > { %v3722_v30 = vmul.f32 %v7505_v45, %v3714_v23 }
0x1dc2   : > { %v3727_v46 = vmul.f32 %v3726_v44, %v3722_v30 }
0x1dc4   : > { %v3732_v5 = vadd.f32 %v3731_v36, %v3727_v46 }
0x1dc6   : > { %v3743_v49 = vpack.c.bf16 %v3732_v5, %v3732_v5 }
0x1dc8   : > { %6944 = vmatmul.mubr.msk.bf16.vlgmr.msra.gmra.mrb[64].mxu0 %vm1193_vm0, %v3743_v49 }
0x1dc9   : > { %6957 = vmatprep.mubr.msk.bf16.mxu0 %vm7700_vm1, %v7699_v15 }
0x1e8b   : > { %v3851_v41 = vpop.f32.mrb[72].mxu1 }
0x1e8c   : > { %v6953_v39 = vpop.f32.mrb[73].mxu1  ;;  %v3852_v52 = vadd.f32 %v3851_v41, %v3812_v8 }
0x1e8d   : > { %v3854_v51 = vpop.f32.mrb[74].mxu1 }
0x1e8e   : > { %v3855_v53 = vadd.f32 %v3854_v51, %v3812_v8  ;;  %v6954_v55 = vpop.f32.mrb[75].mxu1 }
0x1e90   : > { %v8566_v48 = vpack.c.bf16 %v3855_v53, %v3852_v52 }
0x1e92   : > { %3970 = vrot.lane.b32.xlu1 %v8566_v48, %s9166_s30  ;;  %v3864_v24 = vsel %vm1308_vm2, %v8566_v48, 0 }
0x1e93   : > { %6956 = vmatpush3.bf16.xpose.msra.mxu0 %v3864_v24 }
0x1e94   : > { %6967 = vmatprep.subr.bf16.mxu0 %v7699_v15 }
0x1e96   : > { %4080 = vrot.lane.b32.xlu1 %v8566_v48, %s9150_s8 }
0x1e9a   : > { %4190 = vrot.lane.b32.xlu1 %v8566_v48, %s9151_s20 }
0x1e9b   : > { %v3797_v59 = vpop.f32.mrb[64].mxu0 }
0x1e9c   : > { %v3798_v56 = vadd.f32 %v3797_v59, %v3747_v32  ;;  %v6945_v60 = vpop.f32.mrb[65].mxu0 }
0x1e9d   : > { %v3800_v61 = vpop.f32.mrb[66].mxu0 }
0x1e9e   : > { %v3858_v63 = vpack.c.bf16 %v3798_v56, %v3798_v56  ;;  %v6946_v40 = vpop.f32.mrb[67].mxu0 }
0x1ea0   : > { %3968 = vrot.lane.b32.xlu0 %v3858_v63, %s9166_s30  ;;  %6958 = vmatmul.mubr.msk.bf16.vlgmr.msra.gmra.mrb[68].mxu0 %vm1308_vm2, %v3858_v63 }
0x1ea1   : > { %6969 = vmatprep.mubr.msk.bf16.mxu0 %vm7700_vm1, %v7699_v15 }
0x1ea4   : > { %4078 = vrot.lane.b32.xlu0 %v3858_v63, %s9150_s8 }
0x1ea8   : > { %4188 = vrot.lane.b32.xlu0 %v3858_v63, %s9151_s20 }
0x1f04   : > { %v3971_v37 = vpop.permute.xlu1 %3970 }
0x1f05   : > { %v3976_v2 = vsel %vm1308_vm2, %v3971_v37, 0 }
0x1f06   : > { %6968 = vmatpush3.bf16.xpose.msra.mxu0 %v3976_v2 }
0x1f07   : > { %6979 = vmatprep.subr.bf16.mxu0 %v7699_v15 }
0x1f08   : > { %v4081_v3 = vpop.permute.xlu1 %4080 }
0x1f09   : > { %v4086_v7 = vsel %vm1308_vm2, %v4081_v3, 0 }
0x1f0c   : > { %v4191_v6 = vpop.permute.xlu1 %4190 }
0x1f0d   : > { %v4196_v23 = vsel %vm1308_vm2, %v4191_v6, 0 }
0x1f12   : > { %v3969_v1 = vpop.permute.xlu0 %3968 }
0x1f13   : > { %6970 = vmatmul.mubr.msk.bf16.vlgmr.msra.gmra.mrb[72].mxu0 %vm1308_vm2, %v3969_v1 }
0x1f14   : > { %6980 = vmatpush3.bf16.xpose.msra.mxu0 %v4086_v7  ;;  %6981 = vmatprep.mubr.msk.bf16.mxu0 %vm7700_vm1, %v7699_v15 }
0x1f15   : > { %6991 = vmatprep.subr.bf16.mxu0 %v7699_v15 }
0x1f16   : > { %v4079_v43 = vpop.permute.xlu0 %4078 }
0x1f1a   : > { %v4189_v50 = vpop.permute.xlu0 %4188 }
0x1f1b   : > { %6982 = vmatmul.mubr.msk.bf16.vlgmr.msra.gmra.mrb[76].mxu0 %vm1308_vm2, %v4079_v43 }
0x1f1c   : > { %6992 = vmatpush3.bf16.xpose.msra.mxu0 %v4196_v23  ;;  %6993 = vmatprep.mubr.msk.bf16.mxu0 %vm7700_vm1, %v7699_v15 }
0x1f1d   : > { %7003 = vmatprep.subr.bf16.mxu0 %v7699_v15 }
0x1f23   : > { %6994 = vmatmul.mubr.msk.bf16.vlgmr.msra.gmra.mrb[80].mxu0 %vm1308_vm2, %v4189_v50 }
0x1f24   : > { %7007 = vmatprep.mubr.msk.bf16.mxu0 %vm7700_vm1, %v7699_v15 }
0x1f73   : > { %v3900_v9 = vpop.f32.mrb[68].mxu0 }
0x1f74   : > { %v3906_v31 = vmul.f32 0.35355338, %v3900_v9  ;;  %v6959_v54 = vpop.f32.mrb[69].mxu0 }
0x1f75   : > { %v3903_v0 = vpop.f32.mrb[70].mxu0 }
0x1f76   : > { %v3907_v10 = vsel %vm8064_vm3, -1e+30, %v3906_v31  ;;  %v6960_v11 = vpop.f32.mrb[71].mxu0 }
0x1f77   : > { %v3908_v57 = vsel %vm1362_vm4, %v3907_v10, -inf }
0x1f78   : > { %3909 = vmax.xlane.f32.xlu1 %v3908_v57 }
0x1fe6   : > { %v4012_v4 = vpop.f32.mrb[72].mxu0 }
0x1fe7   : > { %v4018_v12 = vmul.f32 0.35355338, %v4012_v4  ;;  %v6971_v13 = vpop.f32.mrb[73].mxu0 }
0x1fe8   : > { %v4015_v14 = vpop.f32.mrb[74].mxu0 }
0x1fe9   : > { %v4019_v16 = vsel %vm8064_vm3, -1e+30, %v4018_v12  ;;  %v6972_v17 = vpop.f32.mrb[75].mxu0 }
0x1fea   : > { %v4020_v18 = vsel %vm1362_vm4, %v4019_v16, -inf }
0x1feb   : > { %4021 = vmax.xlane.f32.xlu0 %v4020_v18 }
0x1fee   : > { %v4122_v19 = vpop.f32.mrb[76].mxu0 }
0x1fef   : > { %v4128_v20 = vmul.f32 0.35355338, %v4122_v19  ;;  %v6983_v21 = vpop.f32.mrb[77].mxu0 }
0x1ff0   : > { %v4125_v22 = vpop.f32.mrb[78].mxu0 }
0x1ff1   : > { %v4129_v29 = vsel %vm8064_vm3, -1e+30, %v4128_v20  ;;  %v6984_v32 = vpop.f32.mrb[79].mxu0  ;;  %v7370_v20 = vld [vmem:[%s9179_s4] sm:$0xff]   ;;  %s9184_s4 = sld [smem:[#allocation40_spill]] }
0x1ff2   : > { %v4130_v33 = vsel %vm1362_vm4, %v4129_v29, -inf  ;;  %7004 = vmatpush3.bf16.msra.mxu0 %v7370_v20 }
0x1ff3   : > { %4131 = vmax.xlane.f32.xlu0 %v4130_v33  ;;  %7005 = vmatprep.subr.bf16.mxu0 %v7699_v15  ;;  %v7371_v33 = vld [vmem:[%s9180_s16 + $0x8] sm:$0xff]  }
0x1ff6   : > { %v4232_v34 = vpop.f32.mrb[80].mxu0  ;;  %7006 = vmatpush3.bf16.msra.mxu0 %v7371_v33 }
0x1ff7   : > { %v4238_v35 = vmul.f32 0.35355338, %v4232_v34  ;;  %v6995_v38 = vpop.f32.mrb[81].mxu0  ;;  %7019 = vmatprep.subr.bf16.mxu0 %v7699_v15  ;;  %s9185_s27 = smov %s9184_s4 }
0x1ff8   : > { %v4235_v42 = vpop.f32.mrb[82].mxu0 }
0x1ff9   : > { %v4239_v26 = vsel %vm8064_vm3, -1e+30, %v4238_v35  ;;  %v6996_v44 = vpop.f32.mrb[83].mxu0 }
0x1ffa   : > { %v4240_v45 = vsel %vm1362_vm4, %v4239_v26, -inf }
0x1ffb   : > { %4241 = vmax.xlane.f32.xlu0 %v4240_v45 }
0x2005   : > { %v3910_v30 = vpop.xlane.xlu1 %3909 }
0x2006   : > { %v3911_v36 = vsub.f32 %v3907_v10, %v3910_v30 }
0x2008   : > { %v3912_v46 = vmul.f32 1.442695, %v3911_v36 }
0x200a   : > { %7506 = vpow2.f32 %v3912_v46 }
0x2014   : > { %v7507_v5 = vpop.eup %7506 }
0x2015   : > { %v3914_v49 = vsel %vm1362_vm4, %v7507_v5, 0.0 }
0x2016   : > { %3915 = vadd.xlane.f32.xlu1 %v3914_v49 }
0x2027   : > { %3921 = vrot.lane.b32.xlu1 %v8566_v48, %s9162_s6 }
0x2078   : > { %v4022_v8 = vpop.xlane.xlu0 %4021 }
0x2079   : > { %v4023_v41 = vsub.f32 %v4019_v16, %v4022_v8 }
0x207b   : > { %v4024_v39 = vmul.f32 1.442695, %v4023_v41 }
0x207d   : > { %7508 = vpow2.f32 %v4024_v39 }
0x2080   : > { %v4132_v51 = vpop.xlane.xlu0 %4131 }
0x2081   : > { %v4133_v52 = vsub.f32 %v4129_v29, %v4132_v51  ;;  %v3742_v51 = vld [vmem:[%s9181_s28] sm:$0x3]  ;;  %s9186_s28 = sld [smem:[#allocation28_spill]] }
0x2083   : > { %v4134_v53 = vmul.f32 1.442695, %v4133_v52  ;;  %v4317_v52 = vrot.slane %v3742_v51, %v8002_v25  ;;  %v7382_v51 = vld [vmem:[%s9160_s14 + $0x10] sm:$0xff]  }
0x2085   : > { %7510 = vpow2.f32 %v4134_v53 }
0x2087   : > { %v7509_v55 = vpop.eup %7508 }
0x2088   : > { %v4242_v24 = vpop.xlane.xlu0 %4241  ;;  %v4026_v59 = vsel %vm1362_vm4, %v7509_v55, 0.0 }
0x2089   : > { %v4243_v56 = vsub.f32 %v4239_v26, %v4242_v24  ;;  %4027 = vadd.xlane.f32.xlu0 %v4026_v59 }
0x208b   : > { %v4244_v60 = vmul.f32 1.442695, %v4243_v56 }
0x208d   : > { %7512 = vpow2.f32 %v4244_v60 }
0x208f   : > { %v7511_v61 = vpop.eup %7510 }
0x2090   : > { %v4136_v63 = vsel %vm1362_vm4, %v7511_v61, 0.0 }
0x2091   : > { %4137 = vadd.xlane.f32.xlu1 %v4136_v63 }
0x2097   : > { %v7513_v40 = vpop.eup %7512 }
0x2098   : > { %v4246_v37 = vsel %vm1362_vm4, %v7513_v40, 0.0 }
0x2099   : > { %4247 = vadd.xlane.f32.xlu0 %v4246_v37 }
0x20a2   : > { %4142 = vrot.lane.b32.xlu1 %v8566_v48, %s9163_s24 }
0x20a3   : > { %v3916_v2 = vpop.xlane.xlu1 %3915 }
0x20a4   : > { %7514 = vrcp.f32 %v3916_v2 }
0x20a6   : > { %4252 = vrot.lane.b32.xlu1 %v8566_v48, %s9148_s11 }
0x20a7   : > { %v3922_v3 = vpop.permute.xlu1 %3921 }
0x20a8   : > { %6962 = vmatpush3.bf16.msra.mxu1 %v3922_v3 }
0x20a9   : > { %6973 = vmatprep.subr.bf16.mxu1 %v7699_v15 }
0x20ae   : > { %v7515_v1 = vpop.eup %7514 }
0x20af   : > { %v3918_v7 = vmul.f32 %v7515_v1, %v7507_v5  ;;  %4032 = vrot.lane.b32.xlu0 %v8566_v48, %s9147_s9  ;;  %v7372_v1 = vld [vmem:[%s9182_s5] sm:$0xff]   ;;  %s9187_s5 = sld [smem:[#allocation29_spill]] }
0x20b1   : > { %v3919_v6 = vpack.c.bf16 %v3918_v7, %v3918_v7  ;;  %v7374_v7 = vld [vmem:[%s9184_s4] sm:$0xff]   ;;  %s9188_s4 = sld [smem:[#allocation39_spill]] }
0x20b3   : > { %6964 = vmatmul.mubr.msk.bf16.vlgmr.msra.gmra.mrb[76].mxu1 %vm1362_vm4, %v3919_v6  ;;  %v7375_v6 = vld [vmem:[%s9185_s27 + $0x8] sm:$0xff]  }
0x20b4   : > { %6975 = vmatprep.mubr.msk.bf16.mxu1 %vm7700_vm1, %v7699_v15 }
0x20b7   : > { %s9189_s2 = smov %s9188_s4 }
0x2116   : > { %v4028_v43 = vpop.xlane.xlu0 %4027 }
0x2117   : > { %7516 = vrcp.f32 %v4028_v43  ;;  %v7376_v43 = vld [vmem:[%s9185_s27 + $0x10] sm:$0xff]  }
0x211e   : > { %v4138_v23 = vpop.xlane.xlu1 %4137 }
0x211f   : > { %7518 = vrcp.f32 %v4138_v23  ;;  %v7377_v23 = vld [vmem:[%s9185_s27 + $0x18] sm:$0xff]  }
0x2121   : > { %v7517_v50 = vpop.eup %7516 }
0x2122   : > { %v4030_v31 = vmul.f32 %v7517_v50, %v7509_v55  ;;  %v4143_v10 = vpop.permute.xlu1 %4142  ;;  %v7378_v50 = vld [vmem:[%s9185_s27 + $0x20] sm:$0xff]  }
0x2124   : > { %v4031_v0 = vpack.c.bf16 %v4030_v31, %v4030_v31 }
0x2126   : > { %v4248_v9 = vpop.xlane.xlu0 %4247  ;;  %v4253_v12 = vpop.permute.xlu1 %4252 }
0x2127   : > { %7520 = vrcp.f32 %v4248_v9  ;;  %v7379_v9 = vld [vmem:[%s9185_s27 + $0x28] sm:$0xff]  }
0x2129   : > { %v7519_v48 = vpop.eup %7518 }
0x212a   : > { %v4033_v54 = vpop.permute.xlu0 %4032  ;;  %v4140_v11 = vmul.f32 %v7519_v48, %v7511_v61  ;;  %v4374_v48 = vld [vmem:[%s9186_s28] sm:$0x3]  ;;  %s9190_s28 = sld [smem:[#allocation41_spill]] }
0x212b   : > { %6974 = vmatpush3.bf16.msra.mxu1 %v4033_v54 }
0x212c   : > { %6985 = vmatprep.subr.bf16.mxu1 %v7699_v15  ;;  %v4141_v57 = vpack.c.bf16 %v4140_v11, %v4140_v11  ;;  %v4392_v11 = vrot.slane %v4374_v48, %v8002_v25 }
0x212e   : > { %6976 = vmatmul.mubr.msk.bf16.vlgmr.msra.gmra.mrb[80].mxu1 %vm1362_vm4, %v4031_v0 }
0x212f   : > { %6986 = vmatpush3.bf16.msra.mxu1 %v4143_v10  ;;  %6987 = vmatprep.mubr.msk.bf16.mxu1 %vm7700_vm1, %v7699_v15  ;;  %v4375_v10 = vld [vmem:[%s9187_s5] sm:$0x3] }
0x2130   : > { %6997 = vmatprep.subr.bf16.mxu1 %v7699_v15  ;;  %s9191_s16 = smov %s9190_s28 }
0x2131   : > { %v7521_v4 = vpop.eup %7520 }
0x2132   : > { %v4250_v13 = vmul.f32 %v7521_v4, %v7513_v40 }
0x2134   : > { %v4251_v14 = vpack.c.bf16 %v4250_v13, %v4250_v13 }
0x2136   : > { %6988 = vmatmul.mubr.msk.bf16.vlgmr.msra.gmra.mrb[84].mxu1 %vm1362_vm4, %v4141_v57 }
0x2137   : > { %6998 = vmatpush3.bf16.msra.mxu1 %v4253_v12  ;;  %6999 = vmatprep.mubr.msk.bf16.mxu1 %vm7700_vm1, %v7699_v15  ;;  %v4397_v12 = vrot.slane %v4375_v10, %v8002_v25 }
0x2138   : > { %7011 = vmatprep.subr.bf16.mxu1 %v7699_v15 }
0x213e   : > { %7000 = vmatmul.mubr.msk.bf16.vlgmr.msra.gmra.mrb[88].mxu1 %vm1362_vm4, %v4251_v14 }
0x213f   : > { %7015 = vmatprep.mubr.msk.bf16.mxu1 %vm7700_vm1, %v7699_v15  ;;  %7012 = vmatpush3.bf16.msra.mxu1 %v7372_v1  ;;  %v7571_v1 = vld [vmem:[%s9161_s22] sm:$0x3] }
0x2140   : > { %7013 = vmatprep.subr.bf16.mxu1 %v7699_v15 }
0x2186   : > { %v3961_v16 = vpop.f32.mrb[76].mxu1 }
0x2187   : > { %v6965_v17 = vpop.f32.mrb[77].mxu1 }
0x2188   : > { %v3964_v18 = vpop.f32.mrb[78].mxu1  ;;  %v7380_v17 = vld [vmem:[%s9185_s27 + $0x30] sm:$0xff]  }
0x2189   : > { %v6966_v19 = vpop.f32.mrb[79].mxu1  ;;  %v7381_v18 = vld [vmem:[%s9185_s27 + $0x38] sm:$0xff]  }
0x218a   : > { %v4403_v19 = vld [vmem:[%s9188_s4] sm:$0x3] }
0x218b   : > { %v4425_v20 = vrot.slane %v4403_v19, %v8002_v25 }
0x2201   : > { %v4072_v21 = vpop.f32.mrb[80].mxu1 }
0x2202   : > { %4299 = vrot.lane.b32.xlu1 %v4072_v21, %s9154_s13  ;;  %v6977_v22 = vpop.f32.mrb[81].mxu1 }
0x2203   : > { %v4075_v29 = vpop.f32.mrb[82].mxu1 }
0x2204   : > { %v6978_v32 = vpop.f32.mrb[83].mxu1 }
0x2209   : > { %v4182_v34 = vpop.f32.mrb[84].mxu1 }
0x220a   : > { %4303 = vrot.lane.b32.xlu0 %v4182_v34, %s9155_s19  ;;  %v6989_v35 = vpop.f32.mrb[85].mxu1 }
0x220b   : > { %v4185_v38 = vpop.f32.mrb[86].mxu1 }
0x220c   : > { %v6990_v42 = vpop.f32.mrb[87].mxu1  ;;  %v4420_v38 = vld [vmem:[%s9190_s28] sm:$0x3] }
0x220d   : > { %v4486_v42 = vrot.slane %v4420_v38, %v8002_v25 }
0x2211   : > { %v4292_v26 = vpop.f32.mrb[88].mxu1 }
0x2212   : > { %4307 = vrot.lane.b32.xlu1 %v4292_v26, %s9156_s21  ;;  %v7001_v44 = vpop.f32.mrb[89].mxu1 }
0x2213   : > { %v4295_v45 = vpop.f32.mrb[90].mxu1 }
0x2214   : > { %v7002_v30 = vpop.f32.mrb[91].mxu1 }
0x2274   : > { %v4300_v36 = vpop.permute.xlu1 %4299 }
0x2275   : > { %v4310_v5 = vsel %vm1308_vm2, %v3961_v16, %v4300_v36 }
0x227c   : > { %v4304_v46 = vpop.permute.xlu0 %4303 }
0x227d   : > { %v4311_v49 = vsel %vm1362_vm4, %v4310_v5, %v4304_v46 }
0x2284   : > { %v4308_v8 = vpop.permute.xlu1 %4307 }
0x2285   : > { %v4312_v41 = vsel %vm1836_vm5, %v4311_v49, %v4308_v8 }
0x2286   : > { %v4313_v39 = vpack.c.bf16 %v4312_v41, %v4312_v41 }
0x2288   : > { %7008 = vmatmul.mubr.msk.bf16.vlgmr.msra.gmra.mrb[84].mxu0 %vm1193_vm0, %v4313_v39 }
0x2289   : > { %7035 = vmatprep.mubr.msk.bf16.mxu0 %vm7700_vm1, %v7699_v15  ;;  %7020 = vmatpush3.bf16.msra.mxu0 %v7374_v7 }
0x228a   : > { %7021 = vmatprep.subr.bf16.mxu0 %v7699_v15 }
0x228d   : > { %7022 = vmatpush3.bf16.msra.mxu0 %v7375_v6 }
0x228e   : > { %7023 = vmatprep.subr.bf16.mxu0 %v7699_v15 }
0x2291   : > { %7024 = vmatpush3.bf16.msra.mxu0 %v7376_v43 }
0x2292   : > { %7025 = vmatprep.subr.bf16.mxu0 %v7699_v15 }
0x2295   : > { %7026 = vmatpush3.bf16.msra.mxu0 %v7377_v23 }
0x2296   : > { %7027 = vmatprep.subr.bf16.mxu0 %v7699_v15 }
0x2299   : > { %7028 = vmatpush3.bf16.msra.mxu0 %v7378_v50 }
0x229a   : > { %7029 = vmatprep.subr.bf16.mxu0 %v7699_v15 }
0x229d   : > { %7030 = vmatpush3.bf16.msra.mxu0 %v7379_v9 }
0x229e   : > { %7031 = vmatprep.subr.bf16.mxu0 %v7699_v15 }
0x22a1   : > { %7032 = vmatpush3.bf16.msra.mxu0 %v7380_v17 }
0x22a2   : > { %7033 = vmatprep.subr.bf16.mxu0 %v7699_v15 }
0x22a5   : > { %7034 = vmatpush3.bf16.msra.mxu0 %v7381_v18 }
0x22a6   : > { %7065 = vmatprep.subr.bf16.mxu0 %v7699_v15 }
0x235b   : > { %v4367_v53 = vpop.f32.mrb[84].mxu0 }
0x235c   : > { %v4368_v55 = vadd.f32 %v4367_v53, %v4317_v52  ;;  %v7009_v24 = vpop.f32.mrb[85].mxu0  ;;  %v7383_v52 = vld [vmem:[%s9160_s14 + $0x18] sm:$0xff]  }
0x235d   : > { %v4370_v59 = vpop.f32.mrb[86].mxu0 }
0x235e   : > { %v8654_v56 = vadd.f32 %v4368_v55, %v8532_v58  ;;  %v7010_v60 = vpop.f32.mrb[87].mxu0  ;;  %v7373_v58 = vld [vmem:[%s9183_s10 + $0x8] sm:$0xff]   ;;  %v7569_v59 = vld [vmem:[%s9158_s25] sm:$0x3] }
0x235f   : > { %7014 = vmatpush3.bf16.msra.mxu1 %v7373_v58  ;;  %v4613_v58 = vrot.slane %v7571_v1, %v8220_v28 }
0x2360   : > { %v4376_v61 = vsel %vm1193_vm0, %v8654_v56, 0.0  ;;  %7039 = vmatprep.subr.bf16.mxu1 %v7699_v15 }
0x2361   : > { %4377 = vadd.xlane.f32.xlu0 %v4376_v61 }
0x23ee   : > { %v4378_v63 = vpop.xlane.xlu0 %4377 }
0x23ef   : > { %v4379_v40 = vmul.f32 0.03125, %v4378_v63  ;;  %v7570_v63 = vld [vmem:[%s9159_s29] sm:$0x3] }
0x23f1   : > { %v4380_v37 = vsub.f32 %v8654_v56, %v4379_v40  ;;  %v4597_v40 = vrot.slane %v7570_v63, %v8220_v28 }
0x23f3   : > { %v4381_v2 = vmul.f32 %v4380_v37, %v4380_v37 }
0x23f5   : > { %v4382_v3 = vsel %vm1193_vm0, %v4381_v2, 0.0 }
0x23f6   : > { %4383 = vadd.xlane.f32.xlu1 %v4382_v3 }
0x2483   : > { %v4384_v31 = vpop.xlane.xlu1 %4383 }
0x2484   : > { %v4385_v54 = vmul.f32 0.03125, %v4384_v31 }
0x2486   : > { %v4386_v0 = vadd.f32 1e-05, %v4385_v54 }
0x2488   : > { %7522 = vrsqrt.f32 %v4386_v0 }
0x2492   : > { %v7523_v57 = vpop.eup %7522 }
0x2493   : > { %v4388_v4 = vmul.f32 %v7523_v57, %v4380_v37 }
0x2495   : > { %v4393_v13 = vmul.f32 %v4392_v11, %v4388_v4 }
0x2497   : > { %v4398_v14 = vadd.f32 %v4397_v12, %v4393_v13 }
0x2499   : > { %v4421_v16 = vpack.c.bf16 %v4398_v14, %v4398_v14 }
0x249b   : > { %7016 = vmatmul.mubr.msk.bf16.vlgmr.msra.gmra.mrb[92].mxu1 %vm1193_vm0, %v4421_v16 }
0x249c   : > { %7043 = vmatprep.mubr.msk.bf16.mxu1 %vm7700_vm1, %v7699_v15  ;;  %7040 = vmatpush3.bf16.msra.mxu1 %v7382_v51 }
0x249d   : > { %7041 = vmatprep.subr.bf16.mxu1 %v7699_v15 }
0x24a0   : > { %7042 = vmatpush3.bf16.msra.mxu1 %v7383_v52 }
0x24a1   : > { %7047 = vmatprep.subr.bf16.mxu1 %v7699_v15 }
0x256e   : > { %v4475_v21 = vpop.f32.mrb[92].mxu1 }
0x256f   : > { %v4476_v22 = vadd.f32 %v4475_v21, %v4425_v20  ;;  %v7017_v29 = vpop.f32.mrb[93].mxu1 }
0x2570   : > { %v4478_v32 = vpop.f32.mrb[94].mxu1 }
0x2571   : > { %v4481_v33 = vmax.f32 %v4476_v22, 0.0  ;;  %v7018_v34 = vpop.f32.mrb[95].mxu1 }
0x2573   : > { %v4482_v35 = vpack.c.bf16 %v4481_v33, %v4481_v33 }
0x2575   : > { %7036 = vmatmul.mubr.bf16.vlgmr.msra.gmra.mrb[88].mxu0 %v4482_v35 }
0x2576   : > { %7067 = vmatprep.mubr.msk.bf16.mxu0 %vm7700_vm1, %v7699_v15 }
0x2648   : > { %v4569_v26 = vpop.f32.mrb[88].mxu0 }
0x2649   : > { %v4570_v44 = vadd.f32 %v4569_v26, %v4486_v42  ;;  %v7037_v45 = vpop.f32.mrb[89].mxu0 }
0x264a   : > { %v4572_v30 = vpop.f32.mrb[90].mxu0 }
0x264b   : > { %v8694_v36 = vadd.f32 %v4570_v44, %v8654_v56  ;;  %v7038_v46 = vpop.f32.mrb[91].mxu0  ;;  %v4592_v56 = vrot.slane %v7569_v59, %v8220_v28 }
0x264d   : > { %v4576_v5 = vsel %vm1193_vm0, %v8694_v36, 0.0 }
0x264e   : > { %4577 = vadd.xlane.f32.xlu0 %v4576_v5 }
0x26db   : > { %v4578_v49 = vpop.xlane.xlu0 %4577 }
0x26dc   : > { %v4579_v8 = vmul.f32 0.03125, %v4578_v49 }
0x26de   : > { %v4580_v41 = vsub.f32 %v8694_v36, %v4579_v8 }
0x26e0   : > { %v4581_v39 = vmul.f32 %v4580_v41, %v4580_v41 }
0x26e2   : > { %v4582_v25 = vsel %vm1193_vm0, %v4581_v39, 0.0 }
0x26e3   : > { %4583 = vadd.xlane.f32.xlu0 %v4582_v25 }
0x2770   : > { %v4584_v53 = vpop.xlane.xlu0 %4583 }
0x2771   : > { %v4585_v55 = vmul.f32 0.03125, %v4584_v53 }
0x2773   : > { %v4586_v24 = vadd.f32 1e-05, %v4585_v55 }
0x2775   : > { %7524 = vrsqrt.f32 %v4586_v24 }
0x277f   : > { %v7525_v60 = vpop.eup %7524 }
0x2780   : > { %v4588_v61 = vmul.f32 %v7525_v60, %v4580_v41 }
0x2782   : > { %v4593_v37 = vmul.f32 %v4592_v56, %v4588_v61 }
0x2784   : > { %v4598_v2 = vadd.f32 %v4597_v40, %v4593_v37 }
0x2786   : > { %v4609_v3 = vpack.c.bf16 %v4598_v2, %v4598_v2 }
0x2788   : > { %7044 = vmatmul.mubr.msk.bf16.vlgmr.msra.gmra.mrb[96].mxu1 %vm1193_vm0, %v4609_v3 }
0x2789   : > { %7049 = vmatprep.mubr.msk.bf16.mxu1 %vm7700_vm1, %v7699_v15 }
0x285b   : > { %v4663_v7 = vpop.f32.mrb[96].mxu1 }
0x285c   : > { %v4664_v6 = vadd.f32 %v4663_v7, %v4613_v58  ;;  %v7045_v43 = vpop.f32.mrb[97].mxu1 }
0x285d   : > { %v4666_v23 = vpop.f32.mrb[98].mxu1 }
0x285e   : > { %v8713_v50 = vpack.c.bf16 %v4664_v6, %v4664_v6  ;;  %v7046_v9 = vpop.f32.mrb[99].mxu1 }
0x2860   : > { %4671 = vrot.lane.b32.xlu0 %v8713_v50, %s9162_s6 }
0x2864   : > { %4783 = vrot.lane.b32.xlu0 %v8713_v50, %s9147_s9 }
0x2868   : > { %4895 = vrot.lane.b32.xlu0 %v8713_v50, %s9163_s24 }
0x286c   : > { %5007 = vrot.lane.b32.xlu0 %v8713_v50, %s9148_s11 }
0x28d2   : > { %v4672_v31 = vpop.permute.xlu0 %4671 }
0x28d3   : > { %v4677_v54 = vsel %vm1308_vm2, %v4672_v31, 0 }
0x28d4   : > { %7048 = vmatpush3.bf16.xpose.msra.mxu1 %v4677_v54 }
0x28d5   : > { %7053 = vmatprep.subr.bf16.mxu1 %v7699_v15 }
0x28d6   : > { %v4784_v32 = vpop.permute.xlu0 %4783 }
0x28d7   : > { %v4789_v34 = vsel %vm1308_vm2, %v4784_v32, 0 }
0x28da   : > { %v4896_v35 = vpop.permute.xlu0 %4895 }
0x28db   : > { %7050 = vmatmul.mubr.msk.bf16.vlgmr.msra.gmra.mrb[100].mxu1 %vm1308_vm2, %v8713_v50  ;;  %v4901_v42 = vsel %vm1308_vm2, %v4896_v35, 0 }
0x28dc   : > { %7055 = vmatprep.mubr.msk.bf16.mxu1 %vm7700_vm1, %v7699_v15 }
0x28de   : > { %v5008_v26 = vpop.permute.xlu0 %5007 }
0x28df   : > { %v5013_v45 = vsel %vm1308_vm2, %v5008_v26, 0 }
0x29ae   : > { %v4713_v0 = vpop.f32.mrb[100].mxu1 }
0x29af   : > { %v4719_v48 = vmul.f32 0.35355338, %v4713_v0  ;;  %v7051_v10 = vpop.f32.mrb[101].mxu1 }
0x29b0   : > { %v4716_v11 = vpop.f32.mrb[102].mxu1 }
0x29b1   : > { %v4720_v57 = vsel %vm8436_vm6, -1e+30, %v4719_v48  ;;  %v7052_v4 = vpop.f32.mrb[103].mxu1 }
0x29b2   : > { %v4721_v12 = vsel %vm1308_vm2, %v4720_v57, -inf }
0x29b3   : > { %4722 = vmax.xlane.f32.xlu1 %v4721_v12 }
0x2a40   : > { %v4723_v13 = vpop.xlane.xlu1 %4722 }
0x2a41   : > { %v4724_v14 = vsub.f32 %v4720_v57, %v4723_v13 }
0x2a43   : > { %v4725_v16 = vmul.f32 1.442695, %v4724_v14 }
0x2a45   : > { %7526 = vpow2.f32 %v4725_v16 }
0x2a4f   : > { %v7527_v17 = vpop.eup %7526 }
0x2a50   : > { %v4727_v18 = vsel %vm1308_vm2, %v7527_v17, 0.0 }
0x2a51   : > { %4728 = vadd.xlane.f32.xlu1 %v4727_v18 }
0x2a62   : > { %4733 = vrot.lane.b32.xlu1 %v8713_v50, %s9149_s26 }
0x2a66   : > { %4781 = vrot.lane.b32.xlu1 %v8713_v50, %s9166_s30 }
0x2a6a   : > { %4893 = vrot.lane.b32.xlu1 %v8713_v50, %s9150_s8 }
0x2a6e   : > { %5005 = vrot.lane.b32.xlu1 %v8713_v50, %s9151_s20 }
0x2ade   : > { %v4729_v19 = vpop.xlane.xlu1 %4728 }
0x2adf   : > { %7528 = vrcp.f32 %v4729_v19 }
0x2ae2   : > { %v4734_v20 = vpop.permute.xlu1 %4733 }
0x2ae3   : > { %v4739_v21 = vsel %vm3252_vm7, %v4734_v20, 0 }
0x2ae4   : > { %7054 = vmatpush3.bf16.msra.mxu1 %v4739_v21 }
0x2ae5   : > { %7059 = vmatprep.subr.bf16.mxu1 %v7699_v15 }
0x2ae6   : > { %v4782_v38 = vpop.permute.xlu1 %4781 }
0x2ae9   : > { %v7529_v22 = vpop.eup %7528 }
0x2aea   : > { %v4731_v29 = vmul.f32 %v7529_v22, %v7527_v17  ;;  %v4894_v44 = vpop.permute.xlu1 %4893 }
0x2aec   : > { %v4732_v33 = vpack.c.bf16 %v4731_v29, %v4731_v29 }
0x2aee   : > { %7056 = vmatmul.mubr.msk.bf16.vlgmr.msra.gmra.mrb[104].mxu1 %vm1308_vm2, %v4732_v33  ;;  %v5006_v30 = vpop.permute.xlu1 %5005 }
0x2aef   : > { %7060 = vmatpush3.bf16.xpose.msra.mxu1 %v4789_v34  ;;  %7061 = vmatprep.mubr.msk.bf16.mxu1 %vm7700_vm1, %v7699_v15 }
0x2af0   : > { %7071 = vmatprep.subr.bf16.mxu1 %v7699_v15 }
0x2af6   : > { %7062 = vmatmul.mubr.msk.bf16.vlgmr.msra.gmra.mrb[108].mxu1 %vm1308_vm2, %v4782_v38 }
0x2af7   : > { %7072 = vmatpush3.bf16.xpose.msra.mxu1 %v4901_v42  ;;  %7073 = vmatprep.mubr.msk.bf16.mxu1 %vm7700_vm1, %v7699_v15 }
0x2af8   : > { %7083 = vmatprep.subr.bf16.mxu1 %v7699_v15 }
0x2afe   : > { %7074 = vmatmul.mubr.msk.bf16.vlgmr.msra.gmra.mrb[112].mxu1 %vm1308_vm2, %v4894_v44 }
0x2aff   : > { %7084 = vmatpush3.bf16.xpose.msra.mxu1 %v5013_v45  ;;  %7085 = vmatprep.mubr.msk.bf16.mxu1 %vm7700_vm1, %v7699_v15 }
0x2b00   : > { %7095 = vmatprep.subr.bf16.mxu1 %v7699_v15 }
0x2b06   : > { %7086 = vmatmul.mubr.msk.bf16.vlgmr.msra.gmra.mrb[116].mxu1 %vm1308_vm2, %v5006_v30  ;;  %v7384_v30 = vld [vmem:[%s9169_s7 + $0x10] sm:$0xff]  }
0x2b07   : > { %7099 = vmatprep.mubr.msk.bf16.mxu1 %vm7700_vm1, %v7699_v15  ;;  %7096 = vmatpush3.bf16.msra.mxu1 %v7384_v30 }
0x2b08   : > { %7097 = vmatprep.subr.bf16.mxu1 %v7699_v15 }
0x2bc1   : > { %v8761_v46 = vpop.f32.mrb[104].mxu1 }
0x2bc2   : > { %v7057_v5 = vpop.f32.mrb[105].mxu1 }
0x2bc3   : > { %v4778_v49 = vpop.f32.mrb[106].mxu1 }
0x2bc4   : > { %v7058_v8 = vpop.f32.mrb[107].mxu1 }
0x2bc9   : > { %v4825_v41 = vpop.f32.mrb[108].mxu1 }
0x2bca   : > { %v4831_v39 = vmul.f32 0.35355338, %v4825_v41  ;;  %v7063_v25 = vpop.f32.mrb[109].mxu1 }
0x2bcb   : > { %v4828_v51 = vpop.f32.mrb[110].mxu1 }
0x2bcc   : > { %v4832_v52 = vsel %vm8436_vm6, -1e+30, %v4831_v39  ;;  %v7064_v53 = vpop.f32.mrb[111].mxu1  ;;  %v7385_v39 = vld [vmem:[%s9169_s7 + $0x18] sm:$0xff]  }
0x2bcd   : > { %v4833_v55 = vsel %vm1308_vm2, %v4832_v52, -inf  ;;  %7098 = vmatpush3.bf16.msra.mxu1 %v7385_v39 }
0x2bce   : > { %4834 = vmax.xlane.f32.xlu0 %v4833_v55  ;;  %7111 = vmatprep.subr.bf16.mxu1 %v7699_v15 }
0x2bd1   : > { %v4937_v24 = vpop.f32.mrb[112].mxu1 }
0x2bd2   : > { %v4943_v59 = vmul.f32 0.35355338, %v4937_v24  ;;  %v7075_v56 = vpop.f32.mrb[113].mxu1 }
0x2bd3   : > { %v4940_v60 = vpop.f32.mrb[114].mxu1 }
0x2bd4   : > { %v4944_v61 = vsel %vm8436_vm6, -1e+30, %v4943_v59  ;;  %v7076_v63 = vpop.f32.mrb[115].mxu1 }
0x2bd5   : > { %v4945_v40 = vsel %vm1308_vm2, %v4944_v61, -inf }
0x2bd6   : > { %4946 = vmax.xlane.f32.xlu1 %v4945_v40 }
0x2bd9   : > { %v5049_v37 = vpop.f32.mrb[116].mxu1 }
0x2bda   : > { %v5055_v2 = vmul.f32 0.35355338, %v5049_v37  ;;  %v7087_v3 = vpop.f32.mrb[117].mxu1 }
0x2bdb   : > { %v5052_v1 = vpop.f32.mrb[118].mxu1 }
0x2bdc   : > { %v5056_v58 = vsel %vm8436_vm6, -1e+30, %v5055_v2  ;;  %v7088_v7 = vpop.f32.mrb[119].mxu1  ;;  %v7572_v1 = vld [vmem:[%s9171_s1] sm:$0x3] }
0x2bdd   : > { %v5057_v6 = vsel %vm1308_vm2, %v5056_v58, -inf }
0x2bde   : > { %5058 = vmax.xlane.f32.xlu0 %v5057_v6 }
0x2be7   : > { %4957 = vrot.lane.b32.xlu1 %v8713_v50, %s9167_s15  ;;  %s9200_s15 = sld [smem:[#allocation45_spill]] }
0x2c5b   : > { %v4835_v43 = vpop.xlane.xlu0 %4834 }
0x2c5c   : > { %v4836_v23 = vsub.f32 %v4832_v52, %v4835_v43 }
0x2c5e   : > { %v4837_v9 = vmul.f32 1.442695, %v4836_v23 }
0x2c60   : > { %7530 = vpow2.f32 %v4837_v9 }
0x2c63   : > { %v4947_v31 = vpop.xlane.xlu1 %4946 }
0x2c64   : > { %v4948_v54 = vsub.f32 %v4944_v61, %v4947_v31 }
0x2c66   : > { %v4949_v0 = vmul.f32 1.442695, %v4948_v54  ;;  %v7386_v54 = vld [vmem:[%s9172_s12 + $0x10] sm:$0xff]  }
0x2c67   : > { %v4958_v19 = vpop.permute.xlu1 %4957 }
0x2c68   : > { %7532 = vpow2.f32 %v4949_v0  ;;  %v4963_v33 = vsel %vm3252_vm7, %v4958_v19, 0  ;;  %v7387_v0 = vld [vmem:[%s9172_s12 + $0x18] sm:$0xff]  }
0x2c6a   : > { %v7531_v48 = vpop.eup %7530 }
0x2c6b   : > { %v5059_v10 = vpop.xlane.xlu0 %5058  ;;  %v4839_v47 = vsel %vm1308_vm2, %v7531_v48, 0.0 }
0x2c6c   : > { %v5060_v11 = vsub.f32 %v5056_v58, %v5059_v10  ;;  %4840 = vadd.xlane.f32.xlu0 %v4839_v47  ;;  %v5136_v58 = vrot.slane %v7572_v1, %v8220_v28 }
0x2c6e   : > { %v5061_v57 = vmul.f32 1.442695, %v5060_v11 }
0x2c70   : > { %7534 = vpow2.f32 %v5061_v57 }
0x2c72   : > { %v7533_v4 = vpop.eup %7532 }
0x2c73   : > { %v4951_v12 = vsel %vm1308_vm2, %v7533_v4, 0.0 }
0x2c74   : > { %4952 = vadd.xlane.f32.xlu0 %v4951_v12 }
0x2c7a   : > { %v7535_v13 = vpop.eup %7534 }
0x2c7b   : > { %v5063_v14 = vsel %vm1308_vm2, %v7535_v13, 0.0 }
0x2c7c   : > { %5064 = vadd.xlane.f32.xlu1 %v5063_v14 }
0x2c8a   : > { %4845 = vrot.lane.b32.xlu0 %v8713_v50, %s9152_s3  ;;  %s9193_s3 = sld [smem:[#allocation36_spill]] }
0x2c8d   : > { %5069 = vrot.lane.b32.xlu1 %v8713_v50, %s9153_s17  ;;  %s9192_s17 = sld [smem:[#allocation27_spill]] }
0x2cf9   : > { %v4841_v16 = vpop.xlane.xlu0 %4840 }
0x2cfa   : > { %7536 = vrcp.f32 %v4841_v16 }
0x2d01   : > { %v4953_v17 = vpop.xlane.xlu0 %4952 }
0x2d02   : > { %7538 = vrcp.f32 %v4953_v17 }
0x2d04   : > { %v7537_v18 = vpop.eup %7536 }
0x2d05   : > { %v4843_v20 = vmul.f32 %v7537_v18, %v7531_v48  ;;  %v4846_v21 = vpop.permute.xlu0 %4845  ;;  %v7574_v18 = vld [vmem:[%s9177_s23] sm:$0x3] }
0x2d06   : > { %v4851_v22 = vsel %vm3252_vm7, %v4846_v21, 0  ;;  %v5209_v19 = vrot.slane %v7574_v18, %v8220_v28 }
0x2d07   : > { %7066 = vmatpush3.bf16.msra.mxu0 %v4851_v22  ;;  %v4844_v29 = vpack.c.bf16 %v4843_v20, %v4843_v20  ;;  %v7575_v22 = vld [vmem:[%s9192_s17] sm:$0x3] }
0x2d08   : > { %7077 = vmatprep.subr.bf16.mxu0 %v7699_v15 }
0x2d09   : > { %v5065_v32 = vpop.xlane.xlu1 %5064 }
0x2d0a   : > { %7540 = vrcp.f32 %v5065_v32  ;;  %7068 = vmatmul.mubr.msk.bf16.vlgmr.msra.gmra.mrb[92].mxu0 %vm1308_vm2, %v4844_v29  ;;  %v5214_v29 = vrot.slane %v7575_v22, %v8220_v28 }
0x2d0b   : > { %7078 = vmatpush3.bf16.msra.mxu0 %v4963_v33  ;;  %7079 = vmatprep.mubr.msk.bf16.mxu0 %vm7700_vm1, %v7699_v15 }
0x2d0c   : > { %v7539_v50 = vpop.eup %7538  ;;  %7089 = vmatprep.subr.bf16.mxu0 %v7699_v15 }
0x2d0d   : > { %v4955_v34 = vmul.f32 %v7539_v50, %v7533_v4  ;;  %v5070_v35 = vpop.permute.xlu1 %5069  ;;  %v7573_v4 = vld [vmem:[%s9176_s18] sm:$0x3] }
0x2d0e   : > { %v5075_v42 = vsel %vm3252_vm7, %v5070_v35, 0  ;;  %v5230_v12 = vrot.slane %v7573_v4, %v8220_v28 }
0x2d0f   : > { %v4956_v38 = vpack.c.bf16 %v4955_v34, %v4955_v34 }
0x2d12   : > { %7080 = vmatmul.mubr.msk.bf16.vlgmr.msra.gmra.mrb[96].mxu0 %vm1308_vm2, %v4956_v38 }
0x2d13   : > { %7090 = vmatpush3.bf16.msra.mxu0 %v5075_v42  ;;  %7091 = vmatprep.mubr.msk.bf16.mxu0 %vm7700_vm1, %v7699_v15 }
0x2d14   : > { %v7541_v26 = vpop.eup %7540  ;;  %7103 = vmatprep.subr.bf16.mxu0 %v7699_v15 }
0x2d15   : > { %v5067_v44 = vmul.f32 %v7541_v26, %v7535_v13 }
0x2d17   : > { %v5068_v45 = vpack.c.bf16 %v5067_v44, %v5067_v44 }
0x2d1a   : > { %7092 = vmatmul.mubr.msk.bf16.vlgmr.msra.gmra.mrb[100].mxu0 %vm1308_vm2, %v5068_v45 }
0x2d1b   : > { %7107 = vmatprep.mubr.msk.bf16.mxu0 %vm7700_vm1, %v7699_v15  ;;  %7104 = vmatpush3.bf16.msra.mxu0 %v7386_v54 }
0x2d1c   : > { %7105 = vmatprep.subr.bf16.mxu0 %v7699_v15 }
0x2d1f   : > { %7106 = vmatpush3.bf16.msra.mxu0 %v7387_v0 }
0x2d20   : > { %7119 = vmatprep.subr.bf16.mxu0 %v7699_v15 }
0x2ddd   : > { %v4887_v5 = vpop.f32.mrb[92].mxu0 }
0x2dde   : > { %5118 = vrot.lane.b32.xlu1 %v4887_v5, %s9154_s13  ;;  %v7069_v49 = vpop.f32.mrb[93].mxu0 }
0x2ddf   : > { %v4890_v8 = vpop.f32.mrb[94].mxu0 }
0x2de0   : > { %v7070_v41 = vpop.f32.mrb[95].mxu0 }
0x2de5   : > { %v4999_v25 = vpop.f32.mrb[96].mxu0 }
0x2de6   : > { %5122 = vrot.lane.b32.xlu0 %v4999_v25, %s9155_s19  ;;  %v7081_v51 = vpop.f32.mrb[97].mxu0 }
0x2de7   : > { %v5002_v52 = vpop.f32.mrb[98].mxu0 }
0x2de8   : > { %v7082_v53 = vpop.f32.mrb[99].mxu0 }
0x2ded   : > { %v5111_v55 = vpop.f32.mrb[100].mxu0 }
0x2dee   : > { %5126 = vrot.lane.b32.xlu1 %v5111_v55, %s9156_s21  ;;  %v7093_v24 = vpop.f32.mrb[101].mxu0 }
0x2def   : > { %v5114_v59 = vpop.f32.mrb[102].mxu0 }
0x2df0   : > { %v7094_v56 = vpop.f32.mrb[103].mxu0 }
0x2e50   : > { %v5119_v60 = vpop.permute.xlu1 %5118 }
0x2e51   : > { %v5129_v63 = vsel %vm1308_vm2, %v8761_v46, %v5119_v60 }
0x2e58   : > { %v5123_v61 = vpop.permute.xlu0 %5122 }
0x2e59   : > { %v5130_v40 = vsel %vm1362_vm4, %v5129_v63, %v5123_v61 }
0x2e60   : > { %v5127_v37 = vpop.permute.xlu1 %5126 }
0x2e61   : > { %v5131_v2 = vsel %vm1836_vm5, %v5130_v40, %v5127_v37 }
0x2e62   : > { %v5132_v3 = vpack.c.bf16 %v5131_v2, %v5131_v2 }
0x2e64   : > { %7100 = vmatmul.mubr.msk.bf16.vlgmr.msra.gmra.mrb[120].mxu1 %vm1193_vm0, %v5132_v3 }
0x2e65   : > { %7115 = vmatprep.mubr.msk.bf16.mxu1 %vm7700_vm1, %v7699_v15 }
0x2f37   : > { %v5186_v7 = vpop.f32.mrb[120].mxu1 }
0x2f38   : > { %v5187_v6 = vadd.f32 %v5186_v7, %v5136_v58  ;;  %v7101_v43 = vpop.f32.mrb[121].mxu1 }
0x2f39   : > { %v5189_v46 = vpop.f32.mrb[122].mxu1 }
0x2f3a   : > { %v8813_v23 = vadd.f32 %v5187_v6, %v8694_v36  ;;  %v7102_v9 = vpop.f32.mrb[123].mxu1 }
0x2f3c   : > { %v5193_v31 = vsel %vm1193_vm0, %v8813_v23, 0.0 }
0x2f3d   : > { %5194 = vadd.xlane.f32.xlu0 %v5193_v31 }
0x2f53   : > { %5286 = vrot.lane.b32.xlu0 %v7386_v54, %s9162_s6 }
0x2f57   : > { %5293 = vrot.lane.b32.xlu0 %v5230_v12, %s9162_s6 }
0x2fca   : > { %v5195_v48 = vpop.xlane.xlu0 %5194 }
0x2fcb   : > { %v5196_v10 = vmul.f32 0.03125, %v5195_v48 }
0x2fcd   : > { %v5197_v36 = vsub.f32 %v8813_v23, %v5196_v10 }
0x2fce   : > { %v5287_v57 = vpop.permute.xlu0 %5286 }
0x2fcf   : > { %v5198_v47 = vmul.f32 %v5197_v36, %v5197_v36  ;;  %7112 = vmatpush3.bf16.msra.mxu1 %v5287_v57 }
0x2fd0   : > { %7113 = vmatprep.subr.bf16.mxu1 %v7699_v15 }
0x2fd1   : > { %v5199_v11 = vsel %vm1193_vm0, %v5198_v47, 0.0 }
0x2fd2   : > { %5200 = vadd.xlane.f32.xlu1 %v5199_v11 }
0x2fe3   : > { %5288 = vrot.lane.b32.xlu1 %v7387_v0, %s9162_s6 }
0x305f   : > { %v5201_v13 = vpop.xlane.xlu1 %5200 }
0x3060   : > { %v5202_v14 = vmul.f32 0.03125, %v5201_v13 }
0x3062   : > { %v5203_v16 = vadd.f32 1e-05, %v5202_v14 }
0x3063   : > { %v5289_v17 = vpop.permute.xlu1 %5288 }
0x3064   : > { %7542 = vrsqrt.f32 %v5203_v16  ;;  %7114 = vmatpush3.bf16.msra.mxu1 %v5289_v17 }
0x3065   : > { %7125 = vmatprep.subr.bf16.mxu1 %v7699_v15 }
0x3067   : > { %7116 = vmatmul.mubr.msk.bf16.vlgmr.msra.gmra.mrb[124].mxu1 %vm1193_vm0, %v8549_v27  ;;  %v5294_v27 = vpop.permute.xlu0 %5293 }
0x3068   : > { %7127 = vmatprep.mubr.msk.bf16.mxu1 %vm7700_vm1, %v7699_v15 }
0x306e   : > { %v7543_v20 = vpop.eup %7542 }
0x306f   : > { %v5205_v21 = vmul.f32 %v7543_v20, %v5197_v36 }
0x3071   : > { %v5210_v32 = vmul.f32 %v5209_v19, %v5205_v21 }
0x3073   : > { %v5215_v33 = vadd.f32 %v5214_v29, %v5210_v32 }
0x3075   : > { %v5226_v50 = vpack.c.bf16 %v5215_v33, %v5215_v33 }
0x3077   : > { %7108 = vmatmul.mubr.msk.bf16.vlgmr.msra.gmra.mrb[104].mxu0 %vm1193_vm0, %v5226_v50 }
0x3078   : > { %7121 = vmatprep.mubr.msk.bf16.mxu0 %vm7700_vm1, %v7699_v15 }
0x313a   : > { %v5330_v34 = vpop.f32.mrb[124].mxu1 }
0x313b   : > { %v7117_v35 = vpop.f32.mrb[125].mxu1  ;;  %v5331_v42 = vadd.f32 %v5330_v34, %v5294_v27 }
0x313c   : > { %v5333_v38 = vpop.f32.mrb[126].mxu1 }
0x313d   : > { %v5334_v26 = vadd.f32 %v5333_v38, %v5294_v27  ;;  %v7118_v44 = vpop.f32.mrb[127].mxu1 }
0x313f   : > { %v8841_v45 = vpack.c.bf16 %v5334_v26, %v5331_v42 }
0x3141   : > { %5449 = vrot.lane.b32.xlu1 %v8841_v45, %s9166_s30  ;;  %v5343_v30 = vsel %vm1308_vm2, %v8841_v45, 0 }
0x3142   : > { %7120 = vmatpush3.bf16.xpose.msra.mxu0 %v5343_v30 }
0x3143   : > { %7131 = vmatprep.subr.bf16.mxu0 %v7699_v15 }
0x3145   : > { %5559 = vrot.lane.b32.xlu1 %v8841_v45, %s9150_s8 }
0x3149   : > { %5669 = vrot.lane.b32.xlu1 %v8841_v45, %s9151_s20 }
0x314a   : > { %v5280_v5 = vpop.f32.mrb[104].mxu0 }
0x314b   : > { %v5281_v49 = vadd.f32 %v5280_v5, %v5230_v12  ;;  %v7109_v8 = vpop.f32.mrb[105].mxu0 }
0x314c   : > { %v5283_v41 = vpop.f32.mrb[106].mxu0 }
0x314d   : > { %v5337_v39 = vpack.c.bf16 %v5281_v49, %v5281_v49  ;;  %v7110_v25 = vpop.f32.mrb[107].mxu0 }
0x314f   : > { %5447 = vrot.lane.b32.xlu0 %v5337_v39, %s9166_s30  ;;  %7122 = vmatmul.mubr.msk.bf16.vlgmr.msra.gmra.mrb[108].mxu0 %vm1308_vm2, %v5337_v39  ;;  %s9198_s30 = sld [smem:[#allocation42_spill]] }
0x3150   : > { %7133 = vmatprep.mubr.msk.bf16.mxu0 %vm7700_vm1, %v7699_v15 }
0x3153   : > { %5557 = vrot.lane.b32.xlu0 %v5337_v39, %s9150_s8  ;;  %s9194_s8 = sld [smem:[#allocation37_spill]] }
0x3157   : > { %5667 = vrot.lane.b32.xlu0 %v5337_v39, %s9151_s20  ;;  %s9202_s20 = sld [smem:[#allocation46_spill]] }
0x31b3   : > { %v5450_v51 = vpop.permute.xlu1 %5449 }
0x31b4   : > { %v5455_v52 = vsel %vm1308_vm2, %v5450_v51, 0 }
0x31b5   : > { %7132 = vmatpush3.bf16.xpose.msra.mxu0 %v5455_v52 }
0x31b6   : > { %7143 = vmatprep.subr.bf16.mxu0 %v7699_v15 }
0x31b7   : > { %v5560_v53 = vpop.permute.xlu1 %5559 }
0x31b8   : > { %v5565_v24 = vsel %vm1308_vm2, %v5560_v53, 0 }
0x31bb   : > { %v5670_v59 = vpop.permute.xlu1 %5669 }
0x31bc   : > { %v5675_v60 = vsel %vm1308_vm2, %v5670_v59, 0 }
0x31c1   : > { %v5448_v55 = vpop.permute.xlu0 %5447 }
0x31c2   : > { %7134 = vmatmul.mubr.msk.bf16.vlgmr.msra.gmra.mrb[112].mxu0 %vm1308_vm2, %v5448_v55 }
0x31c3   : > { %7144 = vmatpush3.bf16.xpose.msra.mxu0 %v5565_v24  ;;  %7145 = vmatprep.mubr.msk.bf16.mxu0 %vm7700_vm1, %v7699_v15 }
0x31c4   : > { %7155 = vmatprep.subr.bf16.mxu0 %v7699_v15 }
0x31c5   : > { %v5558_v56 = vpop.permute.xlu0 %5557 }
0x31c9   : > { %v5668_v61 = vpop.permute.xlu0 %5667 }
0x31ca   : > { %7146 = vmatmul.mubr.msk.bf16.vlgmr.msra.gmra.mrb[116].mxu0 %vm1308_vm2, %v5558_v56 }
0x31cb   : > { %7156 = vmatpush3.bf16.xpose.msra.mxu0 %v5675_v60  ;;  %7157 = vmatprep.mubr.msk.bf16.mxu0 %vm7700_vm1, %v7699_v15 }
0x31cc   : > { %7167 = vmatprep.subr.bf16.mxu0 %v7699_v15 }
0x31d2   : > { %7158 = vmatmul.mubr.msk.bf16.vlgmr.msra.gmra.mrb[120].mxu0 %vm1308_vm2, %v5668_v61 }
0x31d3   : > { %7171 = vmatprep.mubr.msk.bf16.mxu0 %vm7700_vm1, %v7699_v15 }
0x3222   : > { %v5379_v63 = vpop.f32.mrb[108].mxu0 }
0x3223   : > { %v5385_v40 = vmul.f32 0.35355338, %v5379_v63  ;;  %v7123_v37 = vpop.f32.mrb[109].mxu0 }
0x3224   : > { %v5382_v2 = vpop.f32.mrb[110].mxu0 }
0x3225   : > { %v5386_v3 = vsel %vm8064_vm3, -1e+30, %v5385_v40  ;;  %v7124_v1 = vpop.f32.mrb[111].mxu0 }
0x3226   : > { %v5387_v58 = vsel %vm1362_vm4, %v5386_v3, -inf }
0x3227   : > { %5388 = vmax.xlane.f32.xlu1 %v5387_v58 }
0x3295   : > { %v5491_v7 = vpop.f32.mrb[112].mxu0 }
0x3296   : > { %v5497_v6 = vmul.f32 0.35355338, %v5491_v7  ;;  %v7135_v43 = vpop.f32.mrb[113].mxu0 }
0x3297   : > { %v5494_v46 = vpop.f32.mrb[114].mxu0 }
0x3298   : > { %v5498_v9 = vsel %vm8064_vm3, -1e+30, %v5497_v6  ;;  %v7136_v31 = vpop.f32.mrb[115].mxu0 }
0x3299   : > { %v5499_v54 = vsel %vm1362_vm4, %v5498_v9, -inf }
0x329a   : > { %5500 = vmax.xlane.f32.xlu0 %v5499_v54 }
0x329d   : > { %v5601_v0 = vpop.f32.mrb[116].mxu0 }
0x329e   : > { %v5607_v48 = vmul.f32 0.35355338, %v5601_v0  ;;  %v7147_v10 = vpop.f32.mrb[117].mxu0 }
0x329f   : > { %v5604_v36 = vpop.f32.mrb[118].mxu0  ;;  %v7389_v10 = vld [vmem:[%s9193_s3 + $0x18] sm:$0xff]  }
0x32a0   : > { %v5608_v47 = vsel %vm8064_vm3, -1e+30, %v5607_v48  ;;  %v7148_v11 = vpop.f32.mrb[119].mxu0 }
0x32a1   : > { %v5609_v57 = vsel %vm1362_vm4, %v5608_v47, -inf }
0x32a2   : > { %5610 = vmax.xlane.f32.xlu0 %v5609_v57 }
0x32a5   : > { %v5711_v4 = vpop.f32.mrb[120].mxu0 }
0x32a6   : > { %v5717_v12 = vmul.f32 0.35355338, %v5711_v4  ;;  %v7159_v13 = vpop.f32.mrb[121].mxu0 }
0x32a7   : > { %v5714_v14 = vpop.f32.mrb[122].mxu0 }
0x32a8   : > { %v5718_v16 = vsel %vm8064_vm3, -1e+30, %v5717_v12  ;;  %v7160_v17 = vpop.f32.mrb[123].mxu0 }
0x32a9   : > { %v5719_v18 = vsel %vm1362_vm4, %v5718_v16, -inf }
0x32aa   : > { %5720 = vmax.xlane.f32.xlu0 %v5719_v18 }
0x32b4   : > { %v5389_v19 = vpop.xlane.xlu1 %5388 }
0x32b5   : > { %v5390_v20 = vsub.f32 %v5386_v3, %v5389_v19 }
0x32b7   : > { %v5391_v21 = vmul.f32 1.442695, %v5390_v20 }
0x32b9   : > { %7544 = vpow2.f32 %v5391_v21 }
0x32c3   : > { %v7545_v22 = vpop.eup %7544 }
0x32c4   : > { %v5393_v29 = vsel %vm1362_vm4, %v7545_v22, 0.0 }
0x32c5   : > { %5394 = vadd.xlane.f32.xlu1 %v5393_v29  ;;  %v7576_v29 = vld [vmem:[%s9194_s8] sm:$0x3] }
0x32d6   : > { %5400 = vrot.lane.b32.xlu1 %v8841_v45, %s9162_s6  ;;  %s9199_s6 = sld [smem:[#allocation43_spill]] }
0x3327   : > { %v5501_v32 = vpop.xlane.xlu0 %5500 }
0x3328   : > { %v5502_v33 = vsub.f32 %v5498_v9, %v5501_v32  ;;  %v7388_v9 = vld [vmem:[%s9193_s3 + $0x10] sm:$0xff]   ;;  %v5796_v32 = vrot.slane %v7576_v29, %v8220_v28 }
0x3329   : > { %7168 = vmatpush3.bf16.msra.mxu0 %v7388_v9 }
0x332a   : > { %v5503_v50 = vmul.f32 1.442695, %v5502_v33  ;;  %7169 = vmatprep.subr.bf16.mxu0 %v7699_v15 }
0x332c   : > { %7546 = vpow2.f32 %v5503_v50 }
0x332d   : > { %7170 = vmatpush3.bf16.msra.mxu0 %v7389_v10 }
0x332e   : > { %7183 = vmatprep.subr.bf16.mxu0 %v7699_v15 }
0x332f   : > { %v5611_v62 = vpop.xlane.xlu0 %5610 }
0x3330   : > { %v5612_v27 = vsub.f32 %v5608_v47, %v5611_v62 }
0x3332   : > { %v5613_v34 = vmul.f32 1.442695, %v5612_v27 }
0x3334   : > { %7548 = vpow2.f32 %v5613_v34 }
0x3336   : > { %v7547_v35 = vpop.eup %7546 }
0x3337   : > { %v5721_v38 = vpop.xlane.xlu0 %5720  ;;  %v5505_v42 = vsel %vm1362_vm4, %v7547_v35, 0.0 }
0x3338   : > { %v5722_v26 = vsub.f32 %v5718_v16, %v5721_v38  ;;  %5506 = vadd.xlane.f32.xlu0 %v5505_v42 }
0x333a   : > { %v5723_v44 = vmul.f32 1.442695, %v5722_v26 }
0x333c   : > { %7550 = vpow2.f32 %v5723_v44 }
0x333e   : > { %v7549_v30 = vpop.eup %7548 }
0x333f   : > { %v5615_v5 = vsel %vm1362_vm4, %v7549_v30, 0.0 }
0x3340   : > { %5616 = vadd.xlane.f32.xlu1 %v5615_v5 }
0x3346   : > { %v7551_v49 = vpop.eup %7550 }
0x3347   : > { %v5725_v8 = vsel %vm1362_vm4, %v7551_v49, 0.0 }
0x3348   : > { %5726 = vadd.xlane.f32.xlu0 %v5725_v8  ;;  %v7392_v8 = vld [vmem:[%s9185_s27 + $0x40] sm:$0xff]  }
0x3351   : > { %5621 = vrot.lane.b32.xlu1 %v8841_v45, %s9163_s24  ;;  %s9197_s24 = sld [smem:[#allocation44_spill]] }
0x3352   : > { %v5395_v41 = vpop.xlane.xlu1 %5394 }
0x3353   : > { %7552 = vrcp.f32 %v5395_v41  ;;  %v7393_v41 = vld [vmem:[%s9185_s27 + $0x48] sm:$0xff]  }
0x3355   : > { %5731 = vrot.lane.b32.xlu1 %v8841_v45, %s9148_s11  ;;  %s9201_s11 = sld [smem:[#allocation50_spill]] }
0x3356   : > { %v5401_v39 = vpop.permute.xlu1 %5400 }
0x3357   : > { %7126 = vmatpush3.bf16.msra.mxu1 %v5401_v39  ;;  %v7394_v39 = vld [vmem:[%s9185_s27 + $0x50] sm:$0xff]  }
0x3358   : > { %7137 = vmatprep.subr.bf16.mxu1 %v7699_v15 }
0x335d   : > { %v7553_v25 = vpop.eup %7552 }
0x335e   : > { %v5397_v51 = vmul.f32 %v7553_v25, %v7545_v22  ;;  %5511 = vrot.lane.b32.xlu0 %v8841_v45, %s9147_s9  ;;  %v7395_v25 = vld [vmem:[%s9185_s27 + $0x58] sm:$0xff]   ;;  %s1166_s9 = sand.u32 1, %s7649_s0  }
0x335f   : > { %s6164_s8 = scalar_lea.sflag [#allocation5], %s1166_s9 }
0x3360   : > { %v5398_v52 = vpack.c.bf16 %v5397_v51, %v5397_v51  ;;  %v7396_v51 = vld [vmem:[%s9185_s27 + $0x60] sm:$0xff]  }
0x3362   : > { %7128 = vmatmul.mubr.msk.bf16.vlgmr.msra.gmra.mrb[128].mxu1 %vm1362_vm4, %v5398_v52  ;;  %v7397_v52 = vld [vmem:[%s9185_s27 + $0x68] sm:$0xff]  }
0x3363   : > { %7139 = vmatprep.mubr.msk.bf16.mxu1 %vm7700_vm1, %v7699_v15 }
0x33c5   : > { %v5507_v53 = vpop.xlane.xlu0 %5506 }
0x33c6   : > { %7554 = vrcp.f32 %v5507_v53 }
0x33cd   : > { %v5617_v55 = vpop.xlane.xlu1 %5616 }
0x33ce   : > { %7556 = vrcp.f32 %v5617_v55 }
0x33d0   : > { %v7555_v24 = vpop.eup %7554 }
0x33d1   : > { %v5509_v56 = vmul.f32 %v7555_v24, %v7547_v35  ;;  %v5622_v63 = vpop.permute.xlu1 %5621 }
0x33d3   : > { %v5510_v61 = vpack.c.bf16 %v5509_v56, %v5509_v56 }
0x33d5   : > { %v5727_v59 = vpop.xlane.xlu0 %5726  ;;  %v5732_v3 = vpop.permute.xlu1 %5731 }
0x33d6   : > { %7558 = vrcp.f32 %v5727_v59 }
0x33d8   : > { %v7557_v45 = vpop.eup %7556 }
0x33d9   : > { %v5512_v60 = vpop.permute.xlu0 %5511  ;;  %v5619_v40 = vmul.f32 %v7557_v45, %v7549_v30 }
0x33da   : > { %7138 = vmatpush3.bf16.msra.mxu1 %v5512_v60 }
0x33db   : > { %7149 = vmatprep.subr.bf16.mxu1 %v7699_v15  ;;  %v5620_v37 = vpack.c.bf16 %v5619_v40, %v5619_v40 }
0x33dd   : > { %7140 = vmatmul.mubr.msk.bf16.vlgmr.msra.gmra.mrb[132].mxu1 %vm1362_vm4, %v5510_v61 }
0x33de   : > { %7150 = vmatpush3.bf16.msra.mxu1 %v5622_v63  ;;  %7151 = vmatprep.mubr.msk.bf16.mxu1 %vm7700_vm1, %v7699_v15 }
0x33df   : > { %7161 = vmatprep.subr.bf16.mxu1 %v7699_v15 }
0x33e0   : > { %v7559_v2 = vpop.eup %7558 }
0x33e1   : > { %v5729_v1 = vmul.f32 %v7559_v2, %v7551_v49  ;;  %v7390_v49 = vld [vmem:[%s9183_s10 + $0x10] sm:$0xff]  }
0x33e3   : > { %v5730_v58 = vpack.c.bf16 %v5729_v1, %v5729_v1  ;;  %v7399_v1 = vld [vmem:[%s9185_s27 + $0x78] sm:$0xff]  }
0x33e5   : > { %7152 = vmatmul.mubr.msk.bf16.vlgmr.msra.gmra.mrb[136].mxu1 %vm1362_vm4, %v5620_v37 }
0x33e6   : > { %7162 = vmatpush3.bf16.msra.mxu1 %v5732_v3  ;;  %7163 = vmatprep.mubr.msk.bf16.mxu1 %vm7700_vm1, %v7699_v15  ;;  %v7398_v3 = vld [vmem:[%s9185_s27 + $0x70] sm:$0xff]  }
0x33e7   : > { %7175 = vmatprep.subr.bf16.mxu1 %v7699_v15 }
0x33ed   : > { %7164 = vmatmul.mubr.msk.bf16.vlgmr.msra.gmra.mrb[140].mxu1 %vm1362_vm4, %v5730_v58  ;;  %v7579_v58 = vld [vmem:[%s9189_s2] sm:$0x3] }
0x33ee   : > { %7179 = vmatprep.mubr.msk.bf16.mxu1 %vm7700_vm1, %v7699_v15  ;;  %7176 = vmatpush3.bf16.msra.mxu1 %v7390_v49 }
0x33ef   : > { %7177 = vmatprep.subr.bf16.mxu1 %v7699_v15 }
0x3435   : > { %v5440_v7 = vpop.f32.mrb[128].mxu1 }
0x3436   : > { %v7129_v6 = vpop.f32.mrb[129].mxu1 }
0x3437   : > { %v5443_v43 = vpop.f32.mrb[130].mxu1 }
0x3438   : > { %v7130_v46 = vpop.f32.mrb[131].mxu1 }
0x34b0   : > { %v5551_v31 = vpop.f32.mrb[132].mxu1 }
0x34b1   : > { %5778 = vrot.lane.b32.xlu1 %v5551_v31, %s9154_s13  ;;  %v7141_v54 = vpop.f32.mrb[133].mxu1  ;;  %s6291_s13 = sshll.u32 %s1166_s9, 3 }
0x34b2   : > { %v5554_v0 = vpop.f32.mrb[134].mxu1  ;;  %s1168_s4 = scalar_lea.vmem [#allocation4], %s6291_s13 }
0x34b3   : > { %v7142_v48 = vpop.f32.mrb[135].mxu1  ;;  %s6177_s28 = sshll.u32 %s1168_s4, 4  ;;  %s8982_s28 = int_to_ptr.vmem [resolvable:$true] %s6177_s28 }
0x34b4   : > { %v7580_v48 = vld [vmem:[%s9191_s16] sm:$0x3] }
0x34b5   : > { %v5963_v10 = vrot.slane %v7580_v48, %v8220_v28 }
0x34b8   : > { %v5661_v36 = vpop.f32.mrb[136].mxu1 }
0x34b9   : > { %5782 = vrot.lane.b32.xlu0 %v5661_v36, %s9155_s19  ;;  %v7153_v47 = vpop.f32.mrb[137].mxu1  ;;  %s9196_s19 = smov %s9187_s5  ;;  %s6498_s5 = sshll.u32 %s9201_s11, 7 }
0x34ba   : > { %v5664_v11 = vpop.f32.mrb[138].mxu1  ;;  %v7578_v45 = vld [vmem:[%s9196_s19] sm:$0x3]  ;;  %s8980_s17 = scalar_lea.hbm %s9202_s20, %s6498_s5  ;;  %s7715_s19 = smov [#allocation4]  }
0x34bb   : > { %v7154_v57 = vpop.f32.mrb[139].mxu1  ;;  %v5874_v63 = vrot.slane %v7578_v45, %v8220_v28 }
0x34c0   : > { %v5771_v4 = vpop.f32.mrb[140].mxu1 }
0x34c1   : > { %5786 = vrot.lane.b32.xlu1 %v5771_v4, %s9156_s21  ;;  %v7165_v12 = vpop.f32.mrb[141].mxu1  ;;  %s9195_s21 = sld [smem:[#allocation28_spill]] }
0x34c2   : > { %v5774_v13 = vpop.f32.mrb[142].mxu1 }
0x34c3   : > { %v7166_v14 = vpop.f32.mrb[143].mxu1 }
0x34c7   : > { %v7577_v59 = vld [vmem:[%s9195_s21] sm:$0x3]  ;;  %s7593_s21 = scalar_lea.vmem %s8982_s28, 128 }
0x34c8   : > { %v5869_v56 = vrot.slane %v7577_v59, %v8220_v28  ;;  %p7594_p2 = scmp.ne.s32.totalorder %s8982_s28, %s7593_s21 }
0x34ca   : > { %p7595_p3 = pnand %p7594_p2, %p7960_p10 }
0x34cc   : > { %p7596_p4 = pneg %p7595_p3 }
0x3523   : > { %v5779_v16 = vpop.permute.xlu1 %5778 }
0x3524   : > { %v5789_v18 = vsel %vm1308_vm2, %v5440_v7, %v5779_v16  ;;  %v5902_v7 = vrot.slane %v7579_v58, %v8220_v28  ;;  %v7400_v28 = vld [vmem:[%s9197_s24] sm:$0xff]  }
0x352b   : > { %v5783_v17 = vpop.permute.xlu0 %5782 }
0x352c   : > { %v5790_v19 = vsel %vm1362_vm4, %v5789_v18, %v5783_v17 }
0x3533   : > { %v5787_v20 = vpop.permute.xlu1 %5786 }
0x3534   : > { %v5791_v21 = vsel %vm1836_vm5, %v5790_v19, %v5787_v20  ;;  %v7401_v20 = vld [vmem:[%s9197_s24 + $0x8] sm:$0xff]  }
0x3535   : > { %v5792_v22 = vpack.c.bf16 %v5791_v21, %v5791_v21 }
0x3537   : > { %7172 = vmatmul.mubr.msk.bf16.vlgmr.msra.gmra.mrb[124].mxu0 %vm1193_vm0, %v5792_v22 }
0x3538   : > { %7199 = vmatprep.mubr.msk.bf16.mxu0 %vm7700_vm1, %v7699_v15  ;;  %7184 = vmatpush3.bf16.msra.mxu0 %v7392_v8 }
0x3539   : > { %7185 = vmatprep.subr.bf16.mxu0 %v7699_v15 }
0x353c   : > { %7186 = vmatpush3.bf16.msra.mxu0 %v7393_v41 }
0x353d   : > { %7187 = vmatprep.subr.bf16.mxu0 %v7699_v15 }
0x3540   : > { %7188 = vmatpush3.bf16.msra.mxu0 %v7394_v39 }
0x3541   : > { %7189 = vmatprep.subr.bf16.mxu0 %v7699_v15 }
0x3544   : > { %7190 = vmatpush3.bf16.msra.mxu0 %v7395_v25 }
0x3545   : > { %7191 = vmatprep.subr.bf16.mxu0 %v7699_v15 }
0x3548   : > { %7192 = vmatpush3.bf16.msra.mxu0 %v7396_v51 }
0x3549   : > { %7193 = vmatprep.subr.bf16.mxu0 %v7699_v15 }
0x354c   : > { %7194 = vmatpush3.bf16.msra.mxu0 %v7397_v52 }
0x354d   : > { %7195 = vmatprep.subr.bf16.mxu0 %v7699_v15 }
0x3550   : > { %7196 = vmatpush3.bf16.msra.mxu0 %v7398_v3 }
0x3551   : > { %7197 = vmatprep.subr.bf16.mxu0 %v7699_v15 }
0x3554   : > { %7198 = vmatpush3.bf16.msra.mxu0 %v7399_v1 }
0x360a   : > { %v5846_v33 = vpop.f32.mrb[124].mxu0 }
0x360b   : > { %v5847_v50 = vadd.f32 %v5846_v33, %v5796_v32  ;;  %v7173_v62 = vpop.f32.mrb[125].mxu0  ;;  %v6491_v33 = vld [vmem:[%s9198_s30] ss:$0 sm:$0xff]  ;;  %s7597_s30 = sshll.u32 %s7715_s19, 4  ;;  %s7598_s30 = int_to_ptr.vmem [resolvable:$false] %s7597_s30 }
0x360c   : > { %v5849_v27 = vpop.f32.mrb[126].mxu0  ;;  %v6492_v62 = vld [vmem:[%s9199_s6] ss:$0 sm:$0xff]  ;;  %s7599_s6 = scalar_lea.vmem %s7598_s30, 256  ;;  %p7600_p5 = scmp.lt.s32.totalorder %s8982_s28, %s7598_s30 }
0x360d   : > { %v8929_v34 = vadd.f32 %v5847_v50, %v8813_v23  ;;  %v7174_v35 = vpop.f32.mrb[127].mxu0  ;;  %v7391_v23 = vld [vmem:[%s9183_s10 + $0x18] sm:$0xff]   ;;  %p7601_p6 = scmp.lt.s32.totalorder %s7599_s6, %s7593_s21 }
0x360e   : > { %7178 = vmatpush3.bf16.msra.mxu1 %v7391_v23 }
0x360f   : > { %v5853_v38 = vsel %vm1193_vm0, %v8929_v34, 0.0  ;;  %7203 = vmatprep.subr.bf16.mxu1 %v7699_v15  ;;  %p7602_p7 = por %p7601_p6, %p7600_p5 }
0x3610   : > { %5854 = vadd.xlane.f32.xlu0 %v5853_v38  ;;  %v6493_v38 = vld [vmem:[%s9200_s15] ss:$0 sm:$0xff] }
0x3611   : > { %p7603_p8 = pnand %p7602_p7, %p7596_p4 }
0x369d   : > { %v5855_v42 = vpop.xlane.xlu0 %5854 }
0x369e   : > { %v5856_v26 = vmul.f32 0.03125, %v5855_v42 }
0x36a0   : > { %v5857_v44 = vsub.f32 %v8929_v34, %v5856_v26 }
0x36a2   : > { %v5858_v30 = vmul.f32 %v5857_v44, %v5857_v44 }
0x36a4   : > { %v5859_v5 = vsel %vm1193_vm0, %v5858_v30, 0.0 }
0x36a5   : > { %5860 = vadd.xlane.f32.xlu1 %v5859_v5 }
0x3732   : > { %v5861_v53 = vpop.xlane.xlu1 %5860 }
0x3733   : > { %v5862_v55 = vmul.f32 0.03125, %v5861_v53 }
0x3735   : > { %v5863_v24 = vadd.f32 1e-05, %v5862_v55 }
0x3737   : > { %7560 = vrsqrt.f32 %v5863_v24 }
0x3741   : > { %v7561_v60 = vpop.eup %7560 }
0x3742   : > { %v5865_v61 = vmul.f32 %v7561_v60, %v5857_v44 }
0x3744   : > { %v5870_v40 = vmul.f32 %v5869_v56, %v5865_v61 }
0x3746   : > { %v5875_v37 = vadd.f32 %v5874_v63, %v5870_v40 }
0x3748   : > { %v5898_v2 = vpack.c.bf16 %v5875_v37, %v5875_v37 }
0x374a   : > { %7180 = vmatmul.mubr.msk.bf16.vlgmr.msra.gmra.mrb[144].mxu1 %vm1193_vm0, %v5898_v2 }
0x374b   : > { %7207 = vmatprep.mubr.msk.bf16.mxu1 %vm7700_vm1, %v7699_v15  ;;  %7204 = vmatpush3.bf16.msra.mxu1 %v7400_v28 }
0x374c   : > { %7205 = vmatprep.subr.bf16.mxu1 %v7699_v15 }
0x374f   : > { %7206 = vmatpush3.bf16.msra.mxu1 %v7401_v20 }
0x381d   : > { %v5952_v6 = vpop.f32.mrb[144].mxu1 }
0x381e   : > { %v5953_v43 = vadd.f32 %v5952_v6, %v5902_v7  ;;  %v7181_v46 = vpop.f32.mrb[145].mxu1 }
0x381f   : > { %v5955_v9 = vpop.f32.mrb[146].mxu1 }
0x3820   : > { %v5958_v31 = vmax.f32 %v5953_v43, 0.0  ;;  %v7182_v54 = vpop.f32.mrb[147].mxu1 }
0x3822   : > { %v5959_v0 = vpack.c.bf16 %v5958_v31, %v5958_v31 }
0x3824   : > { %7200 = vmatmul.mubr.bf16.vlgmr.msra.gmra.mrb[128].mxu0 %v5959_v0 }
0x38f7   : > { %v6046_v36 = vpop.f32.mrb[128].mxu0 }
0x38f8   : > { %v6047_v47 = vadd.f32 %v6046_v36, %v5963_v10  ;;  %v7201_v11 = vpop.f32.mrb[129].mxu0 }
0x38f9   : > { %v6049_v57 = vpop.f32.mrb[130].mxu0 }
0x38fa   : > { %v6052_v4 = vadd.f32 %v6047_v47, %v8929_v34  ;;  %v7202_v12 = vpop.f32.mrb[131].mxu0 }
0x38fc   : > { %v6055_v13 = vsel %vm1193_vm0, %v6052_v4, 0.0 }
0x38fd   : > { %6056 = vadd.xlane.f32.xlu0 %v6055_v13 }
0x398a   : > { %v6057_v14 = vpop.xlane.xlu0 %6056 }
0x398b   : > { %v6058_v16 = vmul.f32 0.03125, %v6057_v14 }
0x398d   : > { %v6059_v17 = vsub.f32 %v6052_v4, %v6058_v16 }
0x398f   : > { %v6060_v18 = vmul.f32 %v6059_v17, %v6059_v17 }
0x3991   : > { %v6061_v19 = vsel %vm1193_vm0, %v6060_v18, 0.0 }
0x3992   : > { %6062 = vadd.xlane.f32.xlu0 %v6061_v19 }
0x3a1f   : > { %v6063_v21 = vpop.xlane.xlu0 %6062 }
0x3a20   : > { %v6064_v22 = vmul.f32 0.03125, %v6063_v21 }
0x3a22   : > { %v6065_v29 = vadd.f32 1e-06, %v6064_v22 }
0x3a24   : > { %7562 = vrsqrt.f32 %v6065_v29 }
0x3a2e   : > { %v7563_v32 = vpop.eup %7562 }
0x3a2f   : > { %v6067_v50 = vmul.f32 %v7563_v32, %v6059_v17 }
0x3a31   : > { %v6074_v27 = vmul.f32 %v6491_v33, %v6067_v50 }
0x3a33   : > { %v6081_v34 = vadd.f32 %v6492_v62, %v6074_v27 }
0x3a35   : > { %v6087_v35 = vpack.c.bf16 %v6081_v34, %v6081_v34 }
0x3a37   : > { %7208 = vmatmul.mubr.msk.bf16.vlgmr.msra.gmra.mrb[148].mxu1 %vm1193_vm0, %v6087_v35 }
0x3b0a   : > { %v6143_v42 = vpop.f32.mrb[148].mxu1 }
0x3b0b   : > { %v6144_v26 = vadd.f32 %v6493_v38, %v6143_v42  ;;  %v7209_v15 = vpop.f32.mrb[149].mxu1 }
0x3b0c   : > { %v6146_v44 = vpop.f32.mrb[150].mxu1 }
0x3b0d   : > { %v7210_v30 = vpop.f32.mrb[151].mxu1  ;;  %v6150_v5 = vsel %vm6149_vm8, %v6144_v26, -inf }
0x3b0e   : > { %6151 = vmax.xlane.f32.xlu0 %v6150_v5 }
0x3b9b   : > { %v6152_v49 = vpop.xlane.xlu0 %6151 }
0x3b9c   : > { %v6153_v23 = vsub.f32 %v6144_v26, %v6152_v49 }
0x3b9e   : > { %v6154_v8 = vmul.f32 1.442695, %v6153_v23 }
0x3ba0   : > { %7564 = vpow2.f32 %v6154_v8 }
0x3baa   : > { %v7565_v41 = vpop.eup %7564 }
0x3bab   : > { %v6156_v39 = vsel %vm6149_vm8, %v7565_v41, 0.0 }
0x3bac   : > { %6157 = vadd.xlane.f32.xlu1 %v6156_v39 }
0x3c39   : > { %v6158_v25 = vpop.xlane.xlu1 %6157 }
0x3c3a   : > { %7566 = vlog2.f32 %v6158_v25 }
0x3c44   : > { %v7567_v51 = vpop.eup %7566 }
0x3c45   : > { %v6160_v52 = vmul.f32 0.6931472, %v7567_v51 }
0x3c47   : > { %v6161_v53 = vsub.f32 %v6153_v23, %v6160_v52 }
0x3c49   : > { %6162 = vst.msk [vmem:[%s1168_s4] sm:$0xff] %vm6149_vm8, %v6161_v53 }
0x3c4a   : > { %7606 = shalt.err (!%p7603_p8)
}
0x3c4b   : > { %s7607_s15 = scalar_lea.hbm %s8980_s17, 128  ;;  %s7611_s11 = scalar_lea.hbm %s9202_s20, 256 }
0x3c4c   : > { %p7608_p9 = scmp.ne.s32.totalorder %s8980_s17, %s7607_s15  ;;  %p7612_p0 = scmp.lt.u32.totalorder %s8980_s17, %s9202_s20 }
0x3c4d   : > { %p7613_p1 = scmp.lt.u32.totalorder %s7611_s11, %s7607_s15  ;;  %p7615_p3 = scmp.lt.u32.totalorder %s7607_s15, %s8980_s17 }
0x3c4e   : > { %p7609_p12 = pnand %p7608_p9, %p7960_p10 }
0x3c4f   : > { %p7614_p2 = por %p7613_p1, %p7612_p0 }
0x3c50   : > { %p7610_p13 = pneg %p7609_p12 }
0x3c51   : > { %p7616_p5 = por %p7615_p3, %p7614_p2 }
0x3c53   : > { %p7617_p4 = pnand %p7616_p5, %p7610_p13 }
0x3c55   : > { %7620 = shalt.err (!%p7617_p4)
}
0x3c56   : > { %7211 = dma.vmem_to_hbm [thread:$0]  (%p7960_p10), %s8982_s28, 128, %s8980_s17, %s6164_s8  }
0x3c57 PF: > { %s9204_s9 = sld [smem:[#allocation49_spill]]  ;;  %s9205_s13 = sld [smem:[#allocation47_spill]] }
0x3c5d   : > { %p7217_p6 = scmp.ge.s32.totalorder %s9204_s9, 2  ;;  %s6189_s4 = sand.u32 1, %s9205_s13  }
0x3c5e   : > { %s6190_s21 = scalar_lea.sflag [#allocation5], %s6189_s4 }
0x3c5f   : > { %p7214_p7 = pnand %p7217_p6, %p7964_p11 }
0x3c61   : > { %7640 = dma.done.wait (!%p7214_p7), %s6190_s21, 128  }
0x3c62   : > { %7642 = vsyncadd (!%p7214_p7), %s6190_s21, 4294967168  ;;  %s9207_s28 = sld [smem:[#allocation51_spill]]  ;;  %s9208_s19 = sld [smem:[#allocation48_spill]] }
0x3c63   : > { %s9209_s5 = sld [smem:[#allocation52_spill]]  ;;  %s9210_s4 = smov %s7649_s0 }
0x3c68   : > { %p95_p8 = scmp.ge.s32.totalorder %s9207_s28, 4   ;;  %s9211_s0 = smov %s9208_s19 }
0x3c6a   :  { %97 = sbr.rel (!%p95_p8) target bundleno = 98 (0x62), region = 259 }
0x3c71   :  { %6195 = vsyncpa [#allocation5], 1 }
0x3c72   :  { %6197 = vsyncpa [#allocation5 + $0x1], 1 }

</bundles_post_ra>
